<compile_context>
chip_gen: v7x
topology: tpu7x:2x2x1
jax: 0.10.0
libtpu: 0.0.40
codegen_flags: <defaults>
</compile_context>

<pallas_src>
import functools

import jax
import jax.numpy as jnp
from jax.experimental import pallas as pl
from jax.experimental.pallas import tpu as pltpu

F32 = jnp.float32
_CPARAMS = pltpu.CompilerParams(
    dimension_semantics=("arbitrary",),
    vmem_limit_bytes=40 * 1024 * 1024,
)


def _spec(shape):
    nd = len(shape)
    return pl.BlockSpec(shape, lambda i, _nd=nd: (0,) * _nd)


# ========================= single fused forward kernel =======================
def _encoder_kernel(x_ref, adj_ref, ahat_ref, mem_ref, pix_ref,
                    gat_w_ref, gat_att_ref, gat_b_ref,
                    gcn_w_ref, gcn_b_ref,
                    fcg1_w_ref, fcg1_b_ref, fcg2_w_ref, fcg2_b_ref,
                    stem_w_ref, stem_b_ref,
                    rfc1_w_ref, rfc1_b_ref, rfc2_w_ref, rfc2_b_ref,
                    l1a_w_ref, l1a_b_ref, l1b_w_ref, l1b_b_ref,
                    proj_w_ref, proj_b_ref, out1_w_ref, out1_b_ref,
                    out2_w_ref, out2_b_ref,
                    o_ref, *, heads, fout, nb, inv_hw):
    # ------------------------- graph branch ---------------------------------
    # GATConv(38, 38, heads=10) + ReLU
    h = jnp.dot(x_ref[...], gat_w_ref[...], preferred_element_type=F32)   # [N, H*F]
    adj = adj_ref[...]                               # adj[dst, src] incl. self loops
    mask = adj > 0.0
    maskf = mask.astype(F32)
    # src/dst attention logits for ALL heads with ONE MXU matmul against a
    # block-diagonal [H*F, 2H] matrix (built at init) instead of 2*H XLU
    # cross-lane row reductions.
    s = jnp.dot(h, gat_att_ref[...], preferred_element_type=F32)          # [N, 2H]
    outs = []
    for hd in range(heads):                                               # static unroll
        ss = s[:, hd]                                                     # src logit (N,)
        sd = s[:, heads + hd]                                             # dst logit (N,)
        e = sd[:, None] + ss[None, :]                                     # e[dst, src]
        e = jnp.where(e > 0.0, e, 0.2 * e)                                # LeakyReLU(0.2)
        e = jnp.where(mask, e, -1e30)
        e = e - jnp.max(e, axis=1, keepdims=True)
        p = jnp.exp(e) * maskf
        p = p * pl.reciprocal(jnp.sum(p, axis=1, keepdims=True), approx=True)
        outs.append(jnp.dot(p, h[:, hd * fout:(hd + 1) * fout],
                            preferred_element_type=F32))
    gat = jnp.concatenate(outs, axis=1) + gat_b_ref[...]                  # [N, H*F]
    gat = jnp.maximum(gat, 0.0)                                           # ReLU

    # GCNConv(380, 380) + ReLU
    xw = jnp.dot(gat, gcn_w_ref[...], preferred_element_type=F32)
    gcn = jnp.dot(ahat_ref[...], xw, preferred_element_type=F32) + gcn_b_ref[...]
    gcn = jnp.maximum(gcn, 0.0)                                           # [N, H*F]

    # cat([global_max_pool, global_mean_pool], dim=1)
    member = mem_ref[...]                                                 # [B, N]
    counts = jnp.sum(member, axis=1, keepdims=True)
    gap_ = jnp.dot(member, gcn, preferred_element_type=F32)
    gap_ = gap_ * pl.reciprocal(counts, approx=True)                      # [B, H*F]
    masked = jnp.where(member[:, :, None] > 0.0, gcn[None, :, :], -1e30)
    gmp_ = jnp.max(masked, axis=1)                                        # [B, H*F]
    pooled = jnp.concatenate([gmp_, gap_], axis=1)                        # [B, 2*H*F]

    # fc_g1 -> ReLU -> Dropout(eval: identity) -> fc_g2
    g1 = jnp.maximum(jnp.dot(pooled, fcg1_w_ref[...], preferred_element_type=F32)
                     + fcg1_b_ref[...], 0.0)
    g = jnp.dot(g1, fcg2_w_ref[...], preferred_element_type=F32) + fcg2_b_ref[...]

    # ------------------- image branch (image & image_C) ---------------------
    # AdaptiveAvgPool2d((1,1)) re-associated in front of the LINEAR backbone
    # stand-in: mean_HW(pix @ W + b) == mean_HW(pix) @ W + b.
    mean_pix = jnp.sum(pix_ref[...], axis=2) * inv_hw                     # [2B, 3]
    feat = (jnp.dot(mean_pix, stem_w_ref[...], preferred_element_type=F32)
            + stem_b_ref[...])                                            # [2B, 2048]
    f = jnp.maximum(jnp.dot(feat, rfc1_w_ref[...], preferred_element_type=F32)
                    + rfc1_b_ref[...], 0.0)
    f = jnp.maximum(jnp.dot(f, rfc2_w_ref[...], preferred_element_type=F32)
                    + rfc2_b_ref[...], 0.0)                               # [2B, 128]

    # ------------------------------ head ------------------------------------
    X = jnp.concatenate([f[:nb], f[nb:], g], axis=1)                      # [B, 384]
    # layer1: Linear(384,192) [BN192 folded at init] -> ReLU
    h1 = jnp.maximum(jnp.dot(X, l1a_w_ref[...], preferred_element_type=F32)
                     + l1a_b_ref[...], 0.0)
    # x1 = layer1(X) + projection1(X); the out-head's leading BN(96) is folded
    # into both branches' weights (it acts on their sum).
    x1 = (jnp.dot(h1, l1b_w_ref[...], preferred_element_type=F32) + l1b_b_ref[...]
          + jnp.dot(X, proj_w_ref[...], preferred_element_type=F32) + proj_b_ref[...])
    y = jnp.maximum(x1, 0.0)                                              # ReLU after BN(96)
    # Linear(96,48) [BN48 folded] -> ReLU -> Linear(48,1) -> Sigmoid
    y = jnp.maximum(jnp.dot(y, out1_w_ref[...], preferred_element_type=F32)
                    + out1_b_ref[...], 0.0)
    y = jnp.dot(y, out2_w_ref[...], preferred_element_type=F32) + out2_b_ref[...]
    o_ref[...] = jax.nn.sigmoid(y)


def _encoder_pallas(params, x, adj_self, ahat, member, pix,
                    heads=10, fout=38):
    n, fin = x.shape
    b = member.shape[0]
    m, c, s = pix.shape
    hf = heads * fout
    emb = params["fcg2_w"].shape[1]
    return pl.pallas_call(
        functools.partial(_encoder_kernel, heads=heads, fout=fout,
                          nb=b, inv_hw=1.0 / s),
        out_shape=jax.ShapeDtypeStruct((b, 1), F32),
        grid=(1,),
        in_specs=[
            _spec((n, fin)), _spec((n, n)), _spec((n, n)), _spec((b, n)),
            _spec((m, c, s)),
            _spec((fin, hf)), _spec((hf, 2 * heads)), _spec((1, hf)),
            _spec((hf, hf)), _spec((1, hf)),
            _spec((2 * hf, 1500)), _spec((1, 1500)),
            _spec((1500, emb)), _spec((1, emb)),
            _spec((c, 2048)), _spec((1, 2048)),
            _spec((2048, 256)), _spec((1, 256)),
            _spec((256, 128)), _spec((1, 128)),
            _spec((384, 192)), _spec((1, 192)),
            _spec((192, 96)), _spec((1, 96)),
            _spec((384, 96)), _spec((1, 96)),
            _spec((96, 48)), _spec((1, 48)),
            _spec((48, 1)), _spec((1, 1)),
        ],
        out_specs=_spec((b, 1)),
        compiler_params=_CPARAMS,
    )(x, adj_self, ahat, member, pix,
      params["gat_w"], params["gat_att_blk"], params["gat_b"].reshape(1, hf),
      params["gcn_w"], params["gcn_b"].reshape(1, hf),
      params["fcg1_w"], params["fcg1_b"].reshape(1, 1500),
      params["fcg2_w"], params["fcg2_b"].reshape(1, emb),
      params["stem_w"], params["stem_b"].reshape(1, 2048),
      params["rfc1_w"], params["rfc1_b"].reshape(1, 256),
      params["rfc2_w"], params["rfc2_b"].reshape(1, 128),
      params["l1a_w"], params["l1a_b"].reshape(1, 192),
      params["l1b_w"], params["l1b_b"].reshape(1, 96),
      params["proj_w"], params["proj_b"].reshape(1, 96),
      params["out1_w"], params["out1_b"].reshape(1, 48),
      params["out2_w"], params["out2_b"].reshape(1, 1))


# ------------------------------ parameters -----------------------------------
def init_params(key):
    ks = jax.random.split(key, 16)

    def w(k, shape, scale=0.05):
        return scale * jax.random.normal(k, shape, dtype=F32)

    nfx, heads = 38, 10
    hf = heads * nfx
    p = {}
    # GATConv(38, 38, heads=10)
    p["gat_w"] = w(ks[0], (nfx, hf))
    att_src = w(ks[1], (heads, nfx))
    att_dst = w(ks[2], (heads, nfx))
    # Block-diagonal [H*F, 2H] attention matrix (cols 0..H-1: src, H..2H-1: dst)
    # -> per-head logits become ONE MXU matmul inside the kernel instead of 2*H
    # cross-lane reductions.
    eye = jnp.eye(heads, dtype=F32)
    src_blk = (att_src[:, :, None] * eye[:, None, :]).reshape(hf, heads)
    dst_blk = (att_dst[:, :, None] * eye[:, None, :]).reshape(hf, heads)
    p["gat_att_blk"] = jnp.concatenate([src_blk, dst_blk], axis=1)        # [hf, 2H]
    p["gat_b"] = jnp.zeros((hf,), F32)
    # GCNConv(380, 380)
    p["gcn_w"] = w(ks[3], (hf, hf))
    p["gcn_b"] = jnp.zeros((hf,), F32)
    # fc_g1 / fc_g2
    p["fcg1_w"] = w(ks[4], (2 * hf, 1500)); p["fcg1_b"] = jnp.zeros((1500,), F32)
    p["fcg2_w"] = w(ks[5], (1500, 128)); p["fcg2_b"] = jnp.zeros((128,), F32)
    # TODO(synk): frozen 101-layer torchvision ResNet backbone not reproduced; a
    # single LINEAR 1x1-conv stand-in emits the 2048-channel features (this is
    # also what makes the avg-pool-before-matmul re-association exact).
    p["stem_w"] = w(ks[6], (3, 2048)); p["stem_b"] = jnp.zeros((2048,), F32)
    # resnet_fc: Linear(2048,256) ReLU Linear(256,128) ReLU
    p["rfc1_w"] = w(ks[7], (2048, 256)); p["rfc1_b"] = jnp.zeros((256,), F32)
    p["rfc2_w"] = w(ks[8], (256, 128)); p["rfc2_b"] = jnp.zeros((128,), F32)

    # Eval-mode BatchNorm1d (fresh running stats) folded into adjacent Linears.
    def bn(dim, eps=1e-5):
        gamma = jnp.ones((dim,), F32); beta = jnp.zeros((dim,), F32)
        rmean = jnp.zeros((dim,), F32); rvar = jnp.ones((dim,), F32)
        scale = gamma / jnp.sqrt(rvar + eps)
        return scale, beta - rmean * scale

    s192, t192 = bn(192); s96, t96 = bn(96); s48, t48 = bn(48)

    # layer1: Linear(384,192) [BN192 folded] ReLU Linear(192,96)
    l1a_w = w(ks[9], (384, 192)); l1a_b = jnp.zeros((192,), F32)
    p["l1a_w"] = l1a_w * s192[None, :]; p["l1a_b"] = l1a_b * s192 + t192
    # out-head BN(96) acts on layer1(X)+projection1(X): fold into BOTH branches.
    l1b_w = w(ks[10], (192, 96)); l1b_b = jnp.zeros((96,), F32)
    proj_w = w(ks[11], (384, 96)); proj_b = jnp.zeros((96,), F32)
    p["l1b_w"] = l1b_w * s96[None, :]; p["l1b_b"] = l1b_b * s96 + t96
    p["proj_w"] = proj_w * s96[None, :]; p["proj_b"] = proj_b * s96
    # out: ReLU Linear(96,48) [BN48 folded] ReLU Linear(48,1) Sigmoid
    out1_w = w(ks[12], (96, 48)); out1_b = jnp.zeros((48,), F32)
    p["out1_w"] = out1_w * s48[None, :]; p["out1_b"] = out1_b * s48 + t48
    p["out2_w"] = w(ks[13], (48, 1)); p["out2_b"] = jnp.zeros((1,), F32)
    return p


# -------------------------------- forward ------------------------------------
def resnet101_encoder_forward(params, x, edge_index, batch, image, image_C, num_graphs):
    N = x.shape[0]
    B = num_graphs

    # ---- glue (plain JAX): dense adjacency / GCN normalization / membership.
    # (data-dependent scatter from edge_index; kept outside the kernel)
    src, dst = edge_index[0], edge_index[1]
    adj = jnp.zeros((N, N), F32).at[dst, src].set(1.0)            # adj[target, source]
    adj_self = jnp.minimum(adj + jnp.eye(N, dtype=F32), 1.0)      # add self loops
    deg = jnp.sum(adj_self, axis=1)
    dinv = 1.0 / jnp.sqrt(deg)
    ahat = adj_self * dinv[:, None] * dinv[None, :]               # D^-1/2 (A+I) D^-1/2
    member = (batch[None, :] == jnp.arange(B)[:, None]).astype(F32)

    # image & image_C batched together through the fused kernel
    b, c, hh, ww = image.shape
    pix = jnp.concatenate([image, image_C], axis=0).reshape(2 * b, c, hh * ww)

    # ---- single fused Pallas kernel: graph branch + image branch + head ----
    return _encoder_pallas(params, x, adj_self, ahat, member, pix)        # [B, 1]


if __name__ == "__main__":
    key = jax.random.PRNGKey(0)
    kp, kx, ki1, ki2 = jax.random.split(key, 4)
    params = init_params(kp)

    N, B = 16, 2
    x = jax.random.normal(kx, (N, 38), dtype=F32)
    batch = jnp.array([0] * 8 + [1] * 8, dtype=jnp.int32)
    src, dst = [], []
    for gph in range(B):
        base = gph * 8
        for i in range(7):                 # bidirectional chain within each graph
            src += [base + i, base + i + 1]
            dst += [base + i + 1, base + i]
    edge_index = jnp.array([src, dst], dtype=jnp.int32)            # [2, 28]
    image = jax.random.normal(ki1, (B, 3, 8, 8), dtype=F32)        # NCHW, like PyTorch
    image_C = jax.random.normal(ki2, (B, 3, 8, 8), dtype=F32)

    out = resnet101_encoder_forward(params, x, edge_index, batch, image, image_C, B)
    out = jax.block_until_ready(out)
    assert out.shape == (B, 1) and out.dtype == F32
    print("KERNEL_OK")
</pallas_src>

<mosaic_0001>
module attributes {stable_mosaic.version = 11 : i64} {
  func.func @_encoder_kernel(%arg0: i32, %arg1: memref<16x38xf32, #tpu.memory_space<vmem>>, %arg2: memref<16x16xf32, #tpu.memory_space<vmem>>, %arg3: memref<16x16xf32, #tpu.memory_space<vmem>>, %arg4: memref<2x16xf32, #tpu.memory_space<vmem>>, %arg5: memref<4x3x64xf32, #tpu.memory_space<vmem>>, %arg6: memref<38x380xf32, #tpu.memory_space<vmem>>, %arg7: memref<380x20xf32, #tpu.memory_space<vmem>>, %arg8: memref<1x380xf32, #tpu.memory_space<vmem>>, %arg9: memref<380x380xf32, #tpu.memory_space<vmem>>, %arg10: memref<1x380xf32, #tpu.memory_space<vmem>>, %arg11: memref<760x1500xf32, #tpu.memory_space<vmem>>, %arg12: memref<1x1500xf32, #tpu.memory_space<vmem>>, %arg13: memref<1500x128xf32, #tpu.memory_space<vmem>>, %arg14: memref<1x128xf32, #tpu.memory_space<vmem>>, %arg15: memref<3x2048xf32, #tpu.memory_space<vmem>>, %arg16: memref<1x2048xf32, #tpu.memory_space<vmem>>, %arg17: memref<2048x256xf32, #tpu.memory_space<vmem>>, %arg18: memref<1x256xf32, #tpu.memory_space<vmem>>, %arg19: memref<256x128xf32, #tpu.memory_space<vmem>>, %arg20: memref<1x128xf32, #tpu.memory_space<vmem>>, %arg21: memref<384x192xf32, #tpu.memory_space<vmem>>, %arg22: memref<1x192xf32, #tpu.memory_space<vmem>>, %arg23: memref<192x96xf32, #tpu.memory_space<vmem>>, %arg24: memref<1x96xf32, #tpu.memory_space<vmem>>, %arg25: memref<384x96xf32, #tpu.memory_space<vmem>>, %arg26: memref<1x96xf32, #tpu.memory_space<vmem>>, %arg27: memref<96x48xf32, #tpu.memory_space<vmem>>, %arg28: memref<1x48xf32, #tpu.memory_space<vmem>>, %arg29: memref<48x1xf32, #tpu.memory_space<vmem>>, %arg30: memref<1x1xf32, #tpu.memory_space<vmem>>, %arg31: memref<2x1xf32, #tpu.memory_space<vmem>>) attributes {dimension_semantics = [#tpu.dimension_semantics<arbitrary>], iteration_bounds = array<i64: 1>, scalar_prefetch = 0 : i64, scratch_operands = 0 : i64, tpu.core_type = #tpu.core_type<tc>, window_params = [{pipeline_mode = #tpu.pipeline_mode<synchronous>, transform_indices = @transform_0, window_bounds = array<i64: 16, 38>}, {pipeline_mode = #tpu.pipeline_mode<synchronous>, transform_indices = @transform_1, window_bounds = array<i64: 16, 16>}, {pipeline_mode = #tpu.pipeline_mode<synchronous>, transform_indices = @transform_2, window_bounds = array<i64: 16, 16>}, {pipeline_mode = #tpu.pipeline_mode<synchronous>, transform_indices = @transform_3, window_bounds = array<i64: 2, 16>}, {pipeline_mode = #tpu.pipeline_mode<synchronous>, transform_indices = @transform_4, window_bounds = array<i64: 4, 3, 64>}, {pipeline_mode = #tpu.pipeline_mode<synchronous>, transform_indices = @transform_5, window_bounds = array<i64: 38, 380>}, {pipeline_mode = #tpu.pipeline_mode<synchronous>, transform_indices = @transform_6, window_bounds = array<i64: 380, 20>}, {pipeline_mode = #tpu.pipeline_mode<synchronous>, transform_indices = @transform_7, window_bounds = array<i64: 1, 380>}, {pipeline_mode = #tpu.pipeline_mode<synchronous>, transform_indices = @transform_8, window_bounds = array<i64: 380, 380>}, {pipeline_mode = #tpu.pipeline_mode<synchronous>, transform_indices = @transform_9, window_bounds = array<i64: 1, 380>}, {pipeline_mode = #tpu.pipeline_mode<synchronous>, transform_indices = @transform_10, window_bounds = array<i64: 760, 1500>}, {pipeline_mode = #tpu.pipeline_mode<synchronous>, transform_indices = @transform_11, window_bounds = array<i64: 1, 1500>}, {pipeline_mode = #tpu.pipeline_mode<synchronous>, transform_indices = @transform_12, window_bounds = array<i64: 1500, 128>}, {pipeline_mode = #tpu.pipeline_mode<synchronous>, transform_indices = @transform_13, window_bounds = array<i64: 1, 128>}, {pipeline_mode = #tpu.pipeline_mode<synchronous>, transform_indices = @transform_14, window_bounds = array<i64: 3, 2048>}, {pipeline_mode = #tpu.pipeline_mode<synchronous>, transform_indices = @transform_15, window_bounds = array<i64: 1, 2048>}, {pipeline_mode = #tpu.pipeline_mode<synchronous>, transform_indices = @transform_16, window_bounds = array<i64: 2048, 256>}, {pipeline_mode = #tpu.pipeline_mode<synchronous>, transform_indices = @transform_17, window_bounds = array<i64: 1, 256>}, {pipeline_mode = #tpu.pipeline_mode<synchronous>, transform_indices = @transform_18, window_bounds = array<i64: 256, 128>}, {pipeline_mode = #tpu.pipeline_mode<synchronous>, transform_indices = @transform_19, window_bounds = array<i64: 1, 128>}, {pipeline_mode = #tpu.pipeline_mode<synchronous>, transform_indices = @transform_20, window_bounds = array<i64: 384, 192>}, {pipeline_mode = #tpu.pipeline_mode<synchronous>, transform_indices = @transform_21, window_bounds = array<i64: 1, 192>}, {pipeline_mode = #tpu.pipeline_mode<synchronous>, transform_indices = @transform_22, window_bounds = array<i64: 192, 96>}, {pipeline_mode = #tpu.pipeline_mode<synchronous>, transform_indices = @transform_23, window_bounds = array<i64: 1, 96>}, {pipeline_mode = #tpu.pipeline_mode<synchronous>, transform_indices = @transform_24, window_bounds = array<i64: 384, 96>}, {pipeline_mode = #tpu.pipeline_mode<synchronous>, transform_indices = @transform_25, window_bounds = array<i64: 1, 96>}, {pipeline_mode = #tpu.pipeline_mode<synchronous>, transform_indices = @transform_26, window_bounds = array<i64: 96, 48>}, {pipeline_mode = #tpu.pipeline_mode<synchronous>, transform_indices = @transform_27, window_bounds = array<i64: 1, 48>}, {pipeline_mode = #tpu.pipeline_mode<synchronous>, transform_indices = @transform_28, window_bounds = array<i64: 48, 1>}, {pipeline_mode = #tpu.pipeline_mode<synchronous>, transform_indices = @transform_29, window_bounds = array<i64: 1, 1>}, {pipeline_mode = #tpu.pipeline_mode<synchronous>, transform_indices = @transform_30, window_bounds = array<i64: 2, 1>}]} {
    %c0 = arith.constant 0 : index
    %c0_0 = arith.constant 0 : index
    %0 = vector.load %arg1[%c0, %c0_0] : memref<16x38xf32, #tpu.memory_space<vmem>>, vector<16x38xf32>
    %c0_1 = arith.constant 0 : index
    %c0_2 = arith.constant 0 : index
    %1 = vector.load %arg6[%c0_1, %c0_2] : memref<38x380xf32, #tpu.memory_space<vmem>>, vector<38x380xf32>
    %cst = arith.constant dense<0.000000e+00> : vector<16x380xf32>
    %2 = tpu.matmul %0, %1, %cst {dimension_numbers = #tpu.dot_dimension_numbers<[1], [0], [0], [1], [0, 0, 1, 1], [], []>} : vector<16x38xf32>, vector<38x380xf32>, vector<16x380xf32> -> vector<16x380xf32>
    %c0_3 = arith.constant 0 : index
    %c0_4 = arith.constant 0 : index
    %3 = vector.load %arg2[%c0_3, %c0_4] : memref<16x16xf32, #tpu.memory_space<vmem>>, vector<16x16xf32>
    %cst_5 = arith.constant 0.000000e+00 : f32
    %4 = vector.broadcast %cst_5 : f32 to vector<16x16xf32>
    %5 = arith.cmpf ogt, %3, %4 : vector<16x16xf32>
    %6 = arith.extui %5 : vector<16x16xi1> to vector<16x16xi32>
    %7 = arith.sitofp %6 : vector<16x16xi32> to vector<16x16xf32>
    %c0_6 = arith.constant 0 : index
    %c0_7 = arith.constant 0 : index
    %8 = vector.load %arg7[%c0_6, %c0_7] : memref<380x20xf32, #tpu.memory_space<vmem>>, vector<380x20xf32>
    %cst_8 = arith.constant dense<0.000000e+00> : vector<16x20xf32>
    %9 = tpu.matmul %2, %8, %cst_8 {dimension_numbers = #tpu.dot_dimension_numbers<[1], [0], [0], [1], [0, 0, 1, 1], [], []>} : vector<16x380xf32>, vector<380x20xf32>, vector<16x20xf32> -> vector<16x20xf32>
    %10 = vector.extract_strided_slice %9 {offsets = [0, 0], sizes = [16, 1], strides = [1, 1]} : vector<16x20xf32> to vector<16x1xf32>
    %11 = vector.shape_cast %10 : vector<16x1xf32> to vector<16xf32>
    %12 = vector.extract_strided_slice %9 {offsets = [0, 10], sizes = [16, 1], strides = [1, 1]} : vector<16x20xf32> to vector<16x1xf32>
    %13 = vector.shape_cast %12 : vector<16x1xf32> to vector<16xf32>
    %14 = vector.shape_cast %13 : vector<16xf32> to vector<16x1xf32>
    %15 = vector.shape_cast %11 : vector<16xf32> to vector<1x16xf32>
    %16 = vector.broadcast %14 : vector<16x1xf32> to vector<16x16xf32>
    %17 = vector.broadcast %15 : vector<1x16xf32> to vector<16x16xf32>
    %18 = arith.addf %16, %17 : vector<16x16xf32>
    %cst_9 = arith.constant 0.000000e+00 : f32
    %19 = vector.broadcast %cst_9 : f32 to vector<16x16xf32>
    %20 = arith.cmpf ogt, %18, %19 : vector<16x16xf32>
    %cst_10 = arith.constant 2.000000e-01 : f32
    %21 = vector.broadcast %cst_10 : f32 to vector<16x16xf32>
    %22 = arith.mulf %21, %18 : vector<16x16xf32>
    %23 = arith.select %20, %18, %22 : vector<16x16xi1>, vector<16x16xf32>
    %cst_11 = arith.constant -1.000000e+30 : f32
    %24 = vector.broadcast %cst_11 : f32 to vector<16x16xf32>
    %25 = arith.select %5, %23, %24 : vector<16x16xi1>, vector<16x16xf32>
    %cst_12 = arith.constant dense<0xFF800000> : vector<16xf32>
    %26 = vector.multi_reduction <maximumf>, %25, %cst_12 [1] : vector<16x16xf32> to vector<16xf32>
    %27 = vector.shape_cast %26 : vector<16xf32> to vector<16x1xf32>
    %28 = vector.broadcast %27 : vector<16x1xf32> to vector<16x16xf32>
    %29 = arith.subf %25, %28 : vector<16x16xf32>
    %30 = math.exp %29 : vector<16x16xf32>
    %31 = arith.mulf %30, %7 : vector<16x16xf32>
    %cst_13 = arith.constant dense<0.000000e+00> : vector<16xf32>
    %32 = vector.multi_reduction <add>, %31, %cst_13 [1] : vector<16x16xf32> to vector<16xf32>
    %33 = vector.shape_cast %32 : vector<16xf32> to vector<16x1xf32>
    %34 = tpu.reciprocal %33 {approx = true} : vector<16x1xf32> -> vector<16x1xf32>
    %35 = vector.broadcast %34 : vector<16x1xf32> to vector<16x16xf32>
    %36 = arith.mulf %31, %35 : vector<16x16xf32>
    %37 = vector.extract_strided_slice %2 {offsets = [0, 0], sizes = [16, 38], strides = [1, 1]} : vector<16x380xf32> to vector<16x38xf32>
    %cst_14 = arith.constant dense<0.000000e+00> : vector<16x38xf32>
    %38 = tpu.matmul %36, %37, %cst_14 {dimension_numbers = #tpu.dot_dimension_numbers<[1], [0], [0], [1], [0, 0, 1, 1], [], []>} : vector<16x16xf32>, vector<16x38xf32>, vector<16x38xf32> -> vector<16x38xf32>
    %39 = vector.extract_strided_slice %9 {offsets = [0, 1], sizes = [16, 1], strides = [1, 1]} : vector<16x20xf32> to vector<16x1xf32>
    %40 = vector.shape_cast %39 : vector<16x1xf32> to vector<16xf32>
    %41 = vector.extract_strided_slice %9 {offsets = [0, 11], sizes = [16, 1], strides = [1, 1]} : vector<16x20xf32> to vector<16x1xf32>
    %42 = vector.shape_cast %41 : vector<16x1xf32> to vector<16xf32>
    %43 = vector.shape_cast %42 : vector<16xf32> to vector<16x1xf32>
    %44 = vector.shape_cast %40 : vector<16xf32> to vector<1x16xf32>
    %45 = vector.broadcast %43 : vector<16x1xf32> to vector<16x16xf32>
    %46 = vector.broadcast %44 : vector<1x16xf32> to vector<16x16xf32>
    %47 = arith.addf %45, %46 : vector<16x16xf32>
    %cst_15 = arith.constant 0.000000e+00 : f32
    %48 = vector.broadcast %cst_15 : f32 to vector<16x16xf32>
    %49 = arith.cmpf ogt, %47, %48 : vector<16x16xf32>
    %cst_16 = arith.constant 2.000000e-01 : f32
    %50 = vector.broadcast %cst_16 : f32 to vector<16x16xf32>
    %51 = arith.mulf %50, %47 : vector<16x16xf32>
    %52 = arith.select %49, %47, %51 : vector<16x16xi1>, vector<16x16xf32>
    %cst_17 = arith.constant -1.000000e+30 : f32
    %53 = vector.broadcast %cst_17 : f32 to vector<16x16xf32>
    %54 = arith.select %5, %52, %53 : vector<16x16xi1>, vector<16x16xf32>
    %cst_18 = arith.constant dense<0xFF800000> : vector<16xf32>
    %55 = vector.multi_reduction <maximumf>, %54, %cst_18 [1] : vector<16x16xf32> to vector<16xf32>
    %56 = vector.shape_cast %55 : vector<16xf32> to vector<16x1xf32>
    %57 = vector.broadcast %56 : vector<16x1xf32> to vector<16x16xf32>
    %58 = arith.subf %54, %57 : vector<16x16xf32>
    %59 = math.exp %58 : vector<16x16xf32>
    %60 = arith.mulf %59, %7 : vector<16x16xf32>
    %cst_19 = arith.constant dense<0.000000e+00> : vector<16xf32>
    %61 = vector.multi_reduction <add>, %60, %cst_19 [1] : vector<16x16xf32> to vector<16xf32>
    %62 = vector.shape_cast %61 : vector<16xf32> to vector<16x1xf32>
    %63 = tpu.reciprocal %62 {approx = true} : vector<16x1xf32> -> vector<16x1xf32>
    %64 = vector.broadcast %63 : vector<16x1xf32> to vector<16x16xf32>
    %65 = arith.mulf %60, %64 : vector<16x16xf32>
    %66 = vector.extract_strided_slice %2 {offsets = [0, 38], sizes = [16, 38], strides = [1, 1]} : vector<16x380xf32> to vector<16x38xf32>
    %cst_20 = arith.constant dense<0.000000e+00> : vector<16x38xf32>
    %67 = tpu.matmul %65, %66, %cst_20 {dimension_numbers = #tpu.dot_dimension_numbers<[1], [0], [0], [1], [0, 0, 1, 1], [], []>} : vector<16x16xf32>, vector<16x38xf32>, vector<16x38xf32> -> vector<16x38xf32>
    %68 = vector.extract_strided_slice %9 {offsets = [0, 2], sizes = [16, 1], strides = [1, 1]} : vector<16x20xf32> to vector<16x1xf32>
    %69 = vector.shape_cast %68 : vector<16x1xf32> to vector<16xf32>
    %70 = vector.extract_strided_slice %9 {offsets = [0, 12], sizes = [16, 1], strides = [1, 1]} : vector<16x20xf32> to vector<16x1xf32>
    %71 = vector.shape_cast %70 : vector<16x1xf32> to vector<16xf32>
    %72 = vector.shape_cast %71 : vector<16xf32> to vector<16x1xf32>
    %73 = vector.shape_cast %69 : vector<16xf32> to vector<1x16xf32>
    %74 = vector.broadcast %72 : vector<16x1xf32> to vector<16x16xf32>
    %75 = vector.broadcast %73 : vector<1x16xf32> to vector<16x16xf32>
    %76 = arith.addf %74, %75 : vector<16x16xf32>
    %cst_21 = arith.constant 0.000000e+00 : f32
    %77 = vector.broadcast %cst_21 : f32 to vector<16x16xf32>
    %78 = arith.cmpf ogt, %76, %77 : vector<16x16xf32>
    %cst_22 = arith.constant 2.000000e-01 : f32
    %79 = vector.broadcast %cst_22 : f32 to vector<16x16xf32>
    %80 = arith.mulf %79, %76 : vector<16x16xf32>
    %81 = arith.select %78, %76, %80 : vector<16x16xi1>, vector<16x16xf32>
    %cst_23 = arith.constant -1.000000e+30 : f32
    %82 = vector.broadcast %cst_23 : f32 to vector<16x16xf32>
    %83 = arith.select %5, %81, %82 : vector<16x16xi1>, vector<16x16xf32>
    %cst_24 = arith.constant dense<0xFF800000> : vector<16xf32>
    %84 = vector.multi_reduction <maximumf>, %83, %cst_24 [1] : vector<16x16xf32> to vector<16xf32>
    %85 = vector.shape_cast %84 : vector<16xf32> to vector<16x1xf32>
    %86 = vector.broadcast %85 : vector<16x1xf32> to vector<16x16xf32>
    %87 = arith.subf %83, %86 : vector<16x16xf32>
    %88 = math.exp %87 : vector<16x16xf32>
    %89 = arith.mulf %88, %7 : vector<16x16xf32>
    %cst_25 = arith.constant dense<0.000000e+00> : vector<16xf32>
    %90 = vector.multi_reduction <add>, %89, %cst_25 [1] : vector<16x16xf32> to vector<16xf32>
    %91 = vector.shape_cast %90 : vector<16xf32> to vector<16x1xf32>
    %92 = tpu.reciprocal %91 {approx = true} : vector<16x1xf32> -> vector<16x1xf32>
    %93 = vector.broadcast %92 : vector<16x1xf32> to vector<16x16xf32>
    %94 = arith.mulf %89, %93 : vector<16x16xf32>
    %95 = vector.extract_strided_slice %2 {offsets = [0, 76], sizes = [16, 38], strides = [1, 1]} : vector<16x380xf32> to vector<16x38xf32>
    %cst_26 = arith.constant dense<0.000000e+00> : vector<16x38xf32>
    %96 = tpu.matmul %94, %95, %cst_26 {dimension_numbers = #tpu.dot_dimension_numbers<[1], [0], [0], [1], [0, 0, 1, 1], [], []>} : vector<16x16xf32>, vector<16x38xf32>, vector<16x38xf32> -> vector<16x38xf32>
    %97 = vector.extract_strided_slice %9 {offsets = [0, 3], sizes = [16, 1], strides = [1, 1]} : vector<16x20xf32> to vector<16x1xf32>
    %98 = vector.shape_cast %97 : vector<16x1xf32> to vector<16xf32>
    %99 = vector.extract_strided_slice %9 {offsets = [0, 13], sizes = [16, 1], strides = [1, 1]} : vector<16x20xf32> to vector<16x1xf32>
    %100 = vector.shape_cast %99 : vector<16x1xf32> to vector<16xf32>
    %101 = vector.shape_cast %100 : vector<16xf32> to vector<16x1xf32>
    %102 = vector.shape_cast %98 : vector<16xf32> to vector<1x16xf32>
    %103 = vector.broadcast %101 : vector<16x1xf32> to vector<16x16xf32>
    %104 = vector.broadcast %102 : vector<1x16xf32> to vector<16x16xf32>
    %105 = arith.addf %103, %104 : vector<16x16xf32>
    %cst_27 = arith.constant 0.000000e+00 : f32
    %106 = vector.broadcast %cst_27 : f32 to vector<16x16xf32>
    %107 = arith.cmpf ogt, %105, %106 : vector<16x16xf32>
    %cst_28 = arith.constant 2.000000e-01 : f32
    %108 = vector.broadcast %cst_28 : f32 to vector<16x16xf32>
    %109 = arith.mulf %108, %105 : vector<16x16xf32>
    %110 = arith.select %107, %105, %109 : vector<16x16xi1>, vector<16x16xf32>
    %cst_29 = arith.constant -1.000000e+30 : f32
    %111 = vector.broadcast %cst_29 : f32 to vector<16x16xf32>
    %112 = arith.select %5, %110, %111 : vector<16x16xi1>, vector<16x16xf32>
    %cst_30 = arith.constant dense<0xFF800000> : vector<16xf32>
    %113 = vector.multi_reduction <maximumf>, %112, %cst_30 [1] : vector<16x16xf32> to vector<16xf32>
    %114 = vector.shape_cast %113 : vector<16xf32> to vector<16x1xf32>
    %115 = vector.broadcast %114 : vector<16x1xf32> to vector<16x16xf32>
    %116 = arith.subf %112, %115 : vector<16x16xf32>
    %117 = math.exp %116 : vector<16x16xf32>
    %118 = arith.mulf %117, %7 : vector<16x16xf32>
    %cst_31 = arith.constant dense<0.000000e+00> : vector<16xf32>
    %119 = vector.multi_reduction <add>, %118, %cst_31 [1] : vector<16x16xf32> to vector<16xf32>
    %120 = vector.shape_cast %119 : vector<16xf32> to vector<16x1xf32>
    %121 = tpu.reciprocal %120 {approx = true} : vector<16x1xf32> -> vector<16x1xf32>
    %122 = vector.broadcast %121 : vector<16x1xf32> to vector<16x16xf32>
    %123 = arith.mulf %118, %122 : vector<16x16xf32>
    %124 = vector.extract_strided_slice %2 {offsets = [0, 114], sizes = [16, 38], strides = [1, 1]} : vector<16x380xf32> to vector<16x38xf32>
    %cst_32 = arith.constant dense<0.000000e+00> : vector<16x38xf32>
    %125 = tpu.matmul %123, %124, %cst_32 {dimension_numbers = #tpu.dot_dimension_numbers<[1], [0], [0], [1], [0, 0, 1, 1], [], []>} : vector<16x16xf32>, vector<16x38xf32>, vector<16x38xf32> -> vector<16x38xf32>
    %126 = vector.extract_strided_slice %9 {offsets = [0, 4], sizes = [16, 1], strides = [1, 1]} : vector<16x20xf32> to vector<16x1xf32>
    %127 = vector.shape_cast %126 : vector<16x1xf32> to vector<16xf32>
    %128 = vector.extract_strided_slice %9 {offsets = [0, 14], sizes = [16, 1], strides = [1, 1]} : vector<16x20xf32> to vector<16x1xf32>
    %129 = vector.shape_cast %128 : vector<16x1xf32> to vector<16xf32>
    %130 = vector.shape_cast %129 : vector<16xf32> to vector<16x1xf32>
    %131 = vector.shape_cast %127 : vector<16xf32> to vector<1x16xf32>
    %132 = vector.broadcast %130 : vector<16x1xf32> to vector<16x16xf32>
    %133 = vector.broadcast %131 : vector<1x16xf32> to vector<16x16xf32>
    %134 = arith.addf %132, %133 : vector<16x16xf32>
    %cst_33 = arith.constant 0.000000e+00 : f32
    %135 = vector.broadcast %cst_33 : f32 to vector<16x16xf32>
    %136 = arith.cmpf ogt, %134, %135 : vector<16x16xf32>
    %cst_34 = arith.constant 2.000000e-01 : f32
    %137 = vector.broadcast %cst_34 : f32 to vector<16x16xf32>
    %138 = arith.mulf %137, %134 : vector<16x16xf32>
    %139 = arith.select %136, %134, %138 : vector<16x16xi1>, vector<16x16xf32>
    %cst_35 = arith.constant -1.000000e+30 : f32
    %140 = vector.broadcast %cst_35 : f32 to vector<16x16xf32>
    %141 = arith.select %5, %139, %140 : vector<16x16xi1>, vector<16x16xf32>
    %cst_36 = arith.constant dense<0xFF800000> : vector<16xf32>
    %142 = vector.multi_reduction <maximumf>, %141, %cst_36 [1] : vector<16x16xf32> to vector<16xf32>
    %143 = vector.shape_cast %142 : vector<16xf32> to vector<16x1xf32>
    %144 = vector.broadcast %143 : vector<16x1xf32> to vector<16x16xf32>
    %145 = arith.subf %141, %144 : vector<16x16xf32>
    %146 = math.exp %145 : vector<16x16xf32>
    %147 = arith.mulf %146, %7 : vector<16x16xf32>
    %cst_37 = arith.constant dense<0.000000e+00> : vector<16xf32>
    %148 = vector.multi_reduction <add>, %147, %cst_37 [1] : vector<16x16xf32> to vector<16xf32>
    %149 = vector.shape_cast %148 : vector<16xf32> to vector<16x1xf32>
    %150 = tpu.reciprocal %149 {approx = true} : vector<16x1xf32> -> vector<16x1xf32>
    %151 = vector.broadcast %150 : vector<16x1xf32> to vector<16x16xf32>
    %152 = arith.mulf %147, %151 : vector<16x16xf32>
    %153 = vector.extract_strided_slice %2 {offsets = [0, 152], sizes = [16, 38], strides = [1, 1]} : vector<16x380xf32> to vector<16x38xf32>
    %cst_38 = arith.constant dense<0.000000e+00> : vector<16x38xf32>
    %154 = tpu.matmul %152, %153, %cst_38 {dimension_numbers = #tpu.dot_dimension_numbers<[1], [0], [0], [1], [0, 0, 1, 1], [], []>} : vector<16x16xf32>, vector<16x38xf32>, vector<16x38xf32> -> vector<16x38xf32>
    %155 = vector.extract_strided_slice %9 {offsets = [0, 5], sizes = [16, 1], strides = [1, 1]} : vector<16x20xf32> to vector<16x1xf32>
    %156 = vector.shape_cast %155 : vector<16x1xf32> to vector<16xf32>
    %157 = vector.extract_strided_slice %9 {offsets = [0, 15], sizes = [16, 1], strides = [1, 1]} : vector<16x20xf32> to vector<16x1xf32>
    %158 = vector.shape_cast %157 : vector<16x1xf32> to vector<16xf32>
    %159 = vector.shape_cast %158 : vector<16xf32> to vector<16x1xf32>
    %160 = vector.shape_cast %156 : vector<16xf32> to vector<1x16xf32>
    %161 = vector.broadcast %159 : vector<16x1xf32> to vector<16x16xf32>
    %162 = vector.broadcast %160 : vector<1x16xf32> to vector<16x16xf32>
    %163 = arith.addf %161, %162 : vector<16x16xf32>
    %cst_39 = arith.constant 0.000000e+00 : f32
    %164 = vector.broadcast %cst_39 : f32 to vector<16x16xf32>
    %165 = arith.cmpf ogt, %163, %164 : vector<16x16xf32>
    %cst_40 = arith.constant 2.000000e-01 : f32
    %166 = vector.broadcast %cst_40 : f32 to vector<16x16xf32>
    %167 = arith.mulf %166, %163 : vector<16x16xf32>
    %168 = arith.select %165, %163, %167 : vector<16x16xi1>, vector<16x16xf32>
    %cst_41 = arith.constant -1.000000e+30 : f32
    %169 = vector.broadcast %cst_41 : f32 to vector<16x16xf32>
    %170 = arith.select %5, %168, %169 : vector<16x16xi1>, vector<16x16xf32>
    %cst_42 = arith.constant dense<0xFF800000> : vector<16xf32>
    %171 = vector.multi_reduction <maximumf>, %170, %cst_42 [1] : vector<16x16xf32> to vector<16xf32>
    %172 = vector.shape_cast %171 : vector<16xf32> to vector<16x1xf32>
    %173 = vector.broadcast %172 : vector<16x1xf32> to vector<16x16xf32>
    %174 = arith.subf %170, %173 : vector<16x16xf32>
    %175 = math.exp %174 : vector<16x16xf32>
    %176 = arith.mulf %175, %7 : vector<16x16xf32>
    %cst_43 = arith.constant dense<0.000000e+00> : vector<16xf32>
    %177 = vector.multi_reduction <add>, %176, %cst_43 [1] : vector<16x16xf32> to vector<16xf32>
    %178 = vector.shape_cast %177 : vector<16xf32> to vector<16x1xf32>
    %179 = tpu.reciprocal %178 {approx = true} : vector<16x1xf32> -> vector<16x1xf32>
    %180 = vector.broadcast %179 : vector<16x1xf32> to vector<16x16xf32>
    %181 = arith.mulf %176, %180 : vector<16x16xf32>
    %182 = vector.extract_strided_slice %2 {offsets = [0, 190], sizes = [16, 38], strides = [1, 1]} : vector<16x380xf32> to vector<16x38xf32>
    %cst_44 = arith.constant dense<0.000000e+00> : vector<16x38xf32>
    %183 = tpu.matmul %181, %182, %cst_44 {dimension_numbers = #tpu.dot_dimension_numbers<[1], [0], [0], [1], [0, 0, 1, 1], [], []>} : vector<16x16xf32>, vector<16x38xf32>, vector<16x38xf32> -> vector<16x38xf32>
    %184 = vector.extract_strided_slice %9 {offsets = [0, 6], sizes = [16, 1], strides = [1, 1]} : vector<16x20xf32> to vector<16x1xf32>
    %185 = vector.shape_cast %184 : vector<16x1xf32> to vector<16xf32>
    %186 = vector.extract_strided_slice %9 {offsets = [0, 16], sizes = [16, 1], strides = [1, 1]} : vector<16x20xf32> to vector<16x1xf32>
    %187 = vector.shape_cast %186 : vector<16x1xf32> to vector<16xf32>
    %188 = vector.shape_cast %187 : vector<16xf32> to vector<16x1xf32>
    %189 = vector.shape_cast %185 : vector<16xf32> to vector<1x16xf32>
    %190 = vector.broadcast %188 : vector<16x1xf32> to vector<16x16xf32>
    %191 = vector.broadcast %189 : vector<1x16xf32> to vector<16x16xf32>
    %192 = arith.addf %190, %191 : vector<16x16xf32>
    %cst_45 = arith.constant 0.000000e+00 : f32
    %193 = vector.broadcast %cst_45 : f32 to vector<16x16xf32>
    %194 = arith.cmpf ogt, %192, %193 : vector<16x16xf32>
    %cst_46 = arith.constant 2.000000e-01 : f32
    %195 = vector.broadcast %cst_46 : f32 to vector<16x16xf32>
    %196 = arith.mulf %195, %192 : vector<16x16xf32>
    %197 = arith.select %194, %192, %196 : vector<16x16xi1>, vector<16x16xf32>
    %cst_47 = arith.constant -1.000000e+30 : f32
    %198 = vector.broadcast %cst_47 : f32 to vector<16x16xf32>
    %199 = arith.select %5, %197, %198 : vector<16x16xi1>, vector<16x16xf32>
    %cst_48 = arith.constant dense<0xFF800000> : vector<16xf32>
    %200 = vector.multi_reduction <maximumf>, %199, %cst_48 [1] : vector<16x16xf32> to vector<16xf32>
    %201 = vector.shape_cast %200 : vector<16xf32> to vector<16x1xf32>
    %202 = vector.broadcast %201 : vector<16x1xf32> to vector<16x16xf32>
    %203 = arith.subf %199, %202 : vector<16x16xf32>
    %204 = math.exp %203 : vector<16x16xf32>
    %205 = arith.mulf %204, %7 : vector<16x16xf32>
    %cst_49 = arith.constant dense<0.000000e+00> : vector<16xf32>
    %206 = vector.multi_reduction <add>, %205, %cst_49 [1] : vector<16x16xf32> to vector<16xf32>
    %207 = vector.shape_cast %206 : vector<16xf32> to vector<16x1xf32>
    %208 = tpu.reciprocal %207 {approx = true} : vector<16x1xf32> -> vector<16x1xf32>
    %209 = vector.broadcast %208 : vector<16x1xf32> to vector<16x16xf32>
    %210 = arith.mulf %205, %209 : vector<16x16xf32>
    %211 = vector.extract_strided_slice %2 {offsets = [0, 228], sizes = [16, 38], strides = [1, 1]} : vector<16x380xf32> to vector<16x38xf32>
    %cst_50 = arith.constant dense<0.000000e+00> : vector<16x38xf32>
    %212 = tpu.matmul %210, %211, %cst_50 {dimension_numbers = #tpu.dot_dimension_numbers<[1], [0], [0], [1], [0, 0, 1, 1], [], []>} : vector<16x16xf32>, vector<16x38xf32>, vector<16x38xf32> -> vector<16x38xf32>
    %213 = vector.extract_strided_slice %9 {offsets = [0, 7], sizes = [16, 1], strides = [1, 1]} : vector<16x20xf32> to vector<16x1xf32>
    %214 = vector.shape_cast %213 : vector<16x1xf32> to vector<16xf32>
    %215 = vector.extract_strided_slice %9 {offsets = [0, 17], sizes = [16, 1], strides = [1, 1]} : vector<16x20xf32> to vector<16x1xf32>
    %216 = vector.shape_cast %215 : vector<16x1xf32> to vector<16xf32>
    %217 = vector.shape_cast %216 : vector<16xf32> to vector<16x1xf32>
    %218 = vector.shape_cast %214 : vector<16xf32> to vector<1x16xf32>
    %219 = vector.broadcast %217 : vector<16x1xf32> to vector<16x16xf32>
    %220 = vector.broadcast %218 : vector<1x16xf32> to vector<16x16xf32>
    %221 = arith.addf %219, %220 : vector<16x16xf32>
    %cst_51 = arith.constant 0.000000e+00 : f32
    %222 = vector.broadcast %cst_51 : f32 to vector<16x16xf32>
    %223 = arith.cmpf ogt, %221, %222 : vector<16x16xf32>
    %cst_52 = arith.constant 2.000000e-01 : f32
    %224 = vector.broadcast %cst_52 : f32 to vector<16x16xf32>
    %225 = arith.mulf %224, %221 : vector<16x16xf32>
    %226 = arith.select %223, %221, %225 : vector<16x16xi1>, vector<16x16xf32>
    %cst_53 = arith.constant -1.000000e+30 : f32
    %227 = vector.broadcast %cst_53 : f32 to vector<16x16xf32>
    %228 = arith.select %5, %226, %227 : vector<16x16xi1>, vector<16x16xf32>
    %cst_54 = arith.constant dense<0xFF800000> : vector<16xf32>
    %229 = vector.multi_reduction <maximumf>, %228, %cst_54 [1] : vector<16x16xf32> to vector<16xf32>
    %230 = vector.shape_cast %229 : vector<16xf32> to vector<16x1xf32>
    %231 = vector.broadcast %230 : vector<16x1xf32> to vector<16x16xf32>
    %232 = arith.subf %228, %231 : vector<16x16xf32>
    %233 = math.exp %232 : vector<16x16xf32>
    %234 = arith.mulf %233, %7 : vector<16x16xf32>
    %cst_55 = arith.constant dense<0.000000e+00> : vector<16xf32>
    %235 = vector.multi_reduction <add>, %234, %cst_55 [1] : vector<16x16xf32> to vector<16xf32>
    %236 = vector.shape_cast %235 : vector<16xf32> to vector<16x1xf32>
    %237 = tpu.reciprocal %236 {approx = true} : vector<16x1xf32> -> vector<16x1xf32>
    %238 = vector.broadcast %237 : vector<16x1xf32> to vector<16x16xf32>
    %239 = arith.mulf %234, %238 : vector<16x16xf32>
    %240 = vector.extract_strided_slice %2 {offsets = [0, 266], sizes = [16, 38], strides = [1, 1]} : vector<16x380xf32> to vector<16x38xf32>
    %cst_56 = arith.constant dense<0.000000e+00> : vector<16x38xf32>
    %241 = tpu.matmul %239, %240, %cst_56 {dimension_numbers = #tpu.dot_dimension_numbers<[1], [0], [0], [1], [0, 0, 1, 1], [], []>} : vector<16x16xf32>, vector<16x38xf32>, vector<16x38xf32> -> vector<16x38xf32>
    %242 = vector.extract_strided_slice %9 {offsets = [0, 8], sizes = [16, 1], strides = [1, 1]} : vector<16x20xf32> to vector<16x1xf32>
    %243 = vector.shape_cast %242 : vector<16x1xf32> to vector<16xf32>
    %244 = vector.extract_strided_slice %9 {offsets = [0, 18], sizes = [16, 1], strides = [1, 1]} : vector<16x20xf32> to vector<16x1xf32>
    %245 = vector.shape_cast %244 : vector<16x1xf32> to vector<16xf32>
    %246 = vector.shape_cast %245 : vector<16xf32> to vector<16x1xf32>
    %247 = vector.shape_cast %243 : vector<16xf32> to vector<1x16xf32>
    %248 = vector.broadcast %246 : vector<16x1xf32> to vector<16x16xf32>
    %249 = vector.broadcast %247 : vector<1x16xf32> to vector<16x16xf32>
    %250 = arith.addf %248, %249 : vector<16x16xf32>
    %cst_57 = arith.constant 0.000000e+00 : f32
    %251 = vector.broadcast %cst_57 : f32 to vector<16x16xf32>
    %252 = arith.cmpf ogt, %250, %251 : vector<16x16xf32>
    %cst_58 = arith.constant 2.000000e-01 : f32
    %253 = vector.broadcast %cst_58 : f32 to vector<16x16xf32>
    %254 = arith.mulf %253, %250 : vector<16x16xf32>
    %255 = arith.select %252, %250, %254 : vector<16x16xi1>, vector<16x16xf32>
    %cst_59 = arith.constant -1.000000e+30 : f32
    %256 = vector.broadcast %cst_59 : f32 to vector<16x16xf32>
    %257 = arith.select %5, %255, %256 : vector<16x16xi1>, vector<16x16xf32>
    %cst_60 = arith.constant dense<0xFF800000> : vector<16xf32>
    %258 = vector.multi_reduction <maximumf>, %257, %cst_60 [1] : vector<16x16xf32> to vector<16xf32>
    %259 = vector.shape_cast %258 : vector<16xf32> to vector<16x1xf32>
    %260 = vector.broadcast %259 : vector<16x1xf32> to vector<16x16xf32>
    %261 = arith.subf %257, %260 : vector<16x16xf32>
    %262 = math.exp %261 : vector<16x16xf32>
    %263 = arith.mulf %262, %7 : vector<16x16xf32>
    %cst_61 = arith.constant dense<0.000000e+00> : vector<16xf32>
    %264 = vector.multi_reduction <add>, %263, %cst_61 [1] : vector<16x16xf32> to vector<16xf32>
    %265 = vector.shape_cast %264 : vector<16xf32> to vector<16x1xf32>
    %266 = tpu.reciprocal %265 {approx = true} : vector<16x1xf32> -> vector<16x1xf32>
    %267 = vector.broadcast %266 : vector<16x1xf32> to vector<16x16xf32>
    %268 = arith.mulf %263, %267 : vector<16x16xf32>
    %269 = vector.extract_strided_slice %2 {offsets = [0, 304], sizes = [16, 38], strides = [1, 1]} : vector<16x380xf32> to vector<16x38xf32>
    %cst_62 = arith.constant dense<0.000000e+00> : vector<16x38xf32>
    %270 = tpu.matmul %268, %269, %cst_62 {dimension_numbers = #tpu.dot_dimension_numbers<[1], [0], [0], [1], [0, 0, 1, 1], [], []>} : vector<16x16xf32>, vector<16x38xf32>, vector<16x38xf32> -> vector<16x38xf32>
    %271 = vector.extract_strided_slice %9 {offsets = [0, 9], sizes = [16, 1], strides = [1, 1]} : vector<16x20xf32> to vector<16x1xf32>
    %272 = vector.shape_cast %271 : vector<16x1xf32> to vector<16xf32>
    %273 = vector.extract_strided_slice %9 {offsets = [0, 19], sizes = [16, 1], strides = [1, 1]} : vector<16x20xf32> to vector<16x1xf32>
    %274 = vector.shape_cast %273 : vector<16x1xf32> to vector<16xf32>
    %275 = vector.shape_cast %274 : vector<16xf32> to vector<16x1xf32>
    %276 = vector.shape_cast %272 : vector<16xf32> to vector<1x16xf32>
    %277 = vector.broadcast %275 : vector<16x1xf32> to vector<16x16xf32>
    %278 = vector.broadcast %276 : vector<1x16xf32> to vector<16x16xf32>
    %279 = arith.addf %277, %278 : vector<16x16xf32>
    %cst_63 = arith.constant 0.000000e+00 : f32
    %280 = vector.broadcast %cst_63 : f32 to vector<16x16xf32>
    %281 = arith.cmpf ogt, %279, %280 : vector<16x16xf32>
    %cst_64 = arith.constant 2.000000e-01 : f32
    %282 = vector.broadcast %cst_64 : f32 to vector<16x16xf32>
    %283 = arith.mulf %282, %279 : vector<16x16xf32>
    %284 = arith.select %281, %279, %283 : vector<16x16xi1>, vector<16x16xf32>
    %cst_65 = arith.constant -1.000000e+30 : f32
    %285 = vector.broadcast %cst_65 : f32 to vector<16x16xf32>
    %286 = arith.select %5, %284, %285 : vector<16x16xi1>, vector<16x16xf32>
    %cst_66 = arith.constant dense<0xFF800000> : vector<16xf32>
    %287 = vector.multi_reduction <maximumf>, %286, %cst_66 [1] : vector<16x16xf32> to vector<16xf32>
    %288 = vector.shape_cast %287 : vector<16xf32> to vector<16x1xf32>
    %289 = vector.broadcast %288 : vector<16x1xf32> to vector<16x16xf32>
    %290 = arith.subf %286, %289 : vector<16x16xf32>
    %291 = math.exp %290 : vector<16x16xf32>
    %292 = arith.mulf %291, %7 : vector<16x16xf32>
    %cst_67 = arith.constant dense<0.000000e+00> : vector<16xf32>
    %293 = vector.multi_reduction <add>, %292, %cst_67 [1] : vector<16x16xf32> to vector<16xf32>
    %294 = vector.shape_cast %293 : vector<16xf32> to vector<16x1xf32>
    %295 = tpu.reciprocal %294 {approx = true} : vector<16x1xf32> -> vector<16x1xf32>
    %296 = vector.broadcast %295 : vector<16x1xf32> to vector<16x16xf32>
    %297 = arith.mulf %292, %296 : vector<16x16xf32>
    %298 = vector.extract_strided_slice %2 {offsets = [0, 342], sizes = [16, 38], strides = [1, 1]} : vector<16x380xf32> to vector<16x38xf32>
    %cst_68 = arith.constant dense<0.000000e+00> : vector<16x38xf32>
    %299 = tpu.matmul %297, %298, %cst_68 {dimension_numbers = #tpu.dot_dimension_numbers<[1], [0], [0], [1], [0, 0, 1, 1], [], []>} : vector<16x16xf32>, vector<16x38xf32>, vector<16x38xf32> -> vector<16x38xf32>
    %300 = tpu.concatenate %38, %67, %96, %125, %154, %183, %212, %241, %270, %299 in 1 : vector<16x38xf32>, vector<16x38xf32>, vector<16x38xf32>, vector<16x38xf32>, vector<16x38xf32>, vector<16x38xf32>, vector<16x38xf32>, vector<16x38xf32>, vector<16x38xf32>, vector<16x38xf32> -> vector<16x380xf32>
    %c0_69 = arith.constant 0 : index
    %c0_70 = arith.constant 0 : index
    %301 = vector.load %arg8[%c0_69, %c0_70] : memref<1x380xf32, #tpu.memory_space<vmem>>, vector<1x380xf32>
    %302 = vector.broadcast %301 : vector<1x380xf32> to vector<16x380xf32>
    %303 = arith.addf %300, %302 : vector<16x380xf32>
    %cst_71 = arith.constant 0.000000e+00 : f32
    %304 = vector.broadcast %cst_71 : f32 to vector<16x380xf32>
    %305 = arith.maximumf %303, %304 : vector<16x380xf32>
    %c0_72 = arith.constant 0 : index
    %c0_73 = arith.constant 0 : index
    %306 = vector.load %arg9[%c0_72, %c0_73] : memref<380x380xf32, #tpu.memory_space<vmem>>, vector<380x380xf32>
    %cst_74 = arith.constant dense<0.000000e+00> : vector<16x380xf32>
    %307 = tpu.matmul %305, %306, %cst_74 {dimension_numbers = #tpu.dot_dimension_numbers<[1], [0], [0], [1], [0, 0, 1, 1], [], []>} : vector<16x380xf32>, vector<380x380xf32>, vector<16x380xf32> -> vector<16x380xf32>
    %c0_75 = arith.constant 0 : index
    %c0_76 = arith.constant 0 : index
    %308 = vector.load %arg3[%c0_75, %c0_76] : memref<16x16xf32, #tpu.memory_space<vmem>>, vector<16x16xf32>
    %cst_77 = arith.constant dense<0.000000e+00> : vector<16x380xf32>
    %309 = tpu.matmul %308, %307, %cst_77 {dimension_numbers = #tpu.dot_dimension_numbers<[1], [0], [0], [1], [0, 0, 1, 1], [], []>} : vector<16x16xf32>, vector<16x380xf32>, vector<16x380xf32> -> vector<16x380xf32>
    %c0_78 = arith.constant 0 : index
    %c0_79 = arith.constant 0 : index
    %310 = vector.load %arg10[%c0_78, %c0_79] : memref<1x380xf32, #tpu.memory_space<vmem>>, vector<1x380xf32>
    %311 = vector.broadcast %310 : vector<1x380xf32> to vector<16x380xf32>
    %312 = arith.addf %309, %311 : vector<16x380xf32>
    %cst_80 = arith.constant 0.000000e+00 : f32
    %313 = vector.broadcast %cst_80 : f32 to vector<16x380xf32>
    %314 = arith.maximumf %312, %313 : vector<16x380xf32>
    %c0_81 = arith.constant 0 : index
    %c0_82 = arith.constant 0 : index
    %315 = vector.load %arg4[%c0_81, %c0_82] : memref<2x16xf32, #tpu.memory_space<vmem>>, vector<2x16xf32>
    %cst_83 = arith.constant dense<0.000000e+00> : vector<2xf32>
    %316 = vector.multi_reduction <add>, %315, %cst_83 [1] : vector<2x16xf32> to vector<2xf32>
    %317 = vector.shape_cast %316 : vector<2xf32> to vector<2x1xf32>
    %cst_84 = arith.constant dense<0.000000e+00> : vector<2x380xf32>
    %318 = tpu.matmul %315, %314, %cst_84 {dimension_numbers = #tpu.dot_dimension_numbers<[1], [0], [0], [1], [0, 0, 1, 1], [], []>} : vector<2x16xf32>, vector<16x380xf32>, vector<2x380xf32> -> vector<2x380xf32>
    %319 = tpu.reciprocal %317 {approx = true} : vector<2x1xf32> -> vector<2x1xf32>
    %320 = vector.broadcast %319 : vector<2x1xf32> to vector<2x380xf32>
    %321 = arith.mulf %318, %320 : vector<2x380xf32>
    %322 = vector.shape_cast %315 : vector<2x16xf32> to vector<2x16x1xf32>
    %cst_85 = arith.constant 0.000000e+00 : f32
    %323 = vector.broadcast %cst_85 : f32 to vector<2x16x1xf32>
    %324 = arith.cmpf ogt, %322, %323 : vector<2x16x1xf32>
    %325 = vector.shape_cast %314 : vector<16x380xf32> to vector<1x16x380xf32>
    %cst_86 = arith.constant -1.000000e+30 : f32
    %326 = vector.shape_cast %324 : vector<2x16x1xi1> to vector<2x16x1xi1>
    %327 = vector.broadcast %326 : vector<2x16x1xi1> to vector<2x16x380xi1>
    %328 = vector.shape_cast %325 : vector<1x16x380xf32> to vector<1x16x380xf32>
    %329 = vector.broadcast %328 : vector<1x16x380xf32> to vector<2x16x380xf32>
    %330 = vector.broadcast %cst_86 : f32 to vector<2x16x380xf32>
    %331 = arith.select %327, %329, %330 : vector<2x16x380xi1>, vector<2x16x380xf32>
    %cst_87 = arith.constant dense<0xFF800000> : vector<2x380xf32>
    %332 = vector.multi_reduction <maximumf>, %331, %cst_87 [1] : vector<2x16x380xf32> to vector<2x380xf32>
    %333 = tpu.concatenate %332, %321 in 1 : vector<2x380xf32>, vector<2x380xf32> -> vector<2x760xf32>
    %c0_88 = arith.constant 0 : index
    %c0_89 = arith.constant 0 : index
    %334 = vector.load %arg11[%c0_88, %c0_89] : memref<760x1500xf32, #tpu.memory_space<vmem>>, vector<760x1500xf32>
    %cst_90 = arith.constant dense<0.000000e+00> : vector<2x1500xf32>
    %335 = tpu.matmul %333, %334, %cst_90 {dimension_numbers = #tpu.dot_dimension_numbers<[1], [0], [0], [1], [0, 0, 1, 1], [], []>} : vector<2x760xf32>, vector<760x1500xf32>, vector<2x1500xf32> -> vector<2x1500xf32>
    %c0_91 = arith.constant 0 : index
    %c0_92 = arith.constant 0 : index
    %336 = vector.load %arg12[%c0_91, %c0_92] : memref<1x1500xf32, #tpu.memory_space<vmem>>, vector<1x1500xf32>
    %337 = vector.broadcast %336 : vector<1x1500xf32> to vector<2x1500xf32>
    %338 = arith.addf %335, %337 : vector<2x1500xf32>
    %cst_93 = arith.constant 0.000000e+00 : f32
    %339 = vector.broadcast %cst_93 : f32 to vector<2x1500xf32>
    %340 = arith.maximumf %338, %339 : vector<2x1500xf32>
    %c0_94 = arith.constant 0 : index
    %c0_95 = arith.constant 0 : index
    %341 = vector.load %arg13[%c0_94, %c0_95] : memref<1500x128xf32, #tpu.memory_space<vmem>>, vector<1500x128xf32>
    %cst_96 = arith.constant dense<0.000000e+00> : vector<2x128xf32>
    %342 = tpu.matmul %340, %341, %cst_96 {dimension_numbers = #tpu.dot_dimension_numbers<[1], [0], [0], [1], [0, 0, 1, 1], [], []>} : vector<2x1500xf32>, vector<1500x128xf32>, vector<2x128xf32> -> vector<2x128xf32>
    %c0_97 = arith.constant 0 : index
    %c0_98 = arith.constant 0 : index
    %343 = vector.load %arg14[%c0_97, %c0_98] : memref<1x128xf32, #tpu.memory_space<vmem>>, vector<1x128xf32>
    %344 = vector.broadcast %343 : vector<1x128xf32> to vector<2x128xf32>
    %345 = arith.addf %342, %344 : vector<2x128xf32>
    %c0_99 = arith.constant 0 : index
    %c0_100 = arith.constant 0 : index
    %c0_101 = arith.constant 0 : index
    %346 = vector.load %arg5[%c0_99, %c0_100, %c0_101] : memref<4x3x64xf32, #tpu.memory_space<vmem>>, vector<4x3x64xf32>
    %cst_102 = arith.constant dense<0.000000e+00> : vector<4x3xf32>
    %347 = vector.multi_reduction <add>, %346, %cst_102 [2] : vector<4x3x64xf32> to vector<4x3xf32>
    %cst_103 = arith.constant 1.562500e-02 : f32
    %348 = vector.broadcast %cst_103 : f32 to vector<4x3xf32>
    %349 = arith.mulf %347, %348 : vector<4x3xf32>
    %c0_104 = arith.constant 0 : index
    %c0_105 = arith.constant 0 : index
    %350 = vector.load %arg15[%c0_104, %c0_105] : memref<3x2048xf32, #tpu.memory_space<vmem>>, vector<3x2048xf32>
    %cst_106 = arith.constant dense<0.000000e+00> : vector<4x2048xf32>
    %351 = tpu.matmul %349, %350, %cst_106 {dimension_numbers = #tpu.dot_dimension_numbers<[1], [0], [0], [1], [0, 0, 1, 1], [], []>} : vector<4x3xf32>, vector<3x2048xf32>, vector<4x2048xf32> -> vector<4x2048xf32>
    %c0_107 = arith.constant 0 : index
    %c0_108 = arith.constant 0 : index
    %352 = vector.load %arg16[%c0_107, %c0_108] : memref<1x2048xf32, #tpu.memory_space<vmem>>, vector<1x2048xf32>
    %353 = vector.broadcast %352 : vector<1x2048xf32> to vector<4x2048xf32>
    %354 = arith.addf %351, %353 : vector<4x2048xf32>
    %c0_109 = arith.constant 0 : index
    %c0_110 = arith.constant 0 : index
    %355 = vector.load %arg17[%c0_109, %c0_110] : memref<2048x256xf32, #tpu.memory_space<vmem>>, vector<2048x256xf32>
    %cst_111 = arith.constant dense<0.000000e+00> : vector<4x256xf32>
    %356 = tpu.matmul %354, %355, %cst_111 {dimension_numbers = #tpu.dot_dimension_numbers<[1], [0], [0], [1], [0, 0, 1, 1], [], []>} : vector<4x2048xf32>, vector<2048x256xf32>, vector<4x256xf32> -> vector<4x256xf32>
    %c0_112 = arith.constant 0 : index
    %c0_113 = arith.constant 0 : index
    %357 = vector.load %arg18[%c0_112, %c0_113] : memref<1x256xf32, #tpu.memory_space<vmem>>, vector<1x256xf32>
    %358 = vector.broadcast %357 : vector<1x256xf32> to vector<4x256xf32>
    %359 = arith.addf %356, %358 : vector<4x256xf32>
    %cst_114 = arith.constant 0.000000e+00 : f32
    %360 = vector.broadcast %cst_114 : f32 to vector<4x256xf32>
    %361 = arith.maximumf %359, %360 : vector<4x256xf32>
    %c0_115 = arith.constant 0 : index
    %c0_116 = arith.constant 0 : index
    %362 = vector.load %arg19[%c0_115, %c0_116] : memref<256x128xf32, #tpu.memory_space<vmem>>, vector<256x128xf32>
    %cst_117 = arith.constant dense<0.000000e+00> : vector<4x128xf32>
    %363 = tpu.matmul %361, %362, %cst_117 {dimension_numbers = #tpu.dot_dimension_numbers<[1], [0], [0], [1], [0, 0, 1, 1], [], []>} : vector<4x256xf32>, vector<256x128xf32>, vector<4x128xf32> -> vector<4x128xf32>
    %c0_118 = arith.constant 0 : index
    %c0_119 = arith.constant 0 : index
    %364 = vector.load %arg20[%c0_118, %c0_119] : memref<1x128xf32, #tpu.memory_space<vmem>>, vector<1x128xf32>
    %365 = vector.broadcast %364 : vector<1x128xf32> to vector<4x128xf32>
    %366 = arith.addf %363, %365 : vector<4x128xf32>
    %cst_120 = arith.constant 0.000000e+00 : f32
    %367 = vector.broadcast %cst_120 : f32 to vector<4x128xf32>
    %368 = arith.maximumf %366, %367 : vector<4x128xf32>
    %369 = vector.extract_strided_slice %368 {offsets = [0, 0], sizes = [2, 128], strides = [1, 1]} : vector<4x128xf32> to vector<2x128xf32>
    %370 = vector.extract_strided_slice %368 {offsets = [2, 0], sizes = [2, 128], strides = [1, 1]} : vector<4x128xf32> to vector<2x128xf32>
    %371 = tpu.concatenate %369, %370, %345 in 1 : vector<2x128xf32>, vector<2x128xf32>, vector<2x128xf32> -> vector<2x384xf32>
    %c0_121 = arith.constant 0 : index
    %c0_122 = arith.constant 0 : index
    %372 = vector.load %arg21[%c0_121, %c0_122] : memref<384x192xf32, #tpu.memory_space<vmem>>, vector<384x192xf32>
    %cst_123 = arith.constant dense<0.000000e+00> : vector<2x192xf32>
    %373 = tpu.matmul %371, %372, %cst_123 {dimension_numbers = #tpu.dot_dimension_numbers<[1], [0], [0], [1], [0, 0, 1, 1], [], []>} : vector<2x384xf32>, vector<384x192xf32>, vector<2x192xf32> -> vector<2x192xf32>
    %c0_124 = arith.constant 0 : index
    %c0_125 = arith.constant 0 : index
    %374 = vector.load %arg22[%c0_124, %c0_125] : memref<1x192xf32, #tpu.memory_space<vmem>>, vector<1x192xf32>
    %375 = vector.broadcast %374 : vector<1x192xf32> to vector<2x192xf32>
    %376 = arith.addf %373, %375 : vector<2x192xf32>
    %cst_126 = arith.constant 0.000000e+00 : f32
    %377 = vector.broadcast %cst_126 : f32 to vector<2x192xf32>
    %378 = arith.maximumf %376, %377 : vector<2x192xf32>
    %c0_127 = arith.constant 0 : index
    %c0_128 = arith.constant 0 : index
    %379 = vector.load %arg23[%c0_127, %c0_128] : memref<192x96xf32, #tpu.memory_space<vmem>>, vector<192x96xf32>
    %cst_129 = arith.constant dense<0.000000e+00> : vector<2x96xf32>
    %380 = tpu.matmul %378, %379, %cst_129 {dimension_numbers = #tpu.dot_dimension_numbers<[1], [0], [0], [1], [0, 0, 1, 1], [], []>} : vector<2x192xf32>, vector<192x96xf32>, vector<2x96xf32> -> vector<2x96xf32>
    %c0_130 = arith.constant 0 : index
    %c0_131 = arith.constant 0 : index
    %381 = vector.load %arg24[%c0_130, %c0_131] : memref<1x96xf32, #tpu.memory_space<vmem>>, vector<1x96xf32>
    %382 = vector.broadcast %381 : vector<1x96xf32> to vector<2x96xf32>
    %383 = arith.addf %380, %382 : vector<2x96xf32>
    %c0_132 = arith.constant 0 : index
    %c0_133 = arith.constant 0 : index
    %384 = vector.load %arg25[%c0_132, %c0_133] : memref<384x96xf32, #tpu.memory_space<vmem>>, vector<384x96xf32>
    %cst_134 = arith.constant dense<0.000000e+00> : vector<2x96xf32>
    %385 = tpu.matmul %371, %384, %cst_134 {dimension_numbers = #tpu.dot_dimension_numbers<[1], [0], [0], [1], [0, 0, 1, 1], [], []>} : vector<2x384xf32>, vector<384x96xf32>, vector<2x96xf32> -> vector<2x96xf32>
    %386 = arith.addf %383, %385 : vector<2x96xf32>
    %c0_135 = arith.constant 0 : index
    %c0_136 = arith.constant 0 : index
    %387 = vector.load %arg26[%c0_135, %c0_136] : memref<1x96xf32, #tpu.memory_space<vmem>>, vector<1x96xf32>
    %388 = vector.broadcast %387 : vector<1x96xf32> to vector<2x96xf32>
    %389 = arith.addf %386, %388 : vector<2x96xf32>
    %cst_137 = arith.constant 0.000000e+00 : f32
    %390 = vector.broadcast %cst_137 : f32 to vector<2x96xf32>
    %391 = arith.maximumf %389, %390 : vector<2x96xf32>
    %c0_138 = arith.constant 0 : index
    %c0_139 = arith.constant 0 : index
    %392 = vector.load %arg27[%c0_138, %c0_139] : memref<96x48xf32, #tpu.memory_space<vmem>>, vector<96x48xf32>
    %cst_140 = arith.constant dense<0.000000e+00> : vector<2x48xf32>
    %393 = tpu.matmul %391, %392, %cst_140 {dimension_numbers = #tpu.dot_dimension_numbers<[1], [0], [0], [1], [0, 0, 1, 1], [], []>} : vector<2x96xf32>, vector<96x48xf32>, vector<2x48xf32> -> vector<2x48xf32>
    %c0_141 = arith.constant 0 : index
    %c0_142 = arith.constant 0 : index
    %394 = vector.load %arg28[%c0_141, %c0_142] : memref<1x48xf32, #tpu.memory_space<vmem>>, vector<1x48xf32>
    %395 = vector.broadcast %394 : vector<1x48xf32> to vector<2x48xf32>
    %396 = arith.addf %393, %395 : vector<2x48xf32>
    %cst_143 = arith.constant 0.000000e+00 : f32
    %397 = vector.broadcast %cst_143 : f32 to vector<2x48xf32>
    %398 = arith.maximumf %396, %397 : vector<2x48xf32>
    %c0_144 = arith.constant 0 : index
    %c0_145 = arith.constant 0 : index
    %399 = vector.load %arg29[%c0_144, %c0_145] : memref<48x1xf32, #tpu.memory_space<vmem>>, vector<48x1xf32>
    %cst_146 = arith.constant dense<0.000000e+00> : vector<2x1xf32>
    %400 = tpu.matmul %398, %399, %cst_146 {dimension_numbers = #tpu.dot_dimension_numbers<[1], [0], [0], [1], [0, 0, 1, 1], [], []>} : vector<2x48xf32>, vector<48x1xf32>, vector<2x1xf32> -> vector<2x1xf32>
    %c0_147 = arith.constant 0 : index
    %c0_148 = arith.constant 0 : index
    %401 = vector.load %arg30[%c0_147, %c0_148] : memref<1x1xf32, #tpu.memory_space<vmem>>, vector<1x1xf32>
    %402 = vector.broadcast %401 : vector<1x1xf32> to vector<2x1xf32>
    %403 = arith.addf %400, %402 : vector<2x1xf32>
    %404 = arith.negf %403 : vector<2x1xf32>
    %405 = math.exp %404 : vector<2x1xf32>
    %cst_149 = arith.constant 1.000000e+00 : f32
    %406 = vector.broadcast %cst_149 : f32 to vector<2x1xf32>
    %407 = arith.addf %406, %405 : vector<2x1xf32>
    %408 = arith.divf %406, %407 : vector<2x1xf32>
    %c0_150 = arith.constant 0 : index
    %c0_151 = arith.constant 0 : index
    %409 = vector.load %arg31[%c0_150, %c0_151] : memref<2x1xf32, #tpu.memory_space<vmem>>, vector<2x1xf32>
    tpu.vector_store %arg31[%c0_150, %c0_151], %408 {strides = array<i32>} : memref<2x1xf32, #tpu.memory_space<vmem>>, vector<2x1xf32>,
    return
  }
  func.func @transform_0(%arg0: i32) -> (i32, i32) {
    %c0_i32 = arith.constant 0 : i32
    %c0_i32_0 = arith.constant 0 : i32
    %c0_i32_1 = arith.constant 0 : i32
    return %c0_i32, %c0_i32_0 : i32, i32
  }
  func.func @transform_1(%arg0: i32) -> (i32, i32) {
    %c0_i32 = arith.constant 0 : i32
    %c0_i32_0 = arith.constant 0 : i32
    %c0_i32_1 = arith.constant 0 : i32
    return %c0_i32, %c0_i32_0 : i32, i32
  }
  func.func @transform_2(%arg0: i32) -> (i32, i32) {
    %c0_i32 = arith.constant 0 : i32
    %c0_i32_0 = arith.constant 0 : i32
    %c0_i32_1 = arith.constant 0 : i32
    return %c0_i32, %c0_i32_0 : i32, i32
  }
  func.func @transform_3(%arg0: i32) -> (i32, i32) {
    %c0_i32 = arith.constant 0 : i32
    %c0_i32_0 = arith.constant 0 : i32
    %c0_i32_1 = arith.constant 0 : i32
    return %c0_i32, %c0_i32_0 : i32, i32
  }
  func.func @transform_4(%arg0: i32) -> (i32, i32, i32) {
    %c0_i32 = arith.constant 0 : i32
    %c0_i32_0 = arith.constant 0 : i32
    %c0_i32_1 = arith.constant 0 : i32
    %c0_i32_2 = arith.constant 0 : i32
    return %c0_i32, %c0_i32_0, %c0_i32_1 : i32, i32, i32
  }
  func.func @transform_5(%arg0: i32) -> (i32, i32) {
    %c0_i32 = arith.constant 0 : i32
    %c0_i32_0 = arith.constant 0 : i32
    %c0_i32_1 = arith.constant 0 : i32
    return %c0_i32, %c0_i32_0 : i32, i32
  }
  func.func @transform_6(%arg0: i32) -> (i32, i32) {
    %c0_i32 = arith.constant 0 : i32
    %c0_i32_0 = arith.constant 0 : i32
    %c0_i32_1 = arith.constant 0 : i32
    return %c0_i32, %c0_i32_0 : i32, i32
  }
  func.func @transform_7(%arg0: i32) -> (i32, i32) {
    %c0_i32 = arith.constant 0 : i32
    %c0_i32_0 = arith.constant 0 : i32
    %c0_i32_1 = arith.constant 0 : i32
    return %c0_i32, %c0_i32_0 : i32, i32
  }
  func.func @transform_8(%arg0: i32) -> (i32, i32) {
    %c0_i32 = arith.constant 0 : i32
    %c0_i32_0 = arith.constant 0 : i32
    %c0_i32_1 = arith.constant 0 : i32
    return %c0_i32, %c0_i32_0 : i32, i32
  }
  func.func @transform_9(%arg0: i32) -> (i32, i32) {
    %c0_i32 = arith.constant 0 : i32
    %c0_i32_0 = arith.constant 0 : i32
    %c0_i32_1 = arith.constant 0 : i32
    return %c0_i32, %c0_i32_0 : i32, i32
  }
  func.func @transform_10(%arg0: i32) -> (i32, i32) {
    %c0_i32 = arith.constant 0 : i32
    %c0_i32_0 = arith.constant 0 : i32
    %c0_i32_1 = arith.constant 0 : i32
    return %c0_i32, %c0_i32_0 : i32, i32
  }
  func.func @transform_11(%arg0: i32) -> (i32, i32) {
    %c0_i32 = arith.constant 0 : i32
    %c0_i32_0 = arith.constant 0 : i32
    %c0_i32_1 = arith.constant 0 : i32
    return %c0_i32, %c0_i32_0 : i32, i32
  }
  func.func @transform_12(%arg0: i32) -> (i32, i32) {
    %c0_i32 = arith.constant 0 : i32
    %c0_i32_0 = arith.constant 0 : i32
    %c0_i32_1 = arith.constant 0 : i32
    return %c0_i32, %c0_i32_0 : i32, i32
  }
  func.func @transform_13(%arg0: i32) -> (i32, i32) {
    %c0_i32 = arith.constant 0 : i32
    %c0_i32_0 = arith.constant 0 : i32
    %c0_i32_1 = arith.constant 0 : i32
    return %c0_i32, %c0_i32_0 : i32, i32
  }
  func.func @transform_14(%arg0: i32) -> (i32, i32) {
    %c0_i32 = arith.constant 0 : i32
    %c0_i32_0 = arith.constant 0 : i32
    %c0_i32_1 = arith.constant 0 : i32
    return %c0_i32, %c0_i32_0 : i32, i32
  }
  func.func @transform_15(%arg0: i32) -> (i32, i32) {
    %c0_i32 = arith.constant 0 : i32
    %c0_i32_0 = arith.constant 0 : i32
    %c0_i32_1 = arith.constant 0 : i32
    return %c0_i32, %c0_i32_0 : i32, i32
  }
  func.func @transform_16(%arg0: i32) -> (i32, i32) {
    %c0_i32 = arith.constant 0 : i32
    %c0_i32_0 = arith.constant 0 : i32
    %c0_i32_1 = arith.constant 0 : i32
    return %c0_i32, %c0_i32_0 : i32, i32
  }
  func.func @transform_17(%arg0: i32) -> (i32, i32) {
    %c0_i32 = arith.constant 0 : i32
    %c0_i32_0 = arith.constant 0 : i32
    %c0_i32_1 = arith.constant 0 : i32
    return %c0_i32, %c0_i32_0 : i32, i32
  }
  func.func @transform_18(%arg0: i32) -> (i32, i32) {
    %c0_i32 = arith.constant 0 : i32
    %c0_i32_0 = arith.constant 0 : i32
    %c0_i32_1 = arith.constant 0 : i32
    return %c0_i32, %c0_i32_0 : i32, i32
  }
  func.func @transform_19(%arg0: i32) -> (i32, i32) {
    %c0_i32 = arith.constant 0 : i32
    %c0_i32_0 = arith.constant 0 : i32
    %c0_i32_1 = arith.constant 0 : i32
    return %c0_i32, %c0_i32_0 : i32, i32
  }
  func.func @transform_20(%arg0: i32) -> (i32, i32) {
    %c0_i32 = arith.constant 0 : i32
    %c0_i32_0 = arith.constant 0 : i32
    %c0_i32_1 = arith.constant 0 : i32
    return %c0_i32, %c0_i32_0 : i32, i32
  }
  func.func @transform_21(%arg0: i32) -> (i32, i32) {
    %c0_i32 = arith.constant 0 : i32
    %c0_i32_0 = arith.constant 0 : i32
    %c0_i32_1 = arith.constant 0 : i32
    return %c0_i32, %c0_i32_0 : i32, i32
  }
  func.func @transform_22(%arg0: i32) -> (i32, i32) {
    %c0_i32 = arith.constant 0 : i32
    %c0_i32_0 = arith.constant 0 : i32
    %c0_i32_1 = arith.constant 0 : i32
    return %c0_i32, %c0_i32_0 : i32, i32
  }
  func.func @transform_23(%arg0: i32) -> (i32, i32) {
    %c0_i32 = arith.constant 0 : i32
    %c0_i32_0 = arith.constant 0 : i32
    %c0_i32_1 = arith.constant 0 : i32
    return %c0_i32, %c0_i32_0 : i32, i32
  }
  func.func @transform_24(%arg0: i32) -> (i32, i32) {
    %c0_i32 = arith.constant 0 : i32
    %c0_i32_0 = arith.constant 0 : i32
    %c0_i32_1 = arith.constant 0 : i32
    return %c0_i32, %c0_i32_0 : i32, i32
  }
  func.func @transform_25(%arg0: i32) -> (i32, i32) {
    %c0_i32 = arith.constant 0 : i32
    %c0_i32_0 = arith.constant 0 : i32
    %c0_i32_1 = arith.constant 0 : i32
    return %c0_i32, %c0_i32_0 : i32, i32
  }
  func.func @transform_26(%arg0: i32) -> (i32, i32) {
    %c0_i32 = arith.constant 0 : i32
    %c0_i32_0 = arith.constant 0 : i32
    %c0_i32_1 = arith.constant 0 : i32
    return %c0_i32, %c0_i32_0 : i32, i32
  }
  func.func @transform_27(%arg0: i32) -> (i32, i32) {
    %c0_i32 = arith.constant 0 : i32
    %c0_i32_0 = arith.constant 0 : i32
    %c0_i32_1 = arith.constant 0 : i32
    return %c0_i32, %c0_i32_0 : i32, i32
  }
  func.func @transform_28(%arg0: i32) -> (i32, i32) {
    %c0_i32 = arith.constant 0 : i32
    %c0_i32_0 = arith.constant 0 : i32
    %c0_i32_1 = arith.constant 0 : i32
    return %c0_i32, %c0_i32_0 : i32, i32
  }
  func.func @transform_29(%arg0: i32) -> (i32, i32) {
    %c0_i32 = arith.constant 0 : i32
    %c0_i32_0 = arith.constant 0 : i32
    %c0_i32_1 = arith.constant 0 : i32
    return %c0_i32, %c0_i32_0 : i32, i32
  }
  func.func @transform_30(%arg0: i32) -> (i32, i32) {
    %c0_i32 = arith.constant 0 : i32
    %c0_i32_0 = arith.constant 0 : i32
    %c0_i32_1 = arith.constant 0 : i32
    return %c0_i32, %c0_i32_0 : i32, i32
  }
}

</mosaic_0001>

<bundles_post_ra>
// kernel: tpu_custom_call.1
= control target key start
LH: loop header
LB: loop body
LE: loop exit
PB: predicated region body
PF: predicated region fallthrough
CT: control target
= control target key end

     0   :  { %s12467_s3 = smov 5   ;;  %v12468_v0 = vmov 0.0   ;;  %s12469_s10 = smov 6   ;;  %vm152_vm0 = vcmask 1045504   ;;  %vm145_vm1 = vcmask 310272   ;;  %vm377_vm2 = vcmask 1043456   ;;  %s15933_s0 = inlined_call_operand.smem [shape: u32[31], index: -1, kind: input, shape index: {}] }
   0x1   :  { %s12544_s6 = sld [smem:[%s15933_s0 + %s12467_s3]]   ;;  %226 = vmatprep.mubr.f32.mxu0 %v12468_v0  ;;  %vm12470_vm3 = vmmov 1   ;;  %s12471_s14 = smov 14   ;;  %vm370_vm5 = vcmask 1014784   ;;  %vm1068_vm6 = vcmask 113664   ;;  %vm558_vm7 = vcmask 130112  }
   0x2   :  { %s12558_s9 = sld [smem:[%s15933_s0]]   ;;  %vm12631_vm4 = vmpackc.low %vm377_vm2, %vm12470_vm3  ;;  %s12472_s15 = smov 90   ;;  %vm584_vm11 = vcmask 130048  }
   0x3   :  { %s12563_s13 = sld [smem:[%s15933_s0 + %s12469_s10]]   ;;  %s12473_s16 = smov 52  }
   0x4   :  { %s12474_s17 = smov 104   ;;  %s12495_s18 = smov 1  }
   0x5   :  { %s8941_s21 = sld [smem:[%s15933_s0 + %s12495_s18]]   ;;  %s12496_s22 = smov 28  }
   0x6   :  { %s12497_s23 = smov 66   ;;  %s12498_s24 = smov 80  }
   0x7   :  { %v131_v1 = vld [vmem:[%s12544_s6 + $0x8] sm:$0xff]  ;;  %v134_v2 = vld [vmem:[%s12544_s6 + $0x20] sm:$0xff]  ;;  %v133_v5 = vld [vmem:[%s12544_s6 + $0x18] sm:$0xff]  ;;  %s12499_s25 = smov 118   ;;  %s12500_s26 = smov 42  }
   0x8   :  { %v130_v3 = vld [vmem:[%s12544_s6] sm:$0xff]  ;;  %v9750_v4 = vpack.c.bf16 %v134_v2, %v131_v1  ;;  %v137_v6 = vld [vmem:[%s12544_s6 + $0x38] sm:$0xff]  ;;  %v140_v7 = vld [vmem:[%s12544_s6 + $0x50] sm:$0xff]  ;;  %s12501_s27 = smov 8   ;;  %s12502_s1 = smov 38  }
   0x9   :  { %v9752_v8 = vpack.c.bf16 %v133_v5, %v130_v3  ;;  %v9754_v9 = vpack.c.bf16 %v140_v7, %v137_v6  ;;  %v136_v10 = vld [vmem:[%s12544_s6 + $0x30] sm:$0xff]  ;;  %v139_v11 = vld [vmem:[%s12544_s6 + $0x48] sm:$0xff]  ;;  %v138_v16 = vld [vmem:[%s12544_s6 + $0x40] sm:$0xff]  ;;  %s13131_s30 = sld [smem:[%s15933_s0 + %s12501_s27]]   ;;  %s12503_s2 = smov 114  }
   0xa   :  { %9751 = vmatprep.subr.bf16.mxu0 %v9750_v4  ;;  %v9756_v12 = vpack.c.bf16 %v139_v11, %v136_v10  ;;  %v143_v13 = vld [vmem:[%s12544_s6 + $0x68] sm:$0x3f]  ;;  %v132_v14 = vld [vmem:[%s12544_s6 + $0x10] sm:$0xff]  ;;  %v141_v17 = vld [vmem:[%s12544_s6 + $0x58] sm:$0xff]  ;;  %s12504_s3 = smov 76   ;;  %s12505_s4 = smov 24  }
   0xb   :  { %9753 = vmatpush1.bf16.msra.mxu0 %v9752_v8  ;;  %v135_v15 = vld [vmem:[%s12544_s6 + $0x28] sm:$0xff]  ;;  %v354_v18 = vld [vmem:[%s12563_s13 + $0x100] sm:$0xff]  ;;  %v356_v24 = vld [vmem:[%s12563_s13 + $0x110] sm:$0xff]  ;;  %v9762_v26 = vpack.c.bf16 %v141_v17, %v138_v16  ;;  %s12506_s5 = smov 62   ;;  %s12508_s7 = smov 48  }
   0xc   :  { %9755 = vmatprep.subr.bf16.mxu0 %v9754_v9  ;;  %v355_v19 = vld [vmem:[%s12563_s13 + $0x108] sm:$0xff]  ;;  %v142_v20 = vld [vmem:[%s12544_s6 + $0x60] sm:$0x3f]  ;;  %v9758_v21 = vpack.c.bf16 %v135_v15, %v132_v14  ;;  %v357_v25 = vld [vmem:[%s12563_s13 + $0x118] sm:$0xff]  ;;  %s12509_s8 = smov 10   ;;  %s12512_s18 = smov 3  }
   0xd   :  { %v9798_v22 = vpack.c.bf16 %v355_v19, %v354_v18  ;;  %v128_v23 = vld [vmem:[%s12558_s9] sm:$0xff]  ;;  %v9802_v27 = vpack.c.bf16 %v357_v25, %v356_v24  ;;  %v359_v29 = vld [vmem:[%s12563_s13 + $0x128] sm:$0xff]  ;;  %v360_v32 = vld [vmem:[%s12563_s13 + $0x130] sm:$0xff]  ;;  %s12514_s27 = smov 9   ;;  %s12520_s11 = smov 12  }
   0xe   :  { %v358_v28 = vld [vmem:[%s12563_s13 + $0x120] sm:$0xff]  ;;  %v129_v31 = vld [vmem:[%s12558_s9 + $0x8] sm:$0xff]  ;;  %v361_v33 = vld [vmem:[%s12563_s13 + $0x138] sm:$0xff]  ;;  %s12510_s9 = smov 7   ;;  %s14694_s19 = sld [smem:[%s15933_s0 + %s12471_s14]]  }
   0xf   :  { %9757 = vmatpush1.bf16.msra.mxu0 %v9756_v12  ;;  %9799 = vmatprep.subr.bf16.mxu1 %v9798_v22  ;;  %v9806_v30 = vpack.c.bf16 %v359_v29, %v358_v28  ;;  %v144_v34 = vld [vmem:[%s12544_s6 + $0x70] sm:$0x3f]  ;;  %v338_v35 = vld [vmem:[%s12563_s13 + $0x80] sm:$0xff]  ;;  %v339_v36 = vld [vmem:[%s12563_s13 + $0x88] sm:$0xff]  ;;  %v9810_v40 = vpack.c.bf16 %v361_v33, %v360_v32  ;;  %s12507_s6 = smov 100   ;;  %s8947_s12 = sld [smem:[%s15933_s0 + %s12510_s9]]  }
  0x10   :  { %8971 = vmatprep.subr.msk.mxu0 %vm152_vm0, %v143_v13  ;;  %9801 = vmatpush3.bf16.msra.mxu1 %v9798_v22  ;;  %v322_v37 = vld [vmem:[%s12563_s13] sm:$0xff]  ;;  %v323_v38 = vld [vmem:[%s12563_s13 + $0x8] sm:$0xff]  ;;  %v340_v39 = vld [vmem:[%s12563_s13 + $0x90] sm:$0xff]  ;;  %v9766_v44 = vpack.c.bf16 %v339_v36, %v338_v35  ;;  %s12530_s29 = smov 26  }
  0x11   :  { %9803 = vmatprep.subr.bf16.mxu1 %v9802_v27  ;;  %v341_v41 = vld [vmem:[%s12563_s13 + $0x98] sm:$0xff]  ;;  %v362_v42 = vld [vmem:[%s12563_s13 + $0x140] sm:$0xff]  ;;  %v363_v43 = vld [vmem:[%s12563_s13 + $0x148] sm:$0xff]  ;;  %v9768_v45 = vpack.c.bf16 %v323_v38, %v322_v37 }
  0x12   :  { %v9770_v46 = vpack.c.bf16 %v341_v41, %v340_v39  ;;  %v324_v47 = vld [vmem:[%s12563_s13 + $0x10] sm:$0xff]  ;;  %v325_v48 = vld [vmem:[%s12563_s13 + $0x18] sm:$0xff]  ;;  %v342_v49 = vld [vmem:[%s12563_s13 + $0xa0] sm:$0xff]  ;;  %v9814_v50 = vpack.c.bf16 %v363_v43, %v362_v42 }
  0x13   :  { %8972 = vmatpush1.msk.msra.mxu0 %vm152_vm0, %v142_v20  ;;  %v343_v51 = vld [vmem:[%s12563_s13 + $0xa8] sm:$0xff]  ;;  %v364_v52 = vld [vmem:[%s12563_s13 + $0x150] sm:$0xff]  ;;  %v365_v53 = vld [vmem:[%s12563_s13 + $0x158] sm:$0xff]  ;;  %v9772_v54 = vpack.c.bf16 %v325_v48, %v324_v47  ;;  %v12475_v48 = vmov 0  }
  0x14   :  { %8973 = vmatmul.mubr.msk.f32.vlgmr.msra.gmra.mrb[0].mxu0 %vm145_vm1, %v128_v23  ;;  %9759 = vmatprep.subr.bf16.mxu0 %v9758_v21  ;;  %v9774_v55 = vpack.c.bf16 %v343_v51, %v342_v49  ;;  %v326_v56 = vld [vmem:[%s12563_s13 + $0x20] sm:$0xff]  ;;  %v327_v57 = vld [vmem:[%s12563_s13 + $0x28] sm:$0xff]  ;;  %v9818_v58 = vpack.c.bf16 %v365_v53, %v364_v52  ;;  %v344_v59 = vld [vmem:[%s12563_s13 + $0xb0] sm:$0xff]  ;;  %v12476_v49 = vmov 10  }
  0x15   :  { %9761 = vmatpush3.bf16.msra.mxu0 %v9758_v21  ;;  %232 = vmatprep.mubr.f32.mxu0 %v12468_v0  ;;  %v345_v60 = vld [vmem:[%s12563_s13 + $0xb8] sm:$0xff]  ;;  %v9776_v61 = vpack.c.bf16 %v327_v57, %v326_v56  ;;  %v328_v63 = vld [vmem:[%s12563_s13 + $0x30] sm:$0xff]  ;;  %v346_v2 = vld [vmem:[%s12563_s13 + $0xc0] sm:$0xff] }
  0x16   :  { %9763 = vmatprep.subr.bf16.mxu0 %v9762_v26  ;;  %9805 = vmatpush3.bf16.msra.mxu1 %v9802_v27  ;;  %v9778_v62 = vpack.c.bf16 %v345_v60, %v344_v59  ;;  %v329_v1 = vld [vmem:[%s12563_s13 + $0x38] sm:$0xff]  ;;  %v347_v3 = vld [vmem:[%s12563_s13 + $0xc8] sm:$0xff]  ;;  %v330_v6 = vld [vmem:[%s12563_s13 + $0x40] sm:$0xff] }
  0x17   :  { %9807 = vmatprep.subr.bf16.mxu1 %v9806_v30  ;;  %v9780_v4 = vpack.c.bf16 %v329_v1, %v328_v63  ;;  %v9782_v5 = vpack.c.bf16 %v347_v3, %v346_v2  ;;  %v331_v7 = vld [vmem:[%s12563_s13 + $0x48] sm:$0xff]  ;;  %v348_v8 = vld [vmem:[%s12563_s13 + $0xd0] sm:$0xff]  ;;  %v349_v9 = vld [vmem:[%s12563_s13 + $0xd8] sm:$0xff]  ;;  %12295 = vset.pattern.permute.xlu0 %v12475_v48 }
  0x18   :  { %8974 = vmatmul.mubr.msk.f32.gmra.mrb[2].mxu0 %vm145_vm1, %v129_v31  ;;  %v9784_v10 = vpack.c.bf16 %v331_v7, %v330_v6  ;;  %v9786_v11 = vpack.c.bf16 %v349_v9, %v348_v8  ;;  %v332_v12 = vld [vmem:[%s12563_s13 + $0x50] sm:$0xff]  ;;  %v333_v13 = vld [vmem:[%s12563_s13 + $0x58] sm:$0xff]  ;;  %v350_v14 = vld [vmem:[%s12563_s13 + $0xe0] sm:$0xff]  ;;  %12297 = vset.pattern.permute.xlu1 %v12476_v49 }
  0x19   :  { %9765 = vmatpush3.bf16.msra.mxu0 %v9762_v26  ;;  %9516 = vmatprep.mubr.msk.f32.mxu0 %vm145_vm1, %v128_v23  ;;  %v351_v15 = vld [vmem:[%s12563_s13 + $0xe8] sm:$0xff]  ;;  %v9788_v16 = vpack.c.bf16 %v333_v13, %v332_v12  ;;  %v334_v18 = vld [vmem:[%s12563_s13 + $0x60] sm:$0xff]  ;;  %v352_v20 = vld [vmem:[%s12563_s13 + $0xf0] sm:$0xff] }
  0x1a   :  { %9514 = vmatprep.subr.msk.mxu0 %vm152_vm0, %v144_v34  ;;  %9809 = vmatpush3.bf16.msra.mxu1 %v9806_v30  ;;  %v9790_v17 = vpack.c.bf16 %v351_v15, %v350_v14  ;;  %v335_v19 = vld [vmem:[%s12563_s13 + $0x68] sm:$0xff]  ;;  %v353_v21 = vld [vmem:[%s12563_s13 + $0xf8] sm:$0xff]  ;;  %v336_v24 = vld [vmem:[%s12563_s13 + $0x70] sm:$0xff]  ;;  %v12477_v14 = vmov 11   ;;  %v12478_v15 = vmov 1  }
  0x1b   :  { %9811 = vmatprep.subr.bf16.mxu1 %v9810_v40  ;;  %v9792_v22 = vpack.c.bf16 %v335_v19, %v334_v18  ;;  %v9794_v23 = vpack.c.bf16 %v353_v21, %v352_v20  ;;  %v337_v25 = vld [vmem:[%s12563_s13 + $0x78] sm:$0xff]  ;;  %v366_v27 = vld [vmem:[%s12563_s13 + $0x160] sm:$0xff]  ;;  %v367_v28 = vld [vmem:[%s12563_s13 + $0x168] sm:$0xff]  ;;  %v12481_v18 = vmov 13   ;;  %v12482_v19 = vmov 12  }
  0x1c   :  { %v9796_v26 = vpack.c.bf16 %v337_v25, %v336_v24  ;;  %v9822_v29 = vpack.c.bf16 %v367_v28, %v366_v27  ;;  %v368_v30 = vld [vmem:[%s12563_s13 + $0x170] sm:$0xff]  ;;  %v12483_v20 = vmov 5   ;;  %v12484_v21 = vmov 4  }
  0x1d   :  { %9515 = vmatpush3.msk.msra.mxu0 %vm152_vm0, %v144_v34  ;;  %v12487_v24 = vmov 16   ;;  %v12488_v25 = vmov 6   ;;  %v12490_v27 = vmov 7   ;;  %v12491_v28 = vmov 18  }
  0x1e   :  { %9517 = vmatmul.mubr.msk.f32.vlgmr.msra.gmra.mrb[4].mxu0 %vm145_vm1, %v129_v31  ;;  %9767 = vmatprep.subr.bf16.mxu0 %v9766_v44  ;;  %v369_v31 = vld [vmem:[%s12563_s13 + $0x178] sm:$0xf]  ;;  %s12511_s13 = smov 86  }
  0x1f   :  { %9769 = vmatpush3.bf16.msra.mxu0 %v9768_v45  ;;  %9813 = vmatpush3.bf16.msra.mxu1 %v9810_v40  ;;  %v9826_v32 = vpack.c.bf16 %v369_v31, %v368_v30  ;;  %v12493_v30 = vmov 19   ;;  %v12494_v31 = vmov 9  }
  0x20   :  { %9771 = vmatprep.subr.bf16.mxu0 %v9770_v46  ;;  %9815 = vmatprep.subr.bf16.mxu1 %v9814_v50 }
  0x23   :  { %9773 = vmatpush3.bf16.msra.mxu0 %v9772_v54  ;;  %9817 = vmatpush3.bf16.msra.mxu1 %v9814_v50 }
  0x24   :  { %9775 = vmatprep.subr.bf16.mxu0 %v9774_v55  ;;  %9819 = vmatprep.subr.bf16.mxu1 %v9818_v58 }
  0x27   :  { %9777 = vmatpush3.bf16.msra.mxu0 %v9776_v61  ;;  %9821 = vmatpush3.bf16.msra.mxu1 %v9818_v58 }
  0x28   :  { %9779 = vmatprep.subr.bf16.mxu0 %v9778_v62  ;;  %9823 = vmatprep.subr.bf16.mxu1 %v9822_v29 }
  0x2b   :  { %9781 = vmatpush3.bf16.msra.mxu0 %v9780_v4  ;;  %9825 = vmatpush3.bf16.msra.mxu1 %v9822_v29  ;;  %v12492_v29 = vmov 8  }
  0x2c   :  { %9783 = vmatprep.subr.bf16.mxu0 %v9782_v5  ;;  %9828 = vmatprep.subr.msk.bf16.mxu1 %vm12631_vm4, %v9826_v32 }
  0x2f   :  { %9785 = vmatpush3.bf16.msra.mxu0 %v9784_v10  ;;  %9831 = vmatpush3.bf16.msk.msra.mxu1 %vm12631_vm4, %v9826_v32 }
  0x30   :  { %9787 = vmatprep.subr.bf16.mxu0 %v9786_v11 }
  0x33   :  { %9789 = vmatpush3.bf16.msra.mxu0 %v9788_v16  ;;  %v12479_v16 = vmov 3  }
  0x34   :  { %9791 = vmatprep.subr.bf16.mxu0 %v9790_v17  ;;  %v12480_v17 = vmov 2  }
  0x37   :  { %9793 = vmatpush3.bf16.msra.mxu0 %v9792_v22  ;;  %v12485_v22 = vmov 15  }
  0x38   :  { %9795 = vmatprep.subr.bf16.mxu0 %v9794_v23  ;;  %v12486_v23 = vmov 14  }
  0x3b   :  { %9797 = vmatpush3.bf16.msra.mxu0 %v9796_v26  ;;  %v12489_v26 = vmov 17  }
  0xe7   :  { %v228_v34 = vpop.f32.mrb[0].mxu0 }
  0xe8   :  { %v12639_v35 = vpop.f32.mrb[1].mxu0 }
  0xe9   :  { %445 = vmatprep.mubr.f32.mxu0 %v12639_v35  ;;  %v12270_v36 = vpack.i.bf16 %v12639_v35, %v228_v34 }
  0xea   :  { %446 = vmatmul.mubr.f32.vlgmr.msra.gmra.mrb[6].mxu0 %v228_v34 }
  0xeb   :  { %12271 = vrot.lane.b32.xlu1 %v12270_v36, %s12471_s14  ;;  %v234_v37 = vpop.f32.mrb[2].mxu0 }
  0xec   :  { %v12644_v38 = vpop.f32.mrb[3].mxu0  ;;  %v12275_v39 = vpack.i.bf16 %v234_v37, %v228_v34  ;;  %v9832_v40 = vpack.c.bf16 %v234_v37, %v228_v34 }
  0xed   :  { %450 = vmatprep.mubr.f32.mxu0 %v12644_v38  ;;  %v12285_v41 = vpack.i.bf16 %v12644_v38, %v234_v37  ;;  %v12650_v42 = vpack.i.bf16 %v12644_v38, %v12639_v35 }
  0xee   :  { %12276 = vrot.lane.b32.xlu0 %v12275_v39, %s12472_s15  ;;  %451 = vmatmul.mubr.f32.gmra.mrb[8].mxu0 %v234_v37  ;;  %s14473_s15 = sld [smem:[%s15933_s0 + %s12520_s11]]  }
  0xef   :  { %9833 = vmatprep.subr.bf16.mxu1 %v9832_v40  ;;  %12281 = vrot.lane.b32.xlu1 %v12275_v39, %s12473_s16 }
  0xf1   :  { %v12652_v43 = vpop.f32.mrb[4].mxu0 }
  0xf2   :  { %12286 = vrot.lane.b32.xlu0 %v12285_v41, %s12471_s14  ;;  %v12655_v44 = vpop.f32.mrb[5].mxu0  ;;  %v12345_v45 = vpack.i.bf16 %v12652_v43, %v12644_v38  ;;  %s12521_s14 = smov 16  }
  0xf3   :  { %12291 = vrot.lane.b32.xlu1 %v12650_v42, %s12474_s17  ;;  %9551 = vmatprep.mubr.msk.f32.mxu1 %vm370_vm5, %v12655_v44  ;;  %v12340_v46 = vpack.i.bf16 %v12655_v44, %v12639_v35  ;;  %v12666_v47 = vpack.i.bf16 %v12652_v43, %v12655_v44  ;;  %s13377_s17 = sld [smem:[%s15933_s0 + %s12509_s8]]  }
  0xf4   :  { %9552 = vmatmul.mubr.msk.f32.vlgmr.msra.gmra.mrb[0].mxu1 %vm370_vm5, %v12652_v43 }
  0xf5   :  { %9835 = vmatpush3.bf16.msra.mxu1 %v9832_v40 }
 0x15d   :  { %v12272_v50 = vpop.permute.xlu1 %12271 }
 0x15e   :  { %v12274_v57 = vunpack.i.h.bf16 %v12272_v50  ;;  %v12273_v58 = vunpack.i.l.bf16 %v12272_v50 }
 0x160   :  { %v12277_v51 = vpop.permute.xlu0 %12276  ;;  %v1069_v1 = vsel %vm1068_vm6, %v12273_v58, %v12274_v57 }
 0x161   :  { %v12279_v52 = vunpack.i.h.bf16 %v12277_v51  ;;  %v12278_v53 = vunpack.i.l.bf16 %v12277_v51  ;;  %v12282_v54 = vpop.permute.xlu1 %12281 }
 0x162   :  { %v12284_v55 = vunpack.i.h.bf16 %v12282_v54  ;;  %v12283_v56 = vunpack.i.l.bf16 %v12282_v54 }
 0x163   :  { %v9836_v59 = vpack.c.bf16 %v12279_v52, %v12278_v53  ;;  %v547_v52 = vlaneseq }
 0x164   :  { %v12287_v60 = vpop.permute.xlu0 %12286  ;;  %v12672_v61 = vpack.c.bf16 %v12284_v55, %v12283_v56 }
 0x165   :  { %v12289_v62 = vunpack.i.h.bf16 %v12287_v60  ;;  %v12288_v63 = vunpack.i.l.bf16 %v12287_v60  ;;  %9837 = vmatprep.subr.bf16.mxu0 %v9836_v59  ;;  %v12708_v32 = vpop.permute.xlu1 %12291  ;;  %v548_v55 = vand.u32 127, %v547_v52  ;;  %v12726_v56 = vshrl.u32 %v547_v52, 7 }
 0x166   :  { %9839 = vmatpush3.bf16.msra.mxu0 %v9836_v59  ;;  %9841 = vmatprep.subr.bf16.mxu1 %v12672_v61 }
 0x167   :  { %v1070_v2 = vsel %vm1068_vm6, %v12288_v63, %v12289_v62  ;;  %v553_v57 = vadd.s32 4294967288, %v548_v55 }
 0x168   :  { %v12675_v3 = vpack.c.bf16 %v1070_v2, %v1069_v1 }
 0x169   :  { %v12733_v60 = vsub.s32 %v553_v57, %v12726_v56 }
 0x16a   :  { %9845 = vmatprep.subr.bf16.mxu0 %v12675_v3 }
 0x1bd   :  { %v9097_v4 = vpop.f32.mrb[6].mxu0 }
 0x1be   :  { %v9098_v5 = vpop.f32.mrb[7].mxu0 }
 0x1bf   :  { %v9099_v6 = vadd.f32 %v9098_v5, %v9097_v4 }
 0x1c1   :  { %v9100_v7 = vpop.f32.mrb[8].mxu0 }
 0x1c2   :  { %v9101_v8 = vpop.f32.mrb[9].mxu0 }
 0x1c3   :  { %v9102_v9 = vadd.f32 %v9101_v8, %v9100_v7 }
 0x1c7   :  { %v9553_v10 = vpop.f32.mrb[0].mxu1 }
 0x1c8   :  { %v528_v11 = vadd.f32 %v9553_v10, %v9102_v9  ;;  %v522_v12 = vpop.f32.mrb[1].mxu1  ;;  %v12757_v9 = vsub.s32 %v548_v55, %v12726_v56 }
 0x1c9   :  { %v12678_v13 = vadd.f32 %v9099_v6, %v522_v12 }
 0x1ca   :  { %538 = vperm.xlu1 %12297, %v528_v11   ;;  %545 = vperm.xlu0 %12295, %v528_v11  }
 0x1ce   :  { %12299 = vset.pattern.permute.xlu1 %v12477_v14  ;;  %12296 = vset.pattern.permute.xlu0 %v12478_v15 }
 0x1cf   :  { %695 = vperm.xlu1 %12299, %v528_v11   ;;  %702 = vperm.xlu0 %12296, %v528_v11  }
 0x1d3   :  { %12300 = vset.pattern.permute.xlu1 %v12479_v16  ;;  %12298 = vset.pattern.permute.xlu0 %v12480_v17 }
 0x1d4   :  { %1006 = vperm.xlu1 %12300, %v528_v11   ;;  %855 = vperm.xlu0 %12298, %v528_v11  }
 0x1d8   :  { %12303 = vset.pattern.permute.xlu1 %v12481_v18  ;;  %12301 = vset.pattern.permute.xlu0 %v12482_v19 }
 0x1d9   :  { %999 = vperm.xlu1 %12303, %v528_v11   ;;  %848 = vperm.xlu0 %12301, %v528_v11  }
 0x1dd   :  { %12304 = vset.pattern.permute.xlu1 %v12483_v20  ;;  %12302 = vset.pattern.permute.xlu0 %v12484_v21 }
 0x1de   :  { %1317 = vperm.xlu1 %12304, %v528_v11   ;;  %1166 = vperm.xlu0 %12302, %v528_v11  }
 0x1e2   :  { %12307 = vset.pattern.permute.xlu1 %v12485_v22  ;;  %12305 = vset.pattern.permute.xlu0 %v12486_v23 }
 0x1e3   :  { %1310 = vperm.xlu1 %12307, %v528_v11   ;;  %1159 = vperm.xlu0 %12305, %v528_v11  }
 0x1e7   :  { %12308 = vset.pattern.permute.xlu1 %v12487_v24  ;;  %12306 = vset.pattern.permute.xlu0 %v12488_v25 }
 0x1e8   :  { %1461 = vperm.xlu1 %12308, %v528_v11   ;;  %1468 = vperm.xlu0 %12306, %v528_v11  }
 0x1ec   :  { %12311 = vset.pattern.permute.xlu1 %v12489_v26  ;;  %12309 = vset.pattern.permute.xlu0 %v12490_v27 }
 0x1ed   :  { %1619 = vperm.xlu1 %12311, %v528_v11   ;;  %1626 = vperm.xlu0 %12309, %v528_v11  }
 0x1f1   :  { %12313 = vset.pattern.permute.xlu1 %v12491_v28  ;;  %12310 = vset.pattern.permute.xlu0 %v12492_v29 }
 0x1f2   :  { %1770 = vperm.xlu1 %12313, %v528_v11   ;;  %1777 = vperm.xlu0 %12310, %v528_v11  }
 0x1f6   :  { %12314 = vset.pattern.permute.xlu1 %v12493_v30  ;;  %12312 = vset.pattern.permute.xlu0 %v12494_v31 }
 0x1f7   :  { %1921 = vperm.xlu1 %12314, %v528_v11   ;;  %1928 = vperm.xlu0 %12312, %v528_v11  }
 0x1fb   :  { %12316 = vset.pattern.permute.xlu1 %v12476_v49  ;;  %12315 = vset.pattern.permute.xlu0 %v12475_v48 }
 0x1fc   :  { %533 = vperm.xlu1 %12316, %v12678_v13   ;;  %542 = vperm.xlu0 %12315, %v12678_v13  }
 0x200   :  { %12317 = vset.pattern.permute.xlu1 %v12478_v15  ;;  %12320 = vset.pattern.permute.xlu0 %v12482_v19 }
 0x201   :  { %699 = vperm.xlu1 %12317, %v12678_v13   ;;  %844 = vperm.xlu0 %12320, %v12678_v13  }
 0x205   :  { %12318 = vset.pattern.permute.xlu1 %v12480_v17  ;;  %12324 = vset.pattern.permute.xlu0 %v12486_v23 }
 0x206   :  { %852 = vperm.xlu1 %12318, %v12678_v13   ;;  %1155 = vperm.xlu0 %12324, %v12678_v13  }
 0x20a   :  { %12319 = vset.pattern.permute.xlu1 %v12477_v14  ;;  %12328 = vset.pattern.permute.xlu0 %v12487_v24  ;;  %v12761_v14 = vld [vmem:[%s8941_s21 + $0x8] sm:$0xff] }
 0x20b   :  { %691 = vperm.xlu1 %12319, %v12678_v13   ;;  %1457 = vperm.xlu0 %12328, %v12678_v13   ;;  %vm317_vm8 = vcmp.gt.f32.partialorder %v12761_v14, 0.0 }
 0x20f   :  { %12321 = vset.pattern.permute.xlu1 %v12479_v16  ;;  %12334 = vset.pattern.permute.xlu0 %v12493_v30 }
 0x210   :  { %1003 = vperm.xlu1 %12321, %v12678_v13   ;;  %1917 = vperm.xlu0 %12334, %v12678_v13  }
 0x214   :  { %12322 = vset.pattern.permute.xlu1 %v12484_v21  ;;  %12370 = vset.pattern.permute.xlu0 %v12494_v31 }
 0x215   :  { %1163 = vperm.xlu1 %12322, %v12678_v13  }
 0x219   :  { %12323 = vset.pattern.permute.xlu1 %v12481_v18  ;;  %v12764_v18 = vld [vmem:[%s8941_s21] sm:$0xff]  ;;  %s8943_s21 = sld [smem:[%s15933_s0 + %s12512_s18]]  }
 0x21a   :  { %995 = vperm.xlu1 %12323, %v12678_v13   ;;  %vm316_vm12 = vcmp.gt.f32.partialorder %v12764_v18, 0.0 }
 0x21e   :  { %12325 = vset.pattern.permute.xlu1 %v12483_v20 }
 0x21f   :  { %1314 = vperm.xlu1 %12325, %v12678_v13  }
 0x223   :  { %12326 = vset.pattern.permute.xlu1 %v12488_v25 }
 0x224   :  { %1465 = vperm.xlu1 %12326, %v12678_v13  }
 0x228   :  { %12327 = vset.pattern.permute.xlu1 %v12485_v22 }
 0x229   :  { %1306 = vperm.xlu1 %12327, %v12678_v13  }
 0x22d   :  { %12329 = vset.pattern.permute.xlu1 %v12490_v27 }
 0x22e   :  { %1623 = vperm.xlu1 %12329, %v12678_v13  }
 0x232   :  { %12330 = vset.pattern.permute.xlu1 %v12489_v26 }
 0x233   :  { %1615 = vperm.xlu1 %12330, %v12678_v13  }
 0x237   :  { %12331 = vset.pattern.permute.xlu1 %v12492_v29 }
 0x238   :  { %1774 = vperm.xlu1 %12331, %v12678_v13  }
 0x23c   :  { %12332 = vset.pattern.permute.xlu1 %v12494_v31 }
 0x23d   :  { %1925 = vperm.xlu1 %12332, %v12678_v13  }
 0x241   :  { %12333 = vset.pattern.permute.xlu1 %v12491_v28 }
 0x242   :  { %1766 = vperm.xlu1 %12333, %v12678_v13  }
 0x249   :  { %v539_v34 = vpop.permute.xlu1 %538  ;;  %v546_v36 = vpop.permute.xlu0 %545 }
 0x24a   :  { %v557_v12 = vrot.slane %v546_v36, %v12733_v60 }
 0x24e   :  { %v696_v37 = vpop.permute.xlu1 %695  ;;  %v703_v39 = vpop.permute.xlu0 %702 }
 0x24f   :  { %v711_v19 = vrot.slane %v703_v39, %v12733_v60 }
 0x253   :  { %v12710_v40 = vpop.permute.xlu1 %1006  ;;  %v12712_v41 = vpop.permute.xlu0 %855 }
 0x254   :  { %v864_v29 = vrot.slane %v12712_v41, %v12733_v60 }
 0x258   :  { %v12714_v48 = vpop.permute.xlu1 %999  ;;  %v12716_v49 = vpop.permute.xlu0 %848 }
 0x25d   :  { %v12718_v50 = vpop.permute.xlu1 %1317  ;;  %v12720_v51 = vpop.permute.xlu0 %1166 }
 0x262   :  { %v12722_v53 = vpop.permute.xlu1 %1310  ;;  %v12724_v54 = vpop.permute.xlu0 %1159 }
 0x267   :  { %v12728_v58 = vpop.permute.xlu1 %1461  ;;  %v12730_v59 = vpop.permute.xlu0 %1468 }
 0x26c   :  { %v12735_v62 = vpop.permute.xlu1 %1619  ;;  %v12737_v63 = vpop.permute.xlu0 %1626 }
 0x26d   :  { %v1635_v1 = vrot.slane %v12737_v63, %v12733_v60 }
 0x271   :  { %v12741_v2 = vpop.permute.xlu1 %1770  ;;  %v12743_v4 = vpop.permute.xlu0 %1777 }
 0x272   :  { %v1786_v5 = vrot.slane %v12743_v4, %v12733_v60 }
 0x276   :  { %v12750_v6 = vpop.permute.xlu1 %1921  ;;  %v12752_v7 = vpop.permute.xlu0 %1928 }
 0x277   :  { %v1937_v8 = vrot.slane %v12752_v7, %v12733_v60 }
 0x27b   :  { %v534_v10 = vpop.permute.xlu1 %533  ;;  %v543_v11 = vpop.permute.xlu0 %542 }
 0x27c   :  { %v552_v13 = vrot.slane %v543_v11, %v12757_v9 }
 0x27e   :  { %v559_v15 = vsel %vm558_vm7, %v557_v12, %v552_v13 }
 0x27f   :  { %v574_v16 = vadd.f32 %v559_v15, %v534_v10  ;;  %v575_v17 = vadd.f32 %v559_v15, %v539_v34 }
 0x280   :  { %v700_v20 = vpop.permute.xlu1 %699 }
 0x281   :  { %v707_v21 = vrot.slane %v700_v20, %v12757_v9  ;;  %vm577_vm9 = vcmp.gt.f32.partialorder %v575_v17, 0.0  ;;  %v579_v22 = vmul.f32 0.2, %v575_v17  ;;  %vm576_vm10 = vcmp.gt.f32.partialorder %v574_v16, 0.0 }
 0x282   :  { %v578_v23 = vmul.f32 0.2, %v574_v16 }
 0x283   :  { %v581_v24 = vsel %vm577_vm9, %v575_v17, %v579_v22  ;;  %v712_v25 = vsel %vm558_vm7, %v711_v19, %v707_v21 }
 0x284   :  { %v12773_v26 = vsel %vm317_vm8, %v581_v24, -1e+30  ;;  %v580_v27 = vsel %vm576_vm10, %v574_v16, %v578_v23  ;;  %v721_v28 = vadd.f32 %v712_v25, %v696_v37  ;;  %v845_v37 = vpop.permute.xlu0 %844 }
 0x285   :  { %v853_v30 = vpop.permute.xlu1 %852  ;;  %v588_v31 = vsel %vm584_vm11, %v12773_v26, -inf  ;;  %v12781_v34 = vsel %vm316_vm12, %v580_v27, -1e+30 }
 0x286   :  { %v860_v36 = vrot.slane %v853_v30, %v12757_v9  ;;  %589 = vmax.xlane.f32.xlu0 %v588_v31  ;;  %v585_v39 = vsel %vm584_vm11, %v12781_v34, -inf  ;;  %vm723_vm13 = vcmp.gt.f32.partialorder %v721_v28, 0.0  ;;  %v725_v52 = vmul.f32 0.2, %v721_v28 }
 0x287   :  { %586 = vmax.xlane.f32.xlu1 %v585_v39 }
 0x288   :  { %v865_v41 = vsel %vm558_vm7, %v864_v29, %v860_v36  ;;  %v727_v55 = vsel %vm723_vm13, %v721_v28, %v725_v52 }
 0x289   :  { %v12789_v57 = vsel %vm317_vm8, %v727_v55, -1e+30  ;;  %v874_v10 = vadd.f32 %v865_v41, %v12716_v49  ;;  %v873_v11 = vadd.f32 %v865_v41, %v845_v37  ;;  %v1156_v55 = vpop.permute.xlu0 %1155 }
 0x28a   :  { %v692_v12 = vpop.permute.xlu1 %691  ;;  %v733_v13 = vsel %vm584_vm11, %v12789_v57, -inf }
 0x28b   :  { %v720_v15 = vadd.f32 %v712_v25, %v692_v12  ;;  %734 = vmax.xlane.f32.xlu1 %v733_v13  ;;  %vm876_vm14 = vcmp.gt.f32.partialorder %v874_v10, 0.0  ;;  %v878_v16 = vmul.f32 0.2, %v874_v10  ;;  %vm875_vm15 = vcmp.gt.f32.partialorder %v873_v11, 0.0 }
 0x28c   :  { %v877_v17 = vmul.f32 0.2, %v873_v11  ;;  %v1015_v25 = vrot.slane %v12710_v40, %v12733_v60  ;;  %v1175_v40 = vrot.slane %v12720_v51, %v12733_v60 }
 0x28d   :  { %v724_v19 = vmul.f32 0.2, %v720_v15  ;;  %v880_v20 = vsel %vm876_vm14, %v874_v10, %v878_v16  ;;  %vm722_vm0 = vcmp.gt.f32.partialorder %v720_v15, 0.0 }
 0x28e   :  { %v12796_v21 = vsel %vm317_vm8, %v880_v20, -1e+30  ;;  %v879_v24 = vsel %vm875_vm15, %v873_v11, %v877_v17 }
 0x28f   :  { %v1004_v22 = vpop.permute.xlu1 %1003  ;;  %v886_v49 = vsel %vm584_vm11, %v12796_v21, -inf  ;;  %v726_v23 = vsel %vm722_vm0, %v720_v15, %v724_v19  ;;  %v12811_v30 = vsel %vm316_vm12, %v879_v24, -1e+30 }
 0x290   :  { %v1011_v27 = vrot.slane %v1004_v22, %v12757_v9  ;;  %887 = vmax.xlane.f32.xlu1 %v886_v49  ;;  %v12805_v28 = vsel %vm316_vm12, %v726_v23, -1e+30  ;;  %v883_v37 = vsel %vm584_vm11, %v12811_v30, -inf }
 0x291   :  { %v730_v29 = vsel %vm584_vm11, %v12805_v28, -inf }
 0x292   :  { %731 = vmax.xlane.f32.xlu0 %v730_v29  ;;  %v1016_v31 = vsel %vm558_vm7, %v1015_v25, %v1011_v27  ;;  %v1326_v27 = vrot.slane %v12718_v50, %v12733_v60  ;;  %v1477_v50 = vrot.slane %v12730_v59, %v12733_v60 }
 0x293   :  { %v1025_v36 = vadd.f32 %v1016_v31, %v12714_v48 }
 0x294   :  { %v1164_v39 = vpop.permute.xlu1 %1163 }
 0x295   :  { %v1171_v52 = vrot.slane %v1164_v39, %v12757_v9  ;;  %vm1027_vm2 = vcmp.gt.f32.partialorder %v1025_v36, 0.0  ;;  %v1029_v41 = vmul.f32 0.2, %v1025_v36 }
 0x296   :  { %884 = vmax.xlane.f32.xlu0 %v883_v37 }
 0x297   :  { %v1176_v10 = vsel %vm558_vm7, %v1175_v40, %v1171_v52  ;;  %v1031_v11 = vsel %vm1027_vm2, %v1025_v36, %v1029_v41 }
 0x298   :  { %v1184_v12 = vadd.f32 %v1176_v10, %v1156_v55  ;;  %v1185_v13 = vadd.f32 %v1176_v10, %v12724_v54  ;;  %v12824_v48 = vsel %vm317_vm8, %v1031_v11, -1e+30  ;;  %v1458_v11 = vpop.permute.xlu0 %1457 }
 0x299   :  { %v996_v51 = vpop.permute.xlu1 %995  ;;  %v1037_v15 = vsel %vm584_vm11, %v12824_v48, -inf }
 0x29a   :  { %v1024_v16 = vadd.f32 %v1016_v31, %v996_v51  ;;  %1038 = vmax.xlane.f32.xlu1 %v1037_v15  ;;  %vm1187_vm3 = vcmp.gt.f32.partialorder %v1185_v13, 0.0  ;;  %v1189_v17 = vmul.f32 0.2, %v1185_v13  ;;  %vm1186_vm6 = vcmp.gt.f32.partialorder %v1184_v12, 0.0 }
 0x29b   :  { %v1188_v19 = vmul.f32 0.2, %v1184_v12 }
 0x29c   :  { %v1028_v20 = vmul.f32 0.2, %v1024_v16  ;;  %v1191_v22 = vsel %vm1187_vm3, %v1185_v13, %v1189_v17  ;;  %vm1026_vm9 = vcmp.gt.f32.partialorder %v1024_v16, 0.0  ;;  %v1918_v60 = vpop.permute.xlu0 %1917 }
 0x29d   :  { %v12830_v54 = vsel %vm317_vm8, %v1191_v22, -1e+30  ;;  %v1190_v25 = vsel %vm1186_vm6, %v1184_v12, %v1188_v19 }
 0x29e   :  { %v1315_v49 = vpop.permute.xlu1 %1314  ;;  %v1197_v23 = vsel %vm584_vm11, %v12830_v54, -inf  ;;  %v1030_v24 = vsel %vm1026_vm9, %v1024_v16, %v1028_v20  ;;  %v12845_v40 = vsel %vm316_vm12, %v1190_v25, -1e+30 }
 0x29f   :  { %v1322_v29 = vrot.slane %v1315_v49, %v12757_v9  ;;  %1198 = vmax.xlane.f32.xlu1 %v1197_v23  ;;  %v12839_v31 = vsel %vm316_vm12, %v1030_v24, -1e+30  ;;  %v1194_v55 = vsel %vm584_vm11, %v12845_v40, -inf }
 0x2a0   :  { %v1034_v36 = vsel %vm584_vm11, %v12839_v31, -inf }
 0x2a1   :  { %1035 = vmax.xlane.f32.xlu0 %v1034_v36  ;;  %v1327_v39 = vsel %vm558_vm7, %v1326_v27, %v1322_v29 }
 0x2a2   :  { %v1336_v52 = vadd.f32 %v1327_v39, %v12722_v53 }
 0x2a3   :  { %v1466_v37 = vpop.permute.xlu1 %1465 }
 0x2a4   :  { %v1473_v41 = vrot.slane %v1466_v37, %v12757_v9  ;;  %vm1338_vm10 = vcmp.gt.f32.partialorder %v1336_v52, 0.0  ;;  %v1340_v10 = vmul.f32 0.2, %v1336_v52 }
 0x2a5   :  { %1195 = vmax.xlane.f32.xlu0 %v1194_v55 }
 0x2a6   :  { %v1478_v12 = vsel %vm558_vm7, %v1477_v50, %v1473_v41  ;;  %v1342_v13 = vsel %vm1338_vm10, %v1336_v52, %v1340_v10  ;;  %vm2144_vm10 = vcmask 932864  }
 0x2a7   :  { %v1486_v51 = vadd.f32 %v1478_v12, %v1458_v11  ;;  %v1487_v15 = vadd.f32 %v1478_v12, %v12728_v58  ;;  %v12858_v53 = vsel %vm317_vm8, %v1342_v13, -1e+30 }
 0x2a8   :  { %v1307_v59 = vpop.permute.xlu1 %1306  ;;  %v1348_v16 = vsel %vm584_vm11, %v12858_v53, -inf }
 0x2a9   :  { %v1335_v17 = vadd.f32 %v1327_v39, %v1307_v59  ;;  %1349 = vmax.xlane.f32.xlu1 %v1348_v16  ;;  %vm1489_vm13 = vcmp.gt.f32.partialorder %v1487_v15, 0.0  ;;  %v1491_v19 = vmul.f32 0.2, %v1487_v15  ;;  %vm1488_vm14 = vcmp.gt.f32.partialorder %v1486_v51, 0.0 }
 0x2aa   :  { %v1490_v20 = vmul.f32 0.2, %v1486_v51 }
 0x2ab   :  { %v1339_v22 = vmul.f32 0.2, %v1335_v17  ;;  %v1493_v49 = vsel %vm1489_vm13, %v1487_v15, %v1491_v19  ;;  %vm1337_vm15 = vcmp.gt.f32.partialorder %v1335_v17, 0.0  ;;  %vm2147_vm13 = vcmask 195584  }
 0x2ac   :  { %v12864_v58 = vsel %vm317_vm8, %v1493_v49, -1e+30  ;;  %v1492_v25 = vsel %vm1488_vm14, %v1486_v51, %v1490_v20  ;;  %vm2150_vm14 = vcmask 506880  }
 0x2ad   :  { %v1499_v23 = vsel %vm584_vm11, %v12864_v58, -inf  ;;  %v1341_v24 = vsel %vm1337_vm15, %v1335_v17, %v1339_v22  ;;  %v12876_v36 = vsel %vm316_vm12, %v1492_v25, -1e+30  ;;  %v1624_v52 = vpop.permute.xlu1 %1623  ;;  %vm2153_vm15 = vcmask 818176  }
 0x2ae   :  { %1500 = vmax.xlane.f32.xlu1 %v1499_v23  ;;  %v12870_v27 = vsel %vm316_vm12, %v1341_v24, -1e+30  ;;  %v1496_v39 = vsel %vm584_vm11, %v12876_v36, -inf  ;;  %v1631_v41 = vrot.slane %v1624_v52, %v12757_v9 }
 0x2af   :  { %v1345_v29 = vsel %vm584_vm11, %v12870_v27, -inf }
 0x2b0   :  { %1346 = vmax.xlane.f32.xlu0 %v1345_v29  ;;  %v1636_v55 = vsel %vm558_vm7, %v1635_v1, %v1631_v41 }
 0x2b1   :  { %v1645_v12 = vadd.f32 %v1636_v55, %v12735_v62 }
 0x2b2   :  { %v1616_v50 = vpop.permute.xlu1 %1615 }
 0x2b3   :  { %vm1647_vm0 = vcmp.gt.f32.partialorder %v1645_v12, 0.0  ;;  %v1644_v1 = vadd.f32 %v1636_v55, %v1616_v50 }
 0x2b4   :  { %1497 = vmax.xlane.f32.xlu0 %v1496_v39 }
 0x2b5   :  { %v1648_v59 = vmul.f32 0.2, %v1644_v1  ;;  %vm1646_vm3 = vcmp.gt.f32.partialorder %v1644_v1, 0.0 }
 0x2b7   :  { %v1775_v37 = vpop.permute.xlu1 %1774 }
 0x2b8   :  { %v1782_v10 = vrot.slane %v1775_v37, %v12757_v9 }
 0x2bc   :  { %v1926_v11 = vpop.permute.xlu1 %1925 }
 0x2bd   :  { %v1933_v35 = vrot.slane %v1926_v11, %v12757_v9 }
 0x2bf   :  { %12341 = vrot.lane.b32.xlu1 %v12340_v46, %s12496_s22  ;;  %v1649_v46 = vmul.f32 0.2, %v1645_v12  ;;  %v1938_v63 = vsel %vm558_vm7, %v1937_v8, %v1933_v35 }
 0x2c0   :  { %v1947_v62 = vadd.f32 %v1938_v63, %v12750_v6  ;;  %v1946_v7 = vadd.f32 %v1938_v63, %v1918_v60  ;;  %v1650_v6 = vsel %vm1646_vm3, %v1644_v1, %v1648_v59  ;;  %vm2841_vm3 = vcmask 123904  }
 0x2c1   :  { %v1767_v13 = vpop.permute.xlu1 %1766  ;;  %v1651_v51 = vsel %vm1647_vm0, %v1645_v12, %v1649_v46  ;;  %v12915_v22 = vsel %vm316_vm12, %v1650_v6, -1e+30  ;;  %vm2159_vm0 = vcmask 392192  }
 0x2c2   :  { %v1951_v16 = vmul.f32 0.2, %v1947_v62  ;;  %vm1949_vm6 = vcmp.gt.f32.partialorder %v1947_v62, 0.0  ;;  %v1950_v24 = vmul.f32 0.2, %v1946_v7  ;;  %vm1948_vm9 = vcmp.gt.f32.partialorder %v1946_v7, 0.0 }
 0x2c3   :  { %v1654_v29 = vsel %vm584_vm11, %v12915_v22, -inf }
 0x2c4   :  { %v1953_v20 = vsel %vm1949_vm6, %v1947_v62, %v1951_v16  ;;  %v1952_v50 = vsel %vm1948_vm9, %v1946_v7, %v1950_v24 }
 0x2c5   :  { %v12921_v25 = vsel %vm317_vm8, %v1953_v20, -1e+30  ;;  %v12935_v41 = vsel %vm316_vm12, %v1952_v50, -1e+30 }
 0x2c6   :  { %v1959_v52 = vsel %vm584_vm11, %v12921_v25, -inf  ;;  %v1956_v55 = vsel %vm584_vm11, %v12935_v41, -inf }
 0x2ca   :  { %12336 = vrot.lane.b32.xlu0 %v12650_v42, %s12497_s23  ;;  %v1787_v42 = vsel %vm558_vm7, %v1786_v5, %v1782_v10  ;;  %v12905_v5 = vsel %vm317_vm8, %v1651_v51, -1e+30  ;;  %s12513_s23 = smov 2  }
 0x2cb   :  { %v1796_v44 = vadd.f32 %v1787_v42, %v12741_v2  ;;  %v1795_v4 = vadd.f32 %v1787_v42, %v1767_v13  ;;  %v1657_v17 = vsel %vm584_vm11, %v12905_v5, -inf }
 0x2cd   :  { %v1800_v15 = vmul.f32 0.2, %v1796_v44  ;;  %vm1798_vm2 = vcmp.gt.f32.partialorder %v1796_v44, 0.0  ;;  %v1799_v8 = vmul.f32 0.2, %v1795_v4  ;;  %vm1797_vm7 = vcmp.gt.f32.partialorder %v1795_v4, 0.0 }
 0x2cf   :  { %v1802_v2 = vsel %vm1798_vm2, %v1796_v44, %v1800_v15  ;;  %v1801_v23 = vsel %vm1797_vm7, %v1795_v4, %v1799_v8  ;;  %vm2162_vm2 = vcmask 703488  }
 0x2d0   :  { %v12911_v19 = vsel %vm317_vm8, %v1802_v2, -1e+30  ;;  %v12927_v39 = vsel %vm316_vm12, %v1801_v23, -1e+30 }
 0x2d1   :  { %v1808_v49 = vsel %vm584_vm11, %v12911_v19, -inf  ;;  %v1805_v37 = vsel %vm584_vm11, %v12927_v39, -inf }
 0x2e3   :  { %1658 = vmax.xlane.f32.xlu1 %v1657_v17 }
 0x2e7   :  { %1809 = vmax.xlane.f32.xlu1 %v1808_v49 }
 0x2e9   :  { %1655 = vmax.xlane.f32.xlu0 %v1654_v29 }
 0x2eb   :  { %1960 = vmax.xlane.f32.xlu1 %v1959_v52 }
 0x2ed   :  { %1806 = vmax.xlane.f32.xlu0 %v1805_v37 }
 0x2f1   :  { %1957 = vmax.xlane.f32.xlu0 %v1956_v55 }
 0x313   :  { %v590_v10 = vpop.xlane.xlu0 %589 }
 0x314   :  { %v587_v11 = vpop.xlane.xlu1 %586  ;;  %v592_v12 = vsub.f32 %v12773_v26, %v590_v10  ;;  %v12947_v26 = vsel %vm317_vm8, 1.0, %v12468_v0  ;;  %vm1528_vm8 = vcmask 228352  }
 0x315   :  { %v591_v35 = vsub.f32 %v12781_v34, %v587_v11  ;;  %v12952_v34 = vsel %vm316_vm12, 1.0, %v12468_v0  ;;  %vm2141_vm12 = vcmask 621568  }
 0x316   :  { %v595_v42 = vmul.f32 1.442695, %v592_v12 }
 0x317   :  { %v593_v44 = vmul.f32 1.442695, %v591_v35 }
 0x318   :  { %12379 = vpow2.f32 %v595_v42  ;;  %v735_v46 = vpop.xlane.xlu1 %734 }
 0x319   :  { %12381 = vpow2.f32 %v593_v44  ;;  %v737_v63 = vsub.f32 %v12789_v57, %v735_v46 }
 0x31b   :  { %v740_v1 = vmul.f32 1.442695, %v737_v63 }
 0x31d   :  { %12383 = vpow2.f32 %v740_v1  ;;  %v888_v13 = vpop.xlane.xlu1 %887 }
 0x31e   :  { %v890_v62 = vsub.f32 %v12796_v21, %v888_v13 }
 0x31f   :  { %v732_v51 = vpop.xlane.xlu0 %731 }
 0x320   :  { %v893_v15 = vmul.f32 1.442695, %v890_v62  ;;  %v736_v59 = vsub.f32 %v12805_v28, %v732_v51 }
 0x322   :  { %v12380_v57 = vpop.eup %12379  ;;  %12385 = vpow2.f32 %v893_v15  ;;  %v738_v4 = vmul.f32 1.442695, %v736_v59 }
 0x323   :  { %v12382_v2 = vpop.eup %12381  ;;  %v885_v16 = vpop.xlane.xlu0 %884  ;;  %v12955_v21 = vmul.f32 %v12380_v57, %v12947_v26 }
 0x324   :  { %12387 = vpow2.f32 %v738_v4  ;;  %v889_v28 = vsub.f32 %v12811_v30, %v885_v16  ;;  %v12959_v14 = vmul.f32 %v12382_v2, %v12952_v34 }
 0x325   :  { %v602_v60 = vsel %vm584_vm11, %v12955_v21, 0.0 }
 0x326   :  { %v891_v18 = vmul.f32 1.442695, %v889_v28  ;;  %v599_v7 = vsel %vm584_vm11, %v12959_v14, 0.0  ;;  %603 = vadd.xlane.f32.xlu1 %v602_v60 }
 0x327   :  { %v12384_v8 = vpop.eup %12383  ;;  %600 = vadd.xlane.f32.xlu0 %v599_v7  ;;  %v1039_v17 = vpop.xlane.xlu1 %1038 }
 0x328   :  { %12389 = vpow2.f32 %v891_v18  ;;  %v1041_v6 = vsub.f32 %v12824_v48, %v1039_v17  ;;  %v12967_v20 = vmul.f32 %v12384_v8, %v12947_v26 }
 0x32a   :  { %v1044_v30 = vmul.f32 1.442695, %v1041_v6  ;;  %v747_v49 = vsel %vm584_vm11, %v12967_v20, 0.0 }
 0x32b   :  { %748 = vadd.xlane.f32.xlu1 %v747_v49 }
 0x32c   :  { %v12386_v23 = vpop.eup %12385  ;;  %12391 = vpow2.f32 %v1044_v30  ;;  %v1199_v24 = vpop.xlane.xlu1 %1198 }
 0x32d   :  { %v1201_v29 = vsub.f32 %v12830_v54, %v1199_v24  ;;  %v12973_v52 = vmul.f32 %v12386_v23, %v12947_v26 }
 0x32e   :  { %v12388_v50 = vpop.eup %12387  ;;  %v1036_v37 = vpop.xlane.xlu0 %1035 }
 0x32f   :  { %v1204_v55 = vmul.f32 1.442695, %v1201_v29  ;;  %v1040_v48 = vsub.f32 %v12839_v31, %v1036_v37  ;;  %v900_v10 = vsel %vm584_vm11, %v12973_v52, 0.0  ;;  %v12979_v11 = vmul.f32 %v12388_v50, %v12952_v34 }
 0x330   :  { %901 = vadd.xlane.f32.xlu1 %v900_v10 }
 0x331   :  { %12393 = vpow2.f32 %v1204_v55  ;;  %v1042_v12 = vmul.f32 1.442695, %v1040_v48  ;;  %v744_v54 = vsel %vm584_vm11, %v12979_v11, 0.0 }
 0x332   :  { %v12390_v35 = vpop.eup %12389  ;;  %745 = vadd.xlane.f32.xlu0 %v744_v54  ;;  %v1196_v42 = vpop.xlane.xlu0 %1195 }
 0x333   :  { %12395 = vpow2.f32 %v1042_v12  ;;  %v1200_v44 = vsub.f32 %v12845_v40, %v1196_v42  ;;  %v12985_v31 = vmul.f32 %v12390_v35, %v12952_v34 }
 0x335   :  { %v1202_v46 = vmul.f32 1.442695, %v1200_v44  ;;  %v897_v63 = vsel %vm584_vm11, %v12985_v31, 0.0 }
 0x336   :  { %v12392_v1 = vpop.eup %12391  ;;  %v1350_v13 = vpop.xlane.xlu1 %1349  ;;  %898 = vadd.xlane.f32.xlu0 %v897_v63 }
 0x337   :  { %12397 = vpow2.f32 %v1202_v46  ;;  %v1352_v62 = vsub.f32 %v12858_v53, %v1350_v13  ;;  %v12991_v51 = vmul.f32 %v12392_v1, %v12947_v26 }
 0x339   :  { %v1355_v15 = vmul.f32 1.442695, %v1352_v62  ;;  %v1051_v40 = vsel %vm584_vm11, %v12991_v51, 0.0 }
 0x33a   :  { %1052 = vadd.xlane.f32.xlu1 %v1051_v40 }
 0x33b   :  { %v12394_v59 = vpop.eup %12393  ;;  %12399 = vpow2.f32 %v1355_v15  ;;  %v1501_v57 = vpop.xlane.xlu1 %1500 }
 0x33c   :  { %v1503_v4 = vsub.f32 %v12864_v58, %v1501_v57  ;;  %v12997_v2 = vmul.f32 %v12394_v59, %v12947_v26 }
 0x33d   :  { %v12396_v16 = vpop.eup %12395  ;;  %v1347_v28 = vpop.xlane.xlu0 %1346 }
 0x33e   :  { %v1506_v60 = vmul.f32 1.442695, %v1503_v4  ;;  %v1351_v53 = vsub.f32 %v12870_v27, %v1347_v28  ;;  %v1211_v18 = vsel %vm584_vm11, %v12997_v2, 0.0  ;;  %v13003_v7 = vmul.f32 %v12396_v16, %v12952_v34 }
 0x33f   :  { %1212 = vadd.xlane.f32.xlu1 %v1211_v18  ;;  %v13037_v44 = vpop.permute.xlu1 %12341 }
 0x340   :  { %12401 = vpow2.f32 %v1506_v60  ;;  %v1353_v8 = vmul.f32 1.442695, %v1351_v53  ;;  %v1048_v58 = vsel %vm584_vm11, %v13003_v7, 0.0 }
 0x341   :  { %v12398_v17 = vpop.eup %12397  ;;  %v1498_v6 = vpop.xlane.xlu0 %1497  ;;  %1049 = vadd.xlane.f32.xlu0 %v1048_v58 }
 0x342   :  { %12403 = vpow2.f32 %v1353_v8  ;;  %v1502_v30 = vsub.f32 %v12876_v36, %v1498_v6  ;;  %v13009_v27 = vmul.f32 %v12398_v17, %v12952_v34 }
 0x344   :  { %v1504_v49 = vmul.f32 1.442695, %v1502_v30  ;;  %v1208_v23 = vsel %vm584_vm11, %v13009_v27, 0.0 }
 0x345   :  { %v12400_v24 = vpop.eup %12399  ;;  %1209 = vadd.xlane.f32.xlu0 %v1208_v23  ;;  %v13040_v1 = vpop.permute.xlu0 %12336 }
 0x346   :  { %12405 = vpow2.f32 %v1504_v49  ;;  %v13014_v29 = vmul.f32 %v12400_v24, %v12947_v26 }
 0x348   :  { %v1362_v50 = vsel %vm584_vm11, %v13014_v29, 0.0 }
 0x349   :  { %1363 = vadd.xlane.f32.xlu1 %v1362_v50 }
 0x34a   :  { %v12402_v37 = vpop.eup %12401 }
 0x34b   :  { %v13019_v36 = vmul.f32 %v12402_v37, %v12947_v26 }
 0x34c   :  { %v12404_v55 = vpop.eup %12403 }
 0x34d   :  { %v1513_v48 = vsel %vm584_vm11, %v13019_v36, 0.0  ;;  %v13024_v10 = vmul.f32 %v12404_v55, %v12952_v34 }
 0x34e   :  { %1514 = vadd.xlane.f32.xlu1 %v1513_v48 }
 0x34f   :  { %v1359_v12 = vsel %vm584_vm11, %v13024_v10, 0.0 }
 0x350   :  { %v12406_v54 = vpop.eup %12405  ;;  %1360 = vadd.xlane.f32.xlu0 %v1359_v12 }
 0x351   :  { %v13029_v35 = vmul.f32 %v12406_v54, %v12952_v34 }
 0x353   :  { %v1510_v42 = vsel %vm584_vm11, %v13029_v35, 0.0 }
 0x354   :  { %1511 = vadd.xlane.f32.xlu0 %v1510_v42 }
 0x36a   :  { %12346 = vrot.lane.b32.xlu0 %v12345_v45, %s12496_s22 }
 0x370   :  { %v1659_v46 = vpop.xlane.xlu1 %1658 }
 0x371   :  { %v1661_v63 = vsub.f32 %v12905_v5, %v1659_v46 }
 0x373   :  { %v1664_v13 = vmul.f32 1.442695, %v1661_v63 }
 0x374   :  { %v1810_v62 = vpop.xlane.xlu1 %1809 }
 0x375   :  { %v1812_v15 = vsub.f32 %v12911_v19, %v1810_v62  ;;  %12407 = vpow2.f32 %v1664_v13  ;;  %v12294_v13 = vunpack.i.h.bf16 %v12708_v32  ;;  %v12293_v62 = vunpack.i.l.bf16 %v12708_v32 }
 0x376   :  { %v1656_v40 = vpop.xlane.xlu0 %1655 }
 0x377   :  { %v1815_v59 = vmul.f32 1.442695, %v1812_v15  ;;  %v1660_v57 = vsub.f32 %v12915_v22, %v1656_v40 }
 0x378   :  { %v1961_v50 = vpop.xlane.xlu1 %1960 }
 0x379   :  { %v1662_v4 = vmul.f32 1.442695, %v1660_v57  ;;  %12409 = vpow2.f32 %v1815_v59  ;;  %v1963_v37 = vsub.f32 %v12921_v25, %v1961_v50 }
 0x37a   :  { %v1807_v38 = vpop.xlane.xlu0 %1806 }
 0x37b   :  { %12411 = vpow2.f32 %v1662_v4  ;;  %v1811_v43 = vsub.f32 %v12927_v39, %v1807_v38  ;;  %v1966_v55 = vmul.f32 1.442695, %v1963_v37  ;;  %v12339_v38 = vunpack.i.h.bf16 %v13040_v1 }
 0x37d   :  { %v1813_v45 = vmul.f32 1.442695, %v1811_v43 }
 0x37e   :  { %v1958_v16 = vpop.xlane.xlu0 %1957 }
 0x37f   :  { %12413 = vpow2.f32 %v1813_v45  ;;  %v1962_v5 = vsub.f32 %v12935_v41, %v1958_v16  ;;  %v12408_v28 = vpop.eup %12407 }
 0x380   :  { %v13047_v53 = vmul.f32 %v12408_v28, %v12947_v26 }
 0x381   :  { %v1964_v60 = vmul.f32 1.442695, %v1962_v5 }
 0x382   :  { %v1671_v8 = vsel %vm584_vm11, %v13047_v53, 0.0 }
 0x383   :  { %12415 = vpow2.f32 %v1964_v60  ;;  %v12410_v19 = vpop.eup %12409 }
 0x384   :  { %v13057_v17 = vmul.f32 %v12410_v19, %v12947_v26  ;;  %12417 = vpow2.f32 %v1966_v55 }
 0x385   :  { %v12412_v18 = vpop.eup %12411 }
 0x386   :  { %v13050_v22 = vmul.f32 %v12412_v18, %v12952_v34  ;;  %v1822_v6 = vsel %vm584_vm11, %v13057_v17, 0.0 }
 0x388   :  { %v1668_v39 = vsel %vm584_vm11, %v13050_v22, 0.0 }
 0x389   :  { %v12414_v41 = vpop.eup %12413  ;;  %1672 = vadd.xlane.f32.xlu0 %v1671_v8  ;;  %1669 = vadd.xlane.f32.xlu1 %v1668_v39 }
 0x38a   :  { %v13060_v58 = vmul.f32 %v12414_v41, %v12952_v34 }
 0x38c   :  { %v1819_v30 = vsel %vm584_vm11, %v13060_v58, 0.0 }
 0x38d   :  { %v12416_v49 = vpop.eup %12415  ;;  %1823 = vadd.xlane.f32.xlu1 %v1822_v6  ;;  %1820 = vadd.xlane.f32.xlu0 %v1819_v30 }
 0x38e   :  { %v13067_v23 = vmul.f32 %v12416_v49, %v12952_v34  ;;  %v12418_v34 = vpop.eup %12417 }
 0x38f   :  { %v13075_v42 = vmul.f32 %v12418_v34, %v12947_v26  ;;  %v9848_v26 = vpack.c.bf16 %v12294_v13, %v12293_v62 }
 0x390   :  { %v1970_v24 = vsel %vm584_vm11, %v13067_v23, 0.0 }
 0x391   :  { %1971 = vadd.xlane.f32.xlu0 %v1970_v24  ;;  %v1973_v57 = vsel %vm584_vm11, %v13075_v42, 0.0  ;;  %v12343_v24 = vunpack.i.l.bf16 %v13037_v44 }
 0x39e   :  { %12356 = vrot.lane.b32.xlu1 %v12666_v47, %s12498_s24 }
 0x3a7   :  { %12351 = vrot.lane.b32.xlu0 %v12666_v47, %s12499_s25  ;;  %s15826_s25 = sld [smem:[%s15933_s0 + %s12505_s4]]  }
 0x3b3   :  { %v604_v48 = vpop.xlane.xlu1 %603 }
 0x3b4   :  { %12419 = vrcp.f32 %v604_v48  ;;  %v601_v12 = vpop.xlane.xlu0 %600 }
 0x3b5   :  { %12421 = vrcp.f32 %v601_v12 }
 0x3b8   :  { %v749_v54 = vpop.xlane.xlu1 %748 }
 0x3b9   :  { %12423 = vrcp.f32 %v749_v54 }
 0x3bd   :  { %v902_v40 = vpop.xlane.xlu1 %901 }
 0x3be   :  { %v12420_v46 = vpop.eup %12419 }
 0x3bf   :  { %v12422_v63 = vpop.eup %12421  ;;  %v608_v15 = vmul.f32 %v12420_v46, %v12955_v21  ;;  %v746_v25 = vpop.xlane.xlu0 %745 }
 0x3c0   :  { %12425 = vrcp.f32 %v746_v25  ;;  %v607_v59 = vmul.f32 %v12422_v63, %v12959_v14  ;;  %v12338_v14 = vunpack.i.l.bf16 %v13040_v1 }
 0x3c1   :  { %12427 = vrcp.f32 %v902_v40 }
 0x3c2   :  { %9558 = vmatprep.mubr.msk.f32.mxu1 %vm584_vm11, %v607_v59  ;;  %1974 = vadd.xlane.f32.xlu1 %v1973_v57  ;;  %v9852_v60 = vpack.c.bf16 %v12339_v38, %v12338_v14 }
 0x3c3   :  { %9559 = vmatmul.mubr.msk.f32.vlgmr.msra.gmra.mrb[2].mxu1 %vm584_vm11, %v608_v15  ;;  %v899_v4 = vpop.xlane.xlu0 %898  ;;  %v12424_v32 = vpop.eup %12423 }
 0x3c4   :  { %9843 = vmatpush3.bf16.msra.mxu1 %v12672_v61  ;;  %12429 = vrcp.f32 %v899_v4  ;;  %v753_v16 = vmul.f32 %v12424_v32, %v12967_v20 }
 0x3c5   :  { %9849 = vmatprep.subr.bf16.mxu1 %v9848_v26 }
 0x3c7   :  { %v1053_v43 = vpop.xlane.xlu1 %1052 }
 0x3c8   :  { %12431 = vrcp.f32 %v1053_v43 }
 0x3ca   :  { %v12426_v21 = vpop.eup %12425 }
 0x3cb   :  { %v752_v45 = vmul.f32 %v12426_v21, %v12979_v11  ;;  %v12428_v5 = vpop.eup %12427 }
 0x3cc   :  { %v906_v1 = vmul.f32 %v12428_v5, %v12973_v52  ;;  %v1213_v18 = vpop.xlane.xlu1 %1212 }
 0x3cd   :  { %9565 = vmatprep.mubr.msk.f32.mxu0 %vm584_vm11, %v752_v45 }
 0x3ce   :  { %v12430_v28 = vpop.eup %12429  ;;  %9566 = vmatmul.mubr.msk.f32.vlgmr.msra.gmra.mrb[10].mxu0 %vm584_vm11, %v753_v16  ;;  %v1050_v61 = vpop.xlane.xlu0 %1049 }
 0x3cf   :  { %9847 = vmatpush3.bf16.msra.mxu0 %v12675_v3  ;;  %v905_v19 = vmul.f32 %v12430_v28, %v12985_v31  ;;  %12433 = vrcp.f32 %v1050_v61 }
 0x3d0   :  { %9853 = vmatprep.subr.bf16.mxu0 %v9852_v60  ;;  %12435 = vrcp.f32 %v1213_v18 }
 0x3d1   :  { %9572 = vmatprep.mubr.msk.f32.mxu1 %vm584_vm11, %v905_v19 }
 0x3d2   :  { %9573 = vmatmul.mubr.msk.f32.vlgmr.msra.gmra.mrb[4].mxu1 %vm584_vm11, %v906_v1  ;;  %v1210_v20 = vpop.xlane.xlu0 %1209  ;;  %v12432_v11 = vpop.eup %12431 }
 0x3d3   :  { %9851 = vmatpush3.bf16.msra.mxu1 %v9848_v26  ;;  %12361 = vrot.lane.b32.xlu1 %v12666_v47, %s12500_s26  ;;  %12437 = vrcp.f32 %v1210_v20  ;;  %v1057_v52 = vmul.f32 %v12432_v11, %v12991_v51  ;;  %v12344_v51 = vunpack.i.h.bf16 %v13037_v44  ;;  %v2194_v11 = vld [vmem:[%s13131_s30] sm:$0xff]  ;;  %s8942_s26 = sld [smem:[%s15933_s0 + %s12513_s23]]   ;;  %s12522_s23 = smov 15  }
 0x3d6   :  { %v1364_v3 = vpop.xlane.xlu1 %1363 }
 0x3d7   :  { %12439 = vrcp.f32 %v1364_v3 }
 0x3d9   :  { %v12434_v8 = vpop.eup %12433 }
 0x3da   :  { %v1056_v31 = vmul.f32 %v12434_v8, %v13003_v7  ;;  %v12436_v39 = vpop.eup %12435  ;;  %v2197_v8 = vld [vmem:[%s13131_s30 + $0x18] sm:$0xff] }
 0x3db   :  { %v1515_v30 = vpop.xlane.xlu1 %1514  ;;  %v1217_v49 = vmul.f32 %v12436_v39, %v12997_v2  ;;  %v2204_v39 = vld [vmem:[%s13131_s30 + $0x50] sm:$0xff] }
 0x3dc   :  { %9579 = vmatprep.mubr.msk.f32.mxu0 %vm584_vm11, %v1056_v31  ;;  %v9874_v31 = vpack.c.bf16 %v2197_v8, %v2194_v11  ;;  %v2250_v11 = vld [vmem:[%s13131_s30 + $0x1c0] sm:$0xff]  ;;  %v2253_v8 = vld [vmem:[%s13131_s30 + $0x1d8] sm:$0xff] }
 0x3dd   :  { %v1361_v41 = vpop.xlane.xlu0 %1360  ;;  %v12438_v6 = vpop.eup %12437  ;;  %9580 = vmatmul.mubr.msk.f32.vlgmr.msra.gmra.mrb[12].mxu0 %vm584_vm11, %v1057_v52  ;;  %v2201_v52 = vld [vmem:[%s13131_s30 + $0x38] sm:$0xff] }
 0x3de   :  { %12441 = vrcp.f32 %v1361_v41  ;;  %9855 = vmatpush3.bf16.msra.mxu0 %v9852_v60  ;;  %v1216_v47 = vmul.f32 %v12438_v6, %v13009_v27  ;;  %v1529_v27 = vsel %vm1528_vm8, %v12343_v24, %v12344_v51  ;;  %v9876_v41 = vpack.c.bf16 %v2204_v39, %v2201_v52  ;;  %v2200_v6 = vld [vmem:[%s13131_s30 + $0x30] sm:$0xff]  ;;  %v2206_v51 = vld [vmem:[%s13131_s30 + $0x60] sm:$0xff] }
 0x3df   :  { %12443 = vrcp.f32 %v1515_v30  ;;  %v2203_v30 = vld [vmem:[%s13131_s30 + $0x48] sm:$0xff]  ;;  %v2202_v52 = vld [vmem:[%s13131_s30 + $0x40] sm:$0xff] }
 0x3e0   :  { %9586 = vmatprep.mubr.msk.f32.mxu1 %vm584_vm11, %v1216_v47  ;;  %v9878_v47 = vpack.c.bf16 %v2203_v30, %v2200_v6  ;;  %v2248_v30 = vld [vmem:[%s13131_s30 + $0x1b0] sm:$0xff] }
 0x3e1   :  { %v1512_v7 = vpop.xlane.xlu0 %1511  ;;  %9587 = vmatmul.mubr.msk.f32.vlgmr.msra.gmra.mrb[6].mxu1 %vm584_vm11, %v1217_v49  ;;  %v12440_v48 = vpop.eup %12439  ;;  %v2207_v49 = vld [vmem:[%s13131_s30 + $0x68] sm:$0xff] }
 0x3e2   :  { %12445 = vrcp.f32 %v1512_v7  ;;  %v1368_v46 = vmul.f32 %v12440_v48, %v13014_v29  ;;  %v2210_v7 = vld [vmem:[%s13131_s30 + $0x80] sm:$0xff] }
 0x3e3   :  { %v9880_v24 = vpack.c.bf16 %v2210_v7, %v2207_v49 }
 0x3e5   :  { %v12347_v50 = vpop.permute.xlu0 %12346 }
 0x3e6   :  { %v12349_v37 = vunpack.i.h.bf16 %v12347_v50  ;;  %v12348_v55 = vunpack.i.l.bf16 %v12347_v50  ;;  %v2209_v50 = vld [vmem:[%s13131_s30 + $0x78] sm:$0xff] }
 0x3e7   :  { %v9882_v48 = vpack.c.bf16 %v2209_v50, %v2206_v51 }
 0x3e8   :  { %v12442_v12 = vpop.eup %12441  ;;  %v1530_v34 = vsel %vm1528_vm8, %v12348_v55, %v12349_v37  ;;  %v2213_v37 = vld [vmem:[%s13131_s30 + $0x98] sm:$0xff]  ;;  %v2216_v55 = vld [vmem:[%s13131_s30 + $0xb0] sm:$0xff] }
 0x3e9   :  { %v1367_v2 = vmul.f32 %v12442_v12, %v13024_v10  ;;  %v9856_v54 = vpack.c.bf16 %v1530_v34, %v1529_v27  ;;  %v12444_v63 = vpop.eup %12443  ;;  %v9884_v12 = vpack.c.bf16 %v2216_v55, %v2213_v37  ;;  %v2212_v27 = vld [vmem:[%s13131_s30 + $0x90] sm:$0xff]  ;;  %v2215_v34 = vld [vmem:[%s13131_s30 + $0xa8] sm:$0xff]  ;;  %v2258_v55 = vld [vmem:[%s13131_s30 + $0x200] sm:$0xff] }
 0x3ea   :  { %v1519_v62 = vmul.f32 %v12444_v63, %v13019_v36  ;;  %v2255_v37 = vld [vmem:[%s13131_s30 + $0x1e8] sm:$0xff] }
 0x3eb   :  { %9593 = vmatprep.mubr.msk.f32.mxu0 %vm584_vm11, %v1367_v2  ;;  %9857 = vmatprep.subr.bf16.mxu1 %v9856_v54  ;;  %v2219_v2 = vld [vmem:[%s13131_s30 + $0xc8] sm:$0xff] }
 0x3ec   :  { %v12446_v13 = vpop.eup %12445  ;;  %9594 = vmatmul.mubr.msk.f32.vlgmr.msra.gmra.mrb[14].mxu0 %vm584_vm11, %v1368_v46  ;;  %9859 = vmatpush3.bf16.msra.mxu1 %v9856_v54  ;;  %v2222_v54 = vld [vmem:[%s13131_s30 + $0xe0] sm:$0xff]  ;;  %v9886_v46 = vpack.c.bf16 %v2215_v34, %v2212_v27  ;;  %v9912_v27 = vpack.c.bf16 %v2258_v55, %v2255_v37  ;;  %v2259_v34 = vld [vmem:[%s13131_s30 + $0x208] sm:$0xff] }
 0x3ed   :  { %v1518_v44 = vmul.f32 %v12446_v13, %v13029_v35  ;;  %v9888_v63 = vpack.c.bf16 %v2222_v54, %v2219_v2  ;;  %v2218_v13 = vld [vmem:[%s13131_s30 + $0xc0] sm:$0xff]  ;;  %v2257_v54 = vld [vmem:[%s13131_s30 + $0x1f8] sm:$0xff]  ;;  %v2283_v55 = vld [vmem:[%s13131_s30 + $0x2c8] sm:$0xff] }
 0x3ee   :  { %v2254_v2 = vld [vmem:[%s13131_s30 + $0x1e0] sm:$0xff] }
 0x3ef   :  { %9600 = vmatprep.mubr.msk.f32.mxu1 %vm584_vm11, %v1518_v44  ;;  %v2221_v44 = vld [vmem:[%s13131_s30 + $0xd8] sm:$0xff] }
 0x3f0   :  { %9601 = vmatmul.mubr.msk.f32.vlgmr.msra.gmra.mrb[8].mxu1 %vm584_vm11, %v1519_v62  ;;  %v2225_v62 = vld [vmem:[%s13131_s30 + $0xf8] sm:$0xff] }
 0x416   :  { %v1670_v10 = vpop.xlane.xlu1 %1669  ;;  %v1673_v15 = vpop.xlane.xlu0 %1672 }
 0x417   :  { %12447 = vrcp.f32 %v1670_v10  ;;  %v2228_v10 = vld [vmem:[%s13131_s30 + $0x110] sm:$0xff] }
 0x418   :  { %12449 = vrcp.f32 %v1673_v15  ;;  %v9890_v15 = vpack.c.bf16 %v2221_v44, %v2218_v13  ;;  %v2208_v13 = vld [vmem:[%s13131_s30 + $0x70] sm:$0xff]  ;;  %v2211_v44 = vld [vmem:[%s13131_s30 + $0x88] sm:$0xff] }
 0x41a   :  { %v1824_v29 = vpop.xlane.xlu1 %1823  ;;  %v1821_v25 = vpop.xlane.xlu0 %1820 }
 0x41b   :  { %12451 = vrcp.f32 %v1824_v29  ;;  %v9892_v29 = vpack.c.bf16 %v2228_v10, %v2225_v62  ;;  %v9980_v62 = vpack.c.bf16 %v2211_v44, %v2208_v13  ;;  %v2261_v10 = vld [vmem:[%s13131_s30 + $0x218] sm:$0xff]  ;;  %v2288_v44 = vld [vmem:[%s13131_s30 + $0x2f0] sm:$0xff] }
 0x41c   :  { %12453 = vrcp.f32 %v1821_v25  ;;  %v2224_v25 = vld [vmem:[%s13131_s30 + $0xf0] sm:$0xff]  ;;  %v2285_v13 = vld [vmem:[%s13131_s30 + $0x2d8] sm:$0xff] }
 0x41e   :  { %v12357_v40 = vpop.permute.xlu1 %12356  ;;  %v1972_v59 = vpop.xlane.xlu0 %1971 }
 0x41f   :  { %v12359_v57 = vunpack.i.h.bf16 %v12357_v40  ;;  %v12358_v26 = vunpack.i.l.bf16 %v12357_v40  ;;  %12455 = vrcp.f32 %v1972_v59  ;;  %v2227_v40 = vld [vmem:[%s13131_s30 + $0x108] sm:$0xff] }
 0x420   :  { %v9894_v59 = vpack.c.bf16 %v2227_v40, %v2224_v25  ;;  %v2265_v40 = vld [vmem:[%s13131_s30 + $0x238] sm:$0xff] }
 0x421   :  { %v12448_v35 = vpop.eup %12447  ;;  %v9864_v4 = vpack.c.bf16 %v12359_v57, %v12358_v26  ;;  %v2231_v57 = vld [vmem:[%s13131_s30 + $0x128] sm:$0xff]  ;;  %v2234_v26 = vld [vmem:[%s13131_s30 + $0x140] sm:$0xff] }
 0x422   :  { %v12352_v36 = vpop.permute.xlu0 %12351  ;;  %v1676_v32 = vmul.f32 %v12448_v35, %v13050_v22  ;;  %v12450_v14 = vpop.eup %12449 }
 0x423   :  { %v12354_v21 = vunpack.i.h.bf16 %v12352_v36  ;;  %v12353_v38 = vunpack.i.l.bf16 %v12352_v36  ;;  %9865 = vmatprep.subr.bf16.mxu1 %v9864_v4  ;;  %v1677_v61 = vmul.f32 %v12450_v14, %v13047_v53  ;;  %v2230_v36 = vld [vmem:[%s13131_s30 + $0x120] sm:$0xff] }
 0x424   :  { %9607 = vmatprep.mubr.msk.f32.mxu0 %vm584_vm11, %v1676_v32  ;;  %9867 = vmatpush3.bf16.msra.mxu1 %v9864_v4  ;;  %v9896_v4 = vpack.c.bf16 %v2234_v26, %v2231_v57  ;;  %v2233_v32 = vld [vmem:[%s13131_s30 + $0x138] sm:$0xff]  ;;  %v2263_v26 = vld [vmem:[%s13131_s30 + $0x228] sm:$0xff] }
 0x425   :  { %v12452_v43 = vpop.eup %12451  ;;  %v9860_v45 = vpack.c.bf16 %v12354_v21, %v12353_v38  ;;  %v2237_v21 = vld [vmem:[%s13131_s30 + $0x158] sm:$0xff]  ;;  %v9898_v14 = vpack.c.bf16 %v2233_v32, %v2230_v36 }
 0x426   :  { %v12454_v16 = vpop.eup %12453  ;;  %v1828_v5 = vmul.f32 %v12452_v43, %v13057_v17  ;;  %v2240_v43 = vld [vmem:[%s13131_s30 + $0x170] sm:$0xff]  ;;  %v2217_v36 = vld [vmem:[%s13131_s30 + $0xb8] sm:$0xff] }
 0x427   :  { %9861 = vmatprep.subr.bf16.mxu0 %v9860_v45  ;;  %v1827_v28 = vmul.f32 %v12454_v16, %v13060_v58  ;;  %v2239_v16 = vld [vmem:[%s13131_s30 + $0x168] sm:$0xff] }
 0x428   :  { %9863 = vmatpush3.bf16.msra.mxu0 %v9860_v45  ;;  %v2236_v45 = vld [vmem:[%s13131_s30 + $0x150] sm:$0xff] }
 0x429   :  { %v12456_v60 = vpop.eup %12455  ;;  %9614 = vmatprep.mubr.msk.f32.mxu1 %vm584_vm11, %v1827_v28  ;;  %v2243_v28 = vld [vmem:[%s13131_s30 + $0x188] sm:$0xff] }
 0x42a   :  { %9615 = vmatmul.mubr.msk.f32.vlgmr.msra.gmra.mrb[10].mxu1 %vm584_vm11, %v1828_v5  ;;  %v1978_v22 = vmul.f32 %v12456_v60, %v13067_v23  ;;  %v2195_v23 = vld [vmem:[%s13131_s30 + $0x8] sm:$0xff]  ;;  %v9900_v5 = vpack.c.bf16 %v2240_v43, %v2237_v21  ;;  %v2246_v60 = vld [vmem:[%s13131_s30 + $0x1a0] sm:$0xff] }
 0x42b   :  { %9608 = vmatmul.mubr.msk.f32.vlgmr.msra.gmra.mrb[16].mxu0 %vm584_vm11, %v1677_v61  ;;  %v2244_v61 = vld [vmem:[%s13131_s30 + $0x190] sm:$0xff]  ;;  %v2270_v43 = vld [vmem:[%s13131_s30 + $0x260] sm:$0xff] }
 0x42c   :  { %9621 = vmatprep.mubr.msk.f32.mxu0 %vm584_vm11, %v1978_v22  ;;  %v9902_v22 = vpack.c.bf16 %v2239_v16, %v2236_v45  ;;  %v2268_v45 = vld [vmem:[%s13131_s30 + $0x250] sm:$0xff] }
 0x44f   :  { %v1975_v19 = vpop.xlane.xlu1 %1974 }
 0x450   :  { %12457 = vrcp.f32 %v1975_v19  ;;  %v2247_v19 = vld [vmem:[%s13131_s30 + $0x1a8] sm:$0xff] }
 0x453   :  { %v12362_v17 = vpop.permute.xlu1 %12361 }
 0x454   :  { %v12364_v1 = vunpack.i.h.bf16 %v12362_v17  ;;  %v12363_v18 = vunpack.i.l.bf16 %v12362_v17  ;;  %v2242_v17 = vld [vmem:[%s13131_s30 + $0x180] sm:$0xff] }
 0x456   :  { %v9868_v58 = vpack.c.bf16 %v12364_v1, %v12363_v18  ;;  %v2245_v1 = vld [vmem:[%s13131_s30 + $0x198] sm:$0xff]  ;;  %v9904_v18 = vpack.c.bf16 %v2246_v60, %v2243_v28  ;;  %v2266_v28 = vld [vmem:[%s13131_s30 + $0x240] sm:$0xff] }
 0x457   :  { %v9906_v39 = vpack.c.bf16 %v2245_v1, %v2242_v17  ;;  %v2269_v60 = vld [vmem:[%s13131_s30 + $0x258] sm:$0xff]  ;;  %v2223_v17 = vld [vmem:[%s13131_s30 + $0xe8] sm:$0xff] }
 0x458   :  { %9869 = vmatprep.subr.bf16.mxu0 %v9868_v58 }
 0x459   :  { %9871 = vmatpush3.bf16.msra.mxu0 %v9868_v58  ;;  %v9970_v58 = vpack.c.bf16 %v2247_v19, %v2244_v61  ;;  %v2220_v19 = vld [vmem:[%s13131_s30 + $0xd0] sm:$0xff] }
 0x45a   :  { %v12458_v20 = vpop.eup %12457  ;;  %v9988_v1 = vpack.c.bf16 %v2223_v17, %v2220_v19 }
 0x45b   :  { %v1979_v53 = vmul.f32 %v12458_v20, %v13075_v42  ;;  %v2198_v42 = vld [vmem:[%s13131_s30 + $0x20] sm:$0xff]  ;;  %v2196_v20 = vld [vmem:[%s13131_s30 + $0x10] sm:$0xff]  ;;  %9971 = vmatprep.subr.bf16.mxu0 %v9970_v58  ;;  %v2273_v58 = vld [vmem:[%s13131_s30 + $0x278] sm:$0xff] }
 0x45c   :  { %v9872_v3 = vpack.c.bf16 %v2198_v42, %v2195_v23  ;;  %v2249_v23 = vld [vmem:[%s13131_s30 + $0x1b8] sm:$0xff] }
 0x45d   :  { %9622 = vmatmul.mubr.msk.f32.vlgmr.msra.gmra.mrb[18].mxu0 %vm584_vm11, %v1979_v53  ;;  %v2199_v53 = vld [vmem:[%s13131_s30 + $0x28] sm:$0xff] }
 0x45e   :  { %9873 = vmatprep.subr.bf16.mxu1 %v9872_v3  ;;  %v9972_v42 = vpack.c.bf16 %v2199_v53, %v2196_v20  ;;  %v2252_v3 = vld [vmem:[%s13131_s30 + $0x1d0] sm:$0xff]  ;;  %v2274_v53 = vld [vmem:[%s13131_s30 + $0x280] sm:$0xff] }
 0x45f   :  { %9875 = vmatpush1.bf16.msra.mxu1 %v9874_v31  ;;  %v9974_v31 = vpack.c.bf16 %v2253_v8, %v2250_v11  ;;  %v9908_v6 = vpack.c.bf16 %v2252_v3, %v2249_v23  ;;  %v2276_v20 = vld [vmem:[%s13131_s30 + $0x290] sm:$0xff]  ;;  %v2277_v3 = vld [vmem:[%s13131_s30 + $0x298] sm:$0xff]  ;;  %v2275_v8 = vld [vmem:[%s13131_s30 + $0x288] sm:$0xff] }
 0x460   :  { %9877 = vmatprep.subr.bf16.mxu1 %v9876_v41  ;;  %9973 = vmatpush3.bf16.msra.mxu0 %v9972_v42  ;;  %v2205_v41 = vld [vmem:[%s13131_s30 + $0x58] sm:$0xff]  ;;  %v9924_v42 = vpack.c.bf16 %v2276_v20, %v2273_v58  ;;  %v2272_v11 = vld [vmem:[%s13131_s30 + $0x270] sm:$0xff]  ;;  %v13266_v58 = vsub.s32 0, %v12726_v56 }
 0x461   :  { %9975 = vmatprep.subr.bf16.mxu0 %v9974_v31  ;;  %v9976_v49 = vpack.c.bf16 %v2205_v41, %v2202_v52  ;;  %v9990_v31 = vpack.c.bf16 %v2277_v3, %v2274_v53  ;;  %v9926_v52 = vpack.c.bf16 %v2275_v8, %v2272_v11  ;;  %v2229_v41 = vld [vmem:[%s13131_s30 + $0x118] sm:$0xff]  ;;  %v13273_v3 = vsub.s32 1, %v12726_v56 }
 0x463   :  { %9879 = vmatpush1.bf16.msra.mxu1 %v9878_v47  ;;  %v2251_v47 = vld [vmem:[%s13131_s30 + $0x1c8] sm:$0xff] }
 0x464   :  { %9881 = vmatprep.subr.bf16.mxu1 %v9880_v24  ;;  %v9910_v51 = vpack.c.bf16 %v2251_v47, %v2248_v30  ;;  %9977 = vmatpush3.bf16.msra.mxu0 %v9976_v49  ;;  %v2279_v47 = vld [vmem:[%s13131_s30 + $0x2a8] sm:$0xff]  ;;  %v2282_v49 = vld [vmem:[%s13131_s30 + $0x2c0] sm:$0xff] }
 0x465   :  { %v9928_v37 = vpack.c.bf16 %v2282_v49, %v2279_v47 }
 0x467   :  { %9883 = vmatpush1.bf16.msra.mxu1 %v9882_v48  ;;  %v2256_v48 = vld [vmem:[%s13131_s30 + $0x1f0] sm:$0xff] }
 0x468   :  { %9885 = vmatprep.subr.bf16.mxu1 %v9884_v12 }
 0x46b   :  { %9887 = vmatpush1.bf16.msra.mxu1 %v9886_v46  ;;  %v9978_v46 = vpack.c.bf16 %v2259_v34, %v2256_v48  ;;  %v2278_v48 = vld [vmem:[%s13131_s30 + $0x2a0] sm:$0xff] }
 0x46c   :  { %9889 = vmatprep.subr.bf16.mxu1 %v9888_v63  ;;  %v9914_v63 = vpack.c.bf16 %v2257_v54, %v2254_v2  ;;  %v2232_v54 = vld [vmem:[%s13131_s30 + $0x130] sm:$0xff] }
 0x46d   :  { %9979 = vmatprep.subr.bf16.mxu0 %v9978_v46  ;;  %v2235_v46 = vld [vmem:[%s13131_s30 + $0x148] sm:$0xff] }
 0x46e   :  { %9981 = vmatpush3.bf16.msra.mxu0 %v9980_v62  ;;  %v2286_v62 = vld [vmem:[%s13131_s30 + $0x2e0] sm:$0xff] }
 0x46f   :  { %9891 = vmatpush1.bf16.msra.mxu1 %v9890_v15  ;;  %v2264_v15 = vld [vmem:[%s13131_s30 + $0x230] sm:$0xff] }
 0x470   :  { %9893 = vmatprep.subr.bf16.mxu1 %v9892_v29  ;;  %v2262_v29 = vld [vmem:[%s13131_s30 + $0x220] sm:$0xff]  ;;  %v9916_v25 = vpack.c.bf16 %v2264_v15, %v2261_v10  ;;  %v2289_v10 = vld [vmem:[%s13131_s30 + $0x2f8] sm:$0xff]  ;;  %v2284_v15 = vld [vmem:[%s13131_s30 + $0x2d0] sm:$0xff] }
 0x471   :  { %v9982_v57 = vpack.c.bf16 %v2265_v40, %v2262_v29  ;;  %v2287_v29 = vld [vmem:[%s13131_s30 + $0x2e8] sm:$0xff] }
 0x472   :  { %v9934_v40 = vpack.c.bf16 %v2287_v29, %v2284_v15 }
 0x473   :  { %9895 = vmatpush1.bf16.msra.mxu1 %v9894_v59  ;;  %v2260_v59 = vld [vmem:[%s13131_s30 + $0x210] sm:$0xff]  ;;  %9983 = vmatprep.subr.bf16.mxu0 %v9982_v57  ;;  %v2241_v57 = vld [vmem:[%s13131_s30 + $0x178] sm:$0xff] }
 0x474   :  { %9897 = vmatprep.subr.bf16.mxu1 %v9896_v4  ;;  %v2214_v4 = vld [vmem:[%s13131_s30 + $0xa0] sm:$0xff]  ;;  %v9918_v32 = vpack.c.bf16 %v2263_v26, %v2260_v59 }
 0x475   :  { %v9984_v21 = vpack.c.bf16 %v2217_v36, %v2214_v4  ;;  %v2238_v59 = vld [vmem:[%s13131_s30 + $0x160] sm:$0xff] }
 0x476   :  { %v10000_v26 = vpack.c.bf16 %v2241_v57, %v2238_v59  ;;  %v2307_v59 = vld [vmem:[%s13131_s30 + $0x388] sm:$0xff] }
 0x477   :  { %9899 = vmatpush1.bf16.msra.mxu1 %v9898_v14  ;;  %v2267_v14 = vld [vmem:[%s13131_s30 + $0x248] sm:$0xff]  ;;  %9985 = vmatpush3.bf16.msra.mxu0 %v9984_v21 }
 0x478   :  { %9901 = vmatprep.subr.bf16.mxu1 %v9900_v5  ;;  %v9920_v16 = vpack.c.bf16 %v2270_v43, %v2267_v14  ;;  %v2271_v5 = vld [vmem:[%s13131_s30 + $0x268] sm:$0xff]  ;;  %v2294_v43 = vld [vmem:[%s13131_s30 + $0x320] sm:$0xff] }
 0x479   :  { %v9986_v61 = vpack.c.bf16 %v2271_v5, %v2268_v45  ;;  %v2291_v14 = vld [vmem:[%s13131_s30 + $0x308] sm:$0xff]  ;;  %v2292_v45 = vld [vmem:[%s13131_s30 + $0x310] sm:$0xff] }
 0x47b   :  { %9903 = vmatpush1.bf16.msra.mxu1 %v9902_v22  ;;  %v9922_v22 = vpack.c.bf16 %v2269_v60, %v2266_v28  ;;  %9987 = vmatprep.subr.bf16.mxu0 %v9986_v61 }
 0x47c   :  { %9905 = vmatprep.subr.bf16.mxu1 %v9904_v18  ;;  %9989 = vmatpush3.bf16.msra.mxu0 %v9988_v1 }
 0x47d   :  { %9991 = vmatprep.subr.bf16.mxu0 %v9990_v31 }
 0x47f   :  { %9907 = vmatpush1.bf16.msra.mxu1 %v9906_v39  ;;  %v2226_v39 = vld [vmem:[%s13131_s30 + $0x100] sm:$0xff] }
 0x480   :  { %9909 = vmatprep.subr.bf16.mxu1 %v9908_v6  ;;  %v9992_v6 = vpack.c.bf16 %v2229_v41, %v2226_v39 }
 0x482   :  { %9993 = vmatpush3.bf16.msra.mxu0 %v9992_v6 }
 0x483   :  { %9911 = vmatpush1.bf16.msra.mxu1 %v9910_v51  ;;  %v2280_v51 = vld [vmem:[%s13131_s30 + $0x2b0] sm:$0xff] }
 0x484   :  { %9913 = vmatprep.subr.bf16.mxu1 %v9912_v27  ;;  %v2281_v27 = vld [vmem:[%s13131_s30 + $0x2b8] sm:$0xff]  ;;  %v9994_v34 = vpack.c.bf16 %v2283_v55, %v2280_v51  ;;  %v2290_v51 = vld [vmem:[%s13131_s30 + $0x300] sm:$0xff] }
 0x485   :  { %v9930_v2 = vpack.c.bf16 %v2281_v27, %v2278_v48  ;;  %v2300_v48 = vld [vmem:[%s13131_s30 + $0x350] sm:$0xff]  ;;  %v2298_v27 = vld [vmem:[%s13131_s30 + $0x340] sm:$0xff] }
 0x486   :  { %9995 = vmatprep.subr.bf16.mxu0 %v9994_v34  ;;  %v2301_v34 = vld [vmem:[%s13131_s30 + $0x358] sm:$0xff] }
 0x487   :  { %9915 = vmatpush1.bf16.msra.mxu1 %v9914_v63  ;;  %v9996_v63 = vpack.c.bf16 %v2235_v46, %v2232_v54  ;;  %v10006_v15 = vpack.c.bf16 %v2301_v34, %v2298_v27  ;;  %v2320_v27 = vld [vmem:[%s13131_s30 + $0x3f0] sm:$0xff]  ;;  %v2323_v34 = vld [vmem:[%s13131_s30 + $0x408] sm:$0xff] }
 0x488   :  { %9917 = vmatprep.subr.bf16.mxu1 %v9916_v25  ;;  %v9998_v25 = vpack.c.bf16 %v2289_v10, %v2286_v62  ;;  %v2296_v62 = vld [vmem:[%s13131_s30 + $0x330] sm:$0xff]  ;;  %v2303_v10 = vld [vmem:[%s13131_s30 + $0x368] sm:$0xff] }
 0x489   :  { %9997 = vmatpush3.bf16.msra.mxu0 %v9996_v63 }
 0x48a   :  { %9999 = vmatprep.subr.bf16.mxu0 %v9998_v25  ;;  %v2306_v25 = vld [vmem:[%s13131_s30 + $0x380] sm:$0xff] }
 0x48b   :  { %9919 = vmatpush1.bf16.msra.mxu1 %v9918_v32 }
 0x48c   :  { %9921 = vmatprep.subr.bf16.mxu1 %v9920_v16  ;;  %v2295_v16 = vld [vmem:[%s13131_s30 + $0x328] sm:$0xff] }
 0x48d   :  { %10001 = vmatpush3.bf16.msra.mxu0 %v10000_v26  ;;  %v13254_v5 = vpack.c.bf16 %v2295_v16, %v2292_v45  ;;  %v2310_v45 = vld [vmem:[%s13131_s30 + $0x3a0] sm:$0xff]  ;;  %v2313_v16 = vld [vmem:[%s13131_s30 + $0x3b8] sm:$0xff] }
 0x48f   :  { %9923 = vmatpush1.bf16.msra.mxu1 %v9922_v22  ;;  %10003 = vmatprep.subr.bf16.mxu0 %v13254_v5 }
 0x490   :  { %9925 = vmatprep.subr.bf16.mxu1 %v9924_v42 }
 0x493   :  { %9927 = vmatpush1.bf16.msra.mxu1 %v9926_v52 }
 0x494   :  { %9929 = vmatprep.subr.bf16.mxu1 %v9928_v37  ;;  %v2297_v37 = vld [vmem:[%s13131_s30 + $0x338] sm:$0xff] }
 0x496   :  { %v13159_v35 = vpop.f32.mrb[2].mxu1 }
 0x497   :  { %v13164_v38 = vpop.f32.mrb[3].mxu1  ;;  %9931 = vmatpush1.bf16.msra.mxu1 %v9930_v2 }
 0x4a1   :  { %v13185_v7 = vpop.f32.mrb[10].mxu0 }
 0x4a2   :  { %v834_v24 = vpop.f32.mrb[11].mxu0 }
 0x4a3   :  { %2069 = vrot.lane.b32.xlu0 %v834_v24, %s12502_s1 }
 0x4a5   :  { %v13188_v50 = vpop.f32.mrb[4].mxu1 }
 0x4a6   :  { %v13193_v12 = vpop.f32.mrb[5].mxu1 }
 0x4b0   :  { %v9581_v18 = vpop.f32.mrb[12].mxu0 }
 0x4b1   :  { %v1145_v23 = vpop.f32.mrb[13].mxu0 }
 0x4b2   :  { %2085 = vrot.lane.b32.xlu0 %v1145_v23, %s12503_s2  ;;  %v13270_v23 = vld [vmem:[%s8947_s12] sm:$0x7] }
 0x4b3   :  { %v13281_v39 = vrot.slane %v13270_v23, %v13273_v3 }
 0x4b4   :  { %v9588_v30 = vpop.f32.mrb[6].mxu1 }
 0x4b5   :  { %v1296_v24 = vpop.f32.mrb[7].mxu1 }
 0x4b6   :  { %2077 = vrot.lane.b32.xlu0 %v13193_v12, %s12504_s3  ;;  %2093 = vrot.lane.b32.xlu1 %v1296_v24, %s12505_s4  ;;  %v9932_v12 = vpack.c.bf16 %v2288_v44, %v2285_v13  ;;  %v2293_v24 = vld [vmem:[%s13131_s30 + $0x318] sm:$0xff]  ;;  %v9940_v44 = vpack.c.bf16 %v2300_v48, %v2297_v37 }
 0x4b7   :  { %v9938_v63 = vpack.c.bf16 %v2293_v24, %v2290_v51  ;;  %v2324_v51 = vld [vmem:[%s13131_s30 + $0x410] sm:$0xff]  ;;  %v2322_v24 = vld [vmem:[%s13131_s30 + $0x400] sm:$0xff]  ;;  %v2325_v37 = vld [vmem:[%s13131_s30 + $0x418] sm:$0xff] }
 0x4b8   :  { %9933 = vmatprep.subr.bf16.mxu1 %v9932_v12  ;;  %v2299_v12 = vld [vmem:[%s13131_s30 + $0x348] sm:$0xff] }
 0x4b9   :  { %9935 = vmatpush1.bf16.msra.mxu1 %v9934_v40  ;;  %v2304_v40 = vld [vmem:[%s13131_s30 + $0x370] sm:$0xff] }
 0x4ba   :  { %2087 = vrot.lane.b32.xlu0 %v9581_v18, %s12503_s2  ;;  %s12518_s2 = smov 11  }
 0x4be   :  { %2071 = vrot.lane.b32.xlu0 %v13185_v7, %s12502_s1  ;;  %v9936_v7 = vpack.c.bf16 %v2294_v43, %v2291_v14  ;;  %v2312_v14 = vld [vmem:[%s13131_s30 + $0x3b0] sm:$0xff]  ;;  %v10010_v43 = vpack.c.bf16 %v2307_v59, %v2304_v40  ;;  %v2334_v40 = vld [vmem:[%s13131_s30 + $0x460] sm:$0xff]  ;;  %v2337_v59 = vld [vmem:[%s13131_s30 + $0x478] sm:$0xf]  ;;  %s12517_s1 = smov 124  }
 0x4bf   :  { %v9595_v4 = vpop.f32.mrb[14].mxu0 }
 0x4c0   :  { %v1447_v36 = vpop.f32.mrb[15].mxu0  ;;  %9937 = vmatprep.subr.bf16.mxu1 %v9936_v7 }
 0x4c1   :  { %2101 = vrot.lane.b32.xlu1 %v1447_v36, %s12506_s5  ;;  %v9944_v36 = vpack.c.bf16 %v2306_v25, %v2303_v10  ;;  %v2329_v10 = vld [vmem:[%s13131_s30 + $0x438] sm:$0xff]  ;;  %v2336_v25 = vld [vmem:[%s13131_s30 + $0x470] sm:$0xf] }
 0x4c2   :  { %2079 = vrot.lane.b32.xlu0 %v13188_v50, %s12504_s3  ;;  %s12531_s3 = smov 23  }
 0x4c3   :  { %v9602_v32 = vpop.f32.mrb[8].mxu1 }
 0x4c4   :  { %v1605_v21 = vpop.f32.mrb[9].mxu1 }
 0x4c5   :  { %2109 = vrot.lane.b32.xlu1 %v1605_v21, %s12507_s6  ;;  %v2309_v21 = vld [vmem:[%s13131_s30 + $0x398] sm:$0xff] }
 0x4c9   :  { %2095 = vrot.lane.b32.xlu1 %v9588_v30, %s12505_s4 }
 0x4cd   :  { %2103 = vrot.lane.b32.xlu1 %v9595_v4, %s12506_s5  ;;  %v9942_v4 = vpack.c.bf16 %v2299_v12, %v2296_v62  ;;  %v2326_v12 = vld [vmem:[%s13131_s30 + $0x420] sm:$0xff] }
 0x4d1   :  { %2111 = vrot.lane.b32.xlu1 %v9602_v32, %s12507_s6  ;;  %v2305_v32 = vld [vmem:[%s13131_s30 + $0x378] sm:$0xff]  ;;  %s14090_s6 = sld [smem:[%s15933_s0 + %s12518_s2]]  }
 0x4d2   :  { %s8966_s2 = sld [smem:[%s15933_s0 + %s12530_s29]]  }
 0x4fd   :  { %v9616_v28 = vpop.f32.mrb[10].mxu1 }
 0x4fe   :  { %v1907_v50 = vpop.f32.mrb[11].mxu1  ;;  %v9609_v60 = vpop.f32.mrb[16].mxu0 }
 0x4ff   :  { %2125 = vrot.lane.b32.xlu1 %v1907_v50, %s12508_s7  ;;  %v1756_v61 = vpop.f32.mrb[17].mxu0 }
 0x500   :  { %2117 = vrot.lane.b32.xlu0 %v1756_v61, %s12509_s8  ;;  %v9948_v61 = vpack.c.bf16 %v2312_v14, %v2309_v21  ;;  %v13359_v14 = vsub.s32 2, %v12726_v56 }
 0x503   :  { %2119 = vrot.lane.b32.xlu1 %v9609_v60, %s12509_s8  ;;  %s12532_s8 = smov 25  }
 0x504   :  { %s8965_s11 = sld [smem:[%s15933_s0 + %s12532_s8]]  }
 0x515   :  { %v2070_v22 = vpop.permute.xlu0 %2069 }
 0x516   :  { %v2139_v53 = vsel %vm145_vm1, %v13164_v38, %v2070_v22  ;;  %v2170_v38 = vrot.slane %v13270_v23, %v13266_v58 }
 0x524   :  { %v2086_v19 = vpop.permute.xlu0 %2085 }
 0x528   :  { %v2078_v17 = vpop.permute.xlu0 %2077  ;;  %v2094_v1 = vpop.permute.xlu1 %2093 }
 0x529   :  { %v2142_v11 = vsel %vm2141_vm12, %v2139_v53, %v2078_v17  ;;  %v2148_v41 = vsel %vm2147_vm13, %v2086_v19, %v2094_v1  ;;  %v2308_v17 = vld [vmem:[%s13131_s30 + $0x390] sm:$0xff]  ;;  %v2311_v1 = vld [vmem:[%s13131_s30 + $0x3a8] sm:$0xff] }
 0x52a   :  { %v2145_v31 = vsel %vm2144_vm10, %v2142_v11, %v2086_v19  ;;  %v2316_v11 = vld [vmem:[%s13131_s30 + $0x3d0] sm:$0xff] }
 0x52b   :  { %v2182_v47 = vadd.f32 %v2170_v38, %v2145_v31 }
 0x52c   :  { %v13263_v18 = vpop.permute.xlu0 %2087 }
 0x52d   :  { %v2188_v13 = vmax.f32 %v2182_v47, 0.0  ;;  %v2317_v47 = vld [vmem:[%s13131_s30 + $0x3d8] sm:$0xff] }
 0x530   :  { %v9623_v20 = vpop.f32.mrb[18].mxu0  ;;  %v2072_v52 = vpop.permute.xlu0 %2071 }
 0x531   :  { %2135 = vrot.lane.b32.xlu1 %v9623_v20, %s12511_s13  ;;  %v2058_v42 = vpop.f32.mrb[19].mxu0  ;;  %v2140_v29 = vsel %vm145_vm1, %v13159_v35, %v2072_v52  ;;  %v2302_v35 = vld [vmem:[%s13131_s30 + $0x360] sm:$0xff]  ;;  %v10014_v20 = vpack.c.bf16 %v2313_v16, %v2310_v45  ;;  %vm2156_vm1 = vcmask 80896   ;;  %v2178_v45 = vrot.slane %v13270_v23, %v13359_v14 }
 0x532   :  { %2133 = vrot.lane.b32.xlu0 %v2058_v42, %s12511_s13  ;;  %v9946_v60 = vpack.c.bf16 %v2305_v32, %v2302_v35  ;;  %v2318_v42 = vld [vmem:[%s13131_s30 + $0x3e0] sm:$0xff]  ;;  %v2335_v35 = vld [vmem:[%s13131_s30 + $0x468] sm:$0xf] }
 0x533   :  { %v2102_v8 = vpop.permute.xlu1 %2101 }
 0x534   :  { %v2151_v6 = vsel %vm2150_vm14, %v2148_v41, %v2102_v8  ;;  %v2080_v2 = vpop.permute.xlu0 %2079  ;;  %v2319_v8 = vld [vmem:[%s13131_s30 + $0x3e8] sm:$0xff] }
 0x535   :  { %v2143_v57 = vsel %vm2141_vm12, %v2140_v29, %v2080_v2  ;;  %v2327_v2 = vld [vmem:[%s13131_s30 + $0x428] sm:$0xff]  ;;  %vm12516_vm12 = vmmov 0  }
 0x536   :  { %2127 = vrot.lane.b32.xlu0 %v9616_v28, %s12508_s7  ;;  %v2146_v7 = vsel %vm2144_vm10, %v2143_v57, %v13263_v18  ;;  %v9962_v57 = vpack.c.bf16 %v2329_v10, %v2326_v12  ;;  %v3196_v12 = vld [vmem:[%s13377_s17 + $0x2a0] sm:$0xff]  ;;  %v3209_v10 = vld [vmem:[%s13377_s17 + $0x308] sm:$0xff]  ;;  %vm560_vm10 = vcmask 1041409   ;;  %s12519_s7 = smov 4  }
 0x537   :  { %v13286_v30 = vpop.permute.xlu1 %2109  ;;  %v2185_v19 = vadd.f32 %v2170_v38, %v2146_v7  ;;  %v9950_v38 = vpack.c.bf16 %v2311_v1, %v2308_v17  ;;  %s14334_s10 = sld [smem:[%s15933_s0 + %s12519_s7]]  }
 0x538   :  { %v2154_v49 = vsel %vm2153_vm15, %v2151_v6, %v13286_v30  ;;  %v2314_v6 = vld [vmem:[%s13131_s30 + $0x3c0] sm:$0xff]  ;;  %s8963_s7 = sld [smem:[%s15933_s0 + %s12531_s3]]  }
 0x539   :  { %v2183_v55 = vadd.f32 %v13281_v39, %v2154_v49  ;;  %v2191_v52 = vmax.f32 %v2185_v19, 0.0  ;;  %v2321_v49 = vld [vmem:[%s13131_s30 + $0x3f8] sm:$0xff] }
 0x53a   :  { %v9956_v48 = vpack.c.bf16 %v2324_v51, %v2321_v49  ;;  %v3148_v51 = vld [vmem:[%s13377_s17 + $0x120] sm:$0xff] }
 0x53b   :  { %v2189_v54 = vmax.f32 %v2183_v55, 0.0  ;;  %v2096_v46 = vpop.permute.xlu1 %2095  ;;  %v9954_v55 = vpack.c.bf16 %v2317_v47, %v2314_v6  ;;  %v3149_v6 = vld [vmem:[%s13377_s17 + $0x128] sm:$0xff] }
 0x53c   :  { %v2149_v28 = vsel %vm2147_vm13, %v13263_v18, %v2096_v46  ;;  %v2315_v18 = vld [vmem:[%s13131_s30 + $0x3c8] sm:$0xff]  ;;  %v2330_v46 = vld [vmem:[%s13131_s30 + $0x440] sm:$0xff]  ;;  %vm6386_vm13 = vcmask 1042432  }
 0x53d   :  { %2417 = vmatprep.mubr.f32.mxu1 %v2189_v54  ;;  %2571 = vmatprep.mubr.f32.mxu0 %v2189_v54  ;;  %v9952_v41 = vpack.c.bf16 %v2318_v42, %v2315_v18  ;;  %v10022_v54 = vpack.c.bf16 %v2325_v37, %v2322_v24  ;;  %v9960_v62 = vpack.c.bf16 %v2330_v46, %v2327_v2  ;;  %v3113_v42 = vld [vmem:[%s13377_s17 + $0x8] sm:$0xff]  ;;  %v13398_v46 = vld [vmem:[%s8943_s21] sm:$0x3]  ;;  %s14923_s21 = sld [smem:[%s15933_s0 + %s12521_s14]]   ;;  %s12528_s14 = smov 22  }
 0x53e   :  { %2418 = vmatmul.mubr.f32.vlgmr.msra.gmra.mrb[12].mxu1 %v2188_v13  ;;  %2572 = vmatmul.mubr.f32.vlgmr.msra.gmra.mrb[20].mxu0 %v2188_v13  ;;  %v2331_v13 = vld [vmem:[%s13131_s30 + $0x448] sm:$0xff] }
 0x53f   :  { %v2104_v26 = vpop.permute.xlu1 %2103  ;;  %9939 = vmatpush1.bf16.msra.mxu1 %v9938_v63  ;;  %10005 = vmatpush3.bf16.msra.mxu0 %v13254_v5  ;;  %v2328_v63 = vld [vmem:[%s13131_s30 + $0x430] sm:$0xff]  ;;  %v3161_v24 = vld [vmem:[%s13377_s17 + $0x188] sm:$0xff] }
 0x540   :  { %9941 = vmatprep.subr.bf16.mxu1 %v9940_v44  ;;  %10007 = vmatprep.subr.bf16.mxu0 %v10006_v15  ;;  %v2152_v5 = vsel %vm2150_vm14, %v2149_v28, %v2104_v26  ;;  %v9958_v44 = vpack.c.bf16 %v2323_v34, %v2320_v27  ;;  %v10026_v29 = vpack.c.bf16 %v2331_v13, %v2328_v63  ;;  %v3173_v37 = vld [vmem:[%s13377_s17 + $0x1e8] sm:$0xff]  ;;  %v3160_v27 = vld [vmem:[%s13377_s17 + $0x180] sm:$0xff]  ;;  %vm561_vm14 = vcmask 1042434  }
 0x541   :  { %v3172_v34 = vld [vmem:[%s13377_s17 + $0x1e0] sm:$0xff]  ;;  %v3185_v2 = vld [vmem:[%s13377_s17 + $0x248] sm:$0xff]  ;;  %v2996_v63 = vrot.slane %v13398_v46, %v13266_v58 }
 0x542   :  { %v10061_v13 = vpack.c.bf16 %v3172_v34, %v3160_v27 }
 0x543   :  { %v13318_v50 = vpop.permute.xlu1 %2111  ;;  %9943 = vmatpush1.bf16.msra.mxu1 %v9942_v4  ;;  %10009 = vmatpush3.bf16.msra.mxu0 %v10006_v15  ;;  %v2333_v15 = vld [vmem:[%s13131_s30 + $0x458] sm:$0xff]  ;;  %v2332_v4 = vld [vmem:[%s13131_s30 + $0x450] sm:$0xff]  ;;  %s8949_s30 = sld [smem:[%s15933_s0 + %s12514_s27]]   ;;  %s12523_s27 = smov 13  }
 0x544   :  { %v2155_v22 = vsel %vm2153_vm15, %v2152_v5, %v13318_v50  ;;  %9945 = vmatprep.subr.bf16.mxu1 %v9944_v36  ;;  %10011 = vmatprep.subr.bf16.mxu0 %v10010_v43  ;;  %v9964_v26 = vpack.c.bf16 %v2336_v25, %v2333_v15  ;;  %v10030_v36 = vpack.c.bf16 %v2337_v59, %v2334_v40  ;;  %v3221_v15 = vld [vmem:[%s13377_s17 + $0x368] sm:$0xff]  ;;  %vm563_vm15 = vcmask 1043459  }
 0x545   :  { %v2186_v53 = vadd.f32 %v13281_v39, %v2155_v22  ;;  %v10018_v39 = vpack.c.bf16 %v2319_v8, %v2316_v11  ;;  %v9967_v32 = vpack.c.bf16 %v2335_v35, %v2332_v4  ;;  %v3125_v11 = vld [vmem:[%s13377_s17 + $0x68] sm:$0xff]  ;;  %v3112_v8 = vld [vmem:[%s13377_s17] sm:$0xff]  ;;  %2998 = vbcast.lane.b32.xlu1 %v2996_v63, 256  ;;  %v3007_v35 = vrot.slane %v13398_v46, %v13273_v3 }
 0x546   :  { %v3220_v4 = vld [vmem:[%s13377_s17 + $0x360] sm:$0xff] }
 0x547   :  { %v2192_v31 = vmax.f32 %v2186_v53, 0.0  ;;  %9947 = vmatpush1.bf16.msra.mxu1 %v9946_v60  ;;  %10013 = vmatpush3.bf16.msra.mxu0 %v10010_v43 }
 0x548   :  { %9949 = vmatprep.subr.bf16.mxu1 %v9948_v61  ;;  %10015 = vmatprep.subr.bf16.mxu0 %v10014_v20 }
 0x549   :  { %2423 = vmatprep.mubr.f32.mxu1 %v2192_v31  ;;  %2576 = vmatprep.mubr.f32.mxu0 %v2192_v31 }
 0x54a   :  { %2424 = vmatmul.mubr.f32.gmra.mrb[14].mxu1 %v2191_v52  ;;  %2577 = vmatmul.mubr.f32.gmra.mrb[22].mxu0 %v2191_v52  ;;  %v3124_v52 = vld [vmem:[%s13377_s17 + $0x60] sm:$0xff] }
 0x54b   :  { %9951 = vmatpush1.bf16.msra.mxu1 %v9950_v38  ;;  %10017 = vmatpush3.bf16.msra.mxu0 %v10014_v20  ;;  %v10051_v38 = vpack.c.bf16 %v3125_v11, %v3113_v42  ;;  %v10053_v47 = vpack.c.bf16 %v3124_v52, %v3112_v8  ;;  %v3304_v11 = vld [vmem:[%s13377_s17 + $0x600] sm:$0xff]  ;;  %v3341_v52 = vld [vmem:[%s13377_s17 + $0x728] sm:$0xff] }
 0x54c   :  { %9953 = vmatprep.subr.bf16.mxu1 %v9952_v41  ;;  %10019 = vmatprep.subr.bf16.mxu0 %v10018_v39  ;;  %v3137_v41 = vld [vmem:[%s13377_s17 + $0xc8] sm:$0xff]  ;;  %v3316_v8 = vld [vmem:[%s13377_s17 + $0x660] sm:$0xff] }
 0x54d   :  { %2494 = vmatprep.mubr.f32.mxu1 %v12468_v0  ;;  %v10055_v49 = vpack.c.bf16 %v3149_v6, %v3137_v41  ;;  %3002 = vbcast.lane.b32.xlu1 %v2996_v63, 264  ;;  %v10085_v41 = vpack.c.bf16 %v3316_v8, %v3304_v11  ;;  %v2658_v63 = vld [vmem:[%s8942_s26 + $0x8] sm:$0xff]  ;;  %v3484_v11 = vld [vmem:[%s13377_s17 + $0xba0] sm:$0xff] }
 0x54f   :  { %9955 = vmatpush1.bf16.msra.mxu1 %v9954_v55  ;;  %10021 = vmatpush3.bf16.msra.mxu0 %v10018_v39  ;;  %v3136_v39 = vld [vmem:[%s13377_s17 + $0xc0] sm:$0xff] }
 0x550   :  { %9957 = vmatprep.subr.bf16.mxu1 %v9956_v48  ;;  %10023 = vmatprep.subr.bf16.mxu0 %v10022_v54  ;;  %v10057_v55 = vpack.c.bf16 %v3148_v51, %v3136_v39  ;;  %v10059_v48 = vpack.c.bf16 %v3173_v37, %v3161_v24 }
 0x551   :  { %3009 = vbcast.lane.b32.xlu1 %v3007_v35, 256 }
 0x553   :  { %9959 = vmatpush1.bf16.msra.mxu1 %v9958_v44  ;;  %10025 = vmatpush3.bf16.msra.mxu0 %v10022_v54  ;;  %v3197_v54 = vld [vmem:[%s13377_s17 + $0x2a8] sm:$0xff] }
 0x554   :  { %9961 = vmatprep.subr.bf16.mxu1 %v9960_v62  ;;  %10027 = vmatprep.subr.bf16.mxu0 %v10026_v29  ;;  %v10063_v44 = vpack.c.bf16 %v3197_v54, %v3185_v2  ;;  %v3184_v62 = vld [vmem:[%s13377_s17 + $0x240] sm:$0xff] }
 0x555   :  { %v10065_v40 = vpack.c.bf16 %v3196_v12, %v3184_v62  ;;  %3013 = vbcast.lane.b32.xlu1 %v3007_v35, 264  ;;  %v2657_v54 = vld [vmem:[%s8942_s26] sm:$0xff]  ;;  %v3353_v62 = vld [vmem:[%s13377_s17 + $0x788] sm:$0xff]  ;;  %s15088_s26 = sld [smem:[%s15933_s0 + %s12522_s23]]   ;;  %s12535_s23 = smov 30  }
 0x556   :  { %v3365_v12 = vld [vmem:[%s13377_s17 + $0x7e8] sm:$0xff] }
 0x557   :  { %9963 = vmatpush1.bf16.msra.mxu1 %v9962_v57  ;;  %10029 = vmatpush3.bf16.msra.mxu0 %v10026_v29  ;;  %v10067_v57 = vpack.c.bf16 %v3221_v15, %v3209_v10  ;;  %v10091_v10 = vpack.c.bf16 %v3365_v12, %v3353_v62  ;;  %v3352_v15 = vld [vmem:[%s13377_s17 + $0x780] sm:$0xff] }
 0x558   :  { %9966 = vmatprep.subr.msk.bf16.mxu1 %vm12631_vm4, %v9964_v26  ;;  %10032 = vmatprep.subr.msk.bf16.mxu0 %vm12631_vm4, %v10030_v36  ;;  %v3208_v26 = vld [vmem:[%s13377_s17 + $0x300] sm:$0xff] }
 0x55b   :  { %9969 = vmatpush1.bf16.msk.msra.mxu1 %vm12631_vm4, %v9967_v32  ;;  %10035 = vmatpush3.bf16.msk.msra.mxu0 %vm12631_vm4, %v10030_v36  ;;  %v3233_v36 = vld [vmem:[%s13377_s17 + $0x3c8] sm:$0xff]  ;;  %v15094_v33 = vld [vmem:[%s15088_s26] sm:$0xff] }
 0x55c   :  { %10052 = vmatprep.subr.bf16.mxu1 %v10051_v38  ;;  %v3245_v32 = vld [vmem:[%s13377_s17 + $0x428] sm:$0xff] }
 0x55d   :  { %v3329_v38 = vld [vmem:[%s13377_s17 + $0x6c8] sm:$0xff] }
 0x55e   :  { %v10087_v6 = vpack.c.bf16 %v3341_v52, %v3329_v38  ;;  %v2842_v38 = vsel %vm2841_vm3, %v13398_v46, 0.0  ;;  %vm8768_vm3 = vcmask 785408  }
 0x55f   :  { %2843 = vadd.xlane.f32.xlu0 %v2842_v38 }
 0x571   :  { %v2126_v43 = vpop.permute.xlu1 %2125 }
 0x572   :  { %v2118_v21 = vpop.permute.xlu0 %2117 }
 0x573   :  { %v2157_v7 = vsel %vm2156_vm1, %v13286_v30, %v2118_v21  ;;  %v10069_v21 = vpack.c.bf16 %v3220_v4, %v3208_v26  ;;  %v3376_v26 = vld [vmem:[%s13377_s17 + $0x840] sm:$0xff] }
 0x574   :  { %v2160_v16 = vsel %vm2159_vm0, %v2157_v7, %v2126_v43  ;;  %v10071_v43 = vpack.c.bf16 %v3245_v32, %v3233_v36  ;;  %v3232_v7 = vld [vmem:[%s13377_s17 + $0x3c0] sm:$0xff]  ;;  %v3401_v36 = vld [vmem:[%s13377_s17 + $0x908] sm:$0xff] }
 0x575   :  { %v2120_v5 = vpop.permute.xlu1 %2119  ;;  %v3388_v4 = vld [vmem:[%s13377_s17 + $0x8a0] sm:$0xff]  ;;  %v3413_v32 = vld [vmem:[%s13377_s17 + $0x968] sm:$0xff] }
 0x576   :  { %v2158_v22 = vsel %vm2156_vm1, %v13318_v50, %v2120_v5  ;;  %v10097_v35 = vpack.c.bf16 %v3388_v4, %v3376_v26  ;;  %vm6383_vm1 = vcmask 23552  }
 0x5a3   :  { %v2136_v1 = vpop.permute.xlu1 %2135 }
 0x5a4   :  { %v2134_v28 = vpop.permute.xlu0 %2133 }
 0x5a5   :  { %v2163_v60 = vsel %vm2162_vm2, %v2160_v16, %v2134_v28  ;;  %v3257_v16 = vld [vmem:[%s13377_s17 + $0x488] sm:$0xff] }
 0x5a6   :  { %v2184_v61 = vadd.f32 %v2178_v45, %v2163_v60  ;;  %v3269_v28 = vld [vmem:[%s13377_s17 + $0x4e8] sm:$0xff] }
 0x5a7   :  { %v10075_v60 = vpack.c.bf16 %v3269_v28, %v3257_v16  ;;  %v3425_v16 = vld [vmem:[%s13377_s17 + $0x9c8] sm:$0xff] }
 0x5a8   :  { %v2190_v19 = vmax.f32 %v2184_v61, 0.0  ;;  %v2128_v17 = vpop.permute.xlu0 %2127  ;;  %v3256_v61 = vld [vmem:[%s13377_s17 + $0x480] sm:$0xff]  ;;  %v3437_v28 = vld [vmem:[%s13377_s17 + $0xa28] sm:$0xff] }
 0x5a9   :  { %v2161_v18 = vsel %vm2159_vm0, %v2158_v22, %v2128_v17  ;;  %v3268_v22 = vld [vmem:[%s13377_s17 + $0x4e0] sm:$0xff]  ;;  %v3293_v17 = vld [vmem:[%s13377_s17 + $0x5a8] sm:$0xff] }
 0x5aa   :  { %v2164_v20 = vsel %vm2162_vm2, %v2161_v18, %v2136_v1  ;;  %9005 = vmatmul.mubr.msk.f32.vlgmr.msra.gmra.mrb[12].mxu1 %vm370_vm5, %v2190_v19  ;;  %9656 = vmatprep.mubr.msk.f32.mxu0 %vm370_vm5, %v2190_v19  ;;  %v3281_v19 = vld [vmem:[%s13377_s17 + $0x548] sm:$0xff]  ;;  %v10077_v1 = vpack.c.bf16 %v3268_v22, %v3256_v61  ;;  %v3436_v61 = vld [vmem:[%s13377_s17 + $0xa20] sm:$0xff]  ;;  %vm5804_vm2 = vcmask 752640  }
 0x5ab   :  { %v2187_v30 = vadd.f32 %v2178_v45, %v2164_v20  ;;  %2500 = vmatprep.mubr.f32.mxu1 %v12468_v0  ;;  %10054 = vmatpush1.bf16.msra.mxu1 %v10053_v47  ;;  %v3244_v45 = vld [vmem:[%s13377_s17 + $0x420] sm:$0xff]  ;;  %v10079_v18 = vpack.c.bf16 %v3293_v17, %v3281_v19  ;;  %v3449_v19 = vld [vmem:[%s13377_s17 + $0xa88] sm:$0xff] }
 0x5ac   :  { %10056 = vmatprep.subr.bf16.mxu1 %v10055_v49  ;;  %v10073_v5 = vpack.c.bf16 %v3244_v45, %v3232_v7  ;;  %v3280_v20 = vld [vmem:[%s13377_s17 + $0x540] sm:$0xff]  ;;  %v3461_v17 = vld [vmem:[%s13377_s17 + $0xae8] sm:$0xff] }
 0x5ad   :  { %v2193_v23 = vmax.f32 %v2187_v30, 0.0  ;;  %v3292_v30 = vld [vmem:[%s13377_s17 + $0x5a0] sm:$0xff] }
 0x5ae   :  { %v3412_v7 = vld [vmem:[%s13377_s17 + $0x960] sm:$0xff] }
 0x5af   :  { %9006 = vmatmul.mubr.msk.f32.gmra.mrb[14].mxu1 %vm370_vm5, %v2193_v23  ;;  %9657 = vmatmul.mubr.msk.f32.vlgmr.msra.gmra.mrb[24].mxu0 %vm370_vm5, %v2193_v23  ;;  %v3305_v23 = vld [vmem:[%s13377_s17 + $0x608] sm:$0xff] }
 0x5b0   :  { %2746 = vmatprep.mubr.f32.mxu0 %v12468_v0  ;;  %10058 = vmatpush1.bf16.msra.mxu1 %v10057_v55 }
 0x5b1   :  { %10060 = vmatprep.subr.bf16.mxu1 %v10059_v48 }
 0x5b4   :  { %10062 = vmatpush1.bf16.msra.mxu1 %v10061_v13  ;;  %v3340_v13 = vld [vmem:[%s13377_s17 + $0x720] sm:$0xff] }
 0x5b5   :  { %10064 = vmatprep.subr.bf16.mxu1 %v10063_v44 }
 0x5b7   :  { %v13465_v52 = vpop.permute.xlu1 %2998 }
 0x5b8   :  { %10066 = vmatpush1.bf16.msra.mxu1 %v10065_v40  ;;  %v3377_v40 = vld [vmem:[%s13377_s17 + $0x848] sm:$0xff]  ;;  %vm3015_vm6 = vcmp.gt.f32.partialorder %v13465_v52, 0.0 }
 0x5b9   :  { %10068 = vmatprep.subr.bf16.mxu1 %v10067_v57 }
 0x5bc   :  { %10070 = vmatpush1.bf16.msra.mxu1 %v10069_v21  ;;  %v10099_v21 = vpack.c.bf16 %v3413_v32, %v3401_v36 }
 0x5bd   :  { %10072 = vmatprep.subr.bf16.mxu1 %v10071_v43  ;;  %v3400_v43 = vld [vmem:[%s13377_s17 + $0x900] sm:$0xff] }
 0x5be   :  { %v10101_v45 = vpack.c.bf16 %v3412_v7, %v3400_v43 }
 0x5c0   :  { %10074 = vmatpush1.bf16.msra.mxu1 %v10073_v5  ;;  %v10103_v5 = vpack.c.bf16 %v3437_v28, %v3425_v16 }
 0x5c1   :  { %10076 = vmatprep.subr.bf16.mxu1 %v10075_v60  ;;  %v3424_v60 = vld [vmem:[%s13377_s17 + $0x9c0] sm:$0xff] }
 0x5c2   :  { %v10105_v22 = vpack.c.bf16 %v3436_v61, %v3424_v60 }
 0x5c4   :  { %10078 = vmatpush1.bf16.msra.mxu1 %v10077_v1  ;;  %v10107_v1 = vpack.c.bf16 %v3461_v17, %v3449_v19 }
 0x5c5   :  { %10080 = vmatprep.subr.bf16.mxu1 %v10079_v18  ;;  %v3448_v18 = vld [vmem:[%s13377_s17 + $0xa80] sm:$0xff] }
 0x611   :  { %v9193_v50 = vpop.f32.mrb[20].mxu0 }
 0x612   :  { %v9194_v53 = vpop.f32.mrb[21].mxu0 }
 0x613   :  { %v13382_v31 = vadd.f32 %v9194_v53, %v9193_v50  ;;  %v3317_v50 = vld [vmem:[%s13377_s17 + $0x668] sm:$0xff]  ;;  %v10081_v53 = vpack.c.bf16 %v3292_v30, %v3280_v20  ;;  %v3460_v20 = vld [vmem:[%s13377_s17 + $0xae0] sm:$0xff] }
 0x614   :  { %v10083_v42 = vpack.c.bf16 %v3317_v50, %v3305_v23  ;;  %v10109_v30 = vpack.c.bf16 %v3460_v20, %v3448_v18  ;;  %v3473_v23 = vld [vmem:[%s13377_s17 + $0xb48] sm:$0xff] }
 0x615   :  { %10082 = vmatpush1.bf16.msra.mxu1 %v10081_v53  ;;  %v3485_v50 = vld [vmem:[%s13377_s17 + $0xba8] sm:$0xff] }
 0x616   :  { %10084 = vmatprep.subr.bf16.mxu1 %v10083_v42  ;;  %v10111_v53 = vpack.c.bf16 %v3485_v50, %v3473_v23  ;;  %v3472_v42 = vld [vmem:[%s13377_s17 + $0xb40] sm:$0xff] }
 0x617   :  { %v10113_v8 = vpack.c.bf16 %v3484_v11, %v3472_v42 }
 0x619   :  { %10086 = vmatpush1.bf16.msra.mxu1 %v10085_v41  ;;  %v3003_v41 = vpop.permute.xlu1 %3002 }
 0x61a   :  { %10088 = vmatprep.subr.bf16.mxu1 %v10087_v6  ;;  %v2659_v6 = vld [vmem:[%s8949_s30] sm:$0x7]  ;;  %vm3016_vm9 = vcmp.gt.f32.partialorder %v3003_v41, 0.0  ;;  %s8953_s30 = sld [smem:[%s15933_s0 + %s12523_s27]]  }
 0x61d   :  { %v9196_v29 = vpop.f32.mrb[22].mxu0 }
 0x61e   :  { %v9197_v25 = vpop.f32.mrb[23].mxu0 }
 0x61f   :  { %v9198_v59 = vadd.f32 %v9197_v25, %v9196_v29  ;;  %v3364_v29 = vld [vmem:[%s13377_s17 + $0x7e0] sm:$0xff] }
 0x620   :  { %v10093_v25 = vpack.c.bf16 %v3364_v29, %v3352_v15 }
 0x67d   :  { %v2496_v47 = vpop.f32.mrb[12].mxu1 }
 0x67e   :  { %v2498_v49 = vpop.f32.mrb[13].mxu1 }
 0x682   :  { %v2502_v39 = vpop.f32.mrb[14].mxu1  ;;  %v9658_v51 = vpop.f32.mrb[24].mxu0 }
 0x683   :  { %v10038_v24 = vpack.c.bf16 %v2502_v39, %v2496_v47  ;;  %v2654_v37 = vadd.f32 %v9658_v51, %v9198_v59  ;;  %v2504_v55 = vpop.f32.mrb[15].mxu1  ;;  %v2648_v48 = vpop.f32.mrb[25].mxu0  ;;  %v3389_v59 = vld [vmem:[%s13377_s17 + $0x8a8] sm:$0xff]  ;;  %v2664_v47 = vrot.slane %v2659_v6, %v13266_v58  ;;  %v2668_v39 = vrot.slane %v2659_v6, %v13273_v3 }
 0x684   :  { %v10036_v27 = vpack.c.bf16 %v2504_v55, %v2498_v49  ;;  %v2649_v34 = vadd.f32 %v13382_v31, %v2648_v48  ;;  %v3328_v31 = vld [vmem:[%s13377_s17 + $0x6c0] sm:$0xff]  ;;  %v10095_v57 = vpack.c.bf16 %v3389_v59, %v3377_v40  ;;  %v13471_v49 = vpop.permute.xlu1 %3009 }
 0x685   :  { %v10089_v44 = vpack.c.bf16 %v3340_v13, %v3328_v31  ;;  %vm3017_vm7 = vcmp.gt.f32.partialorder %v13471_v49, 0.0  ;;  %v2672_v31 = vrot.slane %v2659_v6, %v13359_v14 }
 0x686   :  { %v10040_v2 = vpack.c.bf16 %v2654_v37, %v2649_v34  ;;  %10037 = vmatprep.subr.bf16.mxu0 %v10036_v27 }
 0x687   :  { %10039 = vmatpush1.bf16.msra.mxu0 %v10038_v24  ;;  %10090 = vmatpush1.bf16.msra.mxu1 %v10089_v44 }
 0x688   :  { %10041 = vmatprep.subr.bf16.mxu0 %v10040_v2  ;;  %10092 = vmatprep.subr.bf16.mxu1 %v10091_v10  ;;  %v3014_v27 = vpop.permute.xlu1 %3013 }
 0x689   :  { %vm3018_vm8 = vcmp.gt.f32.partialorder %v3014_v27, 0.0 }
 0x68a   :  { %9010 = vmatmul.mubr.msk.f32.vlgmr.msra.gmra.mrb[26].mxu0 %vm584_vm11, %v2657_v54 }
 0x68b   :  { %10043 = vmatpush3.bf16.msra.mxu0 %v10040_v2  ;;  %2752 = vmatprep.mubr.f32.mxu0 %v12468_v0 }
 0x68c   :  { %10094 = vmatpush1.bf16.msra.mxu1 %v10093_v25 }
 0x68d   :  { %10096 = vmatprep.subr.bf16.mxu1 %v10095_v57 }
 0x68e   :  { %9011 = vmatmul.mubr.msk.f32.gmra.mrb[28].mxu0 %vm584_vm11, %v2658_v63 }
 0x68f   :  { %9663 = vmatprep.mubr.msk.f32.mxu0 %vm584_vm11, %v2657_v54 }
 0x690   :  { %10098 = vmatpush1.bf16.msra.mxu1 %v10097_v35 }
 0x691   :  { %10100 = vmatprep.subr.bf16.mxu1 %v10099_v21 }
 0x692   :  { %9664 = vmatmul.mubr.msk.f32.vlgmr.msra.gmra.mrb[30].mxu0 %vm584_vm11, %v2658_v63 }
 0x693   :  { %2912 = vmatprep.mubr.f32.mxu0 %v12468_v0 }
 0x694   :  { %10102 = vmatpush1.bf16.msra.mxu1 %v10101_v45 }
 0x695   :  { %10104 = vmatprep.subr.bf16.mxu1 %v10103_v5 }
 0x698   :  { %10106 = vmatpush1.bf16.msra.mxu1 %v10105_v22 }
 0x699   :  { %10108 = vmatprep.subr.bf16.mxu1 %v10107_v1 }
 0x69c   :  { %10110 = vmatpush1.bf16.msra.mxu1 %v10109_v30 }
 0x69d   :  { %10112 = vmatprep.subr.bf16.mxu1 %v10111_v53 }
 0x6a0   :  { %10114 = vmatpush1.bf16.msra.mxu1 %v10113_v8  ;;  %v12515_v8 = vmov 0.0|0.0  }
 0x75d   :  { %v2748_v51 = vpop.f32.mrb[26].mxu0 }
 0x75e   :  { %v2749_v24 = vadd.f32 %v2748_v51, %v2664_v47  ;;  %v2750_v37 = vpop.f32.mrb[27].mxu0 }
 0x75f   :  { %v2751_v55 = vadd.f32 %v2750_v37, %v2668_v39 }
 0x760   :  { %v2834_v48 = vmax.f32 %v2749_v24, 0.0 }
 0x761   :  { %v2835_v34 = vmax.f32 %v2751_v55, 0.0  ;;  %v2754_v2 = vpop.f32.mrb[28].mxu0 }
 0x762   :  { %v2755_v54 = vadd.f32 %v2754_v2, %v2664_v47  ;;  %v2756_v63 = vpop.f32.mrb[29].mxu0  ;;  %v3027_v44 = vsel %vm3015_vm6, %v2834_v48, -1e+30  ;;  %v3033_v62 = vsel %vm3017_vm7, %v2834_v48, -1e+30 }
 0x763   :  { %v2757_v13 = vadd.f32 %v2756_v63, %v2668_v39  ;;  %v3028_v10 = vsel %vm3015_vm6, %v2835_v34, -1e+30  ;;  %v3034_v15 = vsel %vm3017_vm7, %v2835_v34, -1e+30 }
 0x764   :  { %v2837_v12 = vmax.f32 %v2755_v54, 0.0 }
 0x765   :  { %v2838_v29 = vmax.f32 %v2757_v13, 0.0  ;;  %v9665_v25 = vpop.f32.mrb[30].mxu0 }
 0x766   :  { %v10046_v40 = vpack.c.bf16 %v2837_v12, %v2834_v48  ;;  %v3030_v59 = vsel %vm3016_vm9, %v2837_v12, -1e+30  ;;  %v3036_v57 = vsel %vm3018_vm8, %v2837_v12, -1e+30  ;;  %v2831_v26 = vadd.f32 %v9665_v25, %v2672_v31  ;;  %v2825_v4 = vpop.f32.mrb[31].mxu0 }
 0x767   :  { %v3039_v35 = vmax.f32 %v3027_v44, %v3030_v59  ;;  %v3031_v36 = vsel %vm3016_vm9, %v2838_v29, -1e+30  ;;  %v3037_v32 = vsel %vm3018_vm8, %v2838_v29, -1e+30  ;;  %v3062_v21 = vmax.f32 %v3033_v62, %v3036_v57 }
 0x768   :  { %v3046_v43 = vmax.f32 %v3028_v10, %v3031_v36  ;;  %v3069_v7 = vmax.f32 %v3034_v15, %v3037_v32  ;;  %v2839_v45 = vmax.f32 %v2831_v26, 0.0  ;;  %v2826_v16 = vadd.f32 %v2825_v4, %v2672_v31 }
 0x769   :  { %v3040_v28 = vrot.slane %v3039_v35, 4  ;;  %v3063_v5 = vrot.slane %v3062_v21, 4  ;;  %v10044_v60 = vpack.c.bf16 %v2838_v29, %v2835_v34 }
 0x76a   :  { %v3047_v61 = vrot.slane %v3046_v43, 4  ;;  %v3070_v22 = vrot.slane %v3069_v7, 4  ;;  %v3032_v19 = vsel %vm3016_vm9, %v2839_v45, -1e+30  ;;  %v3038_v17 = vsel %vm3018_vm8, %v2839_v45, -1e+30 }
 0x76b   :  { %v3041_v1 = vmax.f32 %v3039_v35, %v3040_v28  ;;  %v3064_v18 = vmax.f32 %v3062_v21, %v3063_v5  ;;  %10045 = vmatprep.subr.bf16.mxu0 %v10044_v60  ;;  %v2836_v23 = vmax.f32 %v2826_v16, 0.0  ;;  %v3054_v42 = vsel %vm370_vm5, %v3032_v19, -inf  ;;  %v3508_v28 = vld [vmem:[%s13377_s17 + $0xc60] sm:$0xff]  ;;  %v3881_v5 = vld [vmem:[%s13377_s17 + $0x1808] sm:$0xff] }
 0x76c   :  { %v3048_v20 = vmax.f32 %v3046_v43, %v3047_v61  ;;  %v3071_v30 = vmax.f32 %v3069_v7, %v3070_v22  ;;  %10047 = vmatpush1.bf16.msra.mxu0 %v10046_v40  ;;  %v3077_v11 = vsel %vm370_vm5, %v3038_v17, -inf  ;;  %v3497_v43 = vld [vmem:[%s13377_s17 + $0xc08] sm:$0xff] }
 0x76d   :  { %v3042_v50 = vrot.slane %v3041_v1, 2  ;;  %v3065_v53 = vrot.slane %v3064_v18, 2  ;;  %10048 = vmatprep.subr.bf16.mxu0 %v12515_v8  ;;  %v10049_v6 = vpack.c.bf16 %v2839_v45, %v2836_v23  ;;  %v3029_v47 = vsel %vm3015_vm6, %v2836_v23, -1e+30  ;;  %v3509_v7 = vld [vmem:[%s13377_s17 + $0xc68] sm:$0xff]  ;;  %v3496_v45 = vld [vmem:[%s13377_s17 + $0xc00] sm:$0xff] }
 0x76e   :  { %v3049_v38 = vrot.slane %v3048_v20, 2  ;;  %v3072_v41 = vrot.slane %v3071_v30, 2  ;;  %v3035_v24 = vsel %vm3017_vm7, %v2836_v23, -1e+30  ;;  %v3053_v37 = vsel %vm370_vm5, %v3029_v47, -inf  ;;  %v3893_v60 = vld [vmem:[%s13377_s17 + $0x1868] sm:$0xff] }
 0x76f   :  { %v3043_v39 = vmax.f32 %v3041_v1, %v3042_v50  ;;  %v3066_v51 = vmax.f32 %v3064_v18, %v3065_v53  ;;  %9014 = vmatmul.mubr.msk.f32.vlgmr.msra.gmra.mrb[32].mxu0 %vm584_vm11, %v13398_v46  ;;  %v3055_v27 = vmax.f32 %v3053_v37, %v3054_v42  ;;  %v3076_v34 = vsel %vm370_vm5, %v3035_v24, -inf  ;;  %v3521_v19 = vld [vmem:[%s13377_s17 + $0xcc8] sm:$0xff]  ;;  %v3880_v1 = vld [vmem:[%s13377_s17 + $0x1800] sm:$0xff] }
 0x770   :  { %v3050_v55 = vmax.f32 %v3048_v20, %v3049_v38  ;;  %v3073_v48 = vmax.f32 %v3071_v30, %v3072_v41  ;;  %10050 = vmatpush3.bf16.msra.mxu0 %v10049_v6  ;;  %9670 = vmatprep.mubr.msk.f32.mxu0 %vm12516_vm12, %v12468_v0  ;;  %v3078_v54 = vmax.f32 %v3076_v34, %v3077_v11  ;;  %v3533_v17 = vld [vmem:[%s13377_s17 + $0xd28] sm:$0xff]  ;;  %v3892_v20 = vld [vmem:[%s13377_s17 + $0x1860] sm:$0xff]  ;;  %vm8935_vm6 = vcmask 1024  }
 0x771   :  { %v3044_v52 = vrot.slane %v3043_v39, 1  ;;  %v3067_v2 = vrot.slane %v3066_v51, 1  ;;  %v3056_v15 = vrot.slane %v3055_v27, 4  ;;  %v10115_v16 = vpack.c.bf16 %v3509_v7, %v3497_v43  ;;  %v3520_v30 = vld [vmem:[%s13377_s17 + $0xcc0] sm:$0xff]  ;;  %v3905_v42 = vld [vmem:[%s13377_s17 + $0x18c8] sm:$0xff] }
 0x772   :  { %v3051_v49 = vrot.slane %v3050_v55, 1  ;;  %v3074_v63 = vrot.slane %v3073_v48, 1  ;;  %v3079_v29 = vrot.slane %v3078_v54, 4  ;;  %v10117_v61 = vpack.c.bf16 %v3508_v28, %v3496_v45  ;;  %v3532_v23 = vld [vmem:[%s13377_s17 + $0xd20] sm:$0xff]  ;;  %v3917_v11 = vld [vmem:[%s13377_s17 + $0x1928] sm:$0xff] }
 0x773   :  { %v3045_v31 = vmax.f32 %v3043_v39, %v3044_v52  ;;  %v3068_v13 = vmax.f32 %v3066_v51, %v3067_v2  ;;  %9671 = vmatmul.mubr.msk.f32.vlgmr.msra.gmra.mrb[34].mxu0 %vm584_vm11, %v13398_v46  ;;  %v3057_v25 = vmax.f32 %v3055_v27, %v3056_v15  ;;  %v10179_v22 = vpack.c.bf16 %v3893_v60, %v3881_v5  ;;  %v3545_v38 = vld [vmem:[%s13377_s17 + $0xd88] sm:$0xff]  ;;  %v3904_v47 = vld [vmem:[%s13377_s17 + $0x18c0] sm:$0xff] }
 0x774   :  { %v3052_v44 = vmax.f32 %v3050_v55, %v3051_v49  ;;  %v3075_v62 = vmax.f32 %v3073_v48, %v3074_v63  ;;  %v3080_v46 = vmax.f32 %v3078_v54, %v3079_v29  ;;  %10116 = vmatprep.subr.bf16.mxu0 %v10115_v16  ;;  %v10119_v18 = vpack.c.bf16 %v3533_v17, %v3521_v19  ;;  %v3557_v6 = vld [vmem:[%s13377_s17 + $0xde8] sm:$0xff]  ;;  %v3916_v39 = vld [vmem:[%s13377_s17 + $0x1920] sm:$0xff] }
 0x775   :  { %v13507_v12 = vsel %vm560_vm10, %v3068_v13, %v3045_v31  ;;  %v3058_v40 = vrot.slane %v3057_v25, 2  ;;  %10118 = vmatpush1.bf16.msra.mxu0 %v10117_v61  ;;  %10180 = vmatprep.subr.bf16.mxu1 %v10179_v22  ;;  %v10181_v50 = vpack.c.bf16 %v3892_v20, %v3880_v1  ;;  %v10121_v53 = vpack.c.bf16 %v3532_v23, %v3520_v30  ;;  %v3544_v37 = vld [vmem:[%s13377_s17 + $0xd80] sm:$0xff]  ;;  %v3929_v48 = vld [vmem:[%s13377_s17 + $0x1988] sm:$0xff] }
 0x776   :  { %v13510_v10 = vsel %vm560_vm10, %v3075_v62, %v3052_v44  ;;  %v3081_v59 = vrot.slane %v3080_v46, 2  ;;  %10120 = vmatprep.subr.bf16.mxu0 %v10119_v18  ;;  %v10183_v41 = vpack.c.bf16 %v3917_v11, %v3905_v42  ;;  %v10123_v51 = vpack.c.bf16 %v3557_v6, %v3545_v38  ;;  %v3556_v55 = vld [vmem:[%s13377_s17 + $0xde0] sm:$0xff]  ;;  %v3941_v27 = vld [vmem:[%s13377_s17 + $0x19e8] sm:$0xff] }
 0x777   :  { %4383 = vmatprep.mubr.f32.mxu1 %v13510_v10  ;;  %v3059_v57 = vmax.f32 %v3057_v25, %v3058_v40  ;;  %v10185_v24 = vpack.c.bf16 %v3916_v39, %v3904_v47  ;;  %v3569_v34 = vld [vmem:[%s13377_s17 + $0xe48] sm:$0xff]  ;;  %v10125_v2 = vpack.c.bf16 %v3556_v55, %v3544_v37  ;;  %v10187_v54 = vpack.c.bf16 %v3941_v27, %v3929_v48  ;;  %v3928_v49 = vld [vmem:[%s13377_s17 + $0x1980] sm:$0xff] }
 0x778   :  { %4384 = vmatmul.mubr.f32.vlgmr.msra.gmra.mrb[16].mxu1 %v13507_v12  ;;  %v3082_v26 = vmax.f32 %v3080_v46, %v3081_v59  ;;  %v3581_v52 = vld [vmem:[%s13377_s17 + $0xea8] sm:$0xff]  ;;  %v3940_v63 = vld [vmem:[%s13377_s17 + $0x19e0] sm:$0xff]  ;;  %vm4316_vm11 = vcmask 982016  }
 0x779   :  { %v3060_v4 = vrot.slane %v3059_v57, 1  ;;  %10182 = vmatpush1.bf16.msra.mxu1 %v10181_v50  ;;  %10122 = vmatpush1.bf16.msra.mxu0 %v10121_v53  ;;  %v3568_v31 = vld [vmem:[%s13377_s17 + $0xe40] sm:$0xff]  ;;  %v10127_v13 = vpack.c.bf16 %v3581_v52, %v3569_v34  ;;  %v3953_v62 = vld [vmem:[%s13377_s17 + $0x1a48] sm:$0xff]  ;;  %v10189_v29 = vpack.c.bf16 %v3940_v63, %v3928_v49 }
 0x77a   :  { %v3083_v35 = vrot.slane %v3082_v26, 1  ;;  %10184 = vmatprep.subr.bf16.mxu1 %v10183_v41  ;;  %10124 = vmatprep.subr.bf16.mxu0 %v10123_v51  ;;  %v3580_v44 = vld [vmem:[%s13377_s17 + $0xea0] sm:$0xff]  ;;  %v3965_v15 = vld [vmem:[%s13377_s17 + $0x1aa8] sm:$0xff] }
 0x77b   :  { %v3061_v36 = vmax.f32 %v3059_v57, %v3060_v4  ;;  %v3593_v25 = vld [vmem:[%s13377_s17 + $0xf08] sm:$0xff]  ;;  %v10191_v40 = vpack.c.bf16 %v3965_v15, %v3953_v62  ;;  %v3952_v59 = vld [vmem:[%s13377_s17 + $0x1a40] sm:$0xff] }
 0x77c   :  { %v3084_v32 = vmax.f32 %v3082_v26, %v3083_v35  ;;  %v3605_v46 = vld [vmem:[%s13377_s17 + $0xf68] sm:$0xff]  ;;  %v3964_v57 = vld [vmem:[%s13377_s17 + $0x1aa0] sm:$0xff]  ;;  %v10129_v26 = vpack.c.bf16 %v3580_v44, %v3568_v31 }
 0x77d   :  { %10186 = vmatpush1.bf16.msra.mxu1 %v10185_v24  ;;  %10126 = vmatpush1.bf16.msra.mxu0 %v10125_v2  ;;  %v3977_v4 = vld [vmem:[%s13377_s17 + $0x1b08] sm:$0xff]  ;;  %v3604_v43 = vld [vmem:[%s13377_s17 + $0xf60] sm:$0xff]  ;;  %v10193_v7 = vpack.c.bf16 %v3964_v57, %v3952_v59 }
 0x77e   :  { %v13515_v21 = vsel %vm560_vm10, %v3084_v32, %v3061_v36  ;;  %10188 = vmatprep.subr.bf16.mxu1 %v10187_v54  ;;  %v3989_v35 = vld [vmem:[%s13377_s17 + $0x1b68] sm:$0xff]  ;;  %10128 = vmatprep.subr.bf16.mxu0 %v10127_v13  ;;  %v10131_v36 = vpack.c.bf16 %v3605_v46, %v3593_v25  ;;  %v3592_v32 = vld [vmem:[%s13377_s17 + $0xf00] sm:$0xff] }
 0x77f   :  { %v3617_v45 = vld [vmem:[%s13377_s17 + $0xfc8] sm:$0xff]  ;;  %v10195_v28 = vpack.c.bf16 %v3989_v35, %v3977_v4  ;;  %v3976_v5 = vld [vmem:[%s13377_s17 + $0x1b00] sm:$0xff]  ;;  %v10133_v61 = vpack.c.bf16 %v3604_v43, %v3592_v32 }
 0x780   :  { %v3629_v16 = vld [vmem:[%s13377_s17 + $0x1028] sm:$0xff]  ;;  %v3988_v60 = vld [vmem:[%s13377_s17 + $0x1b60] sm:$0xff] }
 0x781   :  { %10190 = vmatpush1.bf16.msra.mxu1 %v10189_v29  ;;  %10130 = vmatpush1.bf16.msra.mxu0 %v10129_v26  ;;  %v4001_v22 = vld [vmem:[%s13377_s17 + $0x1bc8] sm:$0xff]  ;;  %v10135_v17 = vpack.c.bf16 %v3629_v16, %v3617_v45  ;;  %v3616_v1 = vld [vmem:[%s13377_s17 + $0xfc0] sm:$0xff]  ;;  %v10197_v20 = vpack.c.bf16 %v3988_v60, %v3976_v5 }
 0x782   :  { %10192 = vmatprep.subr.bf16.mxu1 %v10191_v40  ;;  %v4013_v19 = vld [vmem:[%s13377_s17 + $0x1c28] sm:$0xff]  ;;  %10132 = vmatprep.subr.bf16.mxu0 %v10131_v36  ;;  %v3628_v18 = vld [vmem:[%s13377_s17 + $0x1020] sm:$0xff] }
 0x783   :  { %v3641_v30 = vld [vmem:[%s13377_s17 + $0x1088] sm:$0xff]  ;;  %v10199_v50 = vpack.c.bf16 %v4013_v19, %v4001_v22  ;;  %v4000_v53 = vld [vmem:[%s13377_s17 + $0x1bc0] sm:$0xff]  ;;  %v10137_v11 = vpack.c.bf16 %v3628_v18, %v3616_v1 }
 0x784   :  { %v3653_v23 = vld [vmem:[%s13377_s17 + $0x10e8] sm:$0xff]  ;;  %v4012_v42 = vld [vmem:[%s13377_s17 + $0x1c20] sm:$0xff] }
 0x785   :  { %10194 = vmatpush1.bf16.msra.mxu1 %v10193_v7  ;;  %10134 = vmatpush1.bf16.msra.mxu0 %v10133_v61  ;;  %v4025_v38 = vld [vmem:[%s13377_s17 + $0x1c88] sm:$0xff]  ;;  %v10139_v6 = vpack.c.bf16 %v3653_v23, %v3641_v30  ;;  %v3640_v47 = vld [vmem:[%s13377_s17 + $0x1080] sm:$0xff]  ;;  %v10201_v51 = vpack.c.bf16 %v4012_v42, %v4000_v53 }
 0x786   :  { %10196 = vmatprep.subr.bf16.mxu1 %v10195_v28  ;;  %v4037_v41 = vld [vmem:[%s13377_s17 + $0x1ce8] sm:$0xff]  ;;  %10136 = vmatprep.subr.bf16.mxu0 %v10135_v17  ;;  %v3652_v39 = vld [vmem:[%s13377_s17 + $0x10e0] sm:$0xff] }
 0x787   :  { %v3665_v24 = vld [vmem:[%s13377_s17 + $0x1148] sm:$0xff]  ;;  %v10203_v55 = vpack.c.bf16 %v4037_v41, %v4025_v38  ;;  %v4024_v48 = vld [vmem:[%s13377_s17 + $0x1c80] sm:$0xff]  ;;  %v10141_v34 = vpack.c.bf16 %v3652_v39, %v3640_v47 }
 0x788   :  { %v3677_v37 = vld [vmem:[%s13377_s17 + $0x11a8] sm:$0xff]  ;;  %v4036_v27 = vld [vmem:[%s13377_s17 + $0x1ce0] sm:$0xff] }
 0x789   :  { %10198 = vmatpush1.bf16.msra.mxu1 %v10197_v20  ;;  %10138 = vmatpush1.bf16.msra.mxu0 %v10137_v11  ;;  %v4049_v52 = vld [vmem:[%s13377_s17 + $0x1d48] sm:$0xff]  ;;  %v10143_v54 = vpack.c.bf16 %v3677_v37, %v3665_v24  ;;  %v3664_v49 = vld [vmem:[%s13377_s17 + $0x1140] sm:$0xff]  ;;  %v10205_v31 = vpack.c.bf16 %v4036_v27, %v4024_v48 }
 0x78a   :  { %10200 = vmatprep.subr.bf16.mxu1 %v10199_v50  ;;  %v4061_v2 = vld [vmem:[%s13377_s17 + $0x1da8] sm:$0xff]  ;;  %10140 = vmatprep.subr.bf16.mxu0 %v10139_v6  ;;  %v3676_v63 = vld [vmem:[%s13377_s17 + $0x11a0] sm:$0xff] }
 0x78b   :  { %v3689_v13 = vld [vmem:[%s13377_s17 + $0x1208] sm:$0xff]  ;;  %v10207_v62 = vpack.c.bf16 %v4061_v2, %v4049_v52  ;;  %v4048_v15 = vld [vmem:[%s13377_s17 + $0x1d40] sm:$0xff]  ;;  %v10145_v25 = vpack.c.bf16 %v3676_v63, %v3664_v49 }
 0x78c   :  { %v3701_v44 = vld [vmem:[%s13377_s17 + $0x1268] sm:$0xff]  ;;  %v4060_v29 = vld [vmem:[%s13377_s17 + $0x1da0] sm:$0xff] }
 0x78d   :  { %10202 = vmatpush1.bf16.msra.mxu1 %v10201_v51  ;;  %10142 = vmatpush1.bf16.msra.mxu0 %v10141_v34  ;;  %v4073_v46 = vld [vmem:[%s13377_s17 + $0x1e08] sm:$0xff]  ;;  %v10147_v59 = vpack.c.bf16 %v3701_v44, %v3689_v13  ;;  %v3688_v57 = vld [vmem:[%s13377_s17 + $0x1200] sm:$0xff]  ;;  %v10209_v4 = vpack.c.bf16 %v4060_v29, %v4048_v15 }
 0x78e   :  { %10204 = vmatprep.subr.bf16.mxu1 %v10203_v55  ;;  %v4085_v40 = vld [vmem:[%s13377_s17 + $0x1e68] sm:$0xff]  ;;  %10144 = vmatprep.subr.bf16.mxu0 %v10143_v54  ;;  %v3700_v26 = vld [vmem:[%s13377_s17 + $0x1260] sm:$0xff] }
 0x78f   :  { %v3713_v35 = vld [vmem:[%s13377_s17 + $0x12c8] sm:$0xff]  ;;  %v10211_v32 = vpack.c.bf16 %v4085_v40, %v4073_v46  ;;  %v4072_v43 = vld [vmem:[%s13377_s17 + $0x1e00] sm:$0xff]  ;;  %v10149_v45 = vpack.c.bf16 %v3700_v26, %v3688_v57 }
 0x790   :  { %v3725_v36 = vld [vmem:[%s13377_s17 + $0x1328] sm:$0xff]  ;;  %v4084_v7 = vld [vmem:[%s13377_s17 + $0x1e60] sm:$0xff] }
 0x791   :  { %10206 = vmatpush1.bf16.msra.mxu1 %v10205_v31  ;;  %10146 = vmatpush1.bf16.msra.mxu0 %v10145_v25  ;;  %v4097_v16 = vld [vmem:[%s13377_s17 + $0x1ec8] sm:$0xff]  ;;  %v10151_v5 = vpack.c.bf16 %v3725_v36, %v3713_v35  ;;  %v3712_v60 = vld [vmem:[%s13377_s17 + $0x12c0] sm:$0xff]  ;;  %v10213_v22 = vpack.c.bf16 %v4084_v7, %v4072_v43 }
 0x792   :  { %10208 = vmatprep.subr.bf16.mxu1 %v10207_v62  ;;  %v4109_v28 = vld [vmem:[%s13377_s17 + $0x1f28] sm:$0xff]  ;;  %10148 = vmatprep.subr.bf16.mxu0 %v10147_v59  ;;  %v3724_v61 = vld [vmem:[%s13377_s17 + $0x1320] sm:$0xff] }
 0x793   :  { %v3737_v19 = vld [vmem:[%s13377_s17 + $0x1388] sm:$0xff]  ;;  %v10215_v1 = vpack.c.bf16 %v4109_v28, %v4097_v16  ;;  %v4096_v18 = vld [vmem:[%s13377_s17 + $0x1ec0] sm:$0xff]  ;;  %v10153_v30 = vpack.c.bf16 %v3724_v61, %v3712_v60 }
 0x794   :  { %v3749_v17 = vld [vmem:[%s13377_s17 + $0x13e8] sm:$0xff]  ;;  %v4108_v20 = vld [vmem:[%s13377_s17 + $0x1f20] sm:$0xff] }
 0x795   :  { %10210 = vmatpush1.bf16.msra.mxu1 %v10209_v4  ;;  %10150 = vmatpush1.bf16.msra.mxu0 %v10149_v45  ;;  %v4121_v23 = vld [vmem:[%s13377_s17 + $0x1f88] sm:$0xff]  ;;  %v10155_v53 = vpack.c.bf16 %v3749_v17, %v3737_v19  ;;  %v3736_v42 = vld [vmem:[%s13377_s17 + $0x1380] sm:$0xff]  ;;  %v10217_v38 = vpack.c.bf16 %v4108_v20, %v4096_v18 }
 0x796   :  { %10212 = vmatprep.subr.bf16.mxu1 %v10211_v32  ;;  %v4133_v50 = vld [vmem:[%s13377_s17 + $0x1fe8] sm:$0xff]  ;;  %10152 = vmatprep.subr.bf16.mxu0 %v10151_v5  ;;  %v3748_v11 = vld [vmem:[%s13377_s17 + $0x13e0] sm:$0xff] }
 0x797   :  { %v3761_v41 = vld [vmem:[%s13377_s17 + $0x1448] sm:$0xff]  ;;  %v10219_v47 = vpack.c.bf16 %v4133_v50, %v4121_v23  ;;  %v4120_v39 = vld [vmem:[%s13377_s17 + $0x1f80] sm:$0xff]  ;;  %v10157_v24 = vpack.c.bf16 %v3748_v11, %v3736_v42 }
 0x798   :  { %v3773_v6 = vld [vmem:[%s13377_s17 + $0x14a8] sm:$0xff]  ;;  %v4132_v51 = vld [vmem:[%s13377_s17 + $0x1fe0] sm:$0xff] }
 0x799   :  { %10214 = vmatpush1.bf16.msra.mxu1 %v10213_v22  ;;  %10154 = vmatpush1.bf16.msra.mxu0 %v10153_v30  ;;  %v4145_v37 = vld [vmem:[%s13377_s17 + $0x2048] sm:$0xff]  ;;  %v10159_v48 = vpack.c.bf16 %v3773_v6, %v3761_v41  ;;  %v3760_v27 = vld [vmem:[%s13377_s17 + $0x1440] sm:$0xff]  ;;  %v10221_v52 = vpack.c.bf16 %v4132_v51, %v4120_v39  ;;  %v2844_v41 = vpop.xlane.xlu0 %2843 }
 0x79a   :  { %10216 = vmatprep.subr.bf16.mxu1 %v10215_v1  ;;  %v4157_v55 = vld [vmem:[%s13377_s17 + $0x20a8] sm:$0xff]  ;;  %10156 = vmatprep.subr.bf16.mxu0 %v10155_v53  ;;  %v3772_v34 = vld [vmem:[%s13377_s17 + $0x14a0] sm:$0xff]  ;;  %12459 = vrcp.f32 %v2844_v41 }
 0x79b   :  { %v3785_v2 = vld [vmem:[%s13377_s17 + $0x1508] sm:$0xff]  ;;  %v10223_v49 = vpack.c.bf16 %v4157_v55, %v4145_v37  ;;  %v4144_v63 = vld [vmem:[%s13377_s17 + $0x2040] sm:$0xff]  ;;  %v10161_v13 = vpack.c.bf16 %v3772_v34, %v3760_v27 }
 0x79c   :  { %v3797_v54 = vld [vmem:[%s13377_s17 + $0x1568] sm:$0xff]  ;;  %v4156_v31 = vld [vmem:[%s13377_s17 + $0x20a0] sm:$0xff] }
 0x79d   :  { %10218 = vmatpush1.bf16.msra.mxu1 %v10217_v38  ;;  %10158 = vmatpush1.bf16.msra.mxu0 %v10157_v24  ;;  %v4169_v44 = vld [vmem:[%s13377_s17 + $0x2108] sm:$0xff]  ;;  %v10163_v15 = vpack.c.bf16 %v3797_v54, %v3785_v2  ;;  %v3784_v29 = vld [vmem:[%s13377_s17 + $0x1500] sm:$0xff]  ;;  %v10225_v46 = vpack.c.bf16 %v4156_v31, %v4144_v63  ;;  %v3127_v2 = vld [vmem:[%s13377_s17 + $0x78] sm:$0xff] }
 0x79e   :  { %10220 = vmatprep.subr.bf16.mxu1 %v10219_v47  ;;  %v4181_v62 = vld [vmem:[%s13377_s17 + $0x2168] sm:$0xff]  ;;  %10160 = vmatprep.subr.bf16.mxu0 %v10159_v48  ;;  %v3796_v25 = vld [vmem:[%s13377_s17 + $0x1560] sm:$0xff] }
 0x79f   :  { %v3809_v40 = vld [vmem:[%s13377_s17 + $0x15c8] sm:$0xff]  ;;  %v10227_v57 = vpack.c.bf16 %v4181_v62, %v4169_v44  ;;  %v4168_v26 = vld [vmem:[%s13377_s17 + $0x2100] sm:$0xff]  ;;  %v10165_v35 = vpack.c.bf16 %v3796_v25, %v3784_v29 }
 0x7a0   :  { %v3821_v59 = vld [vmem:[%s13377_s17 + $0x1628] sm:$0xff]  ;;  %v4180_v4 = vld [vmem:[%s13377_s17 + $0x2160] sm:$0xff] }
 0x7a1   :  { %10222 = vmatpush1.bf16.msra.mxu1 %v10221_v52  ;;  %10162 = vmatpush1.bf16.msra.mxu0 %v10161_v13  ;;  %v4193_v36 = vld [vmem:[%s13377_s17 + $0x21c8] sm:$0xff]  ;;  %v10167_v43 = vpack.c.bf16 %v3821_v59, %v3809_v40  ;;  %v3808_v7 = vld [vmem:[%s13377_s17 + $0x15c0] sm:$0xff]  ;;  %v10229_v16 = vpack.c.bf16 %v4180_v4, %v4168_v26  ;;  %v3115_v52 = vld [vmem:[%s13377_s17 + $0x18] sm:$0xff] }
 0x7a2   :  { %10224 = vmatprep.subr.bf16.mxu1 %v10223_v49  ;;  %v4205_v32 = vld [vmem:[%s13377_s17 + $0x2228] sm:$0xff]  ;;  %10164 = vmatprep.subr.bf16.mxu0 %v10163_v15  ;;  %v3820_v45 = vld [vmem:[%s13377_s17 + $0x1620] sm:$0xff]  ;;  %v10239_v49 = vpack.c.bf16 %v3127_v2, %v3115_v52 }
 0x7a3   :  { %v3833_v28 = vld [vmem:[%s13377_s17 + $0x1688] sm:$0xff]  ;;  %v10231_v60 = vpack.c.bf16 %v4205_v32, %v4193_v36  ;;  %v4192_v61 = vld [vmem:[%s13377_s17 + $0x21c0] sm:$0xff]  ;;  %v10169_v19 = vpack.c.bf16 %v3820_v45, %v3808_v7  ;;  %v3126_v36 = vld [vmem:[%s13377_s17 + $0x70] sm:$0xff] }
 0x7a4   :  { %v3845_v5 = vld [vmem:[%s13377_s17 + $0x16e8] sm:$0xff]  ;;  %v4204_v22 = vld [vmem:[%s13377_s17 + $0x2220] sm:$0xff]  ;;  %v12460_v63 = vpop.eup %12459 }
 0x7a5   :  { %10226 = vmatpush1.bf16.msra.mxu1 %v10225_v46  ;;  %10166 = vmatpush1.bf16.msra.mxu0 %v10165_v35  ;;  %v4217_v17 = vld [vmem:[%s13377_s17 + $0x2288] sm:$0xff]  ;;  %v10171_v18 = vpack.c.bf16 %v3845_v5, %v3833_v28  ;;  %v3832_v20 = vld [vmem:[%s13377_s17 + $0x1680] sm:$0xff]  ;;  %v10233_v23 = vpack.c.bf16 %v4204_v22, %v4192_v61  ;;  %v3114_v35 = vld [vmem:[%s13377_s17 + $0x10] sm:$0xff] }
 0x7a6   :  { %10228 = vmatprep.subr.bf16.mxu1 %v10227_v57  ;;  %v4229_v1 = vld [vmem:[%s13377_s17 + $0x22e8] sm:$0xff]  ;;  %10168 = vmatprep.subr.bf16.mxu0 %v10167_v43  ;;  %v3844_v30 = vld [vmem:[%s13377_s17 + $0x16e0] sm:$0xff]  ;;  %v3139_v28 = vld [vmem:[%s13377_s17 + $0xd8] sm:$0xff]  ;;  %v10241_v22 = vpack.c.bf16 %v3126_v36, %v3114_v35 }
 0x7a7   :  { %v10235_v50 = vpack.c.bf16 %v4229_v1, %v4217_v17  ;;  %v4216_v53 = vld [vmem:[%s13377_s17 + $0x2280] sm:$0xff]  ;;  %v10173_v11 = vpack.c.bf16 %v3844_v30, %v3832_v20  ;;  %v3857_v6 = vld [vmem:[%s13377_s17 + $0x1748] sm:$0xff]  ;;  %v3151_v5 = vld [vmem:[%s13377_s17 + $0x138] sm:$0xff] }
 0x7a8   :  { %v4228_v42 = vld [vmem:[%s13377_s17 + $0x22e0] sm:$0xff]  ;;  %v3869_v47 = vld [vmem:[%s13377_s17 + $0x17a8] sm:$0xff]  ;;  %v3138_v1 = vld [vmem:[%s13377_s17 + $0xd0] sm:$0xff] }
 0x7a9   :  { %10230 = vmatpush1.bf16.msra.mxu1 %v10229_v16  ;;  %10170 = vmatpush1.bf16.msra.mxu0 %v10169_v19  ;;  %v10237_v38 = vpack.c.bf16 %v4228_v42, %v4216_v53  ;;  %v10175_v39 = vpack.c.bf16 %v3869_v47, %v3857_v6  ;;  %v3856_v51 = vld [vmem:[%s13377_s17 + $0x1740] sm:$0xff]  ;;  %v3117_v55 = vld [vmem:[%s13377_s17 + $0x28] sm:$0xff]  ;;  %v3150_v30 = vld [vmem:[%s13377_s17 + $0x130] sm:$0xff]  ;;  %v10243_v53 = vpack.c.bf16 %v3151_v5, %v3139_v28 }
 0x7aa   :  { %10232 = vmatprep.subr.bf16.mxu1 %v10231_v60  ;;  %10172 = vmatprep.subr.bf16.mxu0 %v10171_v18  ;;  %v3868_v24 = vld [vmem:[%s13377_s17 + $0x17a0] sm:$0xff]  ;;  %v3129_v48 = vld [vmem:[%s13377_s17 + $0x88] sm:$0xff]  ;;  %v3163_v42 = vld [vmem:[%s13377_s17 + $0x198] sm:$0xff]  ;;  %v10245_v41 = vpack.c.bf16 %v3150_v30, %v3138_v1 }
 0x7ab   :  { %v10177_v37 = vpack.c.bf16 %v3868_v24, %v3856_v51  ;;  %v4241_v27 = vld [vmem:[%s13377_s17 + $0x2348] sm:$0xff]  ;;  %v10427_v34 = vpack.c.bf16 %v3129_v48, %v3117_v55  ;;  %v4240_v54 = vld [vmem:[%s13377_s17 + $0x2340] sm:$0xff]  ;;  %v3162_v51 = vld [vmem:[%s13377_s17 + $0x190] sm:$0xff] }
 0x7ac   :  { %v3116_v57 = vld [vmem:[%s13377_s17 + $0x20] sm:$0xff]  ;;  %v3141_v7 = vld [vmem:[%s13377_s17 + $0xe8] sm:$0xff]  ;;  %v3210_v36 = vld [vmem:[%s13377_s17 + $0x310] sm:$0xff] }
 0x7ad   :  { %10234 = vmatpush1.bf16.msra.mxu1 %v10233_v23  ;;  %10174 = vmatpush1.bf16.msra.mxu0 %v10173_v11  ;;  %v3128_v26 = vld [vmem:[%s13377_s17 + $0x80] sm:$0xff]  ;;  %v3153_v45 = vld [vmem:[%s13377_s17 + $0x148] sm:$0xff]  ;;  %v3175_v11 = vld [vmem:[%s13377_s17 + $0x1f8] sm:$0xff] }
 0x7ae   :  { %10236 = vmatprep.subr.bf16.mxu1 %v10235_v50  ;;  %10176 = vmatprep.subr.bf16.mxu0 %v10175_v39  ;;  %v10429_v16 = vpack.c.bf16 %v3128_v26, %v3116_v57  ;;  %v3140_v19 = vld [vmem:[%s13377_s17 + $0xe0] sm:$0xff]  ;;  %v10431_v20 = vpack.c.bf16 %v3153_v45, %v3141_v7  ;;  %v3165_v23 = vld [vmem:[%s13377_s17 + $0x1a8] sm:$0xff]  ;;  %v10247_v24 = vpack.c.bf16 %v3175_v11, %v3163_v42  ;;  %v3247_v28 = vld [vmem:[%s13377_s17 + $0x438] sm:$0xff] }
 0x7af   :  { %v3152_v17 = vld [vmem:[%s13377_s17 + $0x140] sm:$0xff]  ;;  %v3177_v50 = vld [vmem:[%s13377_s17 + $0x208] sm:$0xff]  ;;  %v3259_v42 = vld [vmem:[%s13377_s17 + $0x498] sm:$0xff] }
 0x7b0   :  { %v10435_v6 = vpack.c.bf16 %v3177_v50, %v3165_v23  ;;  %v3164_v47 = vld [vmem:[%s13377_s17 + $0x1a0] sm:$0xff]  ;;  %v3189_v55 = vld [vmem:[%s13377_s17 + $0x268] sm:$0xff]  ;;  %v3246_v23 = vld [vmem:[%s13377_s17 + $0x430] sm:$0xff] }
 0x7b1   :  { %10238 = vmatpush1.bf16.msra.mxu1 %v10237_v38  ;;  %10178 = vmatpush1.bf16.msra.mxu0 %v10177_v37  ;;  %v10433_v38 = vpack.c.bf16 %v3152_v17, %v3140_v19  ;;  %v3176_v39 = vld [vmem:[%s13377_s17 + $0x200] sm:$0xff]  ;;  %v3174_v37 = vld [vmem:[%s13377_s17 + $0x1f0] sm:$0xff]  ;;  %v3201_v48 = vld [vmem:[%s13377_s17 + $0x2c8] sm:$0xff] }
 0x7b2   :  { %4521 = vmatprep.subr.mxu1 %v4241_v27  ;;  %10428 = vmatprep.subr.bf16.mxu0 %v10427_v34  ;;  %v3187_v27 = vld [vmem:[%s13377_s17 + $0x258] sm:$0xff]  ;;  %v10437_v52 = vpack.c.bf16 %v3176_v39, %v3164_v47  ;;  %v10249_v2 = vpack.c.bf16 %v3174_v37, %v3162_v51  ;;  %v3224_v35 = vld [vmem:[%s13377_s17 + $0x380] sm:$0xff]  ;;  %v3237_v7 = vld [vmem:[%s13377_s17 + $0x3e8] sm:$0xff] }
 0x7b3   :  { %v3199_v34 = vld [vmem:[%s13377_s17 + $0x2b8] sm:$0xff]  ;;  %v3249_v45 = vld [vmem:[%s13377_s17 + $0x448] sm:$0xff]  ;;  %v3236_v17 = vld [vmem:[%s13377_s17 + $0x3e0] sm:$0xff] }
 0x7b4   :  { %v10447_v19 = vpack.c.bf16 %v3249_v45, %v3237_v7  ;;  %v3248_v1 = vld [vmem:[%s13377_s17 + $0x440] sm:$0xff]  ;;  %v3261_v50 = vld [vmem:[%s13377_s17 + $0x4a8] sm:$0xff]  ;;  %v3271_v11 = vld [vmem:[%s13377_s17 + $0x4f8] sm:$0xff] }
 0x7b5   :  { %4522 = vmatpush1.msra.mxu1 %v4240_v54  ;;  %v10439_v54 = vpack.c.bf16 %v3201_v48, %v3189_v55  ;;  %v3260_v47 = vld [vmem:[%s13377_s17 + $0x4a0] sm:$0xff]  ;;  %v3258_v51 = vld [vmem:[%s13377_s17 + $0x490] sm:$0xff]  ;;  %v3285_v55 = vld [vmem:[%s13377_s17 + $0x568] sm:$0xff] }
 0x7b6   :  { %10240 = vmatprep.subr.bf16.mxu1 %v10239_v49  ;;  %v3188_v49 = vld [vmem:[%s13377_s17 + $0x260] sm:$0xff]  ;;  %v3270_v37 = vld [vmem:[%s13377_s17 + $0x4f0] sm:$0xff]  ;;  %v3297_v48 = vld [vmem:[%s13377_s17 + $0x5c8] sm:$0xff] }
 0x7b7   :  { %v3272_v39 = vld [vmem:[%s13377_s17 + $0x500] sm:$0xff]  ;;  %v3333_v7 = vld [vmem:[%s13377_s17 + $0x6e8] sm:$0xff] }
 0x7b8   :  { %v3345_v45 = vld [vmem:[%s13377_s17 + $0x748] sm:$0xff] }
 0x842   :  { %v2914_v31 = vpop.f32.mrb[32].mxu0 }
 0x843   :  { %v2990_v13 = vmul.f32 %v12460_v63, %v2914_v31  ;;  %v2916_v44 = vpop.f32.mrb[33].mxu0  ;;  %v3186_v31 = vld [vmem:[%s13377_s17 + $0x250] sm:$0xff] }
 0x844   :  { %v2991_v62 = vmul.f32 %v12460_v63, %v2916_v44  ;;  %v3198_v44 = vld [vmem:[%s13377_s17 + $0x2b0] sm:$0xff] }
 0x845   :  { %v10253_v57 = vpack.c.bf16 %v3198_v44, %v3186_v31  ;;  %v3282_v31 = vld [vmem:[%s13377_s17 + $0x550] sm:$0xff] }
 0x846   :  { %v12365_v15 = vpack.i.bf16 %v2991_v62, %v2990_v13  ;;  %v2985_v29 = vpop.f32.mrb[34].mxu0  ;;  %v10251_v13 = vpack.c.bf16 %v3199_v34, %v3187_v27  ;;  %v3213_v62 = vld [vmem:[%s13377_s17 + $0x328] sm:$0xff]  ;;  %v3283_v27 = vld [vmem:[%s13377_s17 + $0x558] sm:$0xff]  ;;  %v3294_v44 = vld [vmem:[%s13377_s17 + $0x5b0] sm:$0xff] }
 0x847   :  { %v9672_v25 = vpop.f32.mrb[35].mxu0  ;;  %v2992_v46 = vmul.f32 %v12460_v63, %v2985_v29  ;;  %v3200_v63 = vld [vmem:[%s13377_s17 + $0x2c0] sm:$0xff]  ;;  %v3211_v29 = vld [vmem:[%s13377_s17 + $0x318] sm:$0xff] }
 0x848   :  { %12366 = vrot.lane.b32.xlu1 %v12365_v15, %s12517_s1  ;;  %v3225_v15 = vld [vmem:[%s13377_s17 + $0x388] sm:$0xff]  ;;  %v3223_v25 = vld [vmem:[%s13377_s17 + $0x378] sm:$0xff] }
 0x849   :  { %v10443_v26 = vpack.c.bf16 %v3225_v15, %v3213_v62  ;;  %v3295_v34 = vld [vmem:[%s13377_s17 + $0x5b8] sm:$0xff]  ;;  %v3309_v62 = vld [vmem:[%s13377_s17 + $0x628] sm:$0xff] }
 0x84a   :  { %v3321_v15 = vld [vmem:[%s13377_s17 + $0x688] sm:$0xff] }
 0x84b   :  { %v13647_v40 = vpop.f32.mrb[16].mxu1 }
 0x84c   :  { %3104 = vrot.lane.b32.xlu1 %v2992_v46, %s12517_s1  ;;  %v13649_v59 = vpop.f32.mrb[17].mxu1  ;;  %v10441_v46 = vpack.c.bf16 %v3200_v63, %v3188_v49  ;;  %v3284_v49 = vld [vmem:[%s13377_s17 + $0x560] sm:$0xff]  ;;  %s12524_s1 = smov 18  }
 0x84d   :  { %v3296_v63 = vld [vmem:[%s13377_s17 + $0x5c0] sm:$0xff]  ;;  %s15511_s5 = sld [smem:[%s15933_s0 + %s12524_s1]]  }
 0x8ba   :  { %v12367_v4 = vpop.permute.xlu1 %12366 }
 0x8bb   :  { %v12369_v32 = vunpack.i.h.bf16 %v12367_v4  ;;  %v12368_v43 = vunpack.i.l.bf16 %v12367_v4  ;;  %v3212_v4 = vld [vmem:[%s13377_s17 + $0x320] sm:$0xff] }
 0x8bc   :  { %v10445_v5 = vpack.c.bf16 %v3224_v35, %v3212_v4  ;;  %v3308_v4 = vld [vmem:[%s13377_s17 + $0x620] sm:$0xff] }
 0x8bd   :  { %v13660_v60 = vsel %vm370_vm5, %v12368_v43, %v12369_v32  ;;  %v13664_v61 = vsel %vm370_vm5, %v13515_v21, %v12368_v43  ;;  %v3222_v43 = vld [vmem:[%s13377_s17 + $0x370] sm:$0xff]  ;;  %v3320_v35 = vld [vmem:[%s13377_s17 + $0x680] sm:$0xff] }
 0x8be   :  { %4454 = vmatprep.mubr.f32.mxu0 %v13660_v60  ;;  %v13670_v18 = vpop.permute.xlu1 %3104 }
 0x8bf   :  { %4455 = vmatmul.mubr.f32.vlgmr.msra.gmra.mrb[36].mxu0 %v13664_v61  ;;  %9016 = vmatprep.mubr.msk.f32.mxu1 %vm4316_vm11, %v13670_v18  ;;  %v13680_v21 = vsel %vm370_vm5, %v12369_v32, %v13670_v18  ;;  %v10255_v32 = vpack.c.bf16 %v3223_v25, %v3211_v29  ;;  %v3307_v29 = vld [vmem:[%s13377_s17 + $0x618] sm:$0xff]  ;;  %vm6235_vm5 = vcmask 518144  }
 0x8c0   :  { %10430 = vmatpush1.bf16.msra.mxu0 %v10429_v16  ;;  %4526 = vmatmul.mubr.f32.vlgmr.msra.gmra.mrb[18].mxu1 %v13680_v21  ;;  %v3235_v16 = vld [vmem:[%s13377_s17 + $0x3d8] sm:$0xff] }
 0x8c1   :  { %10242 = vmatpush1.bf16.msra.mxu1 %v10241_v22  ;;  %4809 = vmatprep.mubr.f32.mxu0 %v13510_v10  ;;  %v10257_v22 = vpack.c.bf16 %v3222_v43, %v3210_v36  ;;  %v10259_v30 = vpack.c.bf16 %v3247_v28, %v3235_v16  ;;  %v3319_v25 = vld [vmem:[%s13377_s17 + $0x678] sm:$0xff]  ;;  %v3306_v36 = vld [vmem:[%s13377_s17 + $0x610] sm:$0xff] }
 0x8c2   :  { %4596 = vmatprep.mubr.f32.mxu1 %v13510_v10  ;;  %10432 = vmatprep.subr.bf16.mxu0 %v10431_v20  ;;  %v3234_v20 = vld [vmem:[%s13377_s17 + $0x3d0] sm:$0xff]  ;;  %v3331_v16 = vld [vmem:[%s13377_s17 + $0x6d8] sm:$0xff] }
 0x8c3   :  { %10244 = vmatprep.subr.bf16.mxu1 %v10243_v53  ;;  %v3273_v53 = vld [vmem:[%s13377_s17 + $0x508] sm:$0xff]  ;;  %v3318_v43 = vld [vmem:[%s13377_s17 + $0x670] sm:$0xff]  ;;  %v3343_v28 = vld [vmem:[%s13377_s17 + $0x738] sm:$0xff] }
 0x8c4   :  { %10434 = vmatpush1.bf16.msra.mxu0 %v10433_v38  ;;  %v10449_v38 = vpack.c.bf16 %v3248_v1, %v3236_v17  ;;  %v3332_v17 = vld [vmem:[%s13377_s17 + $0x6e0] sm:$0xff] }
 0x8c5   :  { %10246 = vmatpush1.bf16.msra.mxu1 %v10245_v41  ;;  %10436 = vmatprep.subr.bf16.mxu0 %v10435_v6  ;;  %v10261_v41 = vpack.c.bf16 %v3246_v23, %v3234_v20  ;;  %v10451_v6 = vpack.c.bf16 %v3273_v53, %v3261_v50  ;;  %v3344_v1 = vld [vmem:[%s13377_s17 + $0x740] sm:$0xff]  ;;  %v3330_v20 = vld [vmem:[%s13377_s17 + $0x6d0] sm:$0xff]  ;;  %v3357_v50 = vld [vmem:[%s13377_s17 + $0x7a8] sm:$0xff] }
 0x8c6   :  { %10248 = vmatprep.subr.bf16.mxu1 %v10247_v24  ;;  %v10263_v24 = vpack.c.bf16 %v3271_v11, %v3259_v42  ;;  %v3342_v23 = vld [vmem:[%s13377_s17 + $0x730] sm:$0xff]  ;;  %v3369_v53 = vld [vmem:[%s13377_s17 + $0x808] sm:$0xff]  ;;  %v3355_v42 = vld [vmem:[%s13377_s17 + $0x798] sm:$0xff] }
 0x8c7   :  { %v3367_v11 = vld [vmem:[%s13377_s17 + $0x7f8] sm:$0xff] }
 0x8c8   :  { %10438 = vmatpush1.bf16.msra.mxu0 %v10437_v52  ;;  %v10453_v52 = vpack.c.bf16 %v3272_v39, %v3260_v47  ;;  %v3356_v47 = vld [vmem:[%s13377_s17 + $0x7a0] sm:$0xff] }
 0x8c9   :  { %10250 = vmatpush1.bf16.msra.mxu1 %v10249_v2  ;;  %10440 = vmatprep.subr.bf16.mxu0 %v10439_v54  ;;  %v10265_v2 = vpack.c.bf16 %v3270_v37, %v3258_v51  ;;  %v10455_v54 = vpack.c.bf16 %v3297_v48, %v3285_v55  ;;  %v3368_v39 = vld [vmem:[%s13377_s17 + $0x800] sm:$0xff]  ;;  %v3354_v51 = vld [vmem:[%s13377_s17 + $0x790] sm:$0xff]  ;;  %v3381_v55 = vld [vmem:[%s13377_s17 + $0x868] sm:$0xff] }
 0x8ca   :  { %10252 = vmatprep.subr.bf16.mxu1 %v10251_v13  ;;  %v10267_v13 = vpack.c.bf16 %v3295_v34, %v3283_v27  ;;  %v3366_v37 = vld [vmem:[%s13377_s17 + $0x7f0] sm:$0xff]  ;;  %v3393_v48 = vld [vmem:[%s13377_s17 + $0x8c8] sm:$0xff]  ;;  %v3379_v27 = vld [vmem:[%s13377_s17 + $0x858] sm:$0xff] }
 0x8cb   :  { %v3391_v34 = vld [vmem:[%s13377_s17 + $0x8b8] sm:$0xff] }
 0x8cc   :  { %10442 = vmatpush1.bf16.msra.mxu0 %v10441_v46  ;;  %v10457_v46 = vpack.c.bf16 %v3296_v63, %v3284_v49  ;;  %v3380_v49 = vld [vmem:[%s13377_s17 + $0x860] sm:$0xff] }
 0x8cd   :  { %10254 = vmatpush1.bf16.msra.mxu1 %v10253_v57  ;;  %10444 = vmatprep.subr.bf16.mxu0 %v10443_v26  ;;  %v10269_v57 = vpack.c.bf16 %v3294_v44, %v3282_v31  ;;  %v10459_v26 = vpack.c.bf16 %v3321_v15, %v3309_v62  ;;  %v3392_v63 = vld [vmem:[%s13377_s17 + $0x8c0] sm:$0xff]  ;;  %v3378_v31 = vld [vmem:[%s13377_s17 + $0x850] sm:$0xff]  ;;  %v3405_v62 = vld [vmem:[%s13377_s17 + $0x928] sm:$0xff] }
 0x8ce   :  { %10256 = vmatprep.subr.bf16.mxu1 %v10255_v32  ;;  %v10271_v32 = vpack.c.bf16 %v3319_v25, %v3307_v29  ;;  %v3390_v44 = vld [vmem:[%s13377_s17 + $0x8b0] sm:$0xff]  ;;  %v3417_v15 = vld [vmem:[%s13377_s17 + $0x988] sm:$0xff]  ;;  %v3403_v29 = vld [vmem:[%s13377_s17 + $0x918] sm:$0xff] }
 0x8cf   :  { %v3415_v25 = vld [vmem:[%s13377_s17 + $0x978] sm:$0xff] }
 0x8d0   :  { %10446 = vmatpush1.bf16.msra.mxu0 %v10445_v5  ;;  %v10461_v5 = vpack.c.bf16 %v3320_v35, %v3308_v4  ;;  %v3404_v4 = vld [vmem:[%s13377_s17 + $0x920] sm:$0xff] }
 0x8d1   :  { %10258 = vmatpush1.bf16.msra.mxu1 %v10257_v22  ;;  %10448 = vmatprep.subr.bf16.mxu0 %v10447_v19  ;;  %v10273_v22 = vpack.c.bf16 %v3318_v43, %v3306_v36  ;;  %v10463_v19 = vpack.c.bf16 %v3345_v45, %v3333_v7  ;;  %v3416_v35 = vld [vmem:[%s13377_s17 + $0x980] sm:$0xff]  ;;  %v3402_v36 = vld [vmem:[%s13377_s17 + $0x910] sm:$0xff]  ;;  %v3429_v7 = vld [vmem:[%s13377_s17 + $0x9e8] sm:$0xff] }
 0x8d2   :  { %10260 = vmatprep.subr.bf16.mxu1 %v10259_v30  ;;  %v10275_v30 = vpack.c.bf16 %v3343_v28, %v3331_v16  ;;  %v3414_v43 = vld [vmem:[%s13377_s17 + $0x970] sm:$0xff]  ;;  %v3441_v45 = vld [vmem:[%s13377_s17 + $0xa48] sm:$0xff]  ;;  %v3427_v16 = vld [vmem:[%s13377_s17 + $0x9d8] sm:$0xff] }
 0x8d3   :  { %v3439_v28 = vld [vmem:[%s13377_s17 + $0xa38] sm:$0xff] }
 0x8d4   :  { %10450 = vmatpush1.bf16.msra.mxu0 %v10449_v38  ;;  %v10465_v38 = vpack.c.bf16 %v3344_v1, %v3332_v17  ;;  %v3428_v17 = vld [vmem:[%s13377_s17 + $0x9e0] sm:$0xff] }
 0x8d5   :  { %10262 = vmatpush1.bf16.msra.mxu1 %v10261_v41  ;;  %10452 = vmatprep.subr.bf16.mxu0 %v10451_v6  ;;  %v10277_v41 = vpack.c.bf16 %v3342_v23, %v3330_v20  ;;  %v10467_v6 = vpack.c.bf16 %v3369_v53, %v3357_v50  ;;  %v3440_v1 = vld [vmem:[%s13377_s17 + $0xa40] sm:$0xff]  ;;  %v3426_v20 = vld [vmem:[%s13377_s17 + $0x9d0] sm:$0xff]  ;;  %v3453_v50 = vld [vmem:[%s13377_s17 + $0xaa8] sm:$0xff] }
 0x8d6   :  { %10264 = vmatprep.subr.bf16.mxu1 %v10263_v24  ;;  %v10279_v24 = vpack.c.bf16 %v3367_v11, %v3355_v42  ;;  %v3438_v23 = vld [vmem:[%s13377_s17 + $0xa30] sm:$0xff]  ;;  %v3465_v53 = vld [vmem:[%s13377_s17 + $0xb08] sm:$0xff]  ;;  %v3451_v42 = vld [vmem:[%s13377_s17 + $0xa98] sm:$0xff] }
 0x8d7   :  { %v3463_v11 = vld [vmem:[%s13377_s17 + $0xaf8] sm:$0xff] }
 0x8d8   :  { %10454 = vmatpush1.bf16.msra.mxu0 %v10453_v52  ;;  %v10469_v52 = vpack.c.bf16 %v3368_v39, %v3356_v47  ;;  %v3452_v47 = vld [vmem:[%s13377_s17 + $0xaa0] sm:$0xff] }
 0x8d9   :  { %10266 = vmatpush1.bf16.msra.mxu1 %v10265_v2  ;;  %10456 = vmatprep.subr.bf16.mxu0 %v10455_v54  ;;  %v10281_v2 = vpack.c.bf16 %v3366_v37, %v3354_v51  ;;  %v10471_v54 = vpack.c.bf16 %v3393_v48, %v3381_v55  ;;  %v3464_v39 = vld [vmem:[%s13377_s17 + $0xb00] sm:$0xff]  ;;  %v3450_v51 = vld [vmem:[%s13377_s17 + $0xa90] sm:$0xff]  ;;  %v3477_v55 = vld [vmem:[%s13377_s17 + $0xb68] sm:$0xff] }
 0x8da   :  { %10268 = vmatprep.subr.bf16.mxu1 %v10267_v13  ;;  %v10283_v13 = vpack.c.bf16 %v3391_v34, %v3379_v27  ;;  %v3462_v37 = vld [vmem:[%s13377_s17 + $0xaf0] sm:$0xff]  ;;  %v3489_v48 = vld [vmem:[%s13377_s17 + $0xbc8] sm:$0xff]  ;;  %v3475_v27 = vld [vmem:[%s13377_s17 + $0xb58] sm:$0xff] }
 0x8db   :  { %v3487_v34 = vld [vmem:[%s13377_s17 + $0xbb8] sm:$0xff] }
 0x8dc   :  { %10458 = vmatpush1.bf16.msra.mxu0 %v10457_v46  ;;  %v10473_v46 = vpack.c.bf16 %v3392_v63, %v3380_v49  ;;  %v3476_v49 = vld [vmem:[%s13377_s17 + $0xb60] sm:$0xff] }
 0x8dd   :  { %10270 = vmatpush1.bf16.msra.mxu1 %v10269_v57  ;;  %10460 = vmatprep.subr.bf16.mxu0 %v10459_v26  ;;  %v10285_v57 = vpack.c.bf16 %v3390_v44, %v3378_v31  ;;  %v10475_v26 = vpack.c.bf16 %v3417_v15, %v3405_v62  ;;  %v3488_v63 = vld [vmem:[%s13377_s17 + $0xbc0] sm:$0xff]  ;;  %v3474_v31 = vld [vmem:[%s13377_s17 + $0xb50] sm:$0xff]  ;;  %v3501_v62 = vld [vmem:[%s13377_s17 + $0xc28] sm:$0xff] }
 0x8de   :  { %10272 = vmatprep.subr.bf16.mxu1 %v10271_v32  ;;  %v10287_v32 = vpack.c.bf16 %v3415_v25, %v3403_v29  ;;  %v3486_v44 = vld [vmem:[%s13377_s17 + $0xbb0] sm:$0xff]  ;;  %v3513_v15 = vld [vmem:[%s13377_s17 + $0xc88] sm:$0xff]  ;;  %v3499_v29 = vld [vmem:[%s13377_s17 + $0xc18] sm:$0xff] }
 0x8df   :  { %v3511_v25 = vld [vmem:[%s13377_s17 + $0xc78] sm:$0xff] }
 0x8e0   :  { %10462 = vmatpush1.bf16.msra.mxu0 %v10461_v5  ;;  %v10477_v5 = vpack.c.bf16 %v3416_v35, %v3404_v4  ;;  %v3500_v4 = vld [vmem:[%s13377_s17 + $0xc20] sm:$0xff] }
 0x8e1   :  { %10274 = vmatpush1.bf16.msra.mxu1 %v10273_v22  ;;  %10464 = vmatprep.subr.bf16.mxu0 %v10463_v19  ;;  %v10289_v22 = vpack.c.bf16 %v3414_v43, %v3402_v36  ;;  %v10479_v19 = vpack.c.bf16 %v3441_v45, %v3429_v7  ;;  %v3512_v35 = vld [vmem:[%s13377_s17 + $0xc80] sm:$0xff]  ;;  %v10303_v36 = vpack.c.bf16 %v3511_v25, %v3499_v29  ;;  %v3510_v43 = vld [vmem:[%s13377_s17 + $0xc70] sm:$0xff]  ;;  %v3525_v7 = vld [vmem:[%s13377_s17 + $0xce8] sm:$0xff] }
 0x8e2   :  { %10276 = vmatprep.subr.bf16.mxu1 %v10275_v30  ;;  %v10291_v30 = vpack.c.bf16 %v3439_v28, %v3427_v16  ;;  %v3537_v45 = vld [vmem:[%s13377_s17 + $0xd48] sm:$0xff]  ;;  %v10493_v16 = vpack.c.bf16 %v3512_v35, %v3500_v4  ;;  %v3523_v28 = vld [vmem:[%s13377_s17 + $0xcd8] sm:$0xff]  ;;  %v3596_v4 = vld [vmem:[%s13377_s17 + $0xf20] sm:$0xff] }
 0x8e3   :  { %v3595_v29 = vld [vmem:[%s13377_s17 + $0xf18] sm:$0xff]  ;;  %v3608_v35 = vld [vmem:[%s13377_s17 + $0xf80] sm:$0xff] }
 0x8e4   :  { %10466 = vmatpush1.bf16.msra.mxu0 %v10465_v38  ;;  %v10481_v38 = vpack.c.bf16 %v3440_v1, %v3428_v17  ;;  %v3536_v17 = vld [vmem:[%s13377_s17 + $0xd40] sm:$0xff]  ;;  %v3522_v1 = vld [vmem:[%s13377_s17 + $0xcd0] sm:$0xff]  ;;  %v3607_v25 = vld [vmem:[%s13377_s17 + $0xf78] sm:$0xff] }
 0x8e5   :  { %10278 = vmatpush1.bf16.msra.mxu1 %v10277_v41  ;;  %10468 = vmatprep.subr.bf16.mxu0 %v10467_v6  ;;  %v10293_v41 = vpack.c.bf16 %v3438_v23, %v3426_v20  ;;  %v10483_v6 = vpack.c.bf16 %v3465_v53, %v3453_v50  ;;  %v10495_v20 = vpack.c.bf16 %v3537_v45, %v3525_v7  ;;  %v3549_v23 = vld [vmem:[%s13377_s17 + $0xda8] sm:$0xff] }
 0x8e6   :  { %10280 = vmatprep.subr.bf16.mxu1 %v10279_v24  ;;  %v10295_v24 = vpack.c.bf16 %v3463_v11, %v3451_v42  ;;  %v3561_v50 = vld [vmem:[%s13377_s17 + $0xe08] sm:$0xff]  ;;  %v3547_v42 = vld [vmem:[%s13377_s17 + $0xd98] sm:$0xff] }
 0x8e7   :  { %v3559_v11 = vld [vmem:[%s13377_s17 + $0xdf8] sm:$0xff]  ;;  %v3621_v7 = vld [vmem:[%s13377_s17 + $0xfe8] sm:$0xff] }
 0x8e8   :  { %10470 = vmatpush1.bf16.msra.mxu0 %v10469_v52  ;;  %v10485_v52 = vpack.c.bf16 %v3464_v39, %v3452_v47  ;;  %v3548_v47 = vld [vmem:[%s13377_s17 + $0xda0] sm:$0xff]  ;;  %v3633_v45 = vld [vmem:[%s13377_s17 + $0x1048] sm:$0xff] }
 0x8e9   :  { %10282 = vmatpush1.bf16.msra.mxu1 %v10281_v2  ;;  %10472 = vmatprep.subr.bf16.mxu0 %v10471_v54  ;;  %v10297_v2 = vpack.c.bf16 %v3462_v37, %v3450_v51  ;;  %v10487_v54 = vpack.c.bf16 %v3489_v48, %v3477_v55  ;;  %v3560_v39 = vld [vmem:[%s13377_s17 + $0xe00] sm:$0xff]  ;;  %v3546_v51 = vld [vmem:[%s13377_s17 + $0xd90] sm:$0xff]  ;;  %v3573_v55 = vld [vmem:[%s13377_s17 + $0xe68] sm:$0xff] }
 0x8ea   :  { %10284 = vmatprep.subr.bf16.mxu1 %v10283_v13  ;;  %v10299_v13 = vpack.c.bf16 %v3487_v34, %v3475_v27  ;;  %v3558_v37 = vld [vmem:[%s13377_s17 + $0xdf0] sm:$0xff]  ;;  %v3585_v48 = vld [vmem:[%s13377_s17 + $0xec8] sm:$0xff]  ;;  %v3571_v27 = vld [vmem:[%s13377_s17 + $0xe58] sm:$0xff] }
 0x8eb   :  { %v3583_v34 = vld [vmem:[%s13377_s17 + $0xeb8] sm:$0xff] }
 0x8ec   :  { %10474 = vmatpush1.bf16.msra.mxu0 %v10473_v46  ;;  %v10489_v46 = vpack.c.bf16 %v3488_v63, %v3476_v49  ;;  %v3572_v49 = vld [vmem:[%s13377_s17 + $0xe60] sm:$0xff] }
 0x8ed   :  { %10286 = vmatpush1.bf16.msra.mxu1 %v10285_v57  ;;  %10476 = vmatprep.subr.bf16.mxu0 %v10475_v26  ;;  %v10301_v57 = vpack.c.bf16 %v3486_v44, %v3474_v31  ;;  %v10491_v26 = vpack.c.bf16 %v3513_v15, %v3501_v62  ;;  %v3584_v63 = vld [vmem:[%s13377_s17 + $0xec0] sm:$0xff]  ;;  %v3570_v31 = vld [vmem:[%s13377_s17 + $0xe50] sm:$0xff]  ;;  %v3597_v62 = vld [vmem:[%s13377_s17 + $0xf28] sm:$0xff] }
 0x8ee   :  { %10288 = vmatprep.subr.bf16.mxu1 %v10287_v32  ;;  %v3498_v32 = vld [vmem:[%s13377_s17 + $0xc10] sm:$0xff]  ;;  %v3609_v15 = vld [vmem:[%s13377_s17 + $0xf88] sm:$0xff] }
 0x8ef   :  { %v3582_v44 = vld [vmem:[%s13377_s17 + $0xeb0] sm:$0xff] }
 0x8f0   :  { %10478 = vmatpush1.bf16.msra.mxu0 %v10477_v5  ;;  %v3535_v5 = vld [vmem:[%s13377_s17 + $0xd38] sm:$0xff] }
 0x8f1   :  { %10290 = vmatpush1.bf16.msra.mxu1 %v10289_v22  ;;  %10480 = vmatprep.subr.bf16.mxu0 %v10479_v19  ;;  %v10305_v22 = vpack.c.bf16 %v3510_v43, %v3498_v32  ;;  %v3524_v19 = vld [vmem:[%s13377_s17 + $0xce0] sm:$0xff]  ;;  %v10307_v53 = vpack.c.bf16 %v3535_v5, %v3523_v28  ;;  %v10319_v32 = vpack.c.bf16 %v3607_v25, %v3595_v29  ;;  %v3606_v43 = vld [vmem:[%s13377_s17 + $0xf70] sm:$0xff]  ;;  %v3631_v28 = vld [vmem:[%s13377_s17 + $0x1038] sm:$0xff] }
 0x8f2   :  { %10292 = vmatprep.subr.bf16.mxu1 %v10291_v30  ;;  %v3534_v30 = vld [vmem:[%s13377_s17 + $0xd30] sm:$0xff]  ;;  %v10509_v5 = vpack.c.bf16 %v3608_v35, %v3596_v4  ;;  %v3691_v29 = vld [vmem:[%s13377_s17 + $0x1218] sm:$0xff]  ;;  %v3692_v4 = vld [vmem:[%s13377_s17 + $0x1220] sm:$0xff] }
 0x8f3   :  { %v3703_v25 = vld [vmem:[%s13377_s17 + $0x1278] sm:$0xff]  ;;  %v3704_v35 = vld [vmem:[%s13377_s17 + $0x1280] sm:$0xff] }
 0x8f4   :  { %10482 = vmatpush1.bf16.msra.mxu0 %v10481_v38  ;;  %v10497_v38 = vpack.c.bf16 %v3536_v17, %v3524_v19  ;;  %v10511_v19 = vpack.c.bf16 %v3633_v45, %v3621_v7  ;;  %v3620_v17 = vld [vmem:[%s13377_s17 + $0xfe0] sm:$0xff]  ;;  %v3717_v7 = vld [vmem:[%s13377_s17 + $0x12e8] sm:$0xff] }
 0x8f5   :  { %10294 = vmatpush1.bf16.msra.mxu1 %v10293_v41  ;;  %10484 = vmatprep.subr.bf16.mxu0 %v10483_v6  ;;  %v10309_v41 = vpack.c.bf16 %v3534_v30, %v3522_v1  ;;  %v10499_v6 = vpack.c.bf16 %v3561_v50, %v3549_v23  ;;  %v3632_v1 = vld [vmem:[%s13377_s17 + $0x1040] sm:$0xff]  ;;  %v3630_v23 = vld [vmem:[%s13377_s17 + $0x1030] sm:$0xff]  ;;  %v3645_v50 = vld [vmem:[%s13377_s17 + $0x10a8] sm:$0xff] }
 0x8f6   :  { %10296 = vmatprep.subr.bf16.mxu1 %v10295_v24  ;;  %v10311_v24 = vpack.c.bf16 %v3559_v11, %v3547_v42  ;;  %v3643_v42 = vld [vmem:[%s13377_s17 + $0x1098] sm:$0xff]  ;;  %v3729_v45 = vld [vmem:[%s13377_s17 + $0x1348] sm:$0xff] }
 0x8f7   :  { %v3655_v11 = vld [vmem:[%s13377_s17 + $0x10f8] sm:$0xff] }
 0x8f8   :  { %10486 = vmatpush1.bf16.msra.mxu0 %v10485_v52  ;;  %v10501_v52 = vpack.c.bf16 %v3560_v39, %v3548_v47  ;;  %v3644_v47 = vld [vmem:[%s13377_s17 + $0x10a0] sm:$0xff] }
 0x8f9   :  { %10298 = vmatpush1.bf16.msra.mxu1 %v10297_v2  ;;  %10488 = vmatprep.subr.bf16.mxu0 %v10487_v54  ;;  %v10313_v2 = vpack.c.bf16 %v3558_v37, %v3546_v51  ;;  %v10503_v54 = vpack.c.bf16 %v3585_v48, %v3573_v55  ;;  %v3656_v39 = vld [vmem:[%s13377_s17 + $0x1100] sm:$0xff]  ;;  %v3642_v51 = vld [vmem:[%s13377_s17 + $0x1090] sm:$0xff]  ;;  %v3669_v55 = vld [vmem:[%s13377_s17 + $0x1168] sm:$0xff] }
 0x8fa   :  { %10300 = vmatprep.subr.bf16.mxu1 %v10299_v13  ;;  %v10315_v13 = vpack.c.bf16 %v3583_v34, %v3571_v27  ;;  %v3654_v37 = vld [vmem:[%s13377_s17 + $0x10f0] sm:$0xff]  ;;  %v3681_v48 = vld [vmem:[%s13377_s17 + $0x11c8] sm:$0xff]  ;;  %v3667_v27 = vld [vmem:[%s13377_s17 + $0x1158] sm:$0xff] }
 0x8fb   :  { %v3679_v34 = vld [vmem:[%s13377_s17 + $0x11b8] sm:$0xff] }
 0x8fc   :  { %10490 = vmatpush1.bf16.msra.mxu0 %v10489_v46  ;;  %v10505_v46 = vpack.c.bf16 %v3584_v63, %v3572_v49  ;;  %v3668_v49 = vld [vmem:[%s13377_s17 + $0x1160] sm:$0xff] }
 0x8fd   :  { %10302 = vmatpush1.bf16.msra.mxu1 %v10301_v57  ;;  %10492 = vmatprep.subr.bf16.mxu0 %v10491_v26  ;;  %v10317_v57 = vpack.c.bf16 %v3582_v44, %v3570_v31  ;;  %v10507_v26 = vpack.c.bf16 %v3609_v15, %v3597_v62  ;;  %v3680_v63 = vld [vmem:[%s13377_s17 + $0x11c0] sm:$0xff]  ;;  %v3666_v31 = vld [vmem:[%s13377_s17 + $0x1150] sm:$0xff]  ;;  %v3693_v62 = vld [vmem:[%s13377_s17 + $0x1228] sm:$0xff] }
 0x8fe   :  { %10304 = vmatprep.subr.bf16.mxu1 %v10303_v36  ;;  %v3594_v36 = vld [vmem:[%s13377_s17 + $0xf10] sm:$0xff]  ;;  %v3705_v15 = vld [vmem:[%s13377_s17 + $0x1288] sm:$0xff] }
 0x8ff   :  { %4810 = vmatmul.mubr.f32.vlgmr.msra.gmra.mrb[38].mxu0 %v13507_v12  ;;  %v3678_v44 = vld [vmem:[%s13377_s17 + $0x11b0] sm:$0xff] }
 0x900   :  { %4597 = vmatmul.mubr.f32.vlgmr.msra.gmra.mrb[20].mxu1 %v13507_v12  ;;  %10494 = vmatpush1.bf16.msra.mxu0 %v10493_v16  ;;  %v3619_v16 = vld [vmem:[%s13377_s17 + $0xfd8] sm:$0xff] }
 0x901   :  { %4880 = vmatprep.mubr.f32.mxu0 %v13660_v60  ;;  %10306 = vmatpush1.bf16.msra.mxu1 %v10305_v22  ;;  %v10321_v22 = vpack.c.bf16 %v3606_v43, %v3594_v36  ;;  %v10323_v30 = vpack.c.bf16 %v3631_v28, %v3619_v16  ;;  %v3690_v36 = vld [vmem:[%s13377_s17 + $0x1210] sm:$0xff]  ;;  %v3715_v16 = vld [vmem:[%s13377_s17 + $0x12d8] sm:$0xff] }
 0x902   :  { %4667 = vmatprep.mubr.f32.mxu1 %v13660_v60  ;;  %10496 = vmatprep.subr.bf16.mxu0 %v10495_v20  ;;  %v3618_v20 = vld [vmem:[%s13377_s17 + $0xfd0] sm:$0xff]  ;;  %v3727_v28 = vld [vmem:[%s13377_s17 + $0x1338] sm:$0xff] }
 0x903   :  { %10308 = vmatprep.subr.bf16.mxu1 %v10307_v53  ;;  %v3657_v53 = vld [vmem:[%s13377_s17 + $0x1108] sm:$0xff]  ;;  %v3702_v43 = vld [vmem:[%s13377_s17 + $0x1270] sm:$0xff] }
 0x904   :  { %10498 = vmatpush1.bf16.msra.mxu0 %v10497_v38  ;;  %v10513_v38 = vpack.c.bf16 %v3632_v1, %v3620_v17  ;;  %v3716_v17 = vld [vmem:[%s13377_s17 + $0x12e0] sm:$0xff] }
 0x905   :  { %10310 = vmatpush1.bf16.msra.mxu1 %v10309_v41  ;;  %10500 = vmatprep.subr.bf16.mxu0 %v10499_v6  ;;  %v10325_v41 = vpack.c.bf16 %v3630_v23, %v3618_v20  ;;  %v10515_v6 = vpack.c.bf16 %v3657_v53, %v3645_v50  ;;  %v3728_v1 = vld [vmem:[%s13377_s17 + $0x1340] sm:$0xff]  ;;  %v3714_v20 = vld [vmem:[%s13377_s17 + $0x12d0] sm:$0xff]  ;;  %v3741_v50 = vld [vmem:[%s13377_s17 + $0x13a8] sm:$0xff] }
 0x906   :  { %10312 = vmatprep.subr.bf16.mxu1 %v10311_v24  ;;  %v10327_v24 = vpack.c.bf16 %v3655_v11, %v3643_v42  ;;  %v3726_v23 = vld [vmem:[%s13377_s17 + $0x1330] sm:$0xff]  ;;  %v3753_v53 = vld [vmem:[%s13377_s17 + $0x1408] sm:$0xff]  ;;  %v3739_v42 = vld [vmem:[%s13377_s17 + $0x1398] sm:$0xff] }
 0x907   :  { %v3751_v11 = vld [vmem:[%s13377_s17 + $0x13f8] sm:$0xff] }
 0x908   :  { %10502 = vmatpush1.bf16.msra.mxu0 %v10501_v52  ;;  %v10517_v52 = vpack.c.bf16 %v3656_v39, %v3644_v47  ;;  %v3740_v47 = vld [vmem:[%s13377_s17 + $0x13a0] sm:$0xff] }
 0x909   :  { %10314 = vmatpush1.bf16.msra.mxu1 %v10313_v2  ;;  %10504 = vmatprep.subr.bf16.mxu0 %v10503_v54  ;;  %v10329_v2 = vpack.c.bf16 %v3654_v37, %v3642_v51  ;;  %v10519_v54 = vpack.c.bf16 %v3681_v48, %v3669_v55  ;;  %v3752_v39 = vld [vmem:[%s13377_s17 + $0x1400] sm:$0xff]  ;;  %v3738_v51 = vld [vmem:[%s13377_s17 + $0x1390] sm:$0xff]  ;;  %v3765_v55 = vld [vmem:[%s13377_s17 + $0x1468] sm:$0xff] }
 0x90a   :  { %10316 = vmatprep.subr.bf16.mxu1 %v10315_v13  ;;  %v10331_v13 = vpack.c.bf16 %v3679_v34, %v3667_v27  ;;  %v3750_v37 = vld [vmem:[%s13377_s17 + $0x13f0] sm:$0xff]  ;;  %v3777_v48 = vld [vmem:[%s13377_s17 + $0x14c8] sm:$0xff]  ;;  %v3763_v27 = vld [vmem:[%s13377_s17 + $0x1458] sm:$0xff] }
 0x90b   :  { %v3775_v34 = vld [vmem:[%s13377_s17 + $0x14b8] sm:$0xff] }
 0x90c   :  { %10506 = vmatpush1.bf16.msra.mxu0 %v10505_v46  ;;  %v10521_v46 = vpack.c.bf16 %v3680_v63, %v3668_v49  ;;  %v3764_v49 = vld [vmem:[%s13377_s17 + $0x1460] sm:$0xff] }
 0x90d   :  { %10318 = vmatpush1.bf16.msra.mxu1 %v10317_v57  ;;  %10508 = vmatprep.subr.bf16.mxu0 %v10507_v26  ;;  %v10333_v57 = vpack.c.bf16 %v3678_v44, %v3666_v31  ;;  %v10523_v26 = vpack.c.bf16 %v3705_v15, %v3693_v62  ;;  %v3776_v63 = vld [vmem:[%s13377_s17 + $0x14c0] sm:$0xff]  ;;  %v3762_v31 = vld [vmem:[%s13377_s17 + $0x1450] sm:$0xff]  ;;  %v3789_v62 = vld [vmem:[%s13377_s17 + $0x1528] sm:$0xff] }
 0x90e   :  { %10320 = vmatprep.subr.bf16.mxu1 %v10319_v32  ;;  %v10335_v32 = vpack.c.bf16 %v3703_v25, %v3691_v29  ;;  %v3774_v44 = vld [vmem:[%s13377_s17 + $0x14b0] sm:$0xff]  ;;  %v3801_v15 = vld [vmem:[%s13377_s17 + $0x1588] sm:$0xff]  ;;  %v3787_v29 = vld [vmem:[%s13377_s17 + $0x1518] sm:$0xff] }
 0x90f   :  { %v3799_v25 = vld [vmem:[%s13377_s17 + $0x1578] sm:$0xff] }
 0x910   :  { %10510 = vmatpush1.bf16.msra.mxu0 %v10509_v5  ;;  %v10525_v5 = vpack.c.bf16 %v3704_v35, %v3692_v4  ;;  %v3788_v4 = vld [vmem:[%s13377_s17 + $0x1520] sm:$0xff] }
 0x911   :  { %10322 = vmatpush1.bf16.msra.mxu1 %v10321_v22  ;;  %10512 = vmatprep.subr.bf16.mxu0 %v10511_v19  ;;  %v10337_v22 = vpack.c.bf16 %v3702_v43, %v3690_v36  ;;  %v10527_v19 = vpack.c.bf16 %v3729_v45, %v3717_v7  ;;  %v3800_v35 = vld [vmem:[%s13377_s17 + $0x1580] sm:$0xff]  ;;  %v3786_v36 = vld [vmem:[%s13377_s17 + $0x1510] sm:$0xff]  ;;  %v3813_v7 = vld [vmem:[%s13377_s17 + $0x15e8] sm:$0xff] }
 0x912   :  { %10324 = vmatprep.subr.bf16.mxu1 %v10323_v30  ;;  %v10339_v30 = vpack.c.bf16 %v3727_v28, %v3715_v16  ;;  %v3798_v43 = vld [vmem:[%s13377_s17 + $0x1570] sm:$0xff]  ;;  %v3825_v45 = vld [vmem:[%s13377_s17 + $0x1648] sm:$0xff]  ;;  %v3811_v16 = vld [vmem:[%s13377_s17 + $0x15d8] sm:$0xff] }
 0x913   :  { %v3823_v28 = vld [vmem:[%s13377_s17 + $0x1638] sm:$0xff] }
 0x914   :  { %10514 = vmatpush1.bf16.msra.mxu0 %v10513_v38  ;;  %v10529_v38 = vpack.c.bf16 %v3728_v1, %v3716_v17  ;;  %v3812_v17 = vld [vmem:[%s13377_s17 + $0x15e0] sm:$0xff] }
 0x915   :  { %10326 = vmatpush1.bf16.msra.mxu1 %v10325_v41  ;;  %10516 = vmatprep.subr.bf16.mxu0 %v10515_v6  ;;  %v10341_v41 = vpack.c.bf16 %v3726_v23, %v3714_v20  ;;  %v10531_v6 = vpack.c.bf16 %v3753_v53, %v3741_v50  ;;  %v3824_v1 = vld [vmem:[%s13377_s17 + $0x1640] sm:$0xff]  ;;  %v3810_v20 = vld [vmem:[%s13377_s17 + $0x15d0] sm:$0xff]  ;;  %v3837_v50 = vld [vmem:[%s13377_s17 + $0x16a8] sm:$0xff] }
 0x916   :  { %10328 = vmatprep.subr.bf16.mxu1 %v10327_v24  ;;  %v10343_v24 = vpack.c.bf16 %v3751_v11, %v3739_v42  ;;  %v3822_v23 = vld [vmem:[%s13377_s17 + $0x1630] sm:$0xff]  ;;  %v3849_v53 = vld [vmem:[%s13377_s17 + $0x1708] sm:$0xff]  ;;  %v3835_v42 = vld [vmem:[%s13377_s17 + $0x1698] sm:$0xff] }
 0x917   :  { %v3847_v11 = vld [vmem:[%s13377_s17 + $0x16f8] sm:$0xff] }
 0x918   :  { %10518 = vmatpush1.bf16.msra.mxu0 %v10517_v52  ;;  %v10533_v52 = vpack.c.bf16 %v3752_v39, %v3740_v47  ;;  %v3836_v47 = vld [vmem:[%s13377_s17 + $0x16a0] sm:$0xff] }
 0x919   :  { %10330 = vmatpush1.bf16.msra.mxu1 %v10329_v2  ;;  %10520 = vmatprep.subr.bf16.mxu0 %v10519_v54  ;;  %v10345_v2 = vpack.c.bf16 %v3750_v37, %v3738_v51  ;;  %v10535_v54 = vpack.c.bf16 %v3777_v48, %v3765_v55  ;;  %v3848_v39 = vld [vmem:[%s13377_s17 + $0x1700] sm:$0xff]  ;;  %v3834_v51 = vld [vmem:[%s13377_s17 + $0x1690] sm:$0xff]  ;;  %v3861_v55 = vld [vmem:[%s13377_s17 + $0x1768] sm:$0xff] }
 0x91a   :  { %10332 = vmatprep.subr.bf16.mxu1 %v10331_v13  ;;  %v10347_v13 = vpack.c.bf16 %v3775_v34, %v3763_v27  ;;  %v3846_v37 = vld [vmem:[%s13377_s17 + $0x16f0] sm:$0xff]  ;;  %v3873_v48 = vld [vmem:[%s13377_s17 + $0x17c8] sm:$0xff]  ;;  %v3859_v27 = vld [vmem:[%s13377_s17 + $0x1758] sm:$0xff] }
 0x91b   :  { %v3871_v34 = vld [vmem:[%s13377_s17 + $0x17b8] sm:$0xff] }
 0x91c   :  { %10522 = vmatpush1.bf16.msra.mxu0 %v10521_v46  ;;  %v10537_v46 = vpack.c.bf16 %v3776_v63, %v3764_v49  ;;  %v3860_v49 = vld [vmem:[%s13377_s17 + $0x1760] sm:$0xff] }
 0x91d   :  { %10334 = vmatpush1.bf16.msra.mxu1 %v10333_v57  ;;  %10524 = vmatprep.subr.bf16.mxu0 %v10523_v26  ;;  %v10349_v57 = vpack.c.bf16 %v3774_v44, %v3762_v31  ;;  %v10539_v26 = vpack.c.bf16 %v3801_v15, %v3789_v62  ;;  %v3872_v63 = vld [vmem:[%s13377_s17 + $0x17c0] sm:$0xff]  ;;  %v3858_v31 = vld [vmem:[%s13377_s17 + $0x1750] sm:$0xff]  ;;  %v3885_v62 = vld [vmem:[%s13377_s17 + $0x1828] sm:$0xff] }
 0x91e   :  { %10336 = vmatprep.subr.bf16.mxu1 %v10335_v32  ;;  %v10351_v32 = vpack.c.bf16 %v3799_v25, %v3787_v29  ;;  %v3870_v44 = vld [vmem:[%s13377_s17 + $0x17b0] sm:$0xff]  ;;  %v3897_v15 = vld [vmem:[%s13377_s17 + $0x1888] sm:$0xff]  ;;  %v3883_v29 = vld [vmem:[%s13377_s17 + $0x1818] sm:$0xff] }
 0x91f   :  { %v3895_v25 = vld [vmem:[%s13377_s17 + $0x1878] sm:$0xff] }
 0x920   :  { %10526 = vmatpush1.bf16.msra.mxu0 %v10525_v5  ;;  %v10541_v5 = vpack.c.bf16 %v3800_v35, %v3788_v4  ;;  %v3884_v4 = vld [vmem:[%s13377_s17 + $0x1820] sm:$0xff] }
 0x921   :  { %10338 = vmatpush1.bf16.msra.mxu1 %v10337_v22  ;;  %10528 = vmatprep.subr.bf16.mxu0 %v10527_v19  ;;  %v10353_v22 = vpack.c.bf16 %v3798_v43, %v3786_v36  ;;  %v10543_v19 = vpack.c.bf16 %v3825_v45, %v3813_v7  ;;  %v3896_v35 = vld [vmem:[%s13377_s17 + $0x1880] sm:$0xff]  ;;  %v10367_v36 = vpack.c.bf16 %v3895_v25, %v3883_v29  ;;  %v3894_v43 = vld [vmem:[%s13377_s17 + $0x1870] sm:$0xff]  ;;  %v3909_v7 = vld [vmem:[%s13377_s17 + $0x18e8] sm:$0xff] }
 0x922   :  { %10340 = vmatprep.subr.bf16.mxu1 %v10339_v30  ;;  %v10355_v30 = vpack.c.bf16 %v3823_v28, %v3811_v16  ;;  %v3921_v45 = vld [vmem:[%s13377_s17 + $0x1948] sm:$0xff]  ;;  %v10557_v16 = vpack.c.bf16 %v3896_v35, %v3884_v4  ;;  %v3907_v28 = vld [vmem:[%s13377_s17 + $0x18d8] sm:$0xff]  ;;  %v3980_v4 = vld [vmem:[%s13377_s17 + $0x1b20] sm:$0xff] }
 0x923   :  { %v3979_v29 = vld [vmem:[%s13377_s17 + $0x1b18] sm:$0xff]  ;;  %v3992_v35 = vld [vmem:[%s13377_s17 + $0x1b80] sm:$0xff] }
 0x924   :  { %10530 = vmatpush1.bf16.msra.mxu0 %v10529_v38  ;;  %v10545_v38 = vpack.c.bf16 %v3824_v1, %v3812_v17  ;;  %v3920_v17 = vld [vmem:[%s13377_s17 + $0x1940] sm:$0xff]  ;;  %v3906_v1 = vld [vmem:[%s13377_s17 + $0x18d0] sm:$0xff]  ;;  %v3991_v25 = vld [vmem:[%s13377_s17 + $0x1b78] sm:$0xff] }
 0x925   :  { %10342 = vmatpush1.bf16.msra.mxu1 %v10341_v41  ;;  %10532 = vmatprep.subr.bf16.mxu0 %v10531_v6  ;;  %v10357_v41 = vpack.c.bf16 %v3822_v23, %v3810_v20  ;;  %v10547_v6 = vpack.c.bf16 %v3849_v53, %v3837_v50  ;;  %v10559_v20 = vpack.c.bf16 %v3921_v45, %v3909_v7  ;;  %v3933_v23 = vld [vmem:[%s13377_s17 + $0x19a8] sm:$0xff] }
 0x926   :  { %10344 = vmatprep.subr.bf16.mxu1 %v10343_v24  ;;  %v10359_v24 = vpack.c.bf16 %v3847_v11, %v3835_v42  ;;  %v3945_v50 = vld [vmem:[%s13377_s17 + $0x1a08] sm:$0xff]  ;;  %v3931_v42 = vld [vmem:[%s13377_s17 + $0x1998] sm:$0xff] }
 0x927   :  { %v3943_v11 = vld [vmem:[%s13377_s17 + $0x19f8] sm:$0xff]  ;;  %v4005_v7 = vld [vmem:[%s13377_s17 + $0x1be8] sm:$0xff] }
 0x928   :  { %10534 = vmatpush1.bf16.msra.mxu0 %v10533_v52  ;;  %v10549_v52 = vpack.c.bf16 %v3848_v39, %v3836_v47  ;;  %v3932_v47 = vld [vmem:[%s13377_s17 + $0x19a0] sm:$0xff]  ;;  %v4017_v45 = vld [vmem:[%s13377_s17 + $0x1c48] sm:$0xff] }
 0x929   :  { %10346 = vmatpush1.bf16.msra.mxu1 %v10345_v2  ;;  %10536 = vmatprep.subr.bf16.mxu0 %v10535_v54  ;;  %v10361_v2 = vpack.c.bf16 %v3846_v37, %v3834_v51  ;;  %v10551_v54 = vpack.c.bf16 %v3873_v48, %v3861_v55  ;;  %v3944_v39 = vld [vmem:[%s13377_s17 + $0x1a00] sm:$0xff]  ;;  %v3930_v51 = vld [vmem:[%s13377_s17 + $0x1990] sm:$0xff]  ;;  %v3957_v55 = vld [vmem:[%s13377_s17 + $0x1a68] sm:$0xff] }
 0x92a   :  { %10348 = vmatprep.subr.bf16.mxu1 %v10347_v13  ;;  %v10363_v13 = vpack.c.bf16 %v3871_v34, %v3859_v27  ;;  %v3942_v37 = vld [vmem:[%s13377_s17 + $0x19f0] sm:$0xff]  ;;  %v3969_v48 = vld [vmem:[%s13377_s17 + $0x1ac8] sm:$0xff]  ;;  %v3955_v27 = vld [vmem:[%s13377_s17 + $0x1a58] sm:$0xff] }
 0x92b   :  { %v3967_v34 = vld [vmem:[%s13377_s17 + $0x1ab8] sm:$0xff] }
 0x92c   :  { %10538 = vmatpush1.bf16.msra.mxu0 %v10537_v46  ;;  %v10553_v46 = vpack.c.bf16 %v3872_v63, %v3860_v49  ;;  %v3956_v49 = vld [vmem:[%s13377_s17 + $0x1a60] sm:$0xff] }
 0x92d   :  { %10350 = vmatpush1.bf16.msra.mxu1 %v10349_v57  ;;  %10540 = vmatprep.subr.bf16.mxu0 %v10539_v26  ;;  %v10365_v57 = vpack.c.bf16 %v3870_v44, %v3858_v31  ;;  %v10555_v26 = vpack.c.bf16 %v3897_v15, %v3885_v62  ;;  %v3968_v63 = vld [vmem:[%s13377_s17 + $0x1ac0] sm:$0xff]  ;;  %v3954_v31 = vld [vmem:[%s13377_s17 + $0x1a50] sm:$0xff]  ;;  %v3981_v62 = vld [vmem:[%s13377_s17 + $0x1b28] sm:$0xff] }
 0x92e   :  { %10352 = vmatprep.subr.bf16.mxu1 %v10351_v32  ;;  %v3882_v32 = vld [vmem:[%s13377_s17 + $0x1810] sm:$0xff]  ;;  %v3993_v15 = vld [vmem:[%s13377_s17 + $0x1b88] sm:$0xff] }
 0x92f   :  { %v3966_v44 = vld [vmem:[%s13377_s17 + $0x1ab0] sm:$0xff] }
 0x930   :  { %10542 = vmatpush1.bf16.msra.mxu0 %v10541_v5  ;;  %v3919_v5 = vld [vmem:[%s13377_s17 + $0x1938] sm:$0xff] }
 0x931   :  { %10354 = vmatpush1.bf16.msra.mxu1 %v10353_v22  ;;  %10544 = vmatprep.subr.bf16.mxu0 %v10543_v19  ;;  %v10369_v22 = vpack.c.bf16 %v3894_v43, %v3882_v32  ;;  %v3908_v19 = vld [vmem:[%s13377_s17 + $0x18e0] sm:$0xff]  ;;  %v10371_v53 = vpack.c.bf16 %v3919_v5, %v3907_v28  ;;  %v10383_v32 = vpack.c.bf16 %v3991_v25, %v3979_v29  ;;  %v3990_v43 = vld [vmem:[%s13377_s17 + $0x1b70] sm:$0xff]  ;;  %v4015_v28 = vld [vmem:[%s13377_s17 + $0x1c38] sm:$0xff] }
 0x932   :  { %10356 = vmatprep.subr.bf16.mxu1 %v10355_v30  ;;  %v3918_v30 = vld [vmem:[%s13377_s17 + $0x1930] sm:$0xff]  ;;  %v10573_v5 = vpack.c.bf16 %v3992_v35, %v3980_v4  ;;  %v4075_v29 = vld [vmem:[%s13377_s17 + $0x1e18] sm:$0xff]  ;;  %v4076_v4 = vld [vmem:[%s13377_s17 + $0x1e20] sm:$0xff] }
 0x933   :  { %v4087_v25 = vld [vmem:[%s13377_s17 + $0x1e78] sm:$0xff]  ;;  %v4088_v35 = vld [vmem:[%s13377_s17 + $0x1e80] sm:$0xff] }
 0x934   :  { %10546 = vmatpush1.bf16.msra.mxu0 %v10545_v38  ;;  %v10561_v38 = vpack.c.bf16 %v3920_v17, %v3908_v19  ;;  %v10575_v19 = vpack.c.bf16 %v4017_v45, %v4005_v7  ;;  %v4004_v17 = vld [vmem:[%s13377_s17 + $0x1be0] sm:$0xff]  ;;  %v4101_v7 = vld [vmem:[%s13377_s17 + $0x1ee8] sm:$0xff] }
 0x935   :  { %10358 = vmatpush1.bf16.msra.mxu1 %v10357_v41  ;;  %10548 = vmatprep.subr.bf16.mxu0 %v10547_v6  ;;  %v10373_v41 = vpack.c.bf16 %v3918_v30, %v3906_v1  ;;  %v10563_v6 = vpack.c.bf16 %v3945_v50, %v3933_v23  ;;  %v4016_v1 = vld [vmem:[%s13377_s17 + $0x1c40] sm:$0xff]  ;;  %v4014_v23 = vld [vmem:[%s13377_s17 + $0x1c30] sm:$0xff]  ;;  %v4029_v50 = vld [vmem:[%s13377_s17 + $0x1ca8] sm:$0xff] }
 0x936   :  { %10360 = vmatprep.subr.bf16.mxu1 %v10359_v24  ;;  %v10375_v24 = vpack.c.bf16 %v3943_v11, %v3931_v42  ;;  %v4027_v42 = vld [vmem:[%s13377_s17 + $0x1c98] sm:$0xff]  ;;  %v4113_v45 = vld [vmem:[%s13377_s17 + $0x1f48] sm:$0xff] }
 0x937   :  { %v4039_v11 = vld [vmem:[%s13377_s17 + $0x1cf8] sm:$0xff] }
 0x938   :  { %10550 = vmatpush1.bf16.msra.mxu0 %v10549_v52  ;;  %v10565_v52 = vpack.c.bf16 %v3944_v39, %v3932_v47  ;;  %v4028_v47 = vld [vmem:[%s13377_s17 + $0x1ca0] sm:$0xff] }
 0x939   :  { %10362 = vmatpush1.bf16.msra.mxu1 %v10361_v2  ;;  %10552 = vmatprep.subr.bf16.mxu0 %v10551_v54  ;;  %v10377_v2 = vpack.c.bf16 %v3942_v37, %v3930_v51  ;;  %v10567_v54 = vpack.c.bf16 %v3969_v48, %v3957_v55  ;;  %v4040_v39 = vld [vmem:[%s13377_s17 + $0x1d00] sm:$0xff]  ;;  %v4026_v51 = vld [vmem:[%s13377_s17 + $0x1c90] sm:$0xff]  ;;  %v4053_v55 = vld [vmem:[%s13377_s17 + $0x1d68] sm:$0xff] }
 0x93a   :  { %10364 = vmatprep.subr.bf16.mxu1 %v10363_v13  ;;  %v10379_v13 = vpack.c.bf16 %v3967_v34, %v3955_v27  ;;  %v4038_v37 = vld [vmem:[%s13377_s17 + $0x1cf0] sm:$0xff]  ;;  %v4065_v48 = vld [vmem:[%s13377_s17 + $0x1dc8] sm:$0xff]  ;;  %v4051_v27 = vld [vmem:[%s13377_s17 + $0x1d58] sm:$0xff] }
 0x93b   :  { %v4063_v34 = vld [vmem:[%s13377_s17 + $0x1db8] sm:$0xff] }
 0x93c   :  { %10554 = vmatpush1.bf16.msra.mxu0 %v10553_v46  ;;  %v10569_v46 = vpack.c.bf16 %v3968_v63, %v3956_v49  ;;  %v4052_v49 = vld [vmem:[%s13377_s17 + $0x1d60] sm:$0xff] }
 0x93d   :  { %10366 = vmatpush1.bf16.msra.mxu1 %v10365_v57  ;;  %10556 = vmatprep.subr.bf16.mxu0 %v10555_v26  ;;  %v10381_v57 = vpack.c.bf16 %v3966_v44, %v3954_v31  ;;  %v10571_v26 = vpack.c.bf16 %v3993_v15, %v3981_v62  ;;  %v4064_v63 = vld [vmem:[%s13377_s17 + $0x1dc0] sm:$0xff]  ;;  %v4050_v31 = vld [vmem:[%s13377_s17 + $0x1d50] sm:$0xff]  ;;  %v4077_v62 = vld [vmem:[%s13377_s17 + $0x1e28] sm:$0xff] }
 0x93e   :  { %10368 = vmatprep.subr.bf16.mxu1 %v10367_v36  ;;  %v3978_v36 = vld [vmem:[%s13377_s17 + $0x1b10] sm:$0xff]  ;;  %v4089_v15 = vld [vmem:[%s13377_s17 + $0x1e88] sm:$0xff] }
 0x93f   :  { %4881 = vmatmul.mubr.f32.vlgmr.msra.gmra.mrb[38].mxu0 %v13664_v61  ;;  %v4062_v44 = vld [vmem:[%s13377_s17 + $0x1db0] sm:$0xff] }
 0x940   :  { %4668 = vmatmul.mubr.f32.vlgmr.msra.gmra.mrb[20].mxu1 %v13664_v61  ;;  %10558 = vmatpush1.bf16.msra.mxu0 %v10557_v16  ;;  %v4003_v16 = vld [vmem:[%s13377_s17 + $0x1bd8] sm:$0xff] }
 0x941   :  { %9018 = vmatprep.mubr.msk.f32.mxu0 %vm4316_vm11, %v13670_v18  ;;  %10370 = vmatpush1.bf16.msra.mxu1 %v10369_v22  ;;  %v10385_v22 = vpack.c.bf16 %v3990_v43, %v3978_v36  ;;  %v10387_v30 = vpack.c.bf16 %v4015_v28, %v4003_v16  ;;  %v4074_v36 = vld [vmem:[%s13377_s17 + $0x1e10] sm:$0xff]  ;;  %v4099_v16 = vld [vmem:[%s13377_s17 + $0x1ed8] sm:$0xff] }
 0x942   :  { %9017 = vmatprep.mubr.msk.f32.mxu1 %vm4316_vm11, %v13670_v18  ;;  %10560 = vmatprep.subr.bf16.mxu0 %v10559_v20  ;;  %v4002_v20 = vld [vmem:[%s13377_s17 + $0x1bd0] sm:$0xff]  ;;  %v4111_v28 = vld [vmem:[%s13377_s17 + $0x1f38] sm:$0xff] }
 0x943   :  { %10372 = vmatprep.subr.bf16.mxu1 %v10371_v53  ;;  %v4041_v53 = vld [vmem:[%s13377_s17 + $0x1d08] sm:$0xff]  ;;  %v4086_v43 = vld [vmem:[%s13377_s17 + $0x1e70] sm:$0xff] }
 0x944   :  { %10562 = vmatpush1.bf16.msra.mxu0 %v10561_v38  ;;  %v10577_v38 = vpack.c.bf16 %v4016_v1, %v4004_v17  ;;  %v4100_v17 = vld [vmem:[%s13377_s17 + $0x1ee0] sm:$0xff] }
 0x945   :  { %10374 = vmatpush1.bf16.msra.mxu1 %v10373_v41  ;;  %10564 = vmatprep.subr.bf16.mxu0 %v10563_v6  ;;  %v10389_v41 = vpack.c.bf16 %v4014_v23, %v4002_v20  ;;  %v10579_v6 = vpack.c.bf16 %v4041_v53, %v4029_v50  ;;  %v4112_v1 = vld [vmem:[%s13377_s17 + $0x1f40] sm:$0xff]  ;;  %v4098_v20 = vld [vmem:[%s13377_s17 + $0x1ed0] sm:$0xff]  ;;  %v4125_v50 = vld [vmem:[%s13377_s17 + $0x1fa8] sm:$0xff] }
 0x946   :  { %10376 = vmatprep.subr.bf16.mxu1 %v10375_v24  ;;  %v10391_v24 = vpack.c.bf16 %v4039_v11, %v4027_v42  ;;  %v4110_v23 = vld [vmem:[%s13377_s17 + $0x1f30] sm:$0xff]  ;;  %v4137_v53 = vld [vmem:[%s13377_s17 + $0x2008] sm:$0xff]  ;;  %v4123_v42 = vld [vmem:[%s13377_s17 + $0x1f98] sm:$0xff] }
 0x947   :  { %v4135_v11 = vld [vmem:[%s13377_s17 + $0x1ff8] sm:$0xff] }
 0x948   :  { %10566 = vmatpush1.bf16.msra.mxu0 %v10565_v52  ;;  %v10581_v52 = vpack.c.bf16 %v4040_v39, %v4028_v47  ;;  %v4124_v47 = vld [vmem:[%s13377_s17 + $0x1fa0] sm:$0xff] }
 0x949   :  { %10378 = vmatpush1.bf16.msra.mxu1 %v10377_v2  ;;  %10568 = vmatprep.subr.bf16.mxu0 %v10567_v54  ;;  %v10393_v2 = vpack.c.bf16 %v4038_v37, %v4026_v51  ;;  %v10583_v54 = vpack.c.bf16 %v4065_v48, %v4053_v55  ;;  %v4136_v39 = vld [vmem:[%s13377_s17 + $0x2000] sm:$0xff]  ;;  %v4122_v51 = vld [vmem:[%s13377_s17 + $0x1f90] sm:$0xff]  ;;  %v4149_v55 = vld [vmem:[%s13377_s17 + $0x2068] sm:$0xff] }
 0x94a   :  { %10380 = vmatprep.subr.bf16.mxu1 %v10379_v13  ;;  %v10395_v13 = vpack.c.bf16 %v4063_v34, %v4051_v27  ;;  %v4134_v37 = vld [vmem:[%s13377_s17 + $0x1ff0] sm:$0xff]  ;;  %v4161_v48 = vld [vmem:[%s13377_s17 + $0x20c8] sm:$0xff]  ;;  %v4147_v27 = vld [vmem:[%s13377_s17 + $0x2058] sm:$0xff] }
 0x94b   :  { %v4159_v34 = vld [vmem:[%s13377_s17 + $0x20b8] sm:$0xff] }
 0x94c   :  { %10570 = vmatpush1.bf16.msra.mxu0 %v10569_v46  ;;  %v10585_v46 = vpack.c.bf16 %v4064_v63, %v4052_v49  ;;  %v4148_v49 = vld [vmem:[%s13377_s17 + $0x2060] sm:$0xff] }
 0x94d   :  { %10382 = vmatpush1.bf16.msra.mxu1 %v10381_v57  ;;  %10572 = vmatprep.subr.bf16.mxu0 %v10571_v26  ;;  %v10397_v57 = vpack.c.bf16 %v4062_v44, %v4050_v31  ;;  %v10587_v26 = vpack.c.bf16 %v4089_v15, %v4077_v62  ;;  %v4160_v63 = vld [vmem:[%s13377_s17 + $0x20c0] sm:$0xff]  ;;  %v4146_v31 = vld [vmem:[%s13377_s17 + $0x2050] sm:$0xff]  ;;  %v4173_v62 = vld [vmem:[%s13377_s17 + $0x2128] sm:$0xff] }
 0x94e   :  { %10384 = vmatprep.subr.bf16.mxu1 %v10383_v32  ;;  %v10399_v32 = vpack.c.bf16 %v4087_v25, %v4075_v29  ;;  %v4158_v44 = vld [vmem:[%s13377_s17 + $0x20b0] sm:$0xff]  ;;  %v4185_v15 = vld [vmem:[%s13377_s17 + $0x2188] sm:$0xff]  ;;  %v4171_v29 = vld [vmem:[%s13377_s17 + $0x2118] sm:$0xff] }
 0x94f   :  { %v4183_v25 = vld [vmem:[%s13377_s17 + $0x2178] sm:$0xff] }
 0x950   :  { %10574 = vmatpush1.bf16.msra.mxu0 %v10573_v5  ;;  %v10589_v5 = vpack.c.bf16 %v4088_v35, %v4076_v4  ;;  %v4172_v4 = vld [vmem:[%s13377_s17 + $0x2120] sm:$0xff] }
 0x951   :  { %10386 = vmatpush1.bf16.msra.mxu1 %v10385_v22  ;;  %10576 = vmatprep.subr.bf16.mxu0 %v10575_v19  ;;  %v10401_v22 = vpack.c.bf16 %v4086_v43, %v4074_v36  ;;  %v10591_v19 = vpack.c.bf16 %v4113_v45, %v4101_v7  ;;  %v4184_v35 = vld [vmem:[%s13377_s17 + $0x2180] sm:$0xff]  ;;  %v4170_v36 = vld [vmem:[%s13377_s17 + $0x2110] sm:$0xff]  ;;  %v4197_v7 = vld [vmem:[%s13377_s17 + $0x21e8] sm:$0xff] }
 0x952   :  { %10388 = vmatprep.subr.bf16.mxu1 %v10387_v30  ;;  %v10403_v30 = vpack.c.bf16 %v4111_v28, %v4099_v16  ;;  %v4182_v43 = vld [vmem:[%s13377_s17 + $0x2170] sm:$0xff]  ;;  %v4209_v45 = vld [vmem:[%s13377_s17 + $0x2248] sm:$0xff]  ;;  %v4195_v16 = vld [vmem:[%s13377_s17 + $0x21d8] sm:$0xff] }
 0x953   :  { %v4207_v28 = vld [vmem:[%s13377_s17 + $0x2238] sm:$0xff] }
 0x954   :  { %10578 = vmatpush1.bf16.msra.mxu0 %v10577_v38  ;;  %v10593_v38 = vpack.c.bf16 %v4112_v1, %v4100_v17  ;;  %v4196_v17 = vld [vmem:[%s13377_s17 + $0x21e0] sm:$0xff] }
 0x955   :  { %10390 = vmatpush1.bf16.msra.mxu1 %v10389_v41  ;;  %10580 = vmatprep.subr.bf16.mxu0 %v10579_v6  ;;  %v10405_v41 = vpack.c.bf16 %v4110_v23, %v4098_v20  ;;  %v10595_v6 = vpack.c.bf16 %v4137_v53, %v4125_v50  ;;  %v4208_v1 = vld [vmem:[%s13377_s17 + $0x2240] sm:$0xff]  ;;  %v4194_v20 = vld [vmem:[%s13377_s17 + $0x21d0] sm:$0xff]  ;;  %v4221_v50 = vld [vmem:[%s13377_s17 + $0x22a8] sm:$0xff] }
 0x956   :  { %10392 = vmatprep.subr.bf16.mxu1 %v10391_v24  ;;  %v10407_v24 = vpack.c.bf16 %v4135_v11, %v4123_v42  ;;  %v4206_v23 = vld [vmem:[%s13377_s17 + $0x2230] sm:$0xff]  ;;  %v4233_v53 = vld [vmem:[%s13377_s17 + $0x2308] sm:$0xff]  ;;  %v4219_v42 = vld [vmem:[%s13377_s17 + $0x2298] sm:$0xff] }
 0x957   :  { %v4231_v11 = vld [vmem:[%s13377_s17 + $0x22f8] sm:$0xff] }
 0x958   :  { %10582 = vmatpush1.bf16.msra.mxu0 %v10581_v52  ;;  %v10597_v52 = vpack.c.bf16 %v4136_v39, %v4124_v47  ;;  %v4220_v47 = vld [vmem:[%s13377_s17 + $0x22a0] sm:$0xff] }
 0x959   :  { %10394 = vmatpush1.bf16.msra.mxu1 %v10393_v2  ;;  %10584 = vmatprep.subr.bf16.mxu0 %v10583_v54  ;;  %v10409_v2 = vpack.c.bf16 %v4134_v37, %v4122_v51  ;;  %v10599_v54 = vpack.c.bf16 %v4161_v48, %v4149_v55  ;;  %v4232_v39 = vld [vmem:[%s13377_s17 + $0x2300] sm:$0xff]  ;;  %v10423_v51 = vpack.c.bf16 %v4231_v11, %v4219_v42  ;;  %v4230_v37 = vld [vmem:[%s13377_s17 + $0x22f0] sm:$0xff] }
 0x95a   :  { %10396 = vmatprep.subr.bf16.mxu1 %v10395_v13  ;;  %v10411_v13 = vpack.c.bf16 %v4159_v34, %v4147_v27  ;;  %v10613_v55 = vpack.c.bf16 %v4232_v39, %v4220_v47  ;;  %v4245_v27 = vld [vmem:[%s13377_s17 + $0x2368] sm:$0xff]  ;;  %v4243_v34 = vld [vmem:[%s13377_s17 + $0x2358] sm:$0xff]  ;;  %v3178_v11 = vld [vmem:[%s13377_s17 + $0x210] sm:$0xff] }
 0x95b   :  { %v3203_v47 = vld [vmem:[%s13377_s17 + $0x2d8] sm:$0xff] }
 0x95c   :  { %10586 = vmatpush1.bf16.msra.mxu0 %v10585_v46  ;;  %v10601_v46 = vpack.c.bf16 %v4160_v63, %v4148_v49  ;;  %v3131_v49 = vld [vmem:[%s13377_s17 + $0x98] sm:$0xff]  ;;  %v3120_v63 = vld [vmem:[%s13377_s17 + $0x40] sm:$0xff] }
 0x95d   :  { %10398 = vmatpush1.bf16.msra.mxu1 %v10397_v57  ;;  %10588 = vmatprep.subr.bf16.mxu0 %v10587_v26  ;;  %v10413_v57 = vpack.c.bf16 %v4158_v44, %v4146_v31  ;;  %v10603_v26 = vpack.c.bf16 %v4185_v15, %v4173_v62  ;;  %v3132_v31 = vld [vmem:[%s13377_s17 + $0xa0] sm:$0xff]  ;;  %v3118_v44 = vld [vmem:[%s13377_s17 + $0x30] sm:$0xff] }
 0x95e   :  { %10400 = vmatprep.subr.bf16.mxu1 %v10399_v32  ;;  %v10415_v32 = vpack.c.bf16 %v4183_v25, %v4171_v29  ;;  %v3130_v62 = vld [vmem:[%s13377_s17 + $0x90] sm:$0xff]  ;;  %v3145_v25 = vld [vmem:[%s13377_s17 + $0x108] sm:$0xff] }
 0x95f   :  { %v4242_v15 = vld [vmem:[%s13377_s17 + $0x2350] sm:$0xff] }
 0x960   :  { %10590 = vmatpush1.bf16.msra.mxu0 %v10589_v5  ;;  %v10605_v5 = vpack.c.bf16 %v4184_v35, %v4172_v4  ;;  %v3143_v4 = vld [vmem:[%s13377_s17 + $0xf8] sm:$0xff] }
 0x961   :  { %10402 = vmatpush1.bf16.msra.mxu1 %v10401_v22  ;;  %10592 = vmatprep.subr.bf16.mxu0 %v10591_v19  ;;  %v10417_v22 = vpack.c.bf16 %v4182_v43, %v4170_v36  ;;  %v10607_v19 = vpack.c.bf16 %v4209_v45, %v4197_v7  ;;  %v3155_v35 = vld [vmem:[%s13377_s17 + $0x158] sm:$0xff]  ;;  %v10617_v36 = vpack.c.bf16 %v3130_v62, %v3118_v44  ;;  %v3156_v43 = vld [vmem:[%s13377_s17 + $0x160] sm:$0xff]  ;;  %v3142_v7 = vld [vmem:[%s13377_s17 + $0xf0] sm:$0xff] }
 0x962   :  { %10404 = vmatprep.subr.bf16.mxu1 %v10403_v30  ;;  %v10419_v30 = vpack.c.bf16 %v4207_v28, %v4195_v16  ;;  %v3154_v16 = vld [vmem:[%s13377_s17 + $0x150] sm:$0xff]  ;;  %v3169_v28 = vld [vmem:[%s13377_s17 + $0x1c8] sm:$0xff]  ;;  %v3216_v44 = vld [vmem:[%s13377_s17 + $0x340] sm:$0xff] }
 0x963   :  { %v3228_v62 = vld [vmem:[%s13377_s17 + $0x3a0] sm:$0xff] }
 0x964   :  { %10594 = vmatpush1.bf16.msra.mxu0 %v10593_v38  ;;  %v10609_v38 = vpack.c.bf16 %v4208_v1, %v4196_v17  ;;  %v3179_v17 = vld [vmem:[%s13377_s17 + $0x218] sm:$0xff] }
 0x965   :  { %10406 = vmatpush1.bf16.msra.mxu1 %v10405_v41  ;;  %10596 = vmatprep.subr.bf16.mxu0 %v10595_v6  ;;  %v10421_v41 = vpack.c.bf16 %v4206_v23, %v4194_v20  ;;  %v10611_v6 = vpack.c.bf16 %v4233_v53, %v4221_v50  ;;  %v10621_v20 = vpack.c.bf16 %v3154_v16, %v3142_v7  ;;  %v3168_v23 = vld [vmem:[%s13377_s17 + $0x1c0] sm:$0xff]  ;;  %v3166_v53 = vld [vmem:[%s13377_s17 + $0x1b0] sm:$0xff] }
 0x966   :  { %10408 = vmatprep.subr.bf16.mxu1 %v10407_v24  ;;  %v4218_v24 = vld [vmem:[%s13377_s17 + $0x2290] sm:$0xff]  ;;  %v3180_v50 = vld [vmem:[%s13377_s17 + $0x220] sm:$0xff] }
 0x967   :  { %v10425_v48 = vpack.c.bf16 %v4230_v37, %v4218_v24  ;;  %v10813_v39 = vpack.c.bf16 %v3180_v50, %v3168_v23  ;;  %v3192_v37 = vld [vmem:[%s13377_s17 + $0x280] sm:$0xff]  ;;  %v3238_v16 = vld [vmem:[%s13377_s17 + $0x3f0] sm:$0xff] }
 0x968   :  { %10598 = vmatpush1.bf16.msra.mxu0 %v10597_v52  ;;  %v3121_v52 = vld [vmem:[%s13377_s17 + $0x48] sm:$0xff]  ;;  %v3240_v7 = vld [vmem:[%s13377_s17 + $0x400] sm:$0xff] }
 0x969   :  { %10410 = vmatpush1.bf16.msra.mxu1 %v10409_v2  ;;  %10600 = vmatprep.subr.bf16.mxu0 %v10599_v54  ;;  %v3133_v2 = vld [vmem:[%s13377_s17 + $0xa8] sm:$0xff]  ;;  %v3119_v54 = vld [vmem:[%s13377_s17 + $0x38] sm:$0xff] }
 0x96a   :  { %10412 = vmatprep.subr.bf16.mxu1 %v10411_v13  ;;  %v4244_v13 = vld [vmem:[%s13377_s17 + $0x2360] sm:$0xff]  ;;  %v10803_v29 = vpack.c.bf16 %v3133_v2, %v3121_v52  ;;  %v3217_v52 = vld [vmem:[%s13377_s17 + $0x348] sm:$0xff] }
 0x96b   :  { %v3229_v2 = vld [vmem:[%s13377_s17 + $0x3a8] sm:$0xff] }
 0x96c   :  { %10602 = vmatpush1.bf16.msra.mxu0 %v10601_v46  ;;  %v3157_v46 = vld [vmem:[%s13377_s17 + $0x168] sm:$0xff] }
 0x96d   :  { %10414 = vmatpush1.bf16.msra.mxu1 %v10413_v57  ;;  %10604 = vmatprep.subr.bf16.mxu0 %v10603_v26  ;;  %v10615_v57 = vpack.c.bf16 %v3131_v49, %v3119_v54  ;;  %v10805_v26 = vpack.c.bf16 %v3132_v31, %v3120_v63  ;;  %v10807_v45 = vpack.c.bf16 %v3157_v46, %v3145_v25  ;;  %v3215_v54 = vld [vmem:[%s13377_s17 + $0x338] sm:$0xff]  ;;  %v3226_v25 = vld [vmem:[%s13377_s17 + $0x390] sm:$0xff]  ;;  %v3241_v46 = vld [vmem:[%s13377_s17 + $0x408] sm:$0xff] }
 0x96e   :  { %10416 = vmatprep.subr.bf16.mxu1 %v10415_v32  ;;  %v3144_v32 = vld [vmem:[%s13377_s17 + $0x100] sm:$0xff]  ;;  %v3227_v49 = vld [vmem:[%s13377_s17 + $0x398] sm:$0xff] }
 0x96f   :  { %v10809_v1 = vpack.c.bf16 %v3156_v43, %v3144_v32 }
 0x970   :  { %10606 = vmatpush1.bf16.msra.mxu0 %v10605_v5  ;;  %v3181_v5 = vld [vmem:[%s13377_s17 + $0x228] sm:$0xff] }
 0x971   :  { %10418 = vmatpush1.bf16.msra.mxu1 %v10417_v22  ;;  %10608 = vmatprep.subr.bf16.mxu0 %v10607_v19  ;;  %v10619_v22 = vpack.c.bf16 %v3155_v35, %v3143_v4  ;;  %v3167_v19 = vld [vmem:[%s13377_s17 + $0x1b8] sm:$0xff] }
 0x972   :  { %10420 = vmatprep.subr.bf16.mxu1 %v10419_v30  ;;  %v10811_v30 = vpack.c.bf16 %v3181_v5, %v3169_v28  ;;  %v10623_v42 = vpack.c.bf16 %v3179_v17, %v3167_v19  ;;  %v3239_v4 = vld [vmem:[%s13377_s17 + $0x3f8] sm:$0xff]  ;;  %v3265_v19 = vld [vmem:[%s13377_s17 + $0x4c8] sm:$0xff] }
 0x973   :  { %v3251_v35 = vld [vmem:[%s13377_s17 + $0x458] sm:$0xff]  ;;  %v3277_v17 = vld [vmem:[%s13377_s17 + $0x528] sm:$0xff] }
 0x974   :  { %10610 = vmatpush1.bf16.msra.mxu0 %v10609_v38  ;;  %v3193_v38 = vld [vmem:[%s13377_s17 + $0x288] sm:$0xff]  ;;  %v10635_v5 = vpack.c.bf16 %v3251_v35, %v3239_v4 }
 0x975   :  { %10422 = vmatpush1.bf16.msra.mxu1 %v10421_v41  ;;  %10612 = vmatprep.subr.bf16.mxu0 %v10611_v6  ;;  %v3205_v41 = vld [vmem:[%s13377_s17 + $0x2e8] sm:$0xff]  ;;  %v3191_v6 = vld [vmem:[%s13377_s17 + $0x278] sm:$0xff] }
 0x976   :  { %10424 = vmatprep.subr.bf16.mxu1 %v10423_v51  ;;  %v10625_v51 = vpack.c.bf16 %v3178_v11, %v3166_v53  ;;  %v10815_v24 = vpack.c.bf16 %v3205_v41, %v3193_v38  ;;  %v10827_v53 = vpack.c.bf16 %v3277_v17, %v3265_v19  ;;  %v3276_v11 = vld [vmem:[%s13377_s17 + $0x520] sm:$0xff]  ;;  %v3262_v38 = vld [vmem:[%s13377_s17 + $0x4b0] sm:$0xff]  ;;  %v3347_v19 = vld [vmem:[%s13377_s17 + $0x758] sm:$0xff] }
 0x978   :  { %10614 = vmatpush1.bf16.msra.mxu0 %v10613_v55  ;;  %v3204_v55 = vld [vmem:[%s13377_s17 + $0x2e0] sm:$0xff] }
 0x979   :  { %10426 = vmatpush1.bf16.msra.mxu1 %v10425_v48  ;;  %4947 = vmatprep.subr.mxu0 %v4245_v27  ;;  %v3190_v48 = vld [vmem:[%s13377_s17 + $0x270] sm:$0xff]  ;;  %v10627_v27 = vpack.c.bf16 %v3203_v47, %v3191_v6  ;;  %v10817_v63 = vpack.c.bf16 %v3204_v55, %v3192_v37  ;;  %v3287_v55 = vld [vmem:[%s13377_s17 + $0x578] sm:$0xff] }
 0x97a   :  { %4734 = vmatprep.subr.mxu1 %v4243_v34  ;;  %v3202_v34 = vld [vmem:[%s13377_s17 + $0x2d0] sm:$0xff] }
 0x97b   :  { %v10629_v31 = vpack.c.bf16 %v3202_v34, %v3190_v48  ;;  %v3274_v47 = vld [vmem:[%s13377_s17 + $0x510] sm:$0xff]  ;;  %v3299_v48 = vld [vmem:[%s13377_s17 + $0x5d8] sm:$0xff] }
 0x97c   :  { %4948 = vmatpush1.msra.mxu0 %v4244_v13  ;;  %v10819_v13 = vpack.c.bf16 %v3229_v2, %v3217_v52 }
 0x97d   :  { %4735 = vmatpush1.msra.mxu1 %v4242_v15  ;;  %4952 = vmatmul.mubr.f32.vlgmr.msra.gmra.mrb[38].mxu0 %v13680_v21  ;;  %v3214_v15 = vld [vmem:[%s13377_s17 + $0x330] sm:$0xff] }
 0x97e   :  { %10804 = vmatprep.subr.bf16.mxu0 %v10803_v29  ;;  %4739 = vmatmul.mubr.f32.vlgmr.msra.gmra.mrb[20].mxu1 %v13680_v21  ;;  %v10631_v29 = vpack.c.bf16 %v3227_v49, %v3215_v54  ;;  %v10633_v32 = vpack.c.bf16 %v3226_v25, %v3214_v15  ;;  %v3298_v15 = vld [vmem:[%s13377_s17 + $0x5d0] sm:$0xff]  ;;  %v3325_v25 = vld [vmem:[%s13377_s17 + $0x6a8] sm:$0xff] }
 0x97f   :  { %10616 = vmatprep.subr.bf16.mxu1 %v10615_v57  ;;  %10806 = vmatpush1.bf16.msra.mxu0 %v10805_v26  ;;  %v3253_v57 = vld [vmem:[%s13377_s17 + $0x468] sm:$0xff]  ;;  %v4252_v26 = vld [vmem:[%s14090_s6] sm:$0xff] }
 0x980   :  { %5235 = vmatprep.mubr.f32.mxu0 %v13510_v10  ;;  %10618 = vmatpush1.bf16.msra.mxu1 %v10617_v36  ;;  %v10821_v36 = vpack.c.bf16 %v3228_v62, %v3216_v44  ;;  %v10823_v43 = vpack.c.bf16 %v3253_v57, %v3241_v46  ;;  %v4259_v28 = vrot.slane %v4252_v26, %v13266_v58  ;;  %v3311_v57 = vld [vmem:[%s13377_s17 + $0x638] sm:$0xff] }
 0x981   :  { %5022 = vmatprep.mubr.f32.mxu1 %v13510_v10  ;;  %10808 = vmatprep.subr.bf16.mxu0 %v10807_v45  ;;  %v3252_v45 = vld [vmem:[%s13377_s17 + $0x460] sm:$0xff]  ;;  %v10643_v62 = vpack.c.bf16 %v3299_v48, %v3287_v55  ;;  %v3358_v55 = vld [vmem:[%s13377_s17 + $0x7b0] sm:$0xff] }
 0x982   :  { %10620 = vmatprep.subr.bf16.mxu1 %v10619_v22  ;;  %v3250_v22 = vld [vmem:[%s13377_s17 + $0x450] sm:$0xff]  ;;  %v10825_v23 = vpack.c.bf16 %v3252_v45, %v3240_v7  ;;  %v4386_v41 = vadd.f32 %v13647_v40, %v4259_v28  ;;  %v3337_v28 = vld [vmem:[%s13377_s17 + $0x708] sm:$0xff] }
 0x983   :  { %10810 = vmatpush1.bf16.msra.mxu0 %v10809_v1  ;;  %v4263_v1 = vrot.slane %v4252_v26, %v13273_v3  ;;  %v10637_v50 = vpack.c.bf16 %v3250_v22, %v3238_v16  ;;  %v3323_v26 = vld [vmem:[%s13377_s17 + $0x698] sm:$0xff]  ;;  %v3310_v7 = vld [vmem:[%s13377_s17 + $0x630] sm:$0xff] }
 0x984   :  { %10622 = vmatpush1.bf16.msra.mxu1 %v10621_v20  ;;  %10812 = vmatprep.subr.bf16.mxu0 %v10811_v30  ;;  %v3263_v20 = vld [vmem:[%s13377_s17 + $0x4b8] sm:$0xff]  ;;  %v10647_v45 = vpack.c.bf16 %v3323_v26, %v3311_v57  ;;  %v3322_v16 = vld [vmem:[%s13377_s17 + $0x690] sm:$0xff] }
 0x985   :  { %10624 = vmatprep.subr.bf16.mxu1 %v10623_v42  ;;  %v3275_v30 = vld [vmem:[%s13377_s17 + $0x518] sm:$0xff]  ;;  %v3264_v42 = vld [vmem:[%s13377_s17 + $0x4c0] sm:$0xff] }
 0x986   :  { %v10639_v6 = vpack.c.bf16 %v3275_v30, %v3263_v20  ;;  %v10829_v40 = vpack.c.bf16 %v3276_v11, %v3264_v42  ;;  %v3335_v22 = vld [vmem:[%s13377_s17 + $0x6f8] sm:$0xff]  ;;  %v3336_v30 = vld [vmem:[%s13377_s17 + $0x700] sm:$0xff]  ;;  %v3346_v42 = vld [vmem:[%s13377_s17 + $0x750] sm:$0xff] }
 0x987   :  { %10814 = vmatpush1.bf16.msra.mxu0 %v10813_v39  ;;  %v3289_v39 = vld [vmem:[%s13377_s17 + $0x588] sm:$0xff]  ;;  %v3407_v57 = vld [vmem:[%s13377_s17 + $0x938] sm:$0xff] }
 0x988   :  { %10626 = vmatpush1.bf16.msra.mxu1 %v10625_v51  ;;  %10816 = vmatprep.subr.bf16.mxu0 %v10815_v24  ;;  %v3301_v51 = vld [vmem:[%s13377_s17 + $0x5e8] sm:$0xff]  ;;  %v4388_v24 = vadd.f32 %v13649_v59, %v4263_v1  ;;  %v10641_v59 = vpack.c.bf16 %v3274_v47, %v3262_v38  ;;  %v10649_v1 = vpack.c.bf16 %v3322_v16, %v3310_v7  ;;  %v3419_v26 = vld [vmem:[%s13377_s17 + $0x998] sm:$0xff]  ;;  %v3406_v7 = vld [vmem:[%s13377_s17 + $0x930] sm:$0xff] }
 0x989   :  { %10628 = vmatprep.subr.bf16.mxu1 %v10627_v27  ;;  %v10831_v49 = vpack.c.bf16 %v3301_v51, %v3289_v39  ;;  %v3361_v11 = vld [vmem:[%s13377_s17 + $0x7c8] sm:$0xff]  ;;  %v3418_v16 = vld [vmem:[%s13377_s17 + $0x990] sm:$0xff] }
 0x98a   :  { %v3373_v38 = vld [vmem:[%s13377_s17 + $0x828] sm:$0xff] }
 0x98b   :  { %10818 = vmatpush1.bf16.msra.mxu0 %v10817_v63  ;;  %v3288_v63 = vld [vmem:[%s13377_s17 + $0x580] sm:$0xff]  ;;  %v10843_v51 = vpack.c.bf16 %v3373_v38, %v3361_v11  ;;  %v3457_v11 = vld [vmem:[%s13377_s17 + $0xac8] sm:$0xff] }
 0x98c   :  { %10630 = vmatpush1.bf16.msra.mxu1 %v10629_v31  ;;  %10820 = vmatprep.subr.bf16.mxu0 %v10819_v13  ;;  %v3300_v31 = vld [vmem:[%s13377_s17 + $0x5e0] sm:$0xff]  ;;  %v3286_v13 = vld [vmem:[%s13377_s17 + $0x570] sm:$0xff]  ;;  %v3469_v38 = vld [vmem:[%s13377_s17 + $0xb28] sm:$0xff] }
 0x98d   :  { %10632 = vmatprep.subr.bf16.mxu1 %v10631_v29  ;;  %v3313_v29 = vld [vmem:[%s13377_s17 + $0x648] sm:$0xff]  ;;  %v10833_v4 = vpack.c.bf16 %v3300_v31, %v3288_v63  ;;  %v10645_v35 = vpack.c.bf16 %v3298_v15, %v3286_v13  ;;  %v3384_v63 = vld [vmem:[%s13377_s17 + $0x880] sm:$0xff]  ;;  %v3382_v13 = vld [vmem:[%s13377_s17 + $0x870] sm:$0xff] }
 0x98e   :  { %v3396_v31 = vld [vmem:[%s13377_s17 + $0x8e0] sm:$0xff]  ;;  %v3394_v15 = vld [vmem:[%s13377_s17 + $0x8d0] sm:$0xff] }
 0x98f   :  { %10822 = vmatpush1.bf16.msra.mxu0 %v10821_v36  ;;  %v10835_v36 = vpack.c.bf16 %v3325_v25, %v3313_v29  ;;  %v3409_v29 = vld [vmem:[%s13377_s17 + $0x948] sm:$0xff] }
 0x990   :  { %10634 = vmatpush1.bf16.msra.mxu1 %v10633_v32  ;;  %10824 = vmatprep.subr.bf16.mxu0 %v10823_v43  ;;  %v3312_v32 = vld [vmem:[%s13377_s17 + $0x640] sm:$0xff]  ;;  %v3421_v25 = vld [vmem:[%s13377_s17 + $0x9a8] sm:$0xff] }
 0x991   :  { %10636 = vmatprep.subr.bf16.mxu1 %v10635_v5  ;;  %v3324_v43 = vld [vmem:[%s13377_s17 + $0x6a0] sm:$0xff]  ;;  %v3349_v5 = vld [vmem:[%s13377_s17 + $0x768] sm:$0xff] }
 0x992   :  { %v4456_v37 = vpop.f32.mrb[36].mxu0  ;;  %v10837_v17 = vpack.c.bf16 %v3324_v43, %v3312_v32  ;;  %v10839_v20 = vpack.c.bf16 %v3349_v5, %v3337_v28  ;;  %v3408_v32 = vld [vmem:[%s13377_s17 + $0x940] sm:$0xff]  ;;  %v3433_v28 = vld [vmem:[%s13377_s17 + $0xa08] sm:$0xff] }
 0x993   :  { %10826 = vmatpush1.bf16.msra.mxu0 %v10825_v23  ;;  %v4457_v27 = vadd.f32 %v4456_v37, %v4386_v41  ;;  %v4458_v34 = vpop.f32.mrb[37].mxu0  ;;  %v4527_v52 = vpop.f32.mrb[18].mxu1  ;;  %v3348_v23 = vld [vmem:[%s13377_s17 + $0x760] sm:$0xff]  ;;  %v3359_v41 = vld [vmem:[%s13377_s17 + $0x7b8] sm:$0xff]  ;;  %v3445_v5 = vld [vmem:[%s13377_s17 + $0xa68] sm:$0xff] }
 0x994   :  { %10638 = vmatpush1.bf16.msra.mxu1 %v10637_v50  ;;  %v4459_v2 = vadd.f32 %v4458_v34, %v4388_v24  ;;  %v4529_v54 = vpop.f32.mrb[19].mxu1  ;;  %10828 = vmatprep.subr.bf16.mxu0 %v10827_v53  ;;  %v3334_v50 = vld [vmem:[%s13377_s17 + $0x6f0] sm:$0xff]  ;;  %v10651_v53 = vpack.c.bf16 %v3347_v19, %v3335_v22  ;;  %v10841_v47 = vpack.c.bf16 %v3348_v23, %v3336_v30  ;;  %v3360_v24 = vld [vmem:[%s13377_s17 + $0x7c0] sm:$0xff]  ;;  %v3385_v34 = vld [vmem:[%s13377_s17 + $0x888] sm:$0xff] }
 0x995   :  { %v14134_v44 = vadd.f32 %v4527_v52, %v4457_v27  ;;  %10640 = vmatprep.subr.bf16.mxu1 %v10639_v6  ;;  %v3371_v6 = vld [vmem:[%s13377_s17 + $0x818] sm:$0xff]  ;;  %v10653_v39 = vpack.c.bf16 %v3346_v42, %v3334_v50  ;;  %v3372_v37 = vld [vmem:[%s13377_s17 + $0x820] sm:$0xff]  ;;  %v3370_v27 = vld [vmem:[%s13377_s17 + $0x810] sm:$0xff] }
 0x996   :  { %v14139_v46 = vadd.f32 %v4529_v54, %v4459_v2  ;;  %v10655_v48 = vpack.c.bf16 %v3371_v6, %v3359_v41  ;;  %v3397_v52 = vld [vmem:[%s13377_s17 + $0x8e8] sm:$0xff]  ;;  %v3395_v2 = vld [vmem:[%s13377_s17 + $0x8d8] sm:$0xff]  ;;  %v10845_v54 = vpack.c.bf16 %v3372_v37, %v3360_v24  ;;  %v3420_v43 = vld [vmem:[%s13377_s17 + $0x9a0] sm:$0xff] }
 0x997   :  { %10830 = vmatpush1.bf16.msra.mxu0 %v10829_v40  ;;  %v3383_v40 = vld [vmem:[%s13377_s17 + $0x878] sm:$0xff]  ;;  %v3432_v30 = vld [vmem:[%s13377_s17 + $0xa00] sm:$0xff]  ;;  %v3430_v50 = vld [vmem:[%s13377_s17 + $0x9f0] sm:$0xff] }
 0x998   :  { %10642 = vmatpush1.bf16.msra.mxu1 %v10641_v59  ;;  %10832 = vmatprep.subr.bf16.mxu0 %v10831_v49  ;;  %v10657_v59 = vpack.c.bf16 %v3370_v27, %v3358_v55  ;;  %v10847_v49 = vpack.c.bf16 %v3397_v52, %v3385_v34  ;;  %v3431_v22 = vld [vmem:[%s13377_s17 + $0x9f8] sm:$0xff]  ;;  %v3444_v23 = vld [vmem:[%s13377_s17 + $0xa60] sm:$0xff]  ;;  %v3442_v42 = vld [vmem:[%s13377_s17 + $0xa50] sm:$0xff] }
 0x999   :  { %10644 = vmatprep.subr.bf16.mxu1 %v10643_v62  ;;  %v10659_v62 = vpack.c.bf16 %v3395_v2, %v3383_v40  ;;  %v3443_v19 = vld [vmem:[%s13377_s17 + $0xa58] sm:$0xff]  ;;  %v3456_v24 = vld [vmem:[%s13377_s17 + $0xac0] sm:$0xff]  ;;  %v3454_v55 = vld [vmem:[%s13377_s17 + $0xab0] sm:$0xff] }
 0x99a   :  { %v3455_v41 = vld [vmem:[%s13377_s17 + $0xab8] sm:$0xff]  ;;  %v3468_v37 = vld [vmem:[%s13377_s17 + $0xb20] sm:$0xff]  ;;  %v3466_v27 = vld [vmem:[%s13377_s17 + $0xb10] sm:$0xff] }
 0x99b   :  { %10834 = vmatpush1.bf16.msra.mxu0 %v10833_v4  ;;  %v10849_v4 = vpack.c.bf16 %v3396_v31, %v3384_v63  ;;  %v3467_v6 = vld [vmem:[%s13377_s17 + $0xb18] sm:$0xff]  ;;  %v3481_v34 = vld [vmem:[%s13377_s17 + $0xb88] sm:$0xff]  ;;  %v3480_v63 = vld [vmem:[%s13377_s17 + $0xb80] sm:$0xff] }
 0x99c   :  { %10646 = vmatpush1.bf16.msra.mxu1 %v10645_v35  ;;  %10836 = vmatprep.subr.bf16.mxu0 %v10835_v36  ;;  %v10661_v35 = vpack.c.bf16 %v3394_v15, %v3382_v13  ;;  %v10851_v36 = vpack.c.bf16 %v3421_v25, %v3409_v29  ;;  %v3493_v52 = vld [vmem:[%s13377_s17 + $0xbe8] sm:$0xff]  ;;  %v3479_v40 = vld [vmem:[%s13377_s17 + $0xb78] sm:$0xff]  ;;  %v3492_v31 = vld [vmem:[%s13377_s17 + $0xbe0] sm:$0xff] }
 0x99d   :  { %10648 = vmatprep.subr.bf16.mxu1 %v10647_v45  ;;  %v10663_v45 = vpack.c.bf16 %v3419_v26, %v3407_v57  ;;  %v3491_v2 = vld [vmem:[%s13377_s17 + $0xbd8] sm:$0xff]  ;;  %v3478_v13 = vld [vmem:[%s13377_s17 + $0xb70] sm:$0xff]  ;;  %v3505_v29 = vld [vmem:[%s13377_s17 + $0xc48] sm:$0xff] }
 0x99e   :  { %v3490_v15 = vld [vmem:[%s13377_s17 + $0xbd0] sm:$0xff]  ;;  %v3517_v25 = vld [vmem:[%s13377_s17 + $0xca8] sm:$0xff]  ;;  %v3503_v57 = vld [vmem:[%s13377_s17 + $0xc38] sm:$0xff] }
 0x99f   :  { %10838 = vmatpush1.bf16.msra.mxu0 %v10837_v17  ;;  %v10853_v17 = vpack.c.bf16 %v3420_v43, %v3408_v32  ;;  %v3515_v26 = vld [vmem:[%s13377_s17 + $0xc98] sm:$0xff]  ;;  %v3504_v32 = vld [vmem:[%s13377_s17 + $0xc40] sm:$0xff] }
 0x9a0   :  { %10650 = vmatpush1.bf16.msra.mxu1 %v10649_v1  ;;  %10840 = vmatprep.subr.bf16.mxu0 %v10839_v20  ;;  %v10665_v1 = vpack.c.bf16 %v3418_v16, %v3406_v7  ;;  %v10855_v20 = vpack.c.bf16 %v3445_v5, %v3433_v28  ;;  %v3516_v43 = vld [vmem:[%s13377_s17 + $0xca0] sm:$0xff]  ;;  %v10679_v7 = vpack.c.bf16 %v3515_v26, %v3503_v57  ;;  %v3514_v16 = vld [vmem:[%s13377_s17 + $0xc90] sm:$0xff]  ;;  %v3529_v28 = vld [vmem:[%s13377_s17 + $0xd08] sm:$0xff] }
 0x9a1   :  { %10652 = vmatprep.subr.bf16.mxu1 %v10651_v53  ;;  %v10667_v53 = vpack.c.bf16 %v3443_v19, %v3431_v22  ;;  %v3541_v5 = vld [vmem:[%s13377_s17 + $0xd68] sm:$0xff]  ;;  %v10869_v22 = vpack.c.bf16 %v3516_v43, %v3504_v32  ;;  %v3527_v19 = vld [vmem:[%s13377_s17 + $0xcf8] sm:$0xff]  ;;  %v3600_v32 = vld [vmem:[%s13377_s17 + $0xf40] sm:$0xff] }
 0x9a2   :  { %v3599_v57 = vld [vmem:[%s13377_s17 + $0xf38] sm:$0xff]  ;;  %v3612_v43 = vld [vmem:[%s13377_s17 + $0xfa0] sm:$0xff] }
 0x9a3   :  { %10842 = vmatpush1.bf16.msra.mxu0 %v10841_v47  ;;  %v10857_v47 = vpack.c.bf16 %v3444_v23, %v3432_v30  ;;  %v3540_v30 = vld [vmem:[%s13377_s17 + $0xd60] sm:$0xff]  ;;  %v3526_v23 = vld [vmem:[%s13377_s17 + $0xcf0] sm:$0xff]  ;;  %v3611_v26 = vld [vmem:[%s13377_s17 + $0xf98] sm:$0xff] }
 0x9a4   :  { %10654 = vmatpush1.bf16.msra.mxu1 %v10653_v39  ;;  %10844 = vmatprep.subr.bf16.mxu0 %v10843_v51  ;;  %v10669_v39 = vpack.c.bf16 %v3442_v42, %v3430_v50  ;;  %v10859_v51 = vpack.c.bf16 %v3469_v38, %v3457_v11  ;;  %v10871_v50 = vpack.c.bf16 %v3541_v5, %v3529_v28  ;;  %v3553_v42 = vld [vmem:[%s13377_s17 + $0xdc8] sm:$0xff] }
 0x9a5   :  { %10656 = vmatprep.subr.bf16.mxu1 %v10655_v48  ;;  %v10671_v48 = vpack.c.bf16 %v3467_v6, %v3455_v41  ;;  %v3565_v11 = vld [vmem:[%s13377_s17 + $0xe28] sm:$0xff]  ;;  %v3551_v41 = vld [vmem:[%s13377_s17 + $0xdb8] sm:$0xff] }
 0x9a6   :  { %v3563_v6 = vld [vmem:[%s13377_s17 + $0xe18] sm:$0xff]  ;;  %v3625_v28 = vld [vmem:[%s13377_s17 + $0x1008] sm:$0xff] }
 0x9a7   :  { %10846 = vmatpush1.bf16.msra.mxu0 %v10845_v54  ;;  %v10861_v54 = vpack.c.bf16 %v3468_v37, %v3456_v24  ;;  %v3552_v24 = vld [vmem:[%s13377_s17 + $0xdc0] sm:$0xff]  ;;  %v3637_v5 = vld [vmem:[%s13377_s17 + $0x1068] sm:$0xff] }
 0x9a8   :  { %10658 = vmatpush1.bf16.msra.mxu1 %v10657_v59  ;;  %10848 = vmatprep.subr.bf16.mxu0 %v10847_v49  ;;  %v10673_v59 = vpack.c.bf16 %v3466_v27, %v3454_v55  ;;  %v10863_v49 = vpack.c.bf16 %v3493_v52, %v3481_v34  ;;  %v3564_v37 = vld [vmem:[%s13377_s17 + $0xe20] sm:$0xff]  ;;  %v3550_v55 = vld [vmem:[%s13377_s17 + $0xdb0] sm:$0xff]  ;;  %v3577_v34 = vld [vmem:[%s13377_s17 + $0xe88] sm:$0xff] }
 0x9a9   :  { %10660 = vmatprep.subr.bf16.mxu1 %v10659_v62  ;;  %v10675_v62 = vpack.c.bf16 %v3491_v2, %v3479_v40  ;;  %v3562_v27 = vld [vmem:[%s13377_s17 + $0xe10] sm:$0xff]  ;;  %v3589_v52 = vld [vmem:[%s13377_s17 + $0xee8] sm:$0xff]  ;;  %v3575_v40 = vld [vmem:[%s13377_s17 + $0xe78] sm:$0xff] }
 0x9aa   :  { %v3587_v2 = vld [vmem:[%s13377_s17 + $0xed8] sm:$0xff] }
 0x9ab   :  { %10850 = vmatpush1.bf16.msra.mxu0 %v10849_v4  ;;  %v10865_v4 = vpack.c.bf16 %v3492_v31, %v3480_v63  ;;  %v3576_v63 = vld [vmem:[%s13377_s17 + $0xe80] sm:$0xff] }
 0x9ac   :  { %10662 = vmatpush1.bf16.msra.mxu1 %v10661_v35  ;;  %10852 = vmatprep.subr.bf16.mxu0 %v10851_v36  ;;  %v10677_v35 = vpack.c.bf16 %v3490_v15, %v3478_v13  ;;  %v10867_v36 = vpack.c.bf16 %v3517_v25, %v3505_v29  ;;  %v3588_v31 = vld [vmem:[%s13377_s17 + $0xee0] sm:$0xff]  ;;  %v3574_v13 = vld [vmem:[%s13377_s17 + $0xe70] sm:$0xff]  ;;  %v3601_v29 = vld [vmem:[%s13377_s17 + $0xf48] sm:$0xff] }
 0x9ad   :  { %10664 = vmatprep.subr.bf16.mxu1 %v10663_v45  ;;  %v3502_v45 = vld [vmem:[%s13377_s17 + $0xc30] sm:$0xff]  ;;  %v3613_v25 = vld [vmem:[%s13377_s17 + $0xfa8] sm:$0xff] }
 0x9ae   :  { %v3586_v15 = vld [vmem:[%s13377_s17 + $0xed0] sm:$0xff] }
 0x9af   :  { %10854 = vmatpush1.bf16.msra.mxu0 %v10853_v17  ;;  %v3539_v17 = vld [vmem:[%s13377_s17 + $0xd58] sm:$0xff] }
 0x9b0   :  { %10666 = vmatpush1.bf16.msra.mxu1 %v10665_v1  ;;  %10856 = vmatprep.subr.bf16.mxu0 %v10855_v20  ;;  %v10681_v1 = vpack.c.bf16 %v3514_v16, %v3502_v45  ;;  %v3528_v20 = vld [vmem:[%s13377_s17 + $0xd00] sm:$0xff]  ;;  %v10683_v38 = vpack.c.bf16 %v3539_v17, %v3527_v19  ;;  %v10695_v45 = vpack.c.bf16 %v3611_v26, %v3599_v57  ;;  %v3610_v16 = vld [vmem:[%s13377_s17 + $0xf90] sm:$0xff]  ;;  %v3635_v19 = vld [vmem:[%s13377_s17 + $0x1058] sm:$0xff] }
 0x9b1   :  { %10668 = vmatprep.subr.bf16.mxu1 %v10667_v53  ;;  %v3538_v53 = vld [vmem:[%s13377_s17 + $0xd50] sm:$0xff]  ;;  %v10885_v17 = vpack.c.bf16 %v3612_v43, %v3600_v32  ;;  %v3695_v57 = vld [vmem:[%s13377_s17 + $0x1238] sm:$0xff]  ;;  %v3696_v32 = vld [vmem:[%s13377_s17 + $0x1240] sm:$0xff] }
 0x9b2   :  { %v3707_v26 = vld [vmem:[%s13377_s17 + $0x1298] sm:$0xff]  ;;  %v3708_v43 = vld [vmem:[%s13377_s17 + $0x12a0] sm:$0xff] }
 0x9b3   :  { %10858 = vmatpush1.bf16.msra.mxu0 %v10857_v47  ;;  %v10873_v47 = vpack.c.bf16 %v3540_v30, %v3528_v20  ;;  %v10887_v20 = vpack.c.bf16 %v3637_v5, %v3625_v28  ;;  %v3624_v30 = vld [vmem:[%s13377_s17 + $0x1000] sm:$0xff]  ;;  %v3721_v28 = vld [vmem:[%s13377_s17 + $0x1308] sm:$0xff] }
 0x9b4   :  { %10670 = vmatpush1.bf16.msra.mxu1 %v10669_v39  ;;  %10860 = vmatprep.subr.bf16.mxu0 %v10859_v51  ;;  %v10685_v39 = vpack.c.bf16 %v3538_v53, %v3526_v23  ;;  %v10875_v51 = vpack.c.bf16 %v3565_v11, %v3553_v42  ;;  %v3636_v23 = vld [vmem:[%s13377_s17 + $0x1060] sm:$0xff]  ;;  %v3634_v42 = vld [vmem:[%s13377_s17 + $0x1050] sm:$0xff]  ;;  %v3649_v11 = vld [vmem:[%s13377_s17 + $0x10c8] sm:$0xff] }
 0x9b5   :  { %10672 = vmatprep.subr.bf16.mxu1 %v10671_v48  ;;  %v10687_v48 = vpack.c.bf16 %v3563_v6, %v3551_v41  ;;  %v3647_v41 = vld [vmem:[%s13377_s17 + $0x10b8] sm:$0xff]  ;;  %v3733_v5 = vld [vmem:[%s13377_s17 + $0x1368] sm:$0xff] }
 0x9b6   :  { %v3659_v6 = vld [vmem:[%s13377_s17 + $0x1118] sm:$0xff] }
 0x9b7   :  { %10862 = vmatpush1.bf16.msra.mxu0 %v10861_v54  ;;  %v10877_v54 = vpack.c.bf16 %v3564_v37, %v3552_v24  ;;  %v3648_v24 = vld [vmem:[%s13377_s17 + $0x10c0] sm:$0xff] }
 0x9b8   :  { %10674 = vmatpush1.bf16.msra.mxu1 %v10673_v59  ;;  %10864 = vmatprep.subr.bf16.mxu0 %v10863_v49  ;;  %v10689_v59 = vpack.c.bf16 %v3562_v27, %v3550_v55  ;;  %v10879_v49 = vpack.c.bf16 %v3589_v52, %v3577_v34  ;;  %v3660_v37 = vld [vmem:[%s13377_s17 + $0x1120] sm:$0xff]  ;;  %v3646_v55 = vld [vmem:[%s13377_s17 + $0x10b0] sm:$0xff]  ;;  %v3673_v34 = vld [vmem:[%s13377_s17 + $0x1188] sm:$0xff] }
 0x9b9   :  { %10676 = vmatprep.subr.bf16.mxu1 %v10675_v62  ;;  %v10691_v62 = vpack.c.bf16 %v3587_v2, %v3575_v40  ;;  %v3658_v27 = vld [vmem:[%s13377_s17 + $0x1110] sm:$0xff]  ;;  %v3685_v52 = vld [vmem:[%s13377_s17 + $0x11e8] sm:$0xff]  ;;  %v3671_v40 = vld [vmem:[%s13377_s17 + $0x1178] sm:$0xff] }
 0x9ba   :  { %v3683_v2 = vld [vmem:[%s13377_s17 + $0x11d8] sm:$0xff] }
 0x9bb   :  { %10866 = vmatpush1.bf16.msra.mxu0 %v10865_v4  ;;  %v10881_v4 = vpack.c.bf16 %v3588_v31, %v3576_v63  ;;  %v3672_v63 = vld [vmem:[%s13377_s17 + $0x1180] sm:$0xff] }
 0x9bc   :  { %10678 = vmatpush1.bf16.msra.mxu1 %v10677_v35  ;;  %10868 = vmatprep.subr.bf16.mxu0 %v10867_v36  ;;  %v10693_v35 = vpack.c.bf16 %v3586_v15, %v3574_v13  ;;  %v10883_v36 = vpack.c.bf16 %v3613_v25, %v3601_v29  ;;  %v3684_v31 = vld [vmem:[%s13377_s17 + $0x11e0] sm:$0xff]  ;;  %v3670_v13 = vld [vmem:[%s13377_s17 + $0x1170] sm:$0xff]  ;;  %v3697_v29 = vld [vmem:[%s13377_s17 + $0x1248] sm:$0xff] }
 0x9bd   :  { %10680 = vmatprep.subr.bf16.mxu1 %v10679_v7  ;;  %v3598_v7 = vld [vmem:[%s13377_s17 + $0xf30] sm:$0xff]  ;;  %v3709_v25 = vld [vmem:[%s13377_s17 + $0x12a8] sm:$0xff] }
 0x9be   :  { %5236 = vmatmul.mubr.f32.vlgmr.msra.gmra.mrb[40].mxu0 %v13507_v12  ;;  %v3682_v15 = vld [vmem:[%s13377_s17 + $0x11d0] sm:$0xff] }
 0x9bf   :  { %5023 = vmatmul.mubr.f32.vlgmr.msra.gmra.mrb[22].mxu1 %v13507_v12  ;;  %10870 = vmatpush1.bf16.msra.mxu0 %v10869_v22  ;;  %v3623_v22 = vld [vmem:[%s13377_s17 + $0xff8] sm:$0xff] }
 0x9c0   :  { %5306 = vmatprep.mubr.f32.mxu0 %v13660_v60  ;;  %10682 = vmatpush1.bf16.msra.mxu1 %v10681_v1  ;;  %v10697_v1 = vpack.c.bf16 %v3610_v16, %v3598_v7  ;;  %v10699_v53 = vpack.c.bf16 %v3635_v19, %v3623_v22  ;;  %v3694_v7 = vld [vmem:[%s13377_s17 + $0x1230] sm:$0xff]  ;;  %v3719_v22 = vld [vmem:[%s13377_s17 + $0x12f8] sm:$0xff] }
 0x9c1   :  { %5093 = vmatprep.mubr.f32.mxu1 %v13660_v60  ;;  %10872 = vmatprep.subr.bf16.mxu0 %v10871_v50  ;;  %v3622_v50 = vld [vmem:[%s13377_s17 + $0xff0] sm:$0xff]  ;;  %v3731_v19 = vld [vmem:[%s13377_s17 + $0x1358] sm:$0xff] }
 0x9c2   :  { %10684 = vmatprep.subr.bf16.mxu1 %v10683_v38  ;;  %v3661_v38 = vld [vmem:[%s13377_s17 + $0x1128] sm:$0xff]  ;;  %v3706_v16 = vld [vmem:[%s13377_s17 + $0x1290] sm:$0xff] }
 0x9c3   :  { %10874 = vmatpush1.bf16.msra.mxu0 %v10873_v47  ;;  %v10889_v47 = vpack.c.bf16 %v3636_v23, %v3624_v30  ;;  %v3720_v30 = vld [vmem:[%s13377_s17 + $0x1300] sm:$0xff] }
 0x9c4   :  { %10686 = vmatpush1.bf16.msra.mxu1 %v10685_v39  ;;  %10876 = vmatprep.subr.bf16.mxu0 %v10875_v51  ;;  %v10701_v39 = vpack.c.bf16 %v3634_v42, %v3622_v50  ;;  %v10891_v51 = vpack.c.bf16 %v3661_v38, %v3649_v11  ;;  %v3732_v23 = vld [vmem:[%s13377_s17 + $0x1360] sm:$0xff]  ;;  %v3718_v50 = vld [vmem:[%s13377_s17 + $0x12f0] sm:$0xff]  ;;  %v3745_v11 = vld [vmem:[%s13377_s17 + $0x13c8] sm:$0xff] }
 0x9c5   :  { %10688 = vmatprep.subr.bf16.mxu1 %v10687_v48  ;;  %v10703_v48 = vpack.c.bf16 %v3659_v6, %v3647_v41  ;;  %v3730_v42 = vld [vmem:[%s13377_s17 + $0x1350] sm:$0xff]  ;;  %v3757_v38 = vld [vmem:[%s13377_s17 + $0x1428] sm:$0xff]  ;;  %v3743_v41 = vld [vmem:[%s13377_s17 + $0x13b8] sm:$0xff] }
 0x9c6   :  { %v3755_v6 = vld [vmem:[%s13377_s17 + $0x1418] sm:$0xff] }
 0x9c7   :  { %10878 = vmatpush1.bf16.msra.mxu0 %v10877_v54  ;;  %v10893_v54 = vpack.c.bf16 %v3660_v37, %v3648_v24  ;;  %v3744_v24 = vld [vmem:[%s13377_s17 + $0x13c0] sm:$0xff] }
 0x9c8   :  { %10690 = vmatpush1.bf16.msra.mxu1 %v10689_v59  ;;  %10880 = vmatprep.subr.bf16.mxu0 %v10879_v49  ;;  %v10705_v59 = vpack.c.bf16 %v3658_v27, %v3646_v55  ;;  %v10895_v49 = vpack.c.bf16 %v3685_v52, %v3673_v34  ;;  %v3756_v37 = vld [vmem:[%s13377_s17 + $0x1420] sm:$0xff]  ;;  %v3742_v55 = vld [vmem:[%s13377_s17 + $0x13b0] sm:$0xff]  ;;  %v3769_v34 = vld [vmem:[%s13377_s17 + $0x1488] sm:$0xff] }
 0x9c9   :  { %10692 = vmatprep.subr.bf16.mxu1 %v10691_v62  ;;  %v10707_v62 = vpack.c.bf16 %v3683_v2, %v3671_v40  ;;  %v3754_v27 = vld [vmem:[%s13377_s17 + $0x1410] sm:$0xff]  ;;  %v3781_v52 = vld [vmem:[%s13377_s17 + $0x14e8] sm:$0xff]  ;;  %v3767_v40 = vld [vmem:[%s13377_s17 + $0x1478] sm:$0xff] }
 0x9ca   :  { %v3779_v2 = vld [vmem:[%s13377_s17 + $0x14d8] sm:$0xff] }
 0x9cb   :  { %10882 = vmatpush1.bf16.msra.mxu0 %v10881_v4  ;;  %v10897_v4 = vpack.c.bf16 %v3684_v31, %v3672_v63  ;;  %v3768_v63 = vld [vmem:[%s13377_s17 + $0x1480] sm:$0xff] }
 0x9cc   :  { %10694 = vmatpush1.bf16.msra.mxu1 %v10693_v35  ;;  %10884 = vmatprep.subr.bf16.mxu0 %v10883_v36  ;;  %v10709_v35 = vpack.c.bf16 %v3682_v15, %v3670_v13  ;;  %v10899_v36 = vpack.c.bf16 %v3709_v25, %v3697_v29  ;;  %v3780_v31 = vld [vmem:[%s13377_s17 + $0x14e0] sm:$0xff]  ;;  %v3766_v13 = vld [vmem:[%s13377_s17 + $0x1470] sm:$0xff]  ;;  %v3793_v29 = vld [vmem:[%s13377_s17 + $0x1548] sm:$0xff] }
 0x9cd   :  { %10696 = vmatprep.subr.bf16.mxu1 %v10695_v45  ;;  %v10711_v45 = vpack.c.bf16 %v3707_v26, %v3695_v57  ;;  %v3778_v15 = vld [vmem:[%s13377_s17 + $0x14d0] sm:$0xff]  ;;  %v3805_v25 = vld [vmem:[%s13377_s17 + $0x15a8] sm:$0xff]  ;;  %v3791_v57 = vld [vmem:[%s13377_s17 + $0x1538] sm:$0xff] }
 0x9ce   :  { %v3803_v26 = vld [vmem:[%s13377_s17 + $0x1598] sm:$0xff] }
 0x9cf   :  { %10886 = vmatpush1.bf16.msra.mxu0 %v10885_v17  ;;  %v10901_v17 = vpack.c.bf16 %v3708_v43, %v3696_v32  ;;  %v3792_v32 = vld [vmem:[%s13377_s17 + $0x1540] sm:$0xff] }
 0x9d0   :  { %10698 = vmatpush1.bf16.msra.mxu1 %v10697_v1  ;;  %10888 = vmatprep.subr.bf16.mxu0 %v10887_v20  ;;  %v10713_v1 = vpack.c.bf16 %v3706_v16, %v3694_v7  ;;  %v10903_v20 = vpack.c.bf16 %v3733_v5, %v3721_v28  ;;  %v3804_v43 = vld [vmem:[%s13377_s17 + $0x15a0] sm:$0xff]  ;;  %v3790_v7 = vld [vmem:[%s13377_s17 + $0x1530] sm:$0xff]  ;;  %v3817_v28 = vld [vmem:[%s13377_s17 + $0x1608] sm:$0xff] }
 0x9d1   :  { %10700 = vmatprep.subr.bf16.mxu1 %v10699_v53  ;;  %v10715_v53 = vpack.c.bf16 %v3731_v19, %v3719_v22  ;;  %v3802_v16 = vld [vmem:[%s13377_s17 + $0x1590] sm:$0xff]  ;;  %v3829_v5 = vld [vmem:[%s13377_s17 + $0x1668] sm:$0xff]  ;;  %v3815_v22 = vld [vmem:[%s13377_s17 + $0x15f8] sm:$0xff] }
 0x9d2   :  { %v3827_v19 = vld [vmem:[%s13377_s17 + $0x1658] sm:$0xff] }
 0x9d3   :  { %10890 = vmatpush1.bf16.msra.mxu0 %v10889_v47  ;;  %v10905_v47 = vpack.c.bf16 %v3732_v23, %v3720_v30  ;;  %v3816_v30 = vld [vmem:[%s13377_s17 + $0x1600] sm:$0xff] }
 0x9d4   :  { %10702 = vmatpush1.bf16.msra.mxu1 %v10701_v39  ;;  %10892 = vmatprep.subr.bf16.mxu0 %v10891_v51  ;;  %v10717_v39 = vpack.c.bf16 %v3730_v42, %v3718_v50  ;;  %v10907_v51 = vpack.c.bf16 %v3757_v38, %v3745_v11  ;;  %v3828_v23 = vld [vmem:[%s13377_s17 + $0x1660] sm:$0xff]  ;;  %v3814_v50 = vld [vmem:[%s13377_s17 + $0x15f0] sm:$0xff]  ;;  %v3841_v11 = vld [vmem:[%s13377_s17 + $0x16c8] sm:$0xff] }
 0x9d5   :  { %10704 = vmatprep.subr.bf16.mxu1 %v10703_v48  ;;  %v10719_v48 = vpack.c.bf16 %v3755_v6, %v3743_v41  ;;  %v3826_v42 = vld [vmem:[%s13377_s17 + $0x1650] sm:$0xff]  ;;  %v3853_v38 = vld [vmem:[%s13377_s17 + $0x1728] sm:$0xff]  ;;  %v3839_v41 = vld [vmem:[%s13377_s17 + $0x16b8] sm:$0xff] }
 0x9d6   :  { %v3851_v6 = vld [vmem:[%s13377_s17 + $0x1718] sm:$0xff] }
 0x9d7   :  { %10894 = vmatpush1.bf16.msra.mxu0 %v10893_v54  ;;  %v10909_v54 = vpack.c.bf16 %v3756_v37, %v3744_v24  ;;  %v3840_v24 = vld [vmem:[%s13377_s17 + $0x16c0] sm:$0xff] }
 0x9d8   :  { %10706 = vmatpush1.bf16.msra.mxu1 %v10705_v59  ;;  %10896 = vmatprep.subr.bf16.mxu0 %v10895_v49  ;;  %v10721_v59 = vpack.c.bf16 %v3754_v27, %v3742_v55  ;;  %v10911_v49 = vpack.c.bf16 %v3781_v52, %v3769_v34  ;;  %v3852_v37 = vld [vmem:[%s13377_s17 + $0x1720] sm:$0xff]  ;;  %v3838_v55 = vld [vmem:[%s13377_s17 + $0x16b0] sm:$0xff]  ;;  %v3865_v34 = vld [vmem:[%s13377_s17 + $0x1788] sm:$0xff] }
 0x9d9   :  { %10708 = vmatprep.subr.bf16.mxu1 %v10707_v62  ;;  %v10723_v62 = vpack.c.bf16 %v3779_v2, %v3767_v40  ;;  %v3850_v27 = vld [vmem:[%s13377_s17 + $0x1710] sm:$0xff]  ;;  %v3877_v52 = vld [vmem:[%s13377_s17 + $0x17e8] sm:$0xff]  ;;  %v3863_v40 = vld [vmem:[%s13377_s17 + $0x1778] sm:$0xff] }
 0x9da   :  { %v3875_v2 = vld [vmem:[%s13377_s17 + $0x17d8] sm:$0xff] }
 0x9db   :  { %10898 = vmatpush1.bf16.msra.mxu0 %v10897_v4  ;;  %v10913_v4 = vpack.c.bf16 %v3780_v31, %v3768_v63  ;;  %v3864_v63 = vld [vmem:[%s13377_s17 + $0x1780] sm:$0xff] }
 0x9dc   :  { %10710 = vmatpush1.bf16.msra.mxu1 %v10709_v35  ;;  %10900 = vmatprep.subr.bf16.mxu0 %v10899_v36  ;;  %v10725_v35 = vpack.c.bf16 %v3778_v15, %v3766_v13  ;;  %v10915_v36 = vpack.c.bf16 %v3805_v25, %v3793_v29  ;;  %v3876_v31 = vld [vmem:[%s13377_s17 + $0x17e0] sm:$0xff]  ;;  %v3862_v13 = vld [vmem:[%s13377_s17 + $0x1770] sm:$0xff]  ;;  %v3889_v29 = vld [vmem:[%s13377_s17 + $0x1848] sm:$0xff] }
 0x9dd   :  { %10712 = vmatprep.subr.bf16.mxu1 %v10711_v45  ;;  %v10727_v45 = vpack.c.bf16 %v3803_v26, %v3791_v57  ;;  %v3874_v15 = vld [vmem:[%s13377_s17 + $0x17d0] sm:$0xff]  ;;  %v3901_v25 = vld [vmem:[%s13377_s17 + $0x18a8] sm:$0xff]  ;;  %v3887_v57 = vld [vmem:[%s13377_s17 + $0x1838] sm:$0xff] }
 0x9de   :  { %v3899_v26 = vld [vmem:[%s13377_s17 + $0x1898] sm:$0xff] }
 0x9df   :  { %10902 = vmatpush1.bf16.msra.mxu0 %v10901_v17  ;;  %v10917_v17 = vpack.c.bf16 %v3804_v43, %v3792_v32  ;;  %v3888_v32 = vld [vmem:[%s13377_s17 + $0x1840] sm:$0xff] }
 0x9e0   :  { %10714 = vmatpush1.bf16.msra.mxu1 %v10713_v1  ;;  %10904 = vmatprep.subr.bf16.mxu0 %v10903_v20  ;;  %v10729_v1 = vpack.c.bf16 %v3802_v16, %v3790_v7  ;;  %v10919_v20 = vpack.c.bf16 %v3829_v5, %v3817_v28  ;;  %v3900_v43 = vld [vmem:[%s13377_s17 + $0x18a0] sm:$0xff]  ;;  %v10743_v7 = vpack.c.bf16 %v3899_v26, %v3887_v57  ;;  %v3898_v16 = vld [vmem:[%s13377_s17 + $0x1890] sm:$0xff]  ;;  %v3913_v5 = vld [vmem:[%s13377_s17 + $0x1908] sm:$0xff] }
 0x9e1   :  { %10716 = vmatprep.subr.bf16.mxu1 %v10715_v53  ;;  %v10731_v53 = vpack.c.bf16 %v3827_v19, %v3815_v22  ;;  %v6232_v28 = vld [vmem:[%s14334_s10 + $0x4] sm:$0x7]  ;;  %v3925_v22 = vld [vmem:[%s13377_s17 + $0x1968] sm:$0xff] }
 0x9e2   :  { %v6239_v19 = vsel %vm6235_vm5, %v6232_v28, 0.0  ;;  %v3960_v26 = vld [vmem:[%s13377_s17 + $0x1a80] sm:$0xff] }
 0x9e3   :  { %10906 = vmatpush1.bf16.msra.mxu0 %v10905_v47  ;;  %v10921_v47 = vpack.c.bf16 %v3828_v23, %v3816_v30  ;;  %v3912_v30 = vld [vmem:[%s13377_s17 + $0x1900] sm:$0xff]  ;;  %6240 = vadd.xlane.f32.xlu0 %v6239_v19 }
 0x9e4   :  { %10718 = vmatpush1.bf16.msra.mxu1 %v10717_v39  ;;  %10908 = vmatprep.subr.bf16.mxu0 %v10907_v51  ;;  %v10733_v39 = vpack.c.bf16 %v3826_v42, %v3814_v50  ;;  %v10923_v51 = vpack.c.bf16 %v3853_v38, %v3841_v11  ;;  %v3924_v50 = vld [vmem:[%s13377_s17 + $0x1960] sm:$0xff]  ;;  %v3922_v42 = vld [vmem:[%s13377_s17 + $0x1950] sm:$0xff]  ;;  %v10935_v11 = vpack.c.bf16 %v3925_v22, %v3913_v5  ;;  %v3937_v38 = vld [vmem:[%s13377_s17 + $0x19c8] sm:$0xff] }
 0x9e5   :  { %10720 = vmatprep.subr.bf16.mxu1 %v10719_v48  ;;  %v10735_v48 = vpack.c.bf16 %v3851_v6, %v3839_v41  ;;  %v3949_v41 = vld [vmem:[%s13377_s17 + $0x1a28] sm:$0xff]  ;;  %v3984_v19 = vld [vmem:[%s13377_s17 + $0x1b40] sm:$0xff] }
 0x9e6   :  { %v6233_v6 = vld [vmem:[%s14334_s10 + $0x8] sm:$0x7] }
 0x9e7   :  { %10910 = vmatpush1.bf16.msra.mxu0 %v10909_v54  ;;  %v10925_v54 = vpack.c.bf16 %v3852_v37, %v3840_v24  ;;  %v10937_v24 = vpack.c.bf16 %v3924_v50, %v3912_v30  ;;  %v3936_v37 = vld [vmem:[%s13377_s17 + $0x19c0] sm:$0xff]  ;;  %v3994_v30 = vld [vmem:[%s13377_s17 + $0x1b90] sm:$0xff]  ;;  %v4021_v50 = vld [vmem:[%s13377_s17 + $0x1c68] sm:$0xff] }
 0x9e8   :  { %10722 = vmatpush1.bf16.msra.mxu1 %v10721_v59  ;;  %10912 = vmatprep.subr.bf16.mxu0 %v10911_v49  ;;  %v10737_v59 = vpack.c.bf16 %v3850_v27, %v3838_v55  ;;  %v10927_v49 = vpack.c.bf16 %v3877_v52, %v3865_v34  ;;  %v6242_v55 = vsel %vm6235_vm5, %v6233_v6, 0.0  ;;  %v10939_v34 = vpack.c.bf16 %v3949_v41, %v3937_v38  ;;  %v3948_v52 = vld [vmem:[%s13377_s17 + $0x1a20] sm:$0xff] }
 0x9e9   :  { %10724 = vmatprep.subr.bf16.mxu1 %v10723_v62  ;;  %v10739_v62 = vpack.c.bf16 %v3875_v2, %v3863_v40  ;;  %v3934_v40 = vld [vmem:[%s13377_s17 + $0x19b0] sm:$0xff]  ;;  %6243 = vadd.xlane.f32.xlu0 %v6242_v55  ;;  %v4008_v6 = vld [vmem:[%s13377_s17 + $0x1c00] sm:$0xff]  ;;  %v4045_v55 = vld [vmem:[%s13377_s17 + $0x1d28] sm:$0xff] }
 0x9eb   :  { %10914 = vmatpush1.bf16.msra.mxu0 %v10913_v4  ;;  %v10929_v4 = vpack.c.bf16 %v3876_v31, %v3864_v63  ;;  %v3961_v63 = vld [vmem:[%s13377_s17 + $0x1a88] sm:$0xff] }
 0x9ec   :  { %10726 = vmatpush1.bf16.msra.mxu1 %v10725_v35  ;;  %10916 = vmatprep.subr.bf16.mxu0 %v10915_v36  ;;  %v10741_v35 = vpack.c.bf16 %v3874_v15, %v3862_v13  ;;  %v10931_v36 = vpack.c.bf16 %v3901_v25, %v3889_v29  ;;  %v3973_v31 = vld [vmem:[%s13377_s17 + $0x1ae8] sm:$0xff]  ;;  %v3959_v13 = vld [vmem:[%s13377_s17 + $0x1a78] sm:$0xff]  ;;  %v10941_v15 = vpack.c.bf16 %v3948_v52, %v3936_v37 }
 0x9ed   :  { %10728 = vmatprep.subr.bf16.mxu1 %v10727_v45  ;;  %v3886_v45 = vld [vmem:[%s13377_s17 + $0x1830] sm:$0xff]  ;;  %v10943_v57 = vpack.c.bf16 %v3973_v31, %v3961_v63  ;;  %v4033_v37 = vld [vmem:[%s13377_s17 + $0x1cc8] sm:$0xff] }
 0x9ee   :  { %v10745_v23 = vpack.c.bf16 %v3898_v16, %v3886_v45  ;;  %v3983_v45 = vld [vmem:[%s13377_s17 + $0x1b38] sm:$0xff]  ;;  %v4042_v63 = vld [vmem:[%s13377_s17 + $0x1d10] sm:$0xff]  ;;  %v4057_v31 = vld [vmem:[%s13377_s17 + $0x1d88] sm:$0xff] }
 0x9ef   :  { %10918 = vmatpush1.bf16.msra.mxu0 %v10917_v17  ;;  %v10933_v17 = vpack.c.bf16 %v3900_v43, %v3888_v32  ;;  %v3970_v32 = vld [vmem:[%s13377_s17 + $0x1ad0] sm:$0xff]  ;;  %v3985_v43 = vld [vmem:[%s13377_s17 + $0x1b48] sm:$0xff]  ;;  %v3995_v16 = vld [vmem:[%s13377_s17 + $0x1b98] sm:$0xff] }
 0x9f0   :  { %10730 = vmatpush1.bf16.msra.mxu1 %v10729_v1  ;;  %10920 = vmatprep.subr.bf16.mxu0 %v10919_v20  ;;  %v3911_v1 = vld [vmem:[%s13377_s17 + $0x18f8] sm:$0xff] }
 0x9f1   :  { %10732 = vmatprep.subr.bf16.mxu1 %v10731_v53  ;;  %v3923_v20 = vld [vmem:[%s13377_s17 + $0x1958] sm:$0xff]  ;;  %v3910_v53 = vld [vmem:[%s13377_s17 + $0x18f0] sm:$0xff] }
 0x9f2   :  { %v10749_v27 = vpack.c.bf16 %v3922_v42, %v3910_v53  ;;  %v4007_v53 = vld [vmem:[%s13377_s17 + $0x1bf8] sm:$0xff] }
 0x9f3   :  { %10922 = vmatpush1.bf16.msra.mxu0 %v10921_v47  ;;  %v10747_v47 = vpack.c.bf16 %v3923_v20, %v3911_v1  ;;  %v3982_v1 = vld [vmem:[%s13377_s17 + $0x1b30] sm:$0xff]  ;;  %v10759_v20 = vpack.c.bf16 %v3995_v16, %v3983_v45  ;;  %v4019_v42 = vld [vmem:[%s13377_s17 + $0x1c58] sm:$0xff] }
 0x9f4   :  { %10734 = vmatpush1.bf16.msra.mxu1 %v10733_v39  ;;  %10924 = vmatprep.subr.bf16.mxu0 %v10923_v51  ;;  %v3935_v39 = vld [vmem:[%s13377_s17 + $0x19b8] sm:$0xff]  ;;  %v10761_v38 = vpack.c.bf16 %v3994_v30, %v3982_v1  ;;  %v4078_v1 = vld [vmem:[%s13377_s17 + $0x1e30] sm:$0xff] }
 0x9f5   :  { %10736 = vmatprep.subr.bf16.mxu1 %v10735_v48  ;;  %v3947_v51 = vld [vmem:[%s13377_s17 + $0x1a18] sm:$0xff]  ;;  %v6231_v48 = vld [vmem:[%s14334_s10] sm:$0x7]  ;;  %v4090_v30 = vld [vmem:[%s13377_s17 + $0x1e90] sm:$0xff] }
 0x9f6   :  { %v6236_v2 = vsel %vm6235_vm5, %v6231_v48, 0.0  ;;  %v4031_v48 = vld [vmem:[%s13377_s17 + $0x1cb8] sm:$0xff] }
 0x9f7   :  { %10926 = vmatpush1.bf16.msra.mxu0 %v10925_v54  ;;  %v6234_v54 = vld [vmem:[%s14334_s10 + $0xc] sm:$0x7]  ;;  %6237 = vadd.xlane.f32.xlu1 %v6236_v2  ;;  %v4032_v2 = vld [vmem:[%s13377_s17 + $0x1cc0] sm:$0xff]  ;;  %v4079_v45 = vld [vmem:[%s13377_s17 + $0x1e38] sm:$0xff]  ;;  %s12526_s10 = smov 17  }
 0x9f8   :  { %10738 = vmatpush1.bf16.msra.mxu1 %v10737_v59  ;;  %10928 = vmatprep.subr.bf16.mxu0 %v10927_v49  ;;  %v10751_v59 = vpack.c.bf16 %v3947_v51, %v3935_v39  ;;  %v3946_v49 = vld [vmem:[%s13377_s17 + $0x1a10] sm:$0xff]  ;;  %v6245_v29 = vsel %vm6235_vm5, %v6234_v54, 0.0  ;;  %v10763_v51 = vpack.c.bf16 %v4019_v42, %v4007_v53  ;;  %v4044_v54 = vld [vmem:[%s13377_s17 + $0x1d20] sm:$0xff]  ;;  %v4091_v16 = vld [vmem:[%s13377_s17 + $0x1e98] sm:$0xff]  ;;  %s8957_s13 = sld [smem:[%s15933_s0 + %s12526_s10]]  }
 0x9f9   :  { %10740 = vmatprep.subr.bf16.mxu1 %v10739_v62  ;;  %v3971_v62 = vld [vmem:[%s13377_s17 + $0x1ad8] sm:$0xff]  ;;  %v10753_v25 = vpack.c.bf16 %v3946_v49, %v3934_v40  ;;  %6246 = vadd.xlane.f32.xlu0 %v6245_v29  ;;  %v4006_v39 = vld [vmem:[%s13377_s17 + $0x1bf0] sm:$0xff]  ;;  %v10955_v40 = vpack.c.bf16 %v4045_v55, %v4033_v37  ;;  %v10957_v29 = vpack.c.bf16 %v4044_v54, %v4032_v2  ;;  %v4129_v37 = vld [vmem:[%s13377_s17 + $0x1fc8] sm:$0xff] }
 0x9fa   :  { %v4103_v53 = vld [vmem:[%s13377_s17 + $0x1ef8] sm:$0xff]  ;;  %v4141_v55 = vld [vmem:[%s13377_s17 + $0x2028] sm:$0xff]  ;;  %v4128_v2 = vld [vmem:[%s13377_s17 + $0x1fc0] sm:$0xff] }
 0x9fb   :  { %10930 = vmatpush1.bf16.msra.mxu0 %v10929_v4  ;;  %v3972_v4 = vld [vmem:[%s13377_s17 + $0x1ae0] sm:$0xff]  ;;  %v4115_v42 = vld [vmem:[%s13377_s17 + $0x1f58] sm:$0xff] }
 0x9fc   :  { %10742 = vmatpush1.bf16.msra.mxu1 %v10741_v35  ;;  %10932 = vmatprep.subr.bf16.mxu0 %v10931_v36  ;;  %v3958_v35 = vld [vmem:[%s13377_s17 + $0x1a70] sm:$0xff]  ;;  %v10755_v36 = vpack.c.bf16 %v3971_v62, %v3959_v13  ;;  %v10945_v28 = vpack.c.bf16 %v3972_v4, %v3960_v26  ;;  %v4069_v13 = vld [vmem:[%s13377_s17 + $0x1de8] sm:$0xff]  ;;  %v4055_v62 = vld [vmem:[%s13377_s17 + $0x1d78] sm:$0xff] }
 0x9fd   :  { %10744 = vmatprep.subr.bf16.mxu1 %v10743_v7  ;;  %v3997_v7 = vld [vmem:[%s13377_s17 + $0x1ba8] sm:$0xff]  ;;  %v10757_v5 = vpack.c.bf16 %v3970_v32, %v3958_v35  ;;  %v4056_v26 = vld [vmem:[%s13377_s17 + $0x1d80] sm:$0xff]  ;;  %v4054_v35 = vld [vmem:[%s13377_s17 + $0x1d70] sm:$0xff] }
 0x9fe   :  { %5307 = vmatmul.mubr.f32.vlgmr.msra.gmra.mrb[40].mxu0 %v13664_v61  ;;  %v10947_v22 = vpack.c.bf16 %v3997_v7, %v3985_v43  ;;  %v4068_v4 = vld [vmem:[%s13377_s17 + $0x1de0] sm:$0xff]  ;;  %v4066_v32 = vld [vmem:[%s13377_s17 + $0x1dd0] sm:$0xff]  ;;  %v4081_v43 = vld [vmem:[%s13377_s17 + $0x1e48] sm:$0xff] }
 0x9ff   :  { %5094 = vmatmul.mubr.f32.vlgmr.msra.gmra.mrb[22].mxu1 %v13664_v61  ;;  %10934 = vmatpush1.bf16.msra.mxu0 %v10933_v17  ;;  %v3996_v17 = vld [vmem:[%s13377_s17 + $0x1ba0] sm:$0xff]  ;;  %v4093_v7 = vld [vmem:[%s13377_s17 + $0x1ea8] sm:$0xff] }
 0xa00   :  { %9020 = vmatprep.mubr.msk.f32.mxu0 %vm4316_vm11, %v13670_v18  ;;  %10746 = vmatpush1.bf16.msra.mxu1 %v10745_v23  ;;  %v4009_v23 = vld [vmem:[%s13377_s17 + $0x1c08] sm:$0xff]  ;;  %v4140_v54 = vld [vmem:[%s13377_s17 + $0x2020] sm:$0xff] }
 0xa01   :  { %9019 = vmatprep.mubr.msk.f32.mxu1 %vm4316_vm11, %v13670_v18  ;;  %10936 = vmatprep.subr.bf16.mxu0 %v10935_v11  ;;  %v10949_v11 = vpack.c.bf16 %v3996_v17, %v3984_v19  ;;  %v10951_v41 = vpack.c.bf16 %v4021_v50, %v4009_v23  ;;  %v4080_v19 = vld [vmem:[%s13377_s17 + $0x1e40] sm:$0xff]  ;;  %v4105_v23 = vld [vmem:[%s13377_s17 + $0x1f08] sm:$0xff] }
 0xa02   :  { %10748 = vmatprep.subr.bf16.mxu1 %v10747_v47  ;;  %v4020_v47 = vld [vmem:[%s13377_s17 + $0x1c60] sm:$0xff]  ;;  %v4117_v50 = vld [vmem:[%s13377_s17 + $0x1f68] sm:$0xff] }
 0xa03   :  { %10938 = vmatpush1.bf16.msra.mxu0 %v10937_v24  ;;  %v4018_v24 = vld [vmem:[%s13377_s17 + $0x1c50] sm:$0xff]  ;;  %v4092_v17 = vld [vmem:[%s13377_s17 + $0x1ea0] sm:$0xff] }
 0xa04   :  { %10750 = vmatpush1.bf16.msra.mxu1 %v10749_v27  ;;  %10940 = vmatprep.subr.bf16.mxu0 %v10939_v34  ;;  %v4043_v27 = vld [vmem:[%s13377_s17 + $0x1d18] sm:$0xff]  ;;  %v10953_v34 = vpack.c.bf16 %v4020_v47, %v4008_v6  ;;  %v10765_v52 = vpack.c.bf16 %v4018_v24, %v4006_v39  ;;  %v4104_v6 = vld [vmem:[%s13377_s17 + $0x1f00] sm:$0xff]  ;;  %v4102_v39 = vld [vmem:[%s13377_s17 + $0x1ef0] sm:$0xff] }
 0xa05   :  { %10752 = vmatprep.subr.bf16.mxu1 %v10751_v59  ;;  %v4030_v59 = vld [vmem:[%s13377_s17 + $0x1cb0] sm:$0xff]  ;;  %v10767_v49 = vpack.c.bf16 %v4043_v27, %v4031_v48  ;;  %v4116_v47 = vld [vmem:[%s13377_s17 + $0x1f60] sm:$0xff]  ;;  %v4127_v48 = vld [vmem:[%s13377_s17 + $0x1fb8] sm:$0xff] }
 0xa06   :  { %v4114_v24 = vld [vmem:[%s13377_s17 + $0x1f50] sm:$0xff]  ;;  %v4139_v27 = vld [vmem:[%s13377_s17 + $0x2018] sm:$0xff] }
 0xa07   :  { %10942 = vmatpush1.bf16.msra.mxu0 %v10941_v15  ;;  %v4067_v15 = vld [vmem:[%s13377_s17 + $0x1dd8] sm:$0xff] }
 0xa08   :  { %10754 = vmatpush1.bf16.msra.mxu1 %v10753_v25  ;;  %10944 = vmatprep.subr.bf16.mxu0 %v10943_v57  ;;  %v10769_v25 = vpack.c.bf16 %v4042_v63, %v4030_v59  ;;  %v10959_v57 = vpack.c.bf16 %v4069_v13, %v4057_v31  ;;  %v4126_v59 = vld [vmem:[%s13377_s17 + $0x1fb0] sm:$0xff]  ;;  %v4153_v31 = vld [vmem:[%s13377_s17 + $0x2088] sm:$0xff] }
 0xa09   :  { %10756 = vmatprep.subr.bf16.mxu1 %v10755_v36  ;;  %v10771_v36 = vpack.c.bf16 %v4067_v15, %v4055_v62  ;;  %v4138_v63 = vld [vmem:[%s13377_s17 + $0x2010] sm:$0xff]  ;;  %v4165_v13 = vld [vmem:[%s13377_s17 + $0x20e8] sm:$0xff]  ;;  %v4151_v62 = vld [vmem:[%s13377_s17 + $0x2078] sm:$0xff] }
 0xa0a   :  { %v4163_v15 = vld [vmem:[%s13377_s17 + $0x20d8] sm:$0xff] }
 0xa0b   :  { %10946 = vmatpush1.bf16.msra.mxu0 %v10945_v28  ;;  %v10961_v28 = vpack.c.bf16 %v4068_v4, %v4056_v26  ;;  %v4152_v26 = vld [vmem:[%s13377_s17 + $0x2080] sm:$0xff] }
 0xa0c   :  { %10758 = vmatpush1.bf16.msra.mxu1 %v10757_v5  ;;  %10948 = vmatprep.subr.bf16.mxu0 %v10947_v22  ;;  %v10773_v5 = vpack.c.bf16 %v4066_v32, %v4054_v35  ;;  %v10963_v22 = vpack.c.bf16 %v4093_v7, %v4081_v43  ;;  %v4164_v4 = vld [vmem:[%s13377_s17 + $0x20e0] sm:$0xff]  ;;  %v4150_v35 = vld [vmem:[%s13377_s17 + $0x2070] sm:$0xff]  ;;  %v4177_v43 = vld [vmem:[%s13377_s17 + $0x2148] sm:$0xff] }
 0xa0d   :  { %10760 = vmatprep.subr.bf16.mxu1 %v10759_v20  ;;  %v10775_v20 = vpack.c.bf16 %v4091_v16, %v4079_v45  ;;  %v4162_v32 = vld [vmem:[%s13377_s17 + $0x20d0] sm:$0xff]  ;;  %v4189_v7 = vld [vmem:[%s13377_s17 + $0x21a8] sm:$0xff]  ;;  %v4175_v45 = vld [vmem:[%s13377_s17 + $0x2138] sm:$0xff] }
 0xa0e   :  { %v4187_v16 = vld [vmem:[%s13377_s17 + $0x2198] sm:$0xff] }
 0xa0f   :  { %10950 = vmatpush1.bf16.msra.mxu0 %v10949_v11  ;;  %v10965_v11 = vpack.c.bf16 %v4092_v17, %v4080_v19  ;;  %v4176_v19 = vld [vmem:[%s13377_s17 + $0x2140] sm:$0xff] }
 0xa10   :  { %10762 = vmatpush1.bf16.msra.mxu1 %v10761_v38  ;;  %10952 = vmatprep.subr.bf16.mxu0 %v10951_v41  ;;  %v10777_v38 = vpack.c.bf16 %v4090_v30, %v4078_v1  ;;  %v10967_v41 = vpack.c.bf16 %v4117_v50, %v4105_v23  ;;  %v4188_v17 = vld [vmem:[%s13377_s17 + $0x21a0] sm:$0xff]  ;;  %v4174_v1 = vld [vmem:[%s13377_s17 + $0x2130] sm:$0xff]  ;;  %v4201_v23 = vld [vmem:[%s13377_s17 + $0x2208] sm:$0xff] }
 0xa11   :  { %10764 = vmatprep.subr.bf16.mxu1 %v10763_v51  ;;  %v10779_v51 = vpack.c.bf16 %v4115_v42, %v4103_v53  ;;  %v4186_v30 = vld [vmem:[%s13377_s17 + $0x2190] sm:$0xff]  ;;  %v4213_v50 = vld [vmem:[%s13377_s17 + $0x2268] sm:$0xff]  ;;  %v4199_v53 = vld [vmem:[%s13377_s17 + $0x21f8] sm:$0xff] }
 0xa12   :  { %v4211_v42 = vld [vmem:[%s13377_s17 + $0x2258] sm:$0xff] }
 0xa13   :  { %10954 = vmatpush1.bf16.msra.mxu0 %v10953_v34  ;;  %v10969_v34 = vpack.c.bf16 %v4116_v47, %v4104_v6  ;;  %v4200_v6 = vld [vmem:[%s13377_s17 + $0x2200] sm:$0xff] }
 0xa14   :  { %10766 = vmatpush1.bf16.msra.mxu1 %v10765_v52  ;;  %10956 = vmatprep.subr.bf16.mxu0 %v10955_v40  ;;  %v10781_v52 = vpack.c.bf16 %v4114_v24, %v4102_v39  ;;  %v10971_v40 = vpack.c.bf16 %v4141_v55, %v4129_v37  ;;  %v4212_v47 = vld [vmem:[%s13377_s17 + $0x2260] sm:$0xff]  ;;  %v4198_v39 = vld [vmem:[%s13377_s17 + $0x21f0] sm:$0xff]  ;;  %v4225_v37 = vld [vmem:[%s13377_s17 + $0x22c8] sm:$0xff] }
 0xa15   :  { %10768 = vmatprep.subr.bf16.mxu1 %v10767_v49  ;;  %v10783_v49 = vpack.c.bf16 %v4139_v27, %v4127_v48  ;;  %v4210_v24 = vld [vmem:[%s13377_s17 + $0x2250] sm:$0xff]  ;;  %v4237_v55 = vld [vmem:[%s13377_s17 + $0x2328] sm:$0xff]  ;;  %v4223_v48 = vld [vmem:[%s13377_s17 + $0x22b8] sm:$0xff] }
 0xa16   :  { %v4235_v27 = vld [vmem:[%s13377_s17 + $0x2318] sm:$0xff] }
 0xa17   :  { %10958 = vmatpush1.bf16.msra.mxu0 %v10957_v29  ;;  %v10973_v29 = vpack.c.bf16 %v4140_v54, %v4128_v2  ;;  %v4224_v2 = vld [vmem:[%s13377_s17 + $0x22c0] sm:$0xff] }
 0xa18   :  { %10770 = vmatpush1.bf16.msra.mxu1 %v10769_v25  ;;  %10960 = vmatprep.subr.bf16.mxu0 %v10959_v57  ;;  %v10785_v25 = vpack.c.bf16 %v4138_v63, %v4126_v59  ;;  %v10975_v57 = vpack.c.bf16 %v4165_v13, %v4153_v31  ;;  %v4236_v54 = vld [vmem:[%s13377_s17 + $0x2320] sm:$0xff]  ;;  %v10799_v59 = vpack.c.bf16 %v4235_v27, %v4223_v48  ;;  %v4234_v63 = vld [vmem:[%s13377_s17 + $0x2310] sm:$0xff] }
 0xa19   :  { %10772 = vmatprep.subr.bf16.mxu1 %v10771_v36  ;;  %v10787_v36 = vpack.c.bf16 %v4163_v15, %v4151_v62  ;;  %v10989_v31 = vpack.c.bf16 %v4236_v54, %v4224_v2  ;;  %v4249_v62 = vld [vmem:[%s13377_s17 + $0x2388] sm:$0xff]  ;;  %v4247_v15 = vld [vmem:[%s13377_s17 + $0x2378] sm:$0xff]  ;;  %v3182_v27 = vld [vmem:[%s13377_s17 + $0x230] sm:$0xff] }
 0xa1a   :  { %v3207_v2 = vld [vmem:[%s13377_s17 + $0x2f8] sm:$0xff] }
 0xa1b   :  { %10962 = vmatpush1.bf16.msra.mxu0 %v10961_v28  ;;  %v10977_v28 = vpack.c.bf16 %v4164_v4, %v4152_v26  ;;  %v3135_v26 = vld [vmem:[%s13377_s17 + $0xb8] sm:$0xff]  ;;  %v5609_v4 = vld [vmem:[%s14473_s15] sm:$0xff] }
 0xa1c   :  { %10774 = vmatpush1.bf16.msra.mxu1 %v10773_v5  ;;  %10964 = vmatprep.subr.bf16.mxu0 %v10963_v22  ;;  %v10789_v5 = vpack.c.bf16 %v4162_v32, %v4150_v35  ;;  %v10979_v22 = vpack.c.bf16 %v4189_v7, %v4177_v43  ;;  %v5610_v35 = vld [vmem:[%s14473_s15 + $0x8] sm:$0xff]  ;;  %v3122_v32 = vld [vmem:[%s13377_s17 + $0x50] sm:$0xff] }
 0xa1d   :  { %10776 = vmatprep.subr.bf16.mxu1 %v10775_v20  ;;  %v10791_v20 = vpack.c.bf16 %v4187_v16, %v4175_v45  ;;  %v3134_v43 = vld [vmem:[%s13377_s17 + $0xb0] sm:$0xff] }
 0xa1e   :  { %v4246_v7 = vld [vmem:[%s13377_s17 + $0x2370] sm:$0xff] }
 0xa1f   :  { %10966 = vmatpush1.bf16.msra.mxu0 %v10965_v11  ;;  %v10981_v11 = vpack.c.bf16 %v4188_v17, %v4176_v19  ;;  %v5627_v16 = vld [vmem:[%s14473_s15 + $0x90] sm:$0xff]  ;;  %v3147_v19 = vld [vmem:[%s13377_s17 + $0x118] sm:$0xff] }
 0xa20   :  { %10778 = vmatpush1.bf16.msra.mxu1 %v10777_v38  ;;  %10968 = vmatprep.subr.bf16.mxu0 %v10967_v41  ;;  %v10793_v38 = vpack.c.bf16 %v4186_v30, %v4174_v1  ;;  %v10983_v41 = vpack.c.bf16 %v4213_v50, %v4201_v23  ;;  %v3159_v17 = vld [vmem:[%s13377_s17 + $0x178] sm:$0xff]  ;;  %v10993_v1 = vpack.c.bf16 %v3134_v43, %v3122_v32  ;;  %v3146_v23 = vld [vmem:[%s13377_s17 + $0x110] sm:$0xff]  ;;  %v5618_v32 = vld [vmem:[%s14473_s15 + $0x48] sm:$0xff] }
 0xa21   :  { %10780 = vmatprep.subr.bf16.mxu1 %v10779_v51  ;;  %v10795_v51 = vpack.c.bf16 %v4211_v42, %v4199_v53  ;;  %v5612_v30 = vld [vmem:[%s14473_s15 + $0x18] sm:$0xff]  ;;  %v3158_v53 = vld [vmem:[%s13377_s17 + $0x170] sm:$0xff]  ;;  %v5629_v42 = vld [vmem:[%s14473_s15 + $0xa0] sm:$0xff] }
 0xa22   :  { %v3218_v43 = vld [vmem:[%s13377_s17 + $0x350] sm:$0xff] }
 0xa23   :  { %10970 = vmatpush1.bf16.msra.mxu0 %v10969_v34  ;;  %v10985_v34 = vpack.c.bf16 %v4212_v47, %v4200_v6  ;;  %v3171_v6 = vld [vmem:[%s13377_s17 + $0x1d8] sm:$0xff] }
 0xa24   :  { %10782 = vmatpush1.bf16.msra.mxu1 %v10781_v52  ;;  %10972 = vmatprep.subr.bf16.mxu0 %v10971_v40  ;;  %v10797_v52 = vpack.c.bf16 %v4210_v24, %v4198_v39  ;;  %v10987_v40 = vpack.c.bf16 %v4237_v55, %v4225_v37  ;;  %v3183_v47 = vld [vmem:[%s13377_s17 + $0x238] sm:$0xff]  ;;  %v5613_v37 = vld [vmem:[%s14473_s15 + $0x20] sm:$0xff]  ;;  %v3170_v55 = vld [vmem:[%s13377_s17 + $0x1d0] sm:$0xff] }
 0xa25   :  { %10784 = vmatprep.subr.bf16.mxu1 %v10783_v49  ;;  %v4222_v49 = vld [vmem:[%s13377_s17 + $0x22b0] sm:$0xff]  ;;  %v10999_v48 = vpack.c.bf16 %v3183_v47, %v3171_v6 }
 0xa26   :  { %v10801_v13 = vpack.c.bf16 %v4234_v63, %v4222_v49  ;;  %v5615_v49 = vld [vmem:[%s14473_s15 + $0x30] sm:$0xff]  ;;  %v5616_v63 = vld [vmem:[%s14473_s15 + $0x38] sm:$0xff] }
 0xa27   :  { %10974 = vmatpush1.bf16.msra.mxu0 %v10973_v29  ;;  %v5625_v29 = vld [vmem:[%s14473_s15 + $0x80] sm:$0xff] }
 0xa28   :  { %10786 = vmatpush1.bf16.msra.mxu1 %v10785_v25  ;;  %10976 = vmatprep.subr.bf16.mxu0 %v10975_v57  ;;  %v5626_v25 = vld [vmem:[%s14473_s15 + $0x88] sm:$0xff]  ;;  %v3123_v57 = vld [vmem:[%s13377_s17 + $0x58] sm:$0xff] }
 0xa29   :  { %10788 = vmatprep.subr.bf16.mxu1 %v10787_v36  ;;  %v4248_v36 = vld [vmem:[%s13377_s17 + $0x2380] sm:$0xff]  ;;  %v11179_v45 = vpack.c.bf16 %v5626_v25, %v5625_v29  ;;  %v5634_v29 = vld [vmem:[%s14473_s15 + $0xc8] sm:$0xff]  ;;  %v3219_v25 = vld [vmem:[%s13377_s17 + $0x358] sm:$0xff] }
 0xa2b   :  { %10978 = vmatpush1.bf16.msra.mxu0 %v10977_v28  ;;  %v5628_v28 = vld [vmem:[%s14473_s15 + $0x98] sm:$0xff] }
 0xa2c   :  { %10790 = vmatpush1.bf16.msra.mxu1 %v10789_v5  ;;  %10980 = vmatprep.subr.bf16.mxu0 %v10979_v22  ;;  %v10991_v5 = vpack.c.bf16 %v3135_v26, %v3123_v57  ;;  %v11181_v22 = vpack.c.bf16 %v5610_v35, %v5609_v4  ;;  %v11183_v50 = vpack.c.bf16 %v5628_v28, %v5627_v16  ;;  %v3231_v57 = vld [vmem:[%s13377_s17 + $0x3b8] sm:$0xff]  ;;  %v5635_v16 = vld [vmem:[%s14473_s15 + $0xd0] sm:$0xff] }
 0xa2d   :  { %10792 = vmatprep.subr.bf16.mxu1 %v10791_v20  ;;  %v5611_v20 = vld [vmem:[%s14473_s15 + $0x10] sm:$0xff]  ;;  %v11193_v26 = vpack.c.bf16 %v5616_v63, %v5615_v49  ;;  %v5636_v28 = vld [vmem:[%s14473_s15 + $0xd8] sm:$0xff] }
 0xa2e   :  { %v11185_v39 = vpack.c.bf16 %v5612_v30, %v5611_v20  ;;  %v5619_v20 = vld [vmem:[%s14473_s15 + $0x50] sm:$0xff]  ;;  %v5620_v30 = vld [vmem:[%s14473_s15 + $0x58] sm:$0xff] }
 0xa2f   :  { %10982 = vmatpush1.bf16.msra.mxu0 %v10981_v11  ;;  %v5630_v11 = vld [vmem:[%s14473_s15 + $0xa8] sm:$0xff]  ;;  %v11201_v6 = vpack.c.bf16 %v5620_v30, %v5619_v20  ;;  %v5692_v20 = vld [vmem:[%s14473_s15 + $0x298] sm:$0xff] }
 0xa30   :  { %10794 = vmatpush1.bf16.msra.mxu1 %v10793_v38  ;;  %10984 = vmatprep.subr.bf16.mxu0 %v10983_v41  ;;  %v5598_v38 = vmax.f32 %v14139_v46, 0.0  ;;  %v10995_v41 = vpack.c.bf16 %v3159_v17, %v3147_v19  ;;  %v11187_v24 = vpack.c.bf16 %v5630_v11, %v5629_v42  ;;  %v5614_v46 = vld [vmem:[%s14473_s15 + $0x28] sm:$0xff]  ;;  %v5637_v42 = vld [vmem:[%s14473_s15 + $0xe0] sm:$0xff]  ;;  %v3339_v30 = vld [vmem:[%s13377_s17 + $0x718] sm:$0xff] }
 0xa31   :  { %10796 = vmatprep.subr.bf16.mxu1 %v10795_v51  ;;  %v10997_v51 = vpack.c.bf16 %v3158_v53, %v3146_v23  ;;  %v11189_v54 = vpack.c.bf16 %v5614_v46, %v5613_v37  ;;  %v3242_v23 = vld [vmem:[%s13377_s17 + $0x410] sm:$0xff]  ;;  %v5638_v11 = vld [vmem:[%s14473_s15 + $0xe8] sm:$0xff] }
 0xa32   :  { %v3254_v53 = vld [vmem:[%s13377_s17 + $0x470] sm:$0xff] }
 0xa33   :  { %10986 = vmatpush1.bf16.msra.mxu0 %v10985_v34  ;;  %v5631_v34 = vld [vmem:[%s14473_s15 + $0xb0] sm:$0xff]  ;;  %v11013_v47 = vpack.c.bf16 %v3254_v53, %v3242_v23  ;;  %v3351_v23 = vld [vmem:[%s13377_s17 + $0x778] sm:$0xff]  ;;  %v5597_v53 = vmax.f32 %v14134_v44, 0.0 }
 0xa34   :  { %10798 = vmatpush1.bf16.msra.mxu1 %v10797_v52  ;;  %10988 = vmatprep.subr.bf16.mxu0 %v10987_v40  ;;  %v5632_v52 = vld [vmem:[%s14473_s15 + $0xb8] sm:$0xff]  ;;  %v3266_v37 = vld [vmem:[%s13377_s17 + $0x4d0] sm:$0xff] }
 0xa35   :  { %10800 = vmatprep.subr.bf16.mxu1 %v10799_v59  ;;  %v3195_v40 = vld [vmem:[%s13377_s17 + $0x298] sm:$0xff]  ;;  %v11191_v59 = vpack.c.bf16 %v5632_v52, %v5631_v34  ;;  %v5639_v34 = vld [vmem:[%s14473_s15 + $0xf0] sm:$0xff] }
 0xa36   :  { %v5640_v52 = vld [vmem:[%s14473_s15 + $0xf8] sm:$0xff] }
 0xa37   :  { %10990 = vmatpush1.bf16.msra.mxu0 %v10989_v31  ;;  %v3194_v31 = vld [vmem:[%s13377_s17 + $0x290] sm:$0xff]  ;;  %v3363_v44 = vld [vmem:[%s13377_s17 + $0x7d8] sm:$0xff] }
 0xa38   :  { %10802 = vmatpush1.bf16.msra.mxu1 %v10801_v13  ;;  %5373 = vmatprep.subr.mxu0 %v4249_v62  ;;  %v11003_v13 = vpack.c.bf16 %v3207_v2, %v3195_v40  ;;  %v3206_v62 = vld [vmem:[%s13377_s17 + $0x2f0] sm:$0xff] }
 0xa39   :  { %5160 = vmatprep.subr.mxu1 %v4247_v15  ;;  %v5633_v15 = vld [vmem:[%s14473_s15 + $0xc0] sm:$0xff]  ;;  %v11005_v4 = vpack.c.bf16 %v3206_v62, %v3194_v31  ;;  %v11207_v31 = vpack.c.bf16 %v5640_v52, %v5639_v34  ;;  %v5624_v62 = vld [vmem:[%s14473_s15 + $0x78] sm:$0xff] }
 0xa3a   :  { %v11195_v35 = vpack.c.bf16 %v5634_v29, %v5633_v15  ;;  %v3290_v15 = vld [vmem:[%s13377_s17 + $0x590] sm:$0xff]  ;;  %v14560_v29 = vld [vmem:[%s14090_s6] sm:$0xff] }
 0xa3b   :  { %5374 = vmatpush1.msra.mxu0 %v4248_v36  ;;  %v5617_v36 = vld [vmem:[%s14473_s15 + $0x40] sm:$0xff] }
 0xa3c   :  { %5161 = vmatpush1.msra.mxu1 %v4246_v7  ;;  %5378 = vmatmul.mubr.f32.vlgmr.msra.gmra.mrb[40].mxu0 %v13680_v21  ;;  %v11007_v7 = vpack.c.bf16 %v3231_v57, %v3219_v25  ;;  %v11197_v19 = vpack.c.bf16 %v5618_v32, %v5617_v36  ;;  %v3315_v36 = vld [vmem:[%s13377_s17 + $0x658] sm:$0xff] }
 0xa3d   :  { %11180 = vmatprep.subr.bf16.mxu0 %v11179_v45  ;;  %5165 = vmatmul.mubr.f32.vlgmr.msra.gmra.mrb[22].mxu1 %v13680_v21  ;;  %v3230_v45 = vld [vmem:[%s13377_s17 + $0x3b0] sm:$0xff]  ;;  %v3327_v32 = vld [vmem:[%s13377_s17 + $0x6b8] sm:$0xff] }
 0xa3e   :  { %10992 = vmatprep.subr.bf16.mxu1 %v10991_v5  ;;  %11182 = vmatpush3.bf16.msra.mxu0 %v11181_v22  ;;  %v3243_v5 = vld [vmem:[%s13377_s17 + $0x418] sm:$0xff]  ;;  %v11009_v17 = vpack.c.bf16 %v3230_v45, %v3218_v43 }
 0xa3f   :  { %5875 = vmatprep.mubr.f32.mxu0 %v5598_v38  ;;  %10994 = vmatpush1.bf16.msra.mxu1 %v10993_v1  ;;  %v3255_v22 = vld [vmem:[%s13377_s17 + $0x478] sm:$0xff]  ;;  %v11199_v1 = vpack.c.bf16 %v5636_v28, %v5635_v16  ;;  %v5673_v16 = vld [vmem:[%s14473_s15 + $0x200] sm:$0xff]  ;;  %v5674_v28 = vld [vmem:[%s14473_s15 + $0x208] sm:$0xff] }
 0xa40   :  { %5448 = vmatprep.mubr.f32.mxu1 %v13510_v10  ;;  %11184 = vmatprep.subr.bf16.mxu0 %v11183_v50  ;;  %v11001_v10 = vpack.c.bf16 %v3182_v27, %v3170_v55  ;;  %v11011_v50 = vpack.c.bf16 %v3255_v22, %v3243_v5  ;;  %v3267_v38 = vld [vmem:[%s13377_s17 + $0x4d8] sm:$0xff]  ;;  %v14545_v55 = vsub.s32 5, %v12726_v56  ;;  %v3278_v27 = vld [vmem:[%s13377_s17 + $0x530] sm:$0xff] }
 0xa41   :  { %10996 = vmatprep.subr.bf16.mxu1 %v10995_v41  ;;  %v3279_v41 = vld [vmem:[%s13377_s17 + $0x538] sm:$0xff]  ;;  %v11017_v63 = vpack.c.bf16 %v3278_v27, %v3266_v37  ;;  %v3314_v5 = vld [vmem:[%s13377_s17 + $0x650] sm:$0xff]  ;;  %v5694_v37 = vld [vmem:[%s14473_s15 + $0x2a8] sm:$0xff] }
 0xa42   :  { %11186 = vmatpush3.bf16.msra.mxu0 %v11185_v39  ;;  %v11203_v39 = vpack.c.bf16 %v5638_v11, %v5637_v42  ;;  %v4279_v25 = vrot.slane %v14560_v29, %v14545_v55 }
 0xa43   :  { %10998 = vmatpush1.bf16.msra.mxu1 %v10997_v51  ;;  %11188 = vmatprep.subr.bf16.mxu0 %v11187_v24  ;;  %v5621_v51 = vld [vmem:[%s14473_s15 + $0x60] sm:$0xff]  ;;  %v5622_v24 = vld [vmem:[%s14473_s15 + $0x68] sm:$0xff] }
 0xa44   :  { %11000 = vmatprep.subr.bf16.mxu1 %v10999_v48  ;;  %v11015_v48 = vpack.c.bf16 %v3279_v41, %v3267_v38  ;;  %v11205_v49 = vpack.c.bf16 %v5622_v24, %v5621_v51  ;;  %v5675_v38 = vld [vmem:[%s14473_s15 + $0x210] sm:$0xff]  ;;  %v5676_v41 = vld [vmem:[%s14473_s15 + $0x218] sm:$0xff]  ;;  %v5693_v24 = vld [vmem:[%s14473_s15 + $0x2a0] sm:$0xff] }
 0xa45   :  { %v3350_v51 = vld [vmem:[%s13377_s17 + $0x770] sm:$0xff]  ;;  %v11249_v27 = vpack.c.bf16 %v5676_v41, %v5675_v38  ;;  %v11251_v52 = vpack.c.bf16 %v5694_v37, %v5693_v24 }
 0xa46   :  { %11190 = vmatpush3.bf16.msra.mxu0 %v11189_v54  ;;  %v3291_v54 = vld [vmem:[%s13377_s17 + $0x598] sm:$0xff]  ;;  %v3446_v37 = vld [vmem:[%s13377_s17 + $0xa70] sm:$0xff] }
 0xa47   :  { %11002 = vmatpush1.bf16.msra.mxu1 %v11001_v10  ;;  %11192 = vmatprep.subr.bf16.mxu0 %v11191_v59  ;;  %v3303_v10 = vld [vmem:[%s13377_s17 + $0x5f8] sm:$0xff] }
 0xa48   :  { %11004 = vmatprep.subr.bf16.mxu1 %v11003_v13  ;;  %v5623_v13 = vld [vmem:[%s14473_s15 + $0x70] sm:$0xff]  ;;  %v11019_v57 = vpack.c.bf16 %v3303_v10, %v3291_v54  ;;  %v5678_v54 = vld [vmem:[%s14473_s15 + $0x228] sm:$0xff] }
 0xa49   :  { %v11209_v43 = vpack.c.bf16 %v5624_v62, %v5623_v13  ;;  %v3362_v10 = vld [vmem:[%s13377_s17 + $0x7d0] sm:$0xff]  ;;  %v5696_v13 = vld [vmem:[%s14473_s15 + $0x2b8] sm:$0xff] }
 0xa4a   :  { %11194 = vmatpush3.bf16.msra.mxu0 %v11193_v26  ;;  %v3302_v26 = vld [vmem:[%s13377_s17 + $0x5f0] sm:$0xff]  ;;  %v3387_v62 = vld [vmem:[%s13377_s17 + $0x898] sm:$0xff] }
 0xa4b   :  { %11006 = vmatpush1.bf16.msra.mxu1 %v11005_v4  ;;  %11196 = vmatprep.subr.bf16.mxu0 %v11195_v35  ;;  %v5689_v4 = vld [vmem:[%s14473_s15 + $0x280] sm:$0xff]  ;;  %v5690_v35 = vld [vmem:[%s14473_s15 + $0x288] sm:$0xff] }
 0xa4c   :  { %11008 = vmatprep.subr.bf16.mxu1 %v11007_v7  ;;  %v11021_v7 = vpack.c.bf16 %v3302_v26, %v3290_v15  ;;  %v11243_v45 = vpack.c.bf16 %v5690_v35, %v5689_v4  ;;  %v3399_v15 = vld [vmem:[%s13377_s17 + $0x8f8] sm:$0xff]  ;;  %v5679_v4 = vld [vmem:[%s14473_s15 + $0x230] sm:$0xff] }
 0xa4d   :  { %v5680_v35 = vld [vmem:[%s14473_s15 + $0x238] sm:$0xff] }
 0xa4e   :  { %11198 = vmatpush3.bf16.msra.mxu0 %v11197_v19  ;;  %v11023_v19 = vpack.c.bf16 %v3327_v32, %v3315_v36  ;;  %v3386_v36 = vld [vmem:[%s13377_s17 + $0x890] sm:$0xff]  ;;  %v11035_v32 = vpack.c.bf16 %v3399_v15, %v3387_v62 }
 0xa4f   :  { %11010 = vmatpush1.bf16.msra.mxu1 %v11009_v17  ;;  %11200 = vmatprep.subr.bf16.mxu0 %v11199_v1  ;;  %v3326_v17 = vld [vmem:[%s13377_s17 + $0x6b0] sm:$0xff] }
 0xa50   :  { %v14542_v46 = vpop.f32.mrb[38].mxu0  ;;  %11012 = vmatprep.subr.bf16.mxu1 %v11011_v50  ;;  %v5691_v1 = vld [vmem:[%s14473_s15 + $0x290] sm:$0xff]  ;;  %v11245_v50 = vpack.c.bf16 %v5674_v28, %v5673_v16  ;;  %v11025_v42 = vpack.c.bf16 %v3326_v17, %v3314_v5  ;;  %v3411_v16 = vld [vmem:[%s13377_s17 + $0x958] sm:$0xff]  ;;  %v11257_v5 = vpack.c.bf16 %v5680_v35, %v5679_v4  ;;  %v5681_v17 = vld [vmem:[%s14473_s15 + $0x240] sm:$0xff] }
 0xa51   :  { %v14550_v40 = vpop.f32.mrb[20].mxu1  ;;  %v4955_v2 = vpop.f32.mrb[39].mxu0  ;;  %v11247_v11 = vpack.c.bf16 %v5692_v20, %v5691_v1  ;;  %v3423_v28 = vld [vmem:[%s13377_s17 + $0x9b8] sm:$0xff]  ;;  %v5682_v1 = vld [vmem:[%s14473_s15 + $0x248] sm:$0xff]  ;;  %v3410_v20 = vld [vmem:[%s13377_s17 + $0x950] sm:$0xff] }
 0xa52   :  { %11202 = vmatpush3.bf16.msra.mxu0 %v11201_v6  ;;  %v14554_v59 = vpop.f32.mrb[21].mxu1  ;;  %v12150_v22 = vadd.f32 %v4955_v2, %v4279_v25  ;;  %v3338_v6 = vld [vmem:[%s13377_s17 + $0x710] sm:$0xff]  ;;  %v5677_v2 = vld [vmem:[%s14473_s15 + $0x220] sm:$0xff]  ;;  %v11261_v38 = vpack.c.bf16 %v5682_v1, %v5681_v17  ;;  %v5754_v17 = vld [vmem:[%s14473_s15 + $0x488] sm:$0xff] }
 0xa53   :  { %11014 = vmatpush1.bf16.msra.mxu1 %v11013_v47  ;;  %11204 = vmatprep.subr.bf16.mxu0 %v11203_v39  ;;  %v11027_v39 = vpack.c.bf16 %v3351_v23, %v3339_v30  ;;  %v11029_v34 = vpack.c.bf16 %v3350_v51, %v3338_v6  ;;  %v11253_v25 = vpack.c.bf16 %v5678_v54, %v5677_v2  ;;  %v3422_v23 = vld [vmem:[%s13377_s17 + $0x9b0] sm:$0xff]  ;;  %v14619_v2 = vsub.s32 4, %v12726_v56 }
 0xa54   :  { %11016 = vmatprep.subr.bf16.mxu1 %v11015_v48  ;;  %v5602_v47 = vmax.f32 %v12150_v22, 0.0  ;;  %v3375_v48 = vld [vmem:[%s13377_s17 + $0x838] sm:$0xff]  ;;  %v11039_v30 = vpack.c.bf16 %v3423_v28, %v3411_v16  ;;  %v11041_v41 = vpack.c.bf16 %v3422_v23, %v3410_v20  ;;  %v3434_v51 = vld [vmem:[%s13377_s17 + $0xa10] sm:$0xff] }
 0xa55   :  { %v11045_v54 = vpack.c.bf16 %v3446_v37, %v3434_v51  ;;  %v3470_v62 = vld [vmem:[%s13377_s17 + $0xb30] sm:$0xff]  ;;  %v4275_v35 = vrot.slane %v14560_v29, %v14619_v2 }
 0xa56   :  { %11206 = vmatpush3.bf16.msra.mxu0 %v11205_v49  ;;  %v11031_v49 = vpack.c.bf16 %v3375_v48, %v3363_v44  ;;  %v5701_v44 = vld [vmem:[%s14473_s15 + $0x2e0] sm:$0xff]  ;;  %v5702_v48 = vld [vmem:[%s14473_s15 + $0x2e8] sm:$0xff]  ;;  %v5703_v15 = vld [vmem:[%s14473_s15 + $0x2f0] sm:$0xff] }
 0xa57   :  { %11018 = vmatpush1.bf16.msra.mxu1 %v11017_v63  ;;  %11208 = vmatprep.subr.bf16.mxu0 %v11207_v31  ;;  %v3374_v63 = vld [vmem:[%s13377_s17 + $0x830] sm:$0xff]  ;;  %v12149_v20 = vadd.f32 %v14542_v46, %v4275_v35  ;;  %v3579_v35 = vld [vmem:[%s13377_s17 + $0xe98] sm:$0xff] }
 0xa58   :  { %11020 = vmatprep.subr.bf16.mxu1 %v11019_v57  ;;  %v5695_v31 = vld [vmem:[%s14473_s15 + $0x2b0] sm:$0xff]  ;;  %v11033_v57 = vpack.c.bf16 %v3374_v63, %v3362_v10  ;;  %v11267_v10 = vpack.c.bf16 %v5702_v48, %v5701_v44  ;;  %v5686_v63 = vld [vmem:[%s14473_s15 + $0x268] sm:$0xff]  ;;  %v5740_v44 = vld [vmem:[%s14473_s15 + $0x418] sm:$0xff] }
 0xa59   :  { %v11255_v26 = vpack.c.bf16 %v5696_v13, %v5695_v31  ;;  %v3458_v31 = vld [vmem:[%s13377_s17 + $0xad0] sm:$0xff]  ;;  %v5601_v51 = vmax.f32 %v12149_v20, 0.0  ;;  %v5762_v20 = vld [vmem:[%s14473_s15 + $0x4c8] sm:$0xff] }
 0xa5a   :  { %11210 = vmatpush3.bf16.msra.mxu0 %v11209_v43  ;;  %v3398_v43 = vld [vmem:[%s13377_s17 + $0x8f0] sm:$0xff] }
 0xa5b   :  { %11022 = vmatpush1.bf16.msra.mxu1 %v11021_v7  ;;  %11244 = vmatprep.subr.bf16.mxu0 %v11243_v45  ;;  %v5697_v7 = vld [vmem:[%s14473_s15 + $0x2c0] sm:$0xff]  ;;  %v5698_v45 = vld [vmem:[%s14473_s15 + $0x2c8] sm:$0xff]  ;;  %v11037_v22 = vpack.c.bf16 %v3398_v43, %v3386_v36  ;;  %v11049_v36 = vpack.c.bf16 %v3470_v62, %v3458_v31  ;;  %v5687_v43 = vld [vmem:[%s14473_s15 + $0x270] sm:$0xff] }
 0xa5c   :  { %11024 = vmatprep.subr.bf16.mxu1 %v11023_v19  ;;  %v11259_v19 = vpack.c.bf16 %v5698_v45, %v5697_v7  ;;  %v5688_v7 = vld [vmem:[%s14473_s15 + $0x278] sm:$0xff]  ;;  %v3482_v16 = vld [vmem:[%s13377_s17 + $0xb90] sm:$0xff] }
 0xa5d   :  { %5876 = vmatmul.mubr.f32.vlgmr.msra.gmra.mrb[42].mxu0 %v5597_v53  ;;  %v5700_v53 = vld [vmem:[%s14473_s15 + $0x2d8] sm:$0xff]  ;;  %v3494_v28 = vld [vmem:[%s13377_s17 + $0xbf0] sm:$0xff]  ;;  %v11273_v1 = vpack.c.bf16 %v5688_v7, %v5687_v43 }
 0xa5e   :  { %11246 = vmatpush3.bf16.msra.mxu0 %v11245_v50  ;;  %6015 = vmatprep.mubr.f32.mxu0 %v5602_v47  ;;  %v5699_v50 = vld [vmem:[%s14473_s15 + $0x2d0] sm:$0xff] }
 0xa5f   :  { %11026 = vmatpush1.bf16.msra.mxu1 %v11025_v42  ;;  %11248 = vmatprep.subr.bf16.mxu0 %v11247_v11  ;;  %v3435_v42 = vld [vmem:[%s13377_s17 + $0xa18] sm:$0xff]  ;;  %v11263_v6 = vpack.c.bf16 %v5700_v53, %v5699_v50  ;;  %v5683_v47 = vld [vmem:[%s14473_s15 + $0x250] sm:$0xff]  ;;  %v5737_v50 = vld [vmem:[%s14473_s15 + $0x400] sm:$0xff] }
 0xa60   :  { %11028 = vmatprep.subr.bf16.mxu1 %v11027_v39  ;;  %v3447_v11 = vld [vmem:[%s13377_s17 + $0xa78] sm:$0xff]  ;;  %v5738_v53 = vld [vmem:[%s14473_s15 + $0x408] sm:$0xff]  ;;  %v5739_v37 = vld [vmem:[%s14473_s15 + $0x410] sm:$0xff] }
 0xa61   :  { %v5684_v39 = vld [vmem:[%s14473_s15 + $0x258] sm:$0xff]  ;;  %v11043_v24 = vpack.c.bf16 %v3447_v11, %v3435_v42  ;;  %v3506_v11 = vld [vmem:[%s13377_s17 + $0xc50] sm:$0xff]  ;;  %v11309_v46 = vpack.c.bf16 %v5738_v53, %v5737_v50  ;;  %v11313_v31 = vpack.c.bf16 %v5740_v44, %v5739_v37  ;;  %v5745_v53 = vld [vmem:[%s14473_s15 + $0x440] sm:$0xff] }
 0xa62   :  { %11250 = vmatpush3.bf16.msra.mxu0 %v11249_v27  ;;  %v3459_v27 = vld [vmem:[%s13377_s17 + $0xad8] sm:$0xff]  ;;  %v5747_v44 = vld [vmem:[%s14473_s15 + $0x450] sm:$0xff] }
 0xa63   :  { %11030 = vmatpush1.bf16.msra.mxu1 %v11029_v34  ;;  %11252 = vmatprep.subr.bf16.mxu0 %v11251_v52  ;;  %v3471_v34 = vld [vmem:[%s13377_s17 + $0xb38] sm:$0xff]  ;;  %v11265_v52 = vpack.c.bf16 %v5684_v39, %v5683_v47  ;;  %v5755_v47 = vld [vmem:[%s14473_s15 + $0x490] sm:$0xff] }
 0xa64   :  { %11032 = vmatprep.subr.bf16.mxu1 %v11031_v49  ;;  %v5685_v49 = vld [vmem:[%s14473_s15 + $0x260] sm:$0xff]  ;;  %v11047_v13 = vpack.c.bf16 %v3471_v34, %v3459_v27  ;;  %v5756_v39 = vld [vmem:[%s14473_s15 + $0x498] sm:$0xff]  ;;  %v3530_v27 = vld [vmem:[%s13377_s17 + $0xd10] sm:$0xff] }
 0xa65   :  { %v11269_v4 = vpack.c.bf16 %v5686_v63, %v5685_v49  ;;  %v3542_v34 = vld [vmem:[%s13377_s17 + $0xd70] sm:$0xff]  ;;  %v5757_v49 = vld [vmem:[%s14473_s15 + $0x4a0] sm:$0xff]  ;;  %v5758_v63 = vld [vmem:[%s14473_s15 + $0x4a8] sm:$0xff] }
 0xa66   :  { %11254 = vmatpush3.bf16.msra.mxu0 %v11253_v25  ;;  %v5704_v25 = vld [vmem:[%s14473_s15 + $0x2f8] sm:$0xff]  ;;  %v11315_v62 = vpack.c.bf16 %v5758_v63, %v5757_v49  ;;  %v5765_v49 = vld [vmem:[%s14473_s15 + $0x4e0] sm:$0xff]  ;;  %v5766_v63 = vld [vmem:[%s14473_s15 + $0x4e8] sm:$0xff] }
 0xa67   :  { %11034 = vmatpush1.bf16.msra.mxu1 %v11033_v57  ;;  %11256 = vmatprep.subr.bf16.mxu0 %v11255_v26  ;;  %v3483_v57 = vld [vmem:[%s13377_s17 + $0xb98] sm:$0xff] }
 0xa68   :  { %11036 = vmatprep.subr.bf16.mxu1 %v11035_v32  ;;  %v3495_v26 = vld [vmem:[%s13377_s17 + $0xbf8] sm:$0xff]  ;;  %v11271_v32 = vpack.c.bf16 %v5704_v25, %v5703_v15  ;;  %v5741_v15 = vld [vmem:[%s14473_s15 + $0x420] sm:$0xff]  ;;  %v5742_v25 = vld [vmem:[%s14473_s15 + $0x428] sm:$0xff] }
 0xa69   :  { %v11051_v45 = vpack.c.bf16 %v3495_v26, %v3483_v57  ;;  %v3554_v26 = vld [vmem:[%s13377_s17 + $0xdd0] sm:$0xff] }
 0xa6a   :  { %11258 = vmatpush3.bf16.msra.mxu0 %v11257_v5  ;;  %v3507_v5 = vld [vmem:[%s13377_s17 + $0xc58] sm:$0xff] }
 0xa6b   :  { %11038 = vmatpush1.bf16.msra.mxu1 %v11037_v22  ;;  %11260 = vmatprep.subr.bf16.mxu0 %v11259_v19  ;;  %v3519_v22 = vld [vmem:[%s13377_s17 + $0xcb8] sm:$0xff]  ;;  %v5753_v19 = vld [vmem:[%s14473_s15 + $0x480] sm:$0xff] }
 0xa6c   :  { %11040 = vmatprep.subr.bf16.mxu1 %v11039_v30  ;;  %v11053_v30 = vpack.c.bf16 %v3494_v28, %v3482_v16  ;;  %v11307_v23 = vpack.c.bf16 %v5754_v17, %v5753_v19  ;;  %v11055_v42 = vpack.c.bf16 %v3519_v22, %v3507_v5  ;;  %v5744_v16 = vld [vmem:[%s14473_s15 + $0x438] sm:$0xff]  ;;  %v3578_v5 = vld [vmem:[%s13377_s17 + $0xe90] sm:$0xff] }
 0xa6d   :  { %v3590_v22 = vld [vmem:[%s13377_s17 + $0xef0] sm:$0xff]  ;;  %v3603_v19 = vld [vmem:[%s13377_s17 + $0xf58] sm:$0xff] }
 0xa6e   :  { %11262 = vmatpush3.bf16.msra.mxu0 %v11261_v38  ;;  %v3518_v38 = vld [vmem:[%s13377_s17 + $0xcb0] sm:$0xff]  ;;  %v3615_v17 = vld [vmem:[%s13377_s17 + $0xfb8] sm:$0xff] }
 0xa6f   :  { %11042 = vmatpush1.bf16.msra.mxu1 %v11041_v41  ;;  %11264 = vmatprep.subr.bf16.mxu0 %v11263_v6  ;;  %v3531_v41 = vld [vmem:[%s13377_s17 + $0xd18] sm:$0xff] }
 0xa70   :  { %11044 = vmatprep.subr.bf16.mxu1 %v11043_v24  ;;  %v3543_v6 = vld [vmem:[%s13377_s17 + $0xd78] sm:$0xff]  ;;  %v11057_v24 = vpack.c.bf16 %v3518_v38, %v3506_v11  ;;  %v11071_v11 = vpack.c.bf16 %v3615_v17, %v3603_v19  ;;  %v3602_v38 = vld [vmem:[%s13377_s17 + $0xf50] sm:$0xff] }
 0xa71   :  { %v11059_v48 = vpack.c.bf16 %v3543_v6, %v3531_v41  ;;  %v3614_v41 = vld [vmem:[%s13377_s17 + $0xfb0] sm:$0xff]  ;;  %v3627_v6 = vld [vmem:[%s13377_s17 + $0x1018] sm:$0xff] }
 0xa72   :  { %11266 = vmatpush3.bf16.msra.mxu0 %v11265_v52  ;;  %v3555_v52 = vld [vmem:[%s13377_s17 + $0xdd8] sm:$0xff] }
 0xa73   :  { %11046 = vmatpush1.bf16.msra.mxu1 %v11045_v54  ;;  %11268 = vmatprep.subr.bf16.mxu0 %v11267_v10  ;;  %v11311_v54 = vpack.c.bf16 %v5756_v39, %v5755_v47  ;;  %v3567_v10 = vld [vmem:[%s13377_s17 + $0xe38] sm:$0xff]  ;;  %v5763_v39 = vld [vmem:[%s14473_s15 + $0x4d0] sm:$0xff] }
 0xa74   :  { %11048 = vmatprep.subr.bf16.mxu1 %v11047_v13  ;;  %v11061_v13 = vpack.c.bf16 %v3542_v34, %v3530_v27  ;;  %v11063_v57 = vpack.c.bf16 %v3567_v10, %v3555_v52  ;;  %v3639_v47 = vld [vmem:[%s13377_s17 + $0x1078] sm:$0xff]  ;;  %v3626_v34 = vld [vmem:[%s13377_s17 + $0x1010] sm:$0xff] }
 0xa75   :  { %v11075_v27 = vpack.c.bf16 %v3639_v47, %v3627_v6  ;;  %v3638_v52 = vld [vmem:[%s13377_s17 + $0x1070] sm:$0xff]  ;;  %v3663_v10 = vld [vmem:[%s13377_s17 + $0x1138] sm:$0xff] }
 0xa76   :  { %11270 = vmatpush3.bf16.msra.mxu0 %v11269_v4  ;;  %v3566_v4 = vld [vmem:[%s13377_s17 + $0xe30] sm:$0xff]  ;;  %v3699_v19 = vld [vmem:[%s13377_s17 + $0x1258] sm:$0xff] }
 0xa77   :  { %11050 = vmatpush1.bf16.msra.mxu1 %v11049_v36  ;;  %11272 = vmatprep.subr.bf16.mxu0 %v11271_v32  ;;  %v5759_v36 = vld [vmem:[%s14473_s15 + $0x4b0] sm:$0xff]  ;;  %v11317_v32 = vpack.c.bf16 %v5742_v25, %v5741_v15  ;;  %v11065_v43 = vpack.c.bf16 %v3566_v4, %v3554_v26  ;;  %v5749_v15 = vld [vmem:[%s14473_s15 + $0x460] sm:$0xff]  ;;  %v5750_v25 = vld [vmem:[%s14473_s15 + $0x468] sm:$0xff] }
 0xa78   :  { %11052 = vmatprep.subr.bf16.mxu1 %v11051_v45  ;;  %v5743_v45 = vld [vmem:[%s14473_s15 + $0x430] sm:$0xff]  ;;  %v3711_v17 = vld [vmem:[%s13377_s17 + $0x12b8] sm:$0xff] }
 0xa79   :  { %v3650_v26 = vld [vmem:[%s13377_s17 + $0x10d0] sm:$0xff] }
 0xa7a   :  { %11274 = vmatpush3.bf16.msra.mxu0 %v11273_v1  ;;  %v5761_v1 = vld [vmem:[%s14473_s15 + $0x4c0] sm:$0xff]  ;;  %v3662_v4 = vld [vmem:[%s13377_s17 + $0x1130] sm:$0xff] }
 0xa7b   :  { %11054 = vmatpush1.bf16.msra.mxu1 %v11053_v30  ;;  %11308 = vmatprep.subr.bf16.mxu0 %v11307_v23  ;;  %v11321_v30 = vpack.c.bf16 %v5744_v16, %v5743_v45  ;;  %v11069_v23 = vpack.c.bf16 %v3590_v22, %v3578_v5  ;;  %v11323_v50 = vpack.c.bf16 %v5762_v20, %v5761_v1  ;;  %v5751_v45 = vld [vmem:[%s14473_s15 + $0x470] sm:$0xff]  ;;  %v5752_v16 = vld [vmem:[%s14473_s15 + $0x478] sm:$0xff]  ;;  %v14711_v20 = vld [vmem:[%s14694_s19] sm:$0x77] }
 0xa7c   :  { %11056 = vmatprep.subr.bf16.mxu1 %v11055_v42  ;;  %v5746_v42 = vld [vmem:[%s14473_s15 + $0x448] sm:$0xff]  ;;  %v3674_v5 = vld [vmem:[%s13377_s17 + $0x1190] sm:$0xff]  ;;  %v11337_v1 = vpack.c.bf16 %v5752_v16, %v5751_v45 }
 0xa7d   :  { %6016 = vmatmul.mubr.f32.vlgmr.msra.gmra.mrb[44].mxu0 %v5601_v51  ;;  %v11325_v51 = vpack.c.bf16 %v5746_v42, %v5745_v53  ;;  %v3686_v22 = vld [vmem:[%s13377_s17 + $0x11f0] sm:$0xff] }
 0xa7e   :  { %5449 = vmatmul.mubr.f32.vlgmr.msra.gmra.mrb[24].mxu1 %v13507_v12  ;;  %11310 = vmatpush3.bf16.msra.mxu0 %v11309_v46  ;;  %v3591_v12 = vld [vmem:[%s13377_s17 + $0xef8] sm:$0xff]  ;;  %v3698_v53 = vld [vmem:[%s13377_s17 + $0x1250] sm:$0xff] }
 0xa7f   :  { %11058 = vmatpush1.bf16.msra.mxu1 %v11057_v24  ;;  %5519 = vmatprep.mubr.f32.mxu1 %v13660_v60  ;;  %v5760_v60 = vld [vmem:[%s14473_s15 + $0x4b8] sm:$0xff]  ;;  %v11067_v28 = vpack.c.bf16 %v3591_v12, %v3579_v35  ;;  %v11073_v24 = vpack.c.bf16 %v3614_v41, %v3602_v38  ;;  %v3710_v42 = vld [vmem:[%s13377_s17 + $0x12b0] sm:$0xff] }
 0xa80   :  { %11060 = vmatprep.subr.bf16.mxu1 %v11059_v48  ;;  %11312 = vmatprep.subr.bf16.mxu0 %v11311_v54  ;;  %v11319_v7 = vpack.c.bf16 %v5760_v60, %v5759_v36  ;;  %v5764_v46 = vld [vmem:[%s14473_s15 + $0x4d8] sm:$0xff]  ;;  %v5767_v36 = vld [vmem:[%s14473_s15 + $0x4f0] sm:$0xff]  ;;  %v11089_v41 = vpack.c.bf16 %v3710_v42, %v3698_v53 }
 0xa81   :  { %v11327_v37 = vpack.c.bf16 %v5764_v46, %v5763_v39  ;;  %v5748_v48 = vld [vmem:[%s14473_s15 + $0x458] sm:$0xff]  ;;  %v3722_v47 = vld [vmem:[%s13377_s17 + $0x1310] sm:$0xff] }
 0xa82   :  { %11314 = vmatpush3.bf16.msra.mxu0 %v11313_v31  ;;  %v3651_v54 = vld [vmem:[%s13377_s17 + $0x10d8] sm:$0xff]  ;;  %v11329_v31 = vpack.c.bf16 %v5748_v48, %v5747_v44  ;;  %v3734_v39 = vld [vmem:[%s13377_s17 + $0x1370] sm:$0xff] }
 0xa83   :  { %11062 = vmatpush1.bf16.msra.mxu1 %v11061_v13  ;;  %11316 = vmatprep.subr.bf16.mxu0 %v11315_v62  ;;  %v11077_v13 = vpack.c.bf16 %v3638_v52, %v3626_v34  ;;  %v11331_v62 = vpack.c.bf16 %v5766_v63, %v5765_v49  ;;  %v3675_v35 = vld [vmem:[%s13377_s17 + $0x1198] sm:$0xff]  ;;  %v3746_v44 = vld [vmem:[%s13377_s17 + $0x13d0] sm:$0xff] }
 0xa84   :  { %11064 = vmatprep.subr.bf16.mxu1 %v11063_v57  ;;  %v11079_v57 = vpack.c.bf16 %v3663_v10, %v3651_v54  ;;  %v3687_v12 = vld [vmem:[%s13377_s17 + $0x11f8] sm:$0xff]  ;;  %v3758_v48 = vld [vmem:[%s13377_s17 + $0x1430] sm:$0xff] }
 0xa85   :  { %v5768_v60 = vld [vmem:[%s14473_s15 + $0x4f8] sm:$0xff]  ;;  %v11097_v52 = vpack.c.bf16 %v3758_v48, %v3746_v44  ;;  %v3770_v10 = vld [vmem:[%s13377_s17 + $0x1490] sm:$0xff] }
 0xa86   :  { %11318 = vmatpush3.bf16.msra.mxu0 %v11317_v32  ;;  %v11333_v32 = vpack.c.bf16 %v5750_v25, %v5749_v15  ;;  %v3735_v38 = vld [vmem:[%s13377_s17 + $0x1378] sm:$0xff]  ;;  %v3782_v49 = vld [vmem:[%s13377_s17 + $0x14f0] sm:$0xff] }
 0xa87   :  { %11066 = vmatpush1.bf16.msra.mxu1 %v11065_v43  ;;  %11320 = vmatprep.subr.bf16.mxu0 %v11319_v7  ;;  %v11081_v43 = vpack.c.bf16 %v3662_v4, %v3650_v26  ;;  %v11335_v7 = vpack.c.bf16 %v5768_v60, %v5767_v36  ;;  %v3747_v46 = vld [vmem:[%s13377_s17 + $0x13d8] sm:$0xff]  ;;  %v3794_v15 = vld [vmem:[%s13377_s17 + $0x1550] sm:$0xff] }
 0xa88   :  { %11068 = vmatprep.subr.bf16.mxu1 %v11067_v28  ;;  %v11083_v28 = vpack.c.bf16 %v3687_v12, %v3675_v35  ;;  %v3783_v34 = vld [vmem:[%s13377_s17 + $0x14f8] sm:$0xff]  ;;  %v3806_v25 = vld [vmem:[%s13377_s17 + $0x15b0] sm:$0xff] }
 0xa89   :  { %v3795_v63 = vld [vmem:[%s13377_s17 + $0x1558] sm:$0xff]  ;;  %v11105_v4 = vpack.c.bf16 %v3806_v25, %v3794_v15  ;;  %v3818_v12 = vld [vmem:[%s13377_s17 + $0x1610] sm:$0xff] }
 0xa8a   :  { %11322 = vmatpush3.bf16.msra.mxu0 %v11321_v30  ;;  %v11085_v30 = vpack.c.bf16 %v3686_v22, %v3674_v5  ;;  %v3831_v26 = vld [vmem:[%s13377_s17 + $0x1678] sm:$0xff]  ;;  %v3830_v36 = vld [vmem:[%s13377_s17 + $0x1670] sm:$0xff] }
 0xa8b   :  { %11070 = vmatpush1.bf16.msra.mxu1 %v11069_v23  ;;  %11324 = vmatprep.subr.bf16.mxu0 %v11323_v50  ;;  %v6375_v23 = vcombine.high %v14711_v20, %v14711_v20  ;;  %v11087_v50 = vpack.c.bf16 %v3711_v17, %v3699_v19  ;;  %v3843_v60 = vld [vmem:[%s13377_s17 + $0x16d8] sm:$0xff]  ;;  %v3842_v45 = vld [vmem:[%s13377_s17 + $0x16d0] sm:$0xff] }
 0xa8c   :  { %11072 = vmatprep.subr.bf16.mxu1 %v11071_v11  ;;  %v3723_v11 = vld [vmem:[%s13377_s17 + $0x1318] sm:$0xff]  ;;  %v3854_v16 = vld [vmem:[%s13377_s17 + $0x1730] sm:$0xff] }
 0xa8d   :  { %v11091_v6 = vpack.c.bf16 %v3735_v38, %v3723_v11  ;;  %v3879_v5 = vld [vmem:[%s13377_s17 + $0x17f8] sm:$0xff]  ;;  %v11113_v22 = vpack.c.bf16 %v3854_v16, %v3842_v45  ;;  %v3866_v17 = vld [vmem:[%s13377_s17 + $0x1790] sm:$0xff] }
 0xa8e   :  { %11326 = vmatpush3.bf16.msra.mxu0 %v11325_v51  ;;  %v3759_v51 = vld [vmem:[%s13377_s17 + $0x1438] sm:$0xff]  ;;  %v3890_v42 = vld [vmem:[%s13377_s17 + $0x1850] sm:$0xff] }
 0xa8f   :  { %11074 = vmatpush1.bf16.msra.mxu1 %v11073_v24  ;;  %11328 = vmatprep.subr.bf16.mxu0 %v11327_v37  ;;  %v11093_v24 = vpack.c.bf16 %v3734_v39, %v3722_v47  ;;  %v11095_v37 = vpack.c.bf16 %v3759_v51, %v3747_v46  ;;  %v3902_v11 = vld [vmem:[%s13377_s17 + $0x18b0] sm:$0xff]  ;;  %v3915_v38 = vld [vmem:[%s13377_s17 + $0x1918] sm:$0xff] }
 0xa90   :  { %11076 = vmatprep.subr.bf16.mxu1 %v11075_v27  ;;  %v3771_v27 = vld [vmem:[%s13377_s17 + $0x1498] sm:$0xff]  ;;  %v3914_v39 = vld [vmem:[%s13377_s17 + $0x1910] sm:$0xff] }
 0xa91   :  { %v11099_v54 = vpack.c.bf16 %v3783_v34, %v3771_v27  ;;  %v3926_v46 = vld [vmem:[%s13377_s17 + $0x1970] sm:$0xff]  ;;  %v3939_v51 = vld [vmem:[%s13377_s17 + $0x19d8] sm:$0xff] }
 0xa92   :  { %11330 = vmatpush3.bf16.msra.mxu0 %v11329_v31  ;;  %v3807_v31 = vld [vmem:[%s13377_s17 + $0x15b8] sm:$0xff]  ;;  %v3938_v48 = vld [vmem:[%s13377_s17 + $0x19d0] sm:$0xff] }
 0xa93   :  { %11078 = vmatpush1.bf16.msra.mxu1 %v11077_v13  ;;  %11332 = vmatprep.subr.bf16.mxu0 %v11331_v62  ;;  %v11101_v13 = vpack.c.bf16 %v3782_v49, %v3770_v10  ;;  %v11103_v62 = vpack.c.bf16 %v3807_v31, %v3795_v63  ;;  %v3950_v27 = vld [vmem:[%s13377_s17 + $0x1a30] sm:$0xff]  ;;  %v3963_v34 = vld [vmem:[%s13377_s17 + $0x1a98] sm:$0xff] }
 0xa94   :  { %11080 = vmatprep.subr.bf16.mxu1 %v11079_v57  ;;  %v3819_v57 = vld [vmem:[%s13377_s17 + $0x1618] sm:$0xff]  ;;  %v3962_v10 = vld [vmem:[%s13377_s17 + $0x1a90] sm:$0xff] }
 0xa95   :  { %v11107_v35 = vpack.c.bf16 %v3831_v26, %v3819_v57  ;;  %v3974_v49 = vld [vmem:[%s13377_s17 + $0x1af0] sm:$0xff]  ;;  %v3999_v63 = vld [vmem:[%s13377_s17 + $0x1bb8] sm:$0xff] }
 0xa96   :  { %11334 = vmatpush3.bf16.msra.mxu0 %v11333_v32  ;;  %v3855_v32 = vld [vmem:[%s13377_s17 + $0x1738] sm:$0xff]  ;;  %v11133_v31 = vpack.c.bf16 %v3974_v49, %v3962_v10  ;;  %v3998_v15 = vld [vmem:[%s13377_s17 + $0x1bb0] sm:$0xff] }
 0xa97   :  { %11082 = vmatpush1.bf16.msra.mxu1 %v11081_v43  ;;  %11336 = vmatprep.subr.bf16.mxu0 %v11335_v7  ;;  %v11109_v43 = vpack.c.bf16 %v3830_v36, %v3818_v12  ;;  %v11111_v7 = vpack.c.bf16 %v3855_v32, %v3843_v60  ;;  %v4011_v25 = vld [vmem:[%s13377_s17 + $0x1c18] sm:$0xff]  ;;  %v4022_v12 = vld [vmem:[%s13377_s17 + $0x1c70] sm:$0xff] }
 0xa98   :  { %11084 = vmatprep.subr.bf16.mxu1 %v11083_v28  ;;  %v3867_v28 = vld [vmem:[%s13377_s17 + $0x1798] sm:$0xff]  ;;  %v4046_v45 = vld [vmem:[%s13377_s17 + $0x1d30] sm:$0xff] }
 0xa99   :  { %v11115_v19 = vpack.c.bf16 %v3879_v5, %v3867_v28  ;;  %v4023_v57 = vld [vmem:[%s13377_s17 + $0x1c78] sm:$0xff]  ;;  %v4166_v10 = vld [vmem:[%s13377_s17 + $0x20f0] sm:$0xff] }
 0xa9a   :  { %11338 = vmatpush3.bf16.msra.mxu0 %v11337_v1  ;;  %v3878_v1 = vld [vmem:[%s13377_s17 + $0x17f0] sm:$0xff]  ;;  %v4035_v36 = vld [vmem:[%s13377_s17 + $0x1cd8] sm:$0xff] }
 0xa9b   :  { %11086 = vmatpush1.bf16.msra.mxu1 %v11085_v30  ;;  %9025 = vmatprep.subr.msk.mxu0 %vm6386_vm13, %v6375_v23  ;;  %v3891_v30 = vld [vmem:[%s13377_s17 + $0x1858] sm:$0xff] }
 0xa9c   :  { %11088 = vmatprep.subr.bf16.mxu1 %v11087_v50  ;;  %v3903_v23 = vld [vmem:[%s13377_s17 + $0x18b8] sm:$0xff]  ;;  %v11117_v50 = vpack.c.bf16 %v3878_v1, %v3866_v17  ;;  %v4070_v17 = vld [vmem:[%s13377_s17 + $0x1df0] sm:$0xff] }
 0xa9d   :  { %v11119_v53 = vpack.c.bf16 %v3903_v23, %v3891_v30  ;;  %v4047_v60 = vld [vmem:[%s13377_s17 + $0x1d38] sm:$0xff] }
 0xa9e   :  { %v4059_v16 = vld [vmem:[%s13377_s17 + $0x1d98] sm:$0xff] }
 0xa9f   :  { %11090 = vmatpush1.bf16.msra.mxu1 %v11089_v41  ;;  %v3927_v41 = vld [vmem:[%s13377_s17 + $0x1978] sm:$0xff] }
 0xaa0   :  { %11092 = vmatprep.subr.bf16.mxu1 %v11091_v6  ;;  %v11121_v6 = vpack.c.bf16 %v3902_v11, %v3890_v42  ;;  %v11123_v47 = vpack.c.bf16 %v3927_v41, %v3915_v38  ;;  %v4071_v28 = vld [vmem:[%s13377_s17 + $0x1df8] sm:$0xff]  ;;  %v4094_v42 = vld [vmem:[%s13377_s17 + $0x1eb0] sm:$0xff] }
 0xaa1   :  { %v4083_v1 = vld [vmem:[%s13377_s17 + $0x1e58] sm:$0xff] }
 0xaa2   :  { %v4095_v30 = vld [vmem:[%s13377_s17 + $0x1eb8] sm:$0xff] }
 0xaa3   :  { %11094 = vmatpush1.bf16.msra.mxu1 %v11093_v24  ;;  %v3951_v24 = vld [vmem:[%s13377_s17 + $0x1a38] sm:$0xff] }
 0xaa4   :  { %11096 = vmatprep.subr.bf16.mxu1 %v11095_v37  ;;  %v11125_v37 = vpack.c.bf16 %v3926_v46, %v3914_v39  ;;  %v11127_v44 = vpack.c.bf16 %v3951_v24, %v3939_v51  ;;  %v4107_v11 = vld [vmem:[%s13377_s17 + $0x1f18] sm:$0xff]  ;;  %v4118_v39 = vld [vmem:[%s13377_s17 + $0x1f70] sm:$0xff] }
 0xaa5   :  { %v4119_v38 = vld [vmem:[%s13377_s17 + $0x1f78] sm:$0xff] }
 0xaa6   :  { %v4131_v46 = vld [vmem:[%s13377_s17 + $0x1fd8] sm:$0xff] }
 0xaa7   :  { %11098 = vmatpush1.bf16.msra.mxu1 %v11097_v52  ;;  %v3975_v52 = vld [vmem:[%s13377_s17 + $0x1af8] sm:$0xff] }
 0xaa8   :  { %11100 = vmatprep.subr.bf16.mxu1 %v11099_v54  ;;  %v11129_v54 = vpack.c.bf16 %v3950_v27, %v3938_v48  ;;  %v4143_v51 = vld [vmem:[%s13377_s17 + $0x2038] sm:$0xff]  ;;  %v4142_v48 = vld [vmem:[%s13377_s17 + $0x2030] sm:$0xff] }
 0xaa9   :  { %v4155_v27 = vld [vmem:[%s13377_s17 + $0x2098] sm:$0xff] }
 0xaaa   :  { %v4179_v49 = vld [vmem:[%s13377_s17 + $0x2158] sm:$0xff] }
 0xaab   :  { %11102 = vmatpush1.bf16.msra.mxu1 %v11101_v13 }
 0xaac   :  { %11104 = vmatprep.subr.bf16.mxu1 %v11103_v62  ;;  %v3986_v62 = vld [vmem:[%s13377_s17 + $0x1b50] sm:$0xff] }
 0xaad   :  { %v11137_v26 = vpack.c.bf16 %v3998_v15, %v3986_v62  ;;  %v4190_v62 = vld [vmem:[%s13377_s17 + $0x21b0] sm:$0xff]  ;;  %v4203_v15 = vld [vmem:[%s13377_s17 + $0x2218] sm:$0xff] }
 0xaaf   :  { %11106 = vmatpush1.bf16.msra.mxu1 %v11105_v4  ;;  %v11139_v4 = vpack.c.bf16 %v4023_v57, %v4011_v25  ;;  %v4215_v25 = vld [vmem:[%s13377_s17 + $0x2278] sm:$0xff] }
 0xab0   :  { %11108 = vmatprep.subr.bf16.mxu1 %v11107_v35  ;;  %v4010_v35 = vld [vmem:[%s13377_s17 + $0x1c10] sm:$0xff] }
 0xab1   :  { %v11141_v32 = vpack.c.bf16 %v4022_v12, %v4010_v35  ;;  %v4214_v35 = vld [vmem:[%s13377_s17 + $0x2270] sm:$0xff]  ;;  %v4227_v12 = vld [vmem:[%s13377_s17 + $0x22d8] sm:$0xff] }
 0xab3   :  { %11110 = vmatpush1.bf16.msra.mxu1 %v11109_v43  ;;  %v11143_v43 = vpack.c.bf16 %v4047_v60, %v4035_v36  ;;  %v4239_v36 = vld [vmem:[%s13377_s17 + $0x2338] sm:$0xff]  ;;  %v14808_v60 = vsub.s32 3, %v12726_v56 }
 0xab4   :  { %11112 = vmatprep.subr.bf16.mxu1 %v11111_v7  ;;  %v4034_v7 = vld [vmem:[%s13377_s17 + $0x1cd0] sm:$0xff] }
 0xab5   :  { %v11145_v5 = vpack.c.bf16 %v4046_v45, %v4034_v7  ;;  %v4226_v7 = vld [vmem:[%s13377_s17 + $0x22d0] sm:$0xff] }
 0xab6   :  { %v4238_v45 = vld [vmem:[%s13377_s17 + $0x2330] sm:$0xff] }
 0xab7   :  { %11114 = vmatpush1.bf16.msra.mxu1 %v11113_v22  ;;  %v11147_v22 = vpack.c.bf16 %v4071_v28, %v4059_v16  ;;  %v4271_v16 = vrot.slane %v14560_v29, %v14808_v60  ;;  %v11177_v28 = vpack.c.bf16 %v4238_v45, %v4226_v7 }
 0xab8   :  { %11116 = vmatprep.subr.bf16.mxu1 %v11115_v19  ;;  %v4058_v19 = vld [vmem:[%s13377_s17 + $0x1d90] sm:$0xff] }
 0xab9   :  { %v11149_v23 = vpack.c.bf16 %v4070_v17, %v4058_v19  ;;  %v5658_v19 = vld [vmem:[%s14473_s15 + $0x188] sm:$0xff]  ;;  %v5641_v17 = vld [vmem:[%s14473_s15 + $0x100] sm:$0xff] }
 0xabb   :  { %11118 = vmatpush1.bf16.msra.mxu1 %v11117_v50  ;;  %v11151_v50 = vpack.c.bf16 %v4095_v30, %v4083_v1  ;;  %v5642_v1 = vld [vmem:[%s14473_s15 + $0x108] sm:$0xff]  ;;  %v12148_v30 = vadd.f32 %v14554_v59, %v4271_v16 }
 0xabc   :  { %11120 = vmatprep.subr.bf16.mxu1 %v11119_v53  ;;  %v4082_v53 = vld [vmem:[%s13377_s17 + $0x1e50] sm:$0xff] }
 0xabd   :  { %v11153_v41 = vpack.c.bf16 %v4094_v42, %v4082_v53  ;;  %v4250_v53 = vld [vmem:[%s13377_s17 + $0x2390] sm:$0xff]  ;;  %v11213_v42 = vpack.c.bf16 %v5642_v1, %v5641_v17  ;;  %v5654_v17 = vld [vmem:[%s14473_s15 + $0x168] sm:$0xff] }
 0xabe   :  { %5520 = vmatmul.mubr.f32.vlgmr.msra.gmra.mrb[24].mxu1 %v13664_v61  ;;  %v11131_v61 = vpack.c.bf16 %v3975_v52, %v3963_v34  ;;  %v4167_v34 = vld [vmem:[%s13377_s17 + $0x20f8] sm:$0xff] }
 0xabf   :  { %11122 = vmatpush1.bf16.msra.mxu1 %v11121_v6  ;;  %9021 = vmatprep.mubr.msk.f32.mxu1 %vm4316_vm11, %v13670_v18  ;;  %v3987_v18 = vld [vmem:[%s13377_s17 + $0x1b58] sm:$0xff]  ;;  %v11155_v6 = vpack.c.bf16 %v4119_v38, %v4107_v11  ;;  %v5643_v38 = vld [vmem:[%s14473_s15 + $0x110] sm:$0xff] }
 0xac0   :  { %11124 = vmatprep.subr.bf16.mxu1 %v11123_v47  ;;  %v11135_v13 = vpack.c.bf16 %v3999_v63, %v3987_v18  ;;  %v4106_v47 = vld [vmem:[%s13377_s17 + $0x1f10] sm:$0xff]  ;;  %v4191_v18 = vld [vmem:[%s13377_s17 + $0x21b8] sm:$0xff] }
 0xac1   :  { %v11157_v24 = vpack.c.bf16 %v4118_v39, %v4106_v47  ;;  %v5661_v47 = vld [vmem:[%s14473_s15 + $0x1a0] sm:$0xff]  ;;  %v5662_v39 = vld [vmem:[%s14473_s15 + $0x1a8] sm:$0xff] }
 0xac3   :  { %11126 = vmatpush1.bf16.msra.mxu1 %v11125_v37  ;;  %v11159_v37 = vpack.c.bf16 %v4143_v51, %v4131_v46  ;;  %v11219_v46 = vpack.c.bf16 %v5662_v39, %v5661_v47  ;;  %v5645_v51 = vld [vmem:[%s14473_s15 + $0x120] sm:$0xff] }
 0xac4   :  { %11128 = vmatprep.subr.bf16.mxu1 %v11127_v44  ;;  %v4130_v44 = vld [vmem:[%s13377_s17 + $0x1fd0] sm:$0xff] }
 0xac5   :  { %v11161_v52 = vpack.c.bf16 %v4142_v48, %v4130_v44  ;;  %v5664_v44 = vld [vmem:[%s14473_s15 + $0x1b8] sm:$0xff]  ;;  %v6241_v48 = vpop.xlane.xlu0 %6240 }
 0xac7   :  { %11130 = vmatpush1.bf16.msra.mxu1 %v11129_v54  ;;  %v11163_v54 = vpack.c.bf16 %v4167_v34, %v4155_v27  ;;  %v5647_v34 = vld [vmem:[%s14473_s15 + $0x130] sm:$0xff] }
 0xac8   :  { %11132 = vmatprep.subr.bf16.mxu1 %v11131_v61  ;;  %v4154_v61 = vld [vmem:[%s13377_s17 + $0x2090] sm:$0xff] }
 0xac9   :  { %v11165_v63 = vpack.c.bf16 %v4166_v10, %v4154_v61  ;;  %v5666_v61 = vld [vmem:[%s14473_s15 + $0x1c8] sm:$0xff] }
 0xacb   :  { %11134 = vmatpush1.bf16.msra.mxu1 %v11133_v31  ;;  %v11167_v31 = vpack.c.bf16 %v4191_v18, %v4179_v49  ;;  %v5649_v18 = vld [vmem:[%s14473_s15 + $0x140] sm:$0xff] }
 0xacc   :  { %11136 = vmatprep.subr.bf16.mxu1 %v11135_v13  ;;  %v4178_v13 = vld [vmem:[%s13377_s17 + $0x2150] sm:$0xff] }
 0xacd   :  { %v11169_v57 = vpack.c.bf16 %v4190_v62, %v4178_v13  ;;  %v5668_v13 = vld [vmem:[%s14473_s15 + $0x1d8] sm:$0xff]  ;;  %v6244_v62 = vpop.xlane.xlu0 %6243 }
 0xacf   :  { %11138 = vmatpush1.bf16.msra.mxu1 %v11137_v26  ;;  %v11171_v26 = vpack.c.bf16 %v4215_v25, %v4203_v15  ;;  %v6238_v15 = vpop.xlane.xlu1 %6237 }
 0xad0   :  { %11140 = vmatprep.subr.bf16.mxu1 %v11139_v4  ;;  %v4202_v4 = vld [vmem:[%s13377_s17 + $0x2210] sm:$0xff] }
 0xad3   :  { %11142 = vmatpush1.bf16.msra.mxu1 %v11141_v32  ;;  %v11173_v32 = vpack.c.bf16 %v4214_v35, %v4202_v4  ;;  %v5651_v4 = vld [vmem:[%s14473_s15 + $0x150] sm:$0xff]  ;;  %v5652_v35 = vld [vmem:[%s14473_s15 + $0x158] sm:$0xff] }
 0xad4   :  { %11144 = vmatprep.subr.bf16.mxu1 %v11143_v43  ;;  %v11175_v43 = vpack.c.bf16 %v4239_v36, %v4227_v12  ;;  %v6249_v12 = vmul.f32 0.015625, %v6241_v48  ;;  %v6248_v36 = vmul.f32 0.015625, %v6238_v15  ;;  %v11233_v16 = vpack.c.bf16 %v5652_v35, %v5651_v4  ;;  %v5705_v15 = vld [vmem:[%s14473_s15 + $0x300] sm:$0xff]  ;;  %v5724_v4 = vld [vmem:[%s14473_s15 + $0x398] sm:$0xff] }
 0xad6   :  { %v6355_v1 = vrot.slane %v6249_v12, %v12757_v9 }
 0xad7   :  { %11146 = vmatpush1.bf16.msra.mxu1 %v11145_v5  ;;  %v4251_v5 = vld [vmem:[%s13377_s17 + $0x2398] sm:$0xff] }
 0xad8   :  { %11148 = vmatprep.subr.bf16.mxu1 %v11147_v22  ;;  %v5657_v22 = vld [vmem:[%s14473_s15 + $0x180] sm:$0xff] }
 0xad9   :  { %v11211_v29 = vpack.c.bf16 %v5658_v19, %v5657_v22  ;;  %v5653_v19 = vld [vmem:[%s14473_s15 + $0x160] sm:$0xff] }
 0xada   :  { %v11237_v39 = vpack.c.bf16 %v5654_v17, %v5653_v19  ;;  %v6256_v19 = vld [vmem:[%s14694_s19 + $0x20] sm:$0x77] }
 0xadb   :  { %11150 = vmatpush1.bf16.msra.mxu1 %v11149_v23  ;;  %v5659_v23 = vld [vmem:[%s14473_s15 + $0x190] sm:$0xff] }
 0xadc   :  { %11152 = vmatprep.subr.bf16.mxu1 %v11151_v50  ;;  %v5660_v50 = vld [vmem:[%s14473_s15 + $0x198] sm:$0xff] }
 0xadd   :  { %v11215_v11 = vpack.c.bf16 %v5660_v50, %v5659_v23  ;;  %v14856_v50 = vsub.s32 7, %v12726_v56 }
 0xadf   :  { %11154 = vmatpush1.bf16.msra.mxu1 %v11153_v41  ;;  %v5644_v41 = vld [vmem:[%s14473_s15 + $0x118] sm:$0xff] }
 0xae0   :  { %11156 = vmatprep.subr.bf16.mxu1 %v11155_v6  ;;  %v5600_v6 = vmax.f32 %v12148_v30, 0.0  ;;  %v11217_v59 = vpack.c.bf16 %v5644_v41, %v5643_v38  ;;  %v6351_v30 = vrot.slane %v6248_v36, %v12757_v9  ;;  %v6255_v36 = vld [vmem:[%s14694_s19 + $0x18] sm:$0x77] }
 0xae2   :  { %v6364_v48 = vsel %vm560_vm10, %v6355_v1, %v6351_v30  ;;  %v5709_v1 = vld [vmem:[%s14473_s15 + $0x320] sm:$0xff]  ;;  %v5710_v30 = vld [vmem:[%s14473_s15 + $0x328] sm:$0xff] }
 0xae3   :  { %11158 = vmatpush1.bf16.msra.mxu1 %v11157_v24  ;;  %v5646_v24 = vld [vmem:[%s14473_s15 + $0x128] sm:$0xff] }
 0xae4   :  { %11160 = vmatprep.subr.bf16.mxu1 %v11159_v37  ;;  %v5663_v37 = vld [vmem:[%s14473_s15 + $0x1b0] sm:$0xff] }
 0xae5   :  { %v11223_v27 = vpack.c.bf16 %v5664_v44, %v5663_v37  ;;  %v5655_v44 = vld [vmem:[%s14473_s15 + $0x170] sm:$0xff] }
 0xae7   :  { %11162 = vmatpush1.bf16.msra.mxu1 %v11161_v52  ;;  %v5648_v52 = vld [vmem:[%s14473_s15 + $0x138] sm:$0xff] }
 0xae8   :  { %11164 = vmatprep.subr.bf16.mxu1 %v11163_v54  ;;  %v5665_v54 = vld [vmem:[%s14473_s15 + $0x1c0] sm:$0xff]  ;;  %v11225_v10 = vpack.c.bf16 %v5648_v52, %v5647_v34 }
 0xae9   :  { %v11227_v49 = vpack.c.bf16 %v5666_v61, %v5665_v54  ;;  %v5721_v52 = vld [vmem:[%s14473_s15 + $0x380] sm:$0xff]  ;;  %v5722_v54 = vld [vmem:[%s14473_s15 + $0x388] sm:$0xff] }
 0xaeb   :  { %11166 = vmatpush1.bf16.msra.mxu1 %v11165_v63  ;;  %v5650_v63 = vld [vmem:[%s14473_s15 + $0x148] sm:$0xff] }
 0xaec   :  { %11168 = vmatprep.subr.bf16.mxu1 %v11167_v31  ;;  %v5667_v31 = vld [vmem:[%s14473_s15 + $0x1d0] sm:$0xff]  ;;  %v11229_v25 = vpack.c.bf16 %v5650_v63, %v5649_v18 }
 0xaed   :  { %v6254_v63 = vld [vmem:[%s14694_s19 + $0x10] sm:$0x77] }
 0xaef   :  { %11170 = vmatpush1.bf16.msra.mxu1 %v11169_v57  ;;  %v14841_v57 = vld [vmem:[%s14090_s6 + $0x8] sm:$0xf] }
 0xaf0   :  { %11172 = vmatprep.subr.bf16.mxu1 %v11171_v26  ;;  %v11231_v26 = vpack.c.bf16 %v5668_v13, %v5667_v31  ;;  %v4291_v7 = vrot.slane %v14841_v57, %v13266_v58  ;;  %v4295_v45 = vrot.slane %v14841_v57, %v13273_v3 }
 0xaf3   :  { %11174 = vmatpush1.bf16.msra.mxu1 %v11173_v32  ;;  %v5669_v32 = vld [vmem:[%s14473_s15 + $0x1e0] sm:$0xff] }
 0xaf4   :  { %11176 = vmatprep.subr.bf16.mxu1 %v11175_v43  ;;  %v5670_v43 = vld [vmem:[%s14473_s15 + $0x1e8] sm:$0xff] }
 0xaf5   :  { %v11235_v22 = vpack.c.bf16 %v5670_v43, %v5669_v32  ;;  %v5707_v43 = vld [vmem:[%s14473_s15 + $0x310] sm:$0xff] }
 0xaf7   :  { %11178 = vmatpush1.bf16.msra.mxu1 %v11177_v28  ;;  %v6250_v28 = vmul.f32 0.015625, %v6244_v62  ;;  %v11275_v62 = vpack.c.bf16 %v5722_v54, %v5721_v52 }
 0xaf8   :  { %5586 = vmatprep.subr.mxu1 %v4251_v5  ;;  %v6247_v5 = vpop.xlane.xlu0 %6246 }
 0xaf9   :  { %v6251_v41 = vmul.f32 0.015625, %v6247_v5  ;;  %v6378_v5 = vcombine.high %v6255_v36, %v6255_v36 }
 0xafb   :  { %5587 = vmatpush1.msra.mxu1 %v4250_v53  ;;  %v5671_v53 = vld [vmem:[%s14473_s15 + $0x1f0] sm:$0xff] }
 0xafc   :  { %5591 = vmatmul.mubr.f32.vlgmr.msra.gmra.mrb[24].mxu1 %v13680_v21  ;;  %11212 = vmatprep.subr.bf16.mxu1 %v11211_v29  ;;  %v11221_v21 = vpack.c.bf16 %v5646_v24, %v5645_v51  ;;  %v5672_v29 = vld [vmem:[%s14473_s15 + $0x1f8] sm:$0xff]  ;;  %v6359_v24 = vrot.slane %v6250_v28, %v12757_v9  ;;  %v5726_v28 = vld [vmem:[%s14473_s15 + $0x3a8] sm:$0xff] }
 0xafd   :  { %11214 = vmatpush3.bf16.msra.mxu1 %v11213_v42  ;;  %5945 = vmatprep.mubr.f32.mxu1 %v5600_v6  ;;  %v11239_v37 = vpack.c.bf16 %v5672_v29, %v5671_v53  ;;  %v5728_v53 = vld [vmem:[%s14473_s15 + $0x3b8] sm:$0xff]  ;;  %v6379_v29 = vcombine.high %v6256_v19, %v6256_v19 }
 0xafe   :  { %11216 = vmatprep.subr.bf16.mxu1 %v11215_v11  ;;  %v6365_v13 = vsel %vm561_vm14, %v6359_v24, %v6364_v48  ;;  %v5714_v48 = vld [vmem:[%s14473_s15 + $0x348] sm:$0xff] }
 0xb01   :  { %11218 = vmatpush3.bf16.msra.mxu1 %v11217_v59  ;;  %v6253_v59 = vld [vmem:[%s14694_s19 + $0x8] sm:$0x77] }
 0xb02   :  { %11220 = vmatprep.subr.bf16.mxu1 %v11219_v46  ;;  %v14864_v46 = vld [vmem:[%s14090_s6] sm:$0xff]  ;;  %s12525_s6 = smov 20  }
 0xb03   :  { %v4267_v51 = vrot.slane %v14864_v46, %v13359_v14  ;;  %v4287_v34 = vrot.slane %v14864_v46, %v14856_v50  ;;  %s15669_s9 = sld [smem:[%s15933_s0 + %s12525_s6]]  }
 0xb05   :  { %11222 = vmatpush3.bf16.msra.mxu1 %v11221_v21  ;;  %v5656_v21 = vld [vmem:[%s14473_s15 + $0x178] sm:$0xff]  ;;  %v12147_v31 = vadd.f32 %v14550_v40, %v4267_v51  ;;  %v6377_v40 = vcombine.high %v6254_v63, %v6254_v63 }
 0xb06   :  { %11224 = vmatprep.subr.bf16.mxu1 %v11223_v27  ;;  %v11241_v18 = vpack.c.bf16 %v5656_v21, %v5655_v44  ;;  %v5713_v21 = vld [vmem:[%s14473_s15 + $0x340] sm:$0xff] }
 0xb07   :  { %v5599_v32 = vmax.f32 %v12147_v31, 0.0  ;;  %v11293_v54 = vpack.c.bf16 %v5714_v48, %v5713_v21  ;;  %v5734_v31 = vld [vmem:[%s14473_s15 + $0x3e8] sm:$0xff]  ;;  %v5771_v21 = vld [vmem:[%s14473_s15 + $0x510] sm:$0xff]  ;;  %v5772_v48 = vld [vmem:[%s14473_s15 + $0x518] sm:$0xff] }
 0xb09   :  { %11226 = vmatpush3.bf16.msra.mxu1 %v11225_v10  ;;  %v6376_v10 = vcombine.high %v6253_v59, %v6253_v59 }
 0xb0a   :  { %11228 = vmatprep.subr.bf16.mxu1 %v11227_v49  ;;  %v6363_v49 = vrot.slane %v6251_v41, %v12757_v9  ;;  %v5723_v9 = vld [vmem:[%s14473_s15 + $0x390] sm:$0xff] }
 0xb0c   :  { %v14887_v35 = vsel %vm563_vm15, %v6363_v49, %v6365_v13  ;;  %v5715_v49 = vld [vmem:[%s14473_s15 + $0x350] sm:$0xff] }
 0xb0d   :  { %11230 = vmatpush3.bf16.msra.mxu1 %v11229_v25  ;;  %v5706_v25 = vld [vmem:[%s14473_s15 + $0x308] sm:$0xff] }
 0xb0e   :  { %11232 = vmatprep.subr.bf16.mxu1 %v11231_v26  ;;  %v11277_v12 = vpack.c.bf16 %v5706_v25, %v5705_v15  ;;  %v6988_v15 = vld [vmem:[%s14923_s21 + $0x8] sm:$0xff]  ;;  %v6990_v25 = vld [vmem:[%s14923_s21 + $0x18] sm:$0xff] }
 0xb0f   :  { %v5379_v23 = vpop.f32.mrb[40].mxu0 }
 0xb10   :  { %v12153_v42 = vadd.f32 %v5379_v23, %v4291_v7  ;;  %v14860_v11 = vpop.f32.mrb[22].mxu1  ;;  %v5381_v38 = vpop.f32.mrb[41].mxu0  ;;  %v5708_v7 = vld [vmem:[%s14473_s15 + $0x318] sm:$0xff]  ;;  %v5727_v23 = vld [vmem:[%s14473_s15 + $0x3b0] sm:$0xff] }
 0xb11   :  { %v12154_v6 = vadd.f32 %v5381_v38, %v4295_v45  ;;  %11234 = vmatpush3.bf16.msra.mxu1 %v11233_v16  ;;  %v5168_v47 = vpop.f32.mrb[23].mxu1  ;;  %v5725_v16 = vld [vmem:[%s14473_s15 + $0x3a0] sm:$0xff]  ;;  %v6257_v38 = vld [vmem:[%s14694_s19 + $0x28] sm:$0x77]  ;;  %v11287_v41 = vpack.c.bf16 %v5728_v53, %v5727_v23  ;;  %v6993_v53 = vld [vmem:[%s14923_s21 + $0x30] sm:$0xff] }
 0xb12   :  { %11236 = vmatprep.subr.bf16.mxu1 %v11235_v22  ;;  %v5605_v61 = vmax.f32 %v12153_v42, 0.0  ;;  %v12152_v26 = vadd.f32 %v5168_v47, %v4287_v34  ;;  %v11281_v22 = vpack.c.bf16 %v5708_v7, %v5707_v43  ;;  %v11283_v17 = vpack.c.bf16 %v5726_v28, %v5725_v16  ;;  %v5712_v47 = vld [vmem:[%s14473_s15 + $0x338] sm:$0xff]  ;;  %v6989_v43 = vld [vmem:[%s14923_s21 + $0x10] sm:$0xff]  ;;  %v6992_v16 = vld [vmem:[%s14923_s21 + $0x28] sm:$0xff] }
 0xb13   :  { %v5606_v27 = vmax.f32 %v12154_v6, 0.0  ;;  %v11285_v42 = vpack.c.bf16 %v5710_v30, %v5709_v1  ;;  %v5711_v6 = vld [vmem:[%s14473_s15 + $0x330] sm:$0xff]  ;;  %v6380_v51 = vcombine.high %v6257_v38, %v6257_v38  ;;  %v5732_v34 = vld [vmem:[%s14473_s15 + $0x3d8] sm:$0xff]  ;;  %v6991_v23 = vld [vmem:[%s14923_s21 + $0x20] sm:$0xff] }
 0xb14   :  { %v5604_v45 = vmax.f32 %v12152_v26, 0.0  ;;  %v11289_v24 = vpack.c.bf16 %v5712_v47, %v5711_v6  ;;  %v14947_v26 = vsub.s32 6, %v12726_v56  ;;  %v11382_v56 = vpack.c.bf16 %v6990_v25, %v6988_v15  ;;  %v6994_v28 = vld [vmem:[%s14923_s21 + $0x38] sm:$0xff]  ;;  %v5769_v6 = vld [vmem:[%s14473_s15 + $0x500] sm:$0xff]  ;;  %v5770_v47 = vld [vmem:[%s14473_s15 + $0x508] sm:$0xff] }
 0xb15   :  { %11238 = vmatpush3.bf16.msra.mxu1 %v11237_v39  ;;  %6155 = vmatprep.mubr.f32.mxu0 %v5606_v27  ;;  %v5729_v39 = vld [vmem:[%s14473_s15 + $0x3c0] sm:$0xff]  ;;  %v5731_v27 = vld [vmem:[%s14473_s15 + $0x3d0] sm:$0xff]  ;;  %v5720_v1 = vld [vmem:[%s14473_s15 + $0x378] sm:$0xff] }
 0xb16   :  { %6156 = vmatmul.mubr.f32.vlgmr.msra.gmra.mrb[46].mxu0 %v5605_v61  ;;  %11240 = vmatprep.subr.bf16.mxu1 %v11239_v37  ;;  %v6258_v37 = vld [vmem:[%s14694_s19 + $0x30] sm:$0x77]  ;;  %v6259_v61 = vld [vmem:[%s14694_s19 + $0x38] sm:$0x77] }
 0xb17   :  { %9026 = vmatpush1.msk.msra.mxu0 %vm6386_vm13, %v14711_v20  ;;  %6483 = vmatprep.mubr.f32.mxu0 %v12468_v0  ;;  %v11279_v20 = vpack.c.bf16 %v5724_v4, %v5723_v9  ;;  %v6381_v52 = vcombine.high %v6258_v37, %v6258_v37  ;;  %v6382_v13 = vcombine.high %v6259_v61, %v6259_v61  ;;  %v5717_v4 = vld [vmem:[%s14473_s15 + $0x360] sm:$0xff]  ;;  %v7005_v15 = vld [vmem:[%s14923_s21 + $0x90] sm:$0xff] }
 0xb18   :  { %9028 = vmatprep.subr.msk.mxu0 %vm6386_vm13, %v6376_v10  ;;  %v11295_v10 = vpack.c.bf16 %v5732_v34, %v5731_v27 }
 0xb19   :  { %11242 = vmatpush3.bf16.msra.mxu1 %v11241_v18  ;;  %v5716_v18 = vld [vmem:[%s14473_s15 + $0x358] sm:$0xff] }
 0xb1a   :  { %9027 = vmatmul.mubr.msk.f32.vlgmr.msra.gmra.mrb[48].mxu0 %vm6383_vm1, %v14887_v35  ;;  %11276 = vmatprep.subr.bf16.mxu1 %v11275_v62  ;;  %v11297_v62 = vpack.c.bf16 %v5716_v18, %v5715_v49  ;;  %v7006_v49 = vld [vmem:[%s14923_s21 + $0x98] sm:$0xff]  ;;  %v5773_v18 = vld [vmem:[%s14473_s15 + $0x520] sm:$0xff] }
 0xb1b   :  { %9029 = vmatpush1.msk.msra.mxu0 %vm6386_vm13, %v6253_v59  ;;  %6554 = vmatprep.mubr.f32.mxu0 %v12468_v0  ;;  %v5730_v59 = vld [vmem:[%s14473_s15 + $0x3c8] sm:$0xff] }
 0xb1c   :  { %5946 = vmatmul.mubr.f32.vlgmr.msra.gmra.mrb[26].mxu1 %v5599_v32  ;;  %9031 = vmatprep.subr.msk.mxu0 %vm6386_vm13, %v6377_v40  ;;  %v11291_v44 = vpack.c.bf16 %v5730_v59, %v5729_v39  ;;  %v5718_v40 = vld [vmem:[%s14473_s15 + $0x368] sm:$0xff]  ;;  %v11388_v39 = vpack.c.bf16 %v6993_v53, %v6991_v23  ;;  %v7018_v23 = vld [vmem:[%s14923_s21 + $0xf8] sm:$0xff]  ;;  %v5779_v53 = vld [vmem:[%s14473_s15 + $0x550] sm:$0xff] }
 0xb1d   :  { %11278 = vmatpush3.bf16.msra.mxu1 %v11277_v12  ;;  %6085 = vmatprep.mubr.f32.mxu1 %v5604_v45  ;;  %v5735_v12 = vld [vmem:[%s14473_s15 + $0x3f0] sm:$0xff]  ;;  %v11301_v45 = vpack.c.bf16 %v5718_v40, %v5717_v4  ;;  %v7010_v4 = vld [vmem:[%s14923_s21 + $0xb8] sm:$0xff] }
 0xb1e   :  { %9030 = vmatmul.mubr.msk.f32.vlgmr.msra.gmra.mrb[50].mxu0 %vm6383_vm1, %v14887_v35  ;;  %11280 = vmatprep.subr.bf16.mxu1 %v11279_v20  ;;  %v6987_v20 = vld [vmem:[%s14923_s21] sm:$0xff]  ;;  %v5775_v40 = vld [vmem:[%s14473_s15 + $0x530] sm:$0xff] }
 0xb1f   :  { %9032 = vmatpush1.msk.msra.mxu0 %vm6386_vm13, %v6254_v63  ;;  %6625 = vmatprep.mubr.f32.mxu0 %v12468_v0  ;;  %v5733_v63 = vld [vmem:[%s14473_s15 + $0x3e0] sm:$0xff]  ;;  %v11384_v30 = vpack.c.bf16 %v6989_v43, %v6987_v20  ;;  %v7009_v20 = vld [vmem:[%s14923_s21 + $0xb0] sm:$0xff] }
 0xb20   :  { %9034 = vmatprep.subr.msk.mxu0 %vm6386_vm13, %v6378_v5  ;;  %v11299_v9 = vpack.c.bf16 %v5734_v31, %v5733_v63  ;;  %v4283_v5 = vrot.slane %v14864_v46, %v14947_v26  ;;  %v11386_v46 = vpack.c.bf16 %v6994_v28, %v6992_v16  ;;  %v5774_v63 = vld [vmem:[%s14473_s15 + $0x528] sm:$0xff]  ;;  %v5777_v16 = vld [vmem:[%s14473_s15 + $0x540] sm:$0xff] }
 0xb21   :  { %11282 = vmatpush3.bf16.msra.mxu1 %v11281_v22  ;;  %v11346_v25 = vpack.c.bf16 %v5774_v63, %v5773_v18  ;;  %v5778_v28 = vld [vmem:[%s14473_s15 + $0x548] sm:$0xff]  ;;  %v5785_v63 = vld [vmem:[%s14473_s15 + $0x580] sm:$0xff] }
 0xb22   :  { %9033 = vmatmul.mubr.msk.f32.vlgmr.msra.gmra.mrb[52].mxu0 %vm6383_vm1, %v14887_v35  ;;  %11284 = vmatprep.subr.bf16.mxu1 %v11283_v17  ;;  %v5719_v17 = vld [vmem:[%s14473_s15 + $0x370] sm:$0xff] }
 0xb23   :  { %9035 = vmatpush1.msk.msra.mxu0 %vm6386_vm13, %v6255_v36  ;;  %6696 = vmatprep.mubr.f32.mxu0 %v12468_v0  ;;  %v5736_v36 = vld [vmem:[%s14473_s15 + $0x3f8] sm:$0xff] }
 0xb24   :  { %9037 = vmatprep.subr.msk.mxu0 %vm6386_vm13, %v6379_v29  ;;  %v11305_v29 = vpack.c.bf16 %v5720_v1, %v5719_v17  ;;  %v7011_v17 = vld [vmem:[%s14923_s21 + $0xc0] sm:$0xff]  ;;  %v7013_v1 = vld [vmem:[%s14923_s21 + $0xd0] sm:$0xff] }
 0xb25   :  { %11286 = vmatpush3.bf16.msra.mxu1 %v11285_v42  ;;  %v6996_v42 = vld [vmem:[%s14923_s21 + $0x48] sm:$0xff] }
 0xb26   :  { %9036 = vmatmul.mubr.msk.f32.vlgmr.msra.gmra.mrb[54].mxu0 %vm6383_vm1, %v14887_v35  ;;  %11288 = vmatprep.subr.bf16.mxu1 %v11287_v41  ;;  %v12151_v41 = vadd.f32 %v14860_v11, %v4283_v5  ;;  %v7000_v11 = vld [vmem:[%s14923_s21 + $0x68] sm:$0xff] }
 0xb27   :  { %9038 = vmatpush1.msk.msra.mxu0 %vm6386_vm13, %v6256_v19  ;;  %6767 = vmatprep.mubr.f32.mxu0 %v12468_v0  ;;  %v11303_v19 = vpack.c.bf16 %v5736_v36, %v5735_v12  ;;  %v5776_v12 = vld [vmem:[%s14473_s15 + $0x538] sm:$0xff] }
 0xb28   :  { %9040 = vmatprep.subr.msk.mxu0 %vm6386_vm13, %v6380_v51  ;;  %v6995_v51 = vld [vmem:[%s14923_s21 + $0x40] sm:$0xff]  ;;  %v11349_v43 = vpack.c.bf16 %v5776_v12, %v5775_v40 }
 0xb29   :  { %11290 = vmatpush3.bf16.msra.mxu1 %v11289_v24  ;;  %v6997_v24 = vld [vmem:[%s14923_s21 + $0x50] sm:$0xff]  ;;  %v7027_v12 = vld [vmem:[%s14923_s21 + $0x140] sm:$0xff] }
 0xb2a   :  { %9039 = vmatmul.mubr.msk.f32.vlgmr.msra.gmra.mrb[56].mxu0 %vm6383_vm1, %v14887_v35  ;;  %11292 = vmatprep.subr.bf16.mxu1 %v11291_v44  ;;  %v7002_v44 = vld [vmem:[%s14923_s21 + $0x78] sm:$0xff]  ;;  %v11392_v27 = vpack.c.bf16 %v6997_v24, %v6995_v51 }
 0xb2b   :  { %9041 = vmatpush1.msk.msra.mxu0 %vm6386_vm13, %v6257_v38  ;;  %6838 = vmatprep.mubr.f32.mxu0 %v12468_v0  ;;  %v6998_v38 = vld [vmem:[%s14923_s21 + $0x58] sm:$0xff]  ;;  %v11394_v34 = vpack.c.bf16 %v7002_v44, %v7000_v11 }
 0xb2c   :  { %9043 = vmatprep.subr.msk.mxu0 %vm6386_vm13, %v6381_v52  ;;  %v11390_v59 = vpack.c.bf16 %v6998_v38, %v6996_v42  ;;  %v6999_v52 = vld [vmem:[%s14923_s21 + $0x60] sm:$0xff]  ;;  %v11408_v42 = vpack.c.bf16 %v7013_v1, %v7011_v17  ;;  %v7022_v11 = vld [vmem:[%s14923_s21 + $0x118] sm:$0xff]  ;;  %v7036_v17 = vld [vmem:[%s14923_s21 + $0x188] sm:$0xff] }
 0xb2d   :  { %11294 = vmatpush3.bf16.msra.mxu1 %v11293_v54  ;;  %v7001_v54 = vld [vmem:[%s14923_s21 + $0x70] sm:$0xff]  ;;  %v7038_v1 = vld [vmem:[%s14923_s21 + $0x198] sm:$0xff] }
 0xb2e   :  { %9042 = vmatmul.mubr.msk.f32.vlgmr.msra.gmra.mrb[58].mxu0 %vm6383_vm1, %v14887_v35  ;;  %11296 = vmatprep.subr.bf16.mxu1 %v11295_v10  ;;  %v7004_v10 = vld [vmem:[%s14923_s21 + $0x88] sm:$0xff]  ;;  %v11396_v31 = vpack.c.bf16 %v7001_v54, %v6999_v52  ;;  %v5784_v52 = vld [vmem:[%s14473_s15 + $0x578] sm:$0xff]  ;;  %v7021_v54 = vld [vmem:[%s14923_s21 + $0x110] sm:$0xff] }
 0xb2f   :  { %9044 = vmatpush1.msk.msra.mxu0 %vm6386_vm13, %v6258_v37  ;;  %6909 = vmatprep.mubr.f32.mxu0 %v12468_v0  ;;  %v11340_v37 = vpack.c.bf16 %v5770_v47, %v5769_v6  ;;  %v7015_v6 = vld [vmem:[%s14923_s21 + $0xe0] sm:$0xff] }
 0xb30   :  { %v9256_v32 = vpop.f32.mrb[42].mxu0  ;;  %9046 = vmatprep.subr.msk.mxu0 %vm6386_vm13, %v6382_v13  ;;  %v11398_v13 = vpack.c.bf16 %v7006_v49, %v7004_v10  ;;  %v5781_v47 = vld [vmem:[%s14473_s15 + $0x560] sm:$0xff]  ;;  %v7024_v10 = vld [vmem:[%s14923_s21 + $0x128] sm:$0xff]  ;;  %v7026_v49 = vld [vmem:[%s14923_s21 + $0x138] sm:$0xff] }
 0xb31   :  { %v9257_v7 = vpop.f32.mrb[43].mxu0  ;;  %11298 = vmatpush3.bf16.msra.mxu1 %v11297_v62  ;;  %v7003_v62 = vld [vmem:[%s14923_s21 + $0x80] sm:$0xff] }
 0xb32   :  { %v14964_v22 = vadd.f32 %v9257_v7, %v9256_v32  ;;  %9045 = vmatmul.mubr.msk.f32.vlgmr.msra.gmra.mrb[60].mxu0 %vm6383_vm1, %v14887_v35  ;;  %11300 = vmatprep.subr.bf16.mxu1 %v11299_v9  ;;  %v7008_v9 = vld [vmem:[%s14923_s21 + $0xa8] sm:$0xff]  ;;  %v11400_v36 = vpack.c.bf16 %v7005_v15, %v7003_v62  ;;  %v7025_v62 = vld [vmem:[%s14923_s21 + $0x130] sm:$0xff] }
 0xb33   :  { %9047 = vmatpush1.msk.msra.mxu0 %vm6386_vm13, %v6259_v61  ;;  %6980 = vmatprep.mubr.f32.mxu0 %v12468_v0  ;;  %v11343_v61 = vpack.c.bf16 %v5772_v48, %v5771_v21  ;;  %v11402_v32 = vpack.c.bf16 %v7010_v4, %v7008_v9  ;;  %v7012_v7 = vld [vmem:[%s14923_s21 + $0xc8] sm:$0xff]  ;;  %v7019_v48 = vld [vmem:[%s14923_s21 + $0x100] sm:$0xff]  ;;  %v7030_v9 = vld [vmem:[%s14923_s21 + $0x158] sm:$0xff] }
 0xb34   :  { %11383 = vmatprep.subr.bf16.mxu0 %v11382_v56  ;;  %v7007_v56 = vld [vmem:[%s14923_s21 + $0xa0] sm:$0xff]  ;;  %v5786_v15 = vld [vmem:[%s14473_s15 + $0x588] sm:$0xff] }
 0xb35   :  { %11302 = vmatpush3.bf16.msra.mxu1 %v11301_v45  ;;  %v7014_v45 = vld [vmem:[%s14923_s21 + $0xd8] sm:$0xff]  ;;  %v11404_v5 = vpack.c.bf16 %v7009_v20, %v7007_v56  ;;  %v7032_v56 = vld [vmem:[%s14923_s21 + $0x168] sm:$0xff] }
 0xb36   :  { %9048 = vmatmul.mubr.msk.f32.vlgmr.msra.gmra.mrb[62].mxu0 %vm6383_vm1, %v14887_v35  ;;  %11304 = vmatprep.subr.bf16.mxu1 %v11303_v19  ;;  %v5603_v35 = vmax.f32 %v12151_v41, 0.0  ;;  %v11406_v19 = vpack.c.bf16 %v7014_v45, %v7012_v7  ;;  %v7034_v20 = vld [vmem:[%s14923_s21 + $0x178] sm:$0xff] }
 0xb37   :  { %11385 = vmatpush1.bf16.msra.mxu0 %v11384_v30  ;;  %v11352_v30 = vpack.c.bf16 %v5778_v28, %v5777_v16  ;;  %v5788_v7 = vld [vmem:[%s14473_s15 + $0x598] sm:$0xff]  ;;  %v11426_v16 = vpack.c.bf16 %v7034_v20, %v7032_v56  ;;  %v7031_v28 = vld [vmem:[%s14923_s21 + $0x160] sm:$0xff]  ;;  %v4303_v56 = vrot.slane %v14841_v57, %v14808_v60 }
 0xb38   :  { %11387 = vmatprep.subr.bf16.mxu0 %v11386_v46  ;;  %v7016_v46 = vld [vmem:[%s14923_s21 + $0xe8] sm:$0xff] }
 0xb39   :  { %11306 = vmatpush3.bf16.msra.mxu1 %v11305_v29  ;;  %v5780_v29 = vld [vmem:[%s14473_s15 + $0x558] sm:$0xff]  ;;  %v11410_v38 = vpack.c.bf16 %v7018_v23, %v7016_v46  ;;  %v5790_v46 = vld [vmem:[%s14473_s15 + $0x5a8] sm:$0xff] }
 0xb3a   :  { %11339 = vmatprep.subr.bf16.mxu1 %v12515_v8  ;;  %v11355_v41 = vpack.c.bf16 %v5780_v29, %v5779_v53  ;;  %v11430_v53 = vpack.c.bf16 %v7038_v1, %v7036_v17  ;;  %v7035_v29 = vld [vmem:[%s14923_s21 + $0x180] sm:$0xff]  ;;  %v6271_v17 = vrot.slane %v15094_v33, %v13273_v3  ;;  %v6267_v1 = vrot.slane %v15094_v33, %v13266_v58 }
 0xb3b   :  { %11389 = vmatpush1.bf16.msra.mxu0 %v11388_v39  ;;  %v5782_v39 = vld [vmem:[%s14473_s15 + $0x568] sm:$0xff] }
 0xb3c   :  { %6086 = vmatmul.mubr.f32.vlgmr.msra.gmra.mrb[28].mxu1 %v5603_v35  ;;  %11391 = vmatprep.subr.bf16.mxu0 %v11390_v59  ;;  %v7017_v59 = vld [vmem:[%s14923_s21 + $0xf0] sm:$0xff]  ;;  %v11358_v35 = vpack.c.bf16 %v5782_v39, %v5781_v47  ;;  %v5792_v39 = vld [vmem:[%s14473_s15 + $0x5b8] sm:$0xff] }
 0xb3d   :  { %11341 = vmatpush1.bf16.msra.mxu1 %v11340_v37  ;;  %v11412_v51 = vpack.c.bf16 %v7017_v59, %v7015_v6  ;;  %v7020_v37 = vld [vmem:[%s14923_s21 + $0x108] sm:$0xff]  ;;  %v7042_v6 = vld [vmem:[%s14923_s21 + $0x1b8] sm:$0xff]  ;;  %v5791_v47 = vld [vmem:[%s14473_s15 + $0x5b0] sm:$0xff] }
 0xb3e   :  { %11342 = vmatprep.subr.bf16.mxu1 %v12515_v8  ;;  %v11414_v21 = vpack.c.bf16 %v7022_v11, %v7020_v37  ;;  %v7041_v37 = vld [vmem:[%s14923_s21 + $0x1b0] sm:$0xff]  ;;  %v11373_v11 = vpack.c.bf16 %v5792_v39, %v5791_v47  ;;  %v6279_v39 = vrot.slane %v15094_v33, %v14808_v60 }
 0xb3f   :  { %11393 = vmatpush1.bf16.msra.mxu0 %v11392_v27 }
 0xb40   :  { %11395 = vmatprep.subr.bf16.mxu0 %v11394_v34  ;;  %v5783_v34 = vld [vmem:[%s14473_s15 + $0x570] sm:$0xff] }
 0xb41   :  { %11344 = vmatpush1.bf16.msra.mxu1 %v11343_v61  ;;  %v11416_v61 = vpack.c.bf16 %v7021_v54, %v7019_v48  ;;  %v11361_v18 = vpack.c.bf16 %v5784_v52, %v5783_v34  ;;  %v7044_v48 = vld [vmem:[%s14923_s21 + $0x1c8] sm:$0xff]  ;;  %v7046_v34 = vld [vmem:[%s14923_s21 + $0x1d8] sm:$0xff] }
 0xb42   :  { %11345 = vmatprep.subr.bf16.mxu1 %v12515_v8  ;;  %v11438_v54 = vpack.c.bf16 %v7046_v34, %v7044_v48  ;;  %v7060_v34 = vld [vmem:[%s14923_s21 + $0x248] sm:$0xff] }
 0xb43   :  { %11397 = vmatpush1.bf16.msra.mxu0 %v11396_v31  ;;  %v11418_v31 = vpack.c.bf16 %v7026_v49, %v7024_v10  ;;  %v7045_v10 = vld [vmem:[%s14923_s21 + $0x1d0] sm:$0xff] }
 0xb44   :  { %11399 = vmatprep.subr.bf16.mxu0 %v11398_v13  ;;  %v7023_v13 = vld [vmem:[%s14923_s21 + $0x120] sm:$0xff]  ;;  %v5795_v49 = vld [vmem:[%s14473_s15 + $0x5d0] sm:$0xff] }
 0xb45   :  { %11347 = vmatpush1.bf16.msra.mxu1 %v11346_v25  ;;  %v7028_v25 = vld [vmem:[%s14923_s21 + $0x148] sm:$0xff]  ;;  %v11420_v4 = vpack.c.bf16 %v7025_v62, %v7023_v13  ;;  %v7050_v13 = vld [vmem:[%s14923_s21 + $0x1f8] sm:$0xff] }
 0xb46   :  { %11348 = vmatprep.subr.bf16.mxu1 %v12515_v8  ;;  %v11422_v40 = vpack.c.bf16 %v7030_v9, %v7028_v25  ;;  %v7047_v25 = vld [vmem:[%s14923_s21 + $0x1e0] sm:$0xff]  ;;  %v7049_v9 = vld [vmem:[%s14923_s21 + $0x1f0] sm:$0xff] }
 0xb47   :  { %11401 = vmatpush1.bf16.msra.mxu0 %v11400_v36  ;;  %v7029_v36 = vld [vmem:[%s14923_s21 + $0x150] sm:$0xff] }
 0xb48   :  { %11403 = vmatprep.subr.bf16.mxu0 %v11402_v32  ;;  %v11364_v32 = vpack.c.bf16 %v5786_v15, %v5785_v63  ;;  %v11424_v45 = vpack.c.bf16 %v7029_v36, %v7027_v12  ;;  %v7054_v12 = vld [vmem:[%s14923_s21 + $0x218] sm:$0xff] }
 0xb49   :  { %11350 = vmatpush1.bf16.msra.mxu1 %v11349_v43  ;;  %v5787_v43 = vld [vmem:[%s14473_s15 + $0x590] sm:$0xff] }
 0xb4a   :  { %11351 = vmatprep.subr.bf16.mxu1 %v12515_v8 }
 0xb4b   :  { %11405 = vmatpush1.bf16.msra.mxu0 %v11404_v5  ;;  %v7033_v5 = vld [vmem:[%s14923_s21 + $0x170] sm:$0xff] }
 0xb4c   :  { %11407 = vmatprep.subr.bf16.mxu0 %v11406_v19  ;;  %v11367_v19 = vpack.c.bf16 %v5788_v7, %v5787_v43  ;;  %v11428_v23 = vpack.c.bf16 %v7033_v5, %v7031_v28 }
 0xb4d   :  { %11353 = vmatpush1.bf16.msra.mxu1 %v11352_v30  ;;  %v5789_v30 = vld [vmem:[%s14473_s15 + $0x5a0] sm:$0xff] }
 0xb4e   :  { %11354 = vmatprep.subr.bf16.mxu1 %v12515_v8 }
 0xb4f   :  { %11409 = vmatpush1.bf16.msra.mxu0 %v11408_v42  ;;  %v7037_v42 = vld [vmem:[%s14923_s21 + $0x190] sm:$0xff] }
 0xb50   :  { %v9326_v24 = vpop.f32.mrb[44].mxu0  ;;  %11411 = vmatprep.subr.bf16.mxu0 %v11410_v38  ;;  %v11370_v38 = vpack.c.bf16 %v5790_v46, %v5789_v30  ;;  %v11432_v59 = vpack.c.bf16 %v7037_v42, %v7035_v29  ;;  %v7051_v30 = vld [vmem:[%s14923_s21 + $0x200] sm:$0xff]  ;;  %v7053_v46 = vld [vmem:[%s14923_s21 + $0x210] sm:$0xff]  ;;  %v7058_v29 = vld [vmem:[%s14923_s21 + $0x238] sm:$0xff] }
 0xb51   :  { %v9327_v44 = vpop.f32.mrb[45].mxu0  ;;  %11356 = vmatpush1.bf16.msra.mxu1 %v11355_v41  ;;  %v7040_v41 = vld [vmem:[%s14923_s21 + $0x1a8] sm:$0xff]  ;;  %v9022_v42 = vld [vmem:[%s8953_s30] ss:$0 sm:$0xff] }
 0xb52   :  { %v15024_v27 = vadd.f32 %v9327_v44, %v9326_v24  ;;  %11357 = vmatprep.subr.bf16.mxu1 %v12515_v8  ;;  %v7039_v24 = vld [vmem:[%s14923_s21 + $0x1a0] sm:$0xff] }
 0xb53   :  { %11413 = vmatpush1.bf16.msra.mxu0 %v11412_v51  ;;  %v11434_v51 = vpack.c.bf16 %v7042_v6, %v7040_v41  ;;  %v5793_v44 = vld [vmem:[%s14473_s15 + $0x5c0] sm:$0xff]  ;;  %v6275_v41 = vrot.slane %v15094_v33, %v13359_v14 }
 0xb54   :  { %11415 = vmatprep.subr.bf16.mxu0 %v11414_v21  ;;  %v11436_v21 = vpack.c.bf16 %v7041_v37, %v7039_v24 }
 0xb55   :  { %11359 = vmatpush1.bf16.msra.mxu1 %v11358_v35  ;;  %v5794_v35 = vld [vmem:[%s14473_s15 + $0x5c8] sm:$0xff] }
 0xb56   :  { %11360 = vmatprep.subr.bf16.mxu1 %v12515_v8  ;;  %v11376_v52 = vpack.c.bf16 %v5794_v35, %v5793_v44  ;;  %v7057_v44 = vld [vmem:[%s14923_s21 + $0x230] sm:$0xff]  ;;  %v5878_v35 = vadd.f32 %v14964_v22, %v9022_v42  ;;  %v6287_v22 = vrot.slane %v15094_v33, %v14545_v55 }
 0xb57   :  { %11417 = vmatpush1.bf16.msra.mxu0 %v11416_v61  ;;  %v7043_v61 = vld [vmem:[%s14923_s21 + $0x1c0] sm:$0xff] }
 0xb58   :  { %11419 = vmatprep.subr.bf16.mxu0 %v11418_v31  ;;  %v11440_v63 = vpack.c.bf16 %v7045_v10, %v7043_v61  ;;  %v7048_v31 = vld [vmem:[%s14923_s21 + $0x1e8] sm:$0xff]  ;;  %v6283_v10 = vrot.slane %v15094_v33, %v14619_v2 }
 0xb59   :  { %11362 = vmatpush1.bf16.msra.mxu1 %v11361_v18  ;;  %v5796_v18 = vld [vmem:[%s14473_s15 + $0x5d8] sm:$0xf]  ;;  %v11442_v15 = vpack.c.bf16 %v7050_v13, %v7048_v31  ;;  %v7059_v13 = vld [vmem:[%s14923_s21 + $0x240] sm:$0xff]  ;;  %s12527_s15 = smov 19  }
 0xb5a   :  { %11363 = vmatprep.subr.bf16.mxu1 %v12515_v8  ;;  %v11379_v62 = vpack.c.bf16 %v5796_v18, %v5795_v49  ;;  %s8959_s19 = sld [smem:[%s15933_s0 + %s12527_s15]]  }
 0xb5b   :  { %11421 = vmatpush1.bf16.msra.mxu0 %v11420_v4  ;;  %v11444_v4 = vpack.c.bf16 %v7049_v9, %v7047_v25  ;;  %v7064_v25 = vld [vmem:[%s14923_s21 + $0x268] sm:$0xff]  ;;  %v7066_v9 = vld [vmem:[%s14923_s21 + $0x278] sm:$0xff]  ;;  %s8968_s15 = sld [smem:[%s15933_s0 + %s12496_s22]]   ;;  %s12533_s22 = smov 29  }
 0xb5c   :  { %11423 = vmatprep.subr.bf16.mxu0 %v11422_v40  ;;  %v7052_v40 = vld [vmem:[%s14923_s21 + $0x208] sm:$0xff] }
 0xb5d   :  { %11365 = vmatpush1.bf16.msra.mxu1 %v11364_v32  ;;  %v11446_v36 = vpack.c.bf16 %v7054_v12, %v7052_v40  ;;  %v4299_v32 = vrot.slane %v14841_v57, %v13359_v14 }
 0xb5e   :  { %11366 = vmatprep.subr.bf16.mxu1 %v12515_v8 }
 0xb5f   :  { %11425 = vmatpush1.bf16.msra.mxu0 %v11424_v45 }
 0xb60   :  { %11427 = vmatprep.subr.bf16.mxu0 %v11426_v16 }
 0xb61   :  { %11368 = vmatpush1.bf16.msra.mxu1 %v11367_v19 }
 0xb62   :  { %11369 = vmatprep.subr.bf16.mxu1 %v12515_v8 }
 0xb63   :  { %11429 = vmatpush1.bf16.msra.mxu0 %v11428_v23 }
 0xb64   :  { %11431 = vmatprep.subr.bf16.mxu0 %v11430_v53  ;;  %v7056_v53 = vld [vmem:[%s14923_s21 + $0x228] sm:$0xff] }
 0xb65   :  { %11371 = vmatpush1.bf16.msra.mxu1 %v11370_v38  ;;  %v11450_v37 = vpack.c.bf16 %v7058_v29, %v7056_v53  ;;  %v7067_v53 = vld [vmem:[%s14923_s21 + $0x280] sm:$0xff]  ;;  %v7069_v29 = vld [vmem:[%s14923_s21 + $0x290] sm:$0xff] }
 0xb66   :  { %11372 = vmatprep.subr.bf16.mxu1 %v12515_v8 }
 0xb67   :  { %11433 = vmatpush1.bf16.msra.mxu0 %v11432_v59  ;;  %v11448_v59 = vpack.c.bf16 %v7053_v46, %v7051_v30 }
 0xb68   :  { %11435 = vmatprep.subr.bf16.mxu0 %v11434_v51 }
 0xb69   :  { %11374 = vmatpush1.bf16.msra.mxu1 %v11373_v11  ;;  %v7055_v11 = vld [vmem:[%s14923_s21 + $0x220] sm:$0xff] }
 0xb6a   :  { %11375 = vmatprep.subr.bf16.mxu1 %v12515_v8 }
 0xb6b   :  { %11437 = vmatpush1.bf16.msra.mxu0 %v11436_v21 }
 0xb6c   :  { %11439 = vmatprep.subr.bf16.mxu0 %v11438_v54 }
 0xb6d   :  { %11377 = vmatpush1.bf16.msra.mxu1 %v11376_v52  ;;  %v7062_v52 = vld [vmem:[%s14923_s21 + $0x258] sm:$0xff] }
 0xb6e   :  { %11378 = vmatprep.subr.bf16.mxu1 %v12515_v8  ;;  %v11454_v31 = vpack.c.bf16 %v7062_v52, %v7060_v34 }
 0xb6f   :  { %11441 = vmatpush1.bf16.msra.mxu0 %v11440_v63  ;;  %v11452_v63 = vpack.c.bf16 %v7057_v44, %v7055_v11  ;;  %v7071_v11 = vld [vmem:[%s14923_s21 + $0x2a0] sm:$0xff]  ;;  %v7073_v44 = vld [vmem:[%s14923_s21 + $0x2b0] sm:$0xff] }
 0xb70   :  { %11443 = vmatprep.subr.bf16.mxu0 %v11442_v15 }
 0xb71   :  { %11381 = vmatpush1.bf16.msk.msra.mxu1 %vm12631_vm4, %v11379_v62  ;;  %v7061_v62 = vld [vmem:[%s14923_s21 + $0x250] sm:$0xff]  ;;  %vm8477_vm4 = vcmask 523264  }
 0xb73   :  { %11445 = vmatpush1.bf16.msra.mxu0 %v11444_v4 }
 0xb74   :  { %11447 = vmatprep.subr.bf16.mxu0 %v11446_v36  ;;  %v6291_v36 = vrot.slane %v15094_v33, %v14947_v26 }
 0xbcf   :  { %v5592_v20 = vpop.f32.mrb[24].mxu1 }
 0xbd0   :  { %v12155_v43 = vadd.f32 %v5592_v20, %v4299_v32  ;;  %v5594_v7 = vpop.f32.mrb[25].mxu1  ;;  %v11456_v20 = vpack.c.bf16 %v7061_v62, %v7059_v13  ;;  %v7082_v13 = vld [vmem:[%s14923_s21 + $0x2f8] sm:$0xff] }
 0xbd1   :  { %v12156_v45 = vadd.f32 %v5594_v7, %v4303_v56  ;;  %v6295_v56 = vrot.slane %v15094_v33, %v14856_v50  ;;  %v11458_v7 = vpack.c.bf16 %v7066_v9, %v7064_v25 }
 0xbd2   :  { %v5607_v28 = vmax.f32 %v12155_v43, 0.0  ;;  %v15137_v43 = vld [vmem:[%s15088_s26 + $0x8] sm:$0xff]  ;;  %s12529_s26 = smov 21  }
 0xbd3   :  { %v5608_v16 = vmax.f32 %v12156_v45, 0.0  ;;  %v7065_v45 = vld [vmem:[%s14923_s21 + $0x270] sm:$0xff]  ;;  %v6299_v33 = vrot.slane %v15137_v43, %v13266_v58  ;;  %v6303_v30 = vrot.slane %v15137_v43, %v13273_v3  ;;  %v6315_v52 = vrot.slane %v15137_v43, %v14619_v2  ;;  %s8961_s4 = sld [smem:[%s15933_s0 + %s12529_s26]]  }
 0xbd4   :  { %s8970_s26 = sld [smem:[%s15933_s0 + %s12535_s23]]  }
 0xbd5   :  { %9024 = vmatprep.mubr.msk.f32.mxu1 %vm5804_vm2, %v5608_v16 }
 0xbd6   :  { %6226 = vmatmul.mubr.f32.vlgmr.msra.gmra.mrb[30].mxu1 %v5607_v28  ;;  %v7068_v28 = vld [vmem:[%s14923_s21 + $0x288] sm:$0xff] }
 0xbe9   :  { %v9396_v57 = vpop.f32.mrb[46].mxu0 }
 0xbea   :  { %v9397_v5 = vpop.f32.mrb[47].mxu0 }
 0xbeb   :  { %v15096_v19 = vadd.f32 %v9397_v5, %v9396_v57  ;;  %v7070_v57 = vld [vmem:[%s14923_s21 + $0x298] sm:$0xff] }
 0xbed   :  { %v6485_v23 = vpop.f32.mrb[48].mxu0 }
 0xbee   :  { %v6487_v38 = vpop.f32.mrb[49].mxu0  ;;  %v6486_v51 = vadd.f32 %v6485_v23, %v6267_v1  ;;  %v11462_v23 = vpack.c.bf16 %v7070_v57, %v7068_v28  ;;  %v7083_v28 = vld [vmem:[%s14923_s21 + $0x300] sm:$0xff]  ;;  %v7085_v57 = vld [vmem:[%s14923_s21 + $0x310] sm:$0xff] }
 0xbef   :  { %v9291_v6 = vpop.f32.mrb[26].mxu1  ;;  %v6488_v47 = vadd.f32 %v6487_v38, %v6271_v17  ;;  %v7072_v38 = vld [vmem:[%s14923_s21 + $0x2a8] sm:$0xff] }
 0xbf0   :  { %v9292_v24 = vpop.f32.mrb[27].mxu1 }
 0xbf1   :  { %v9293_v21 = vadd.f32 %v9292_v24, %v9291_v6  ;;  %v6556_v48 = vpop.f32.mrb[50].mxu0  ;;  %7575 = vmatprep.mubr.f32.mxu0 %v6488_v47  ;;  %v11464_v24 = vpack.c.bf16 %v7069_v29, %v7067_v53  ;;  %v7087_v29 = vld [vmem:[%s14923_s21 + $0x320] sm:$0xff] }
 0xbf2   :  { %v15115_v54 = vadd.f32 %v6556_v48, %v6275_v41  ;;  %v6558_v61 = vpop.f32.mrb[51].mxu0  ;;  %7576 = vmatmul.mubr.f32.vlgmr.msra.gmra.mrb[64].mxu0 %v6486_v51  ;;  %v7074_v41 = vld [vmem:[%s14923_s21 + $0x2b8] sm:$0xff]  ;;  %v6311_v51 = vrot.slane %v15137_v43, %v14808_v60  ;;  %v6319_v60 = vrot.slane %v15137_v43, %v14545_v55  ;;  %v6327_v55 = vrot.slane %v15137_v43, %v14856_v50 }
 0xbf3   :  { %v5948_v49 = vadd.f32 %v9293_v21, %v5878_v35  ;;  %v6559_v18 = vadd.f32 %v6558_v61, %v6279_v39  ;;  %11449 = vmatpush1.bf16.msra.mxu0 %v11448_v59  ;;  %v6307_v39 = vrot.slane %v15137_v43, %v13359_v14  ;;  %v7076_v21 = vld [vmem:[%s14923_s21 + $0x2c8] sm:$0xff]  ;;  %v7078_v48 = vld [vmem:[%s14923_s21 + $0x2d8] sm:$0xff] }
 0xbf4   :  { %11451 = vmatprep.subr.bf16.mxu0 %v11450_v37  ;;  %v11466_v37 = vpack.c.bf16 %v7074_v41, %v7072_v38  ;;  %v7092_v41 = vld [vmem:[%s14923_s21 + $0x348] sm:$0xff] }
 0xbf5   :  { %v6627_v15 = vpop.f32.mrb[52].mxu0  ;;  %7646 = vmatprep.mubr.f32.mxu0 %v6559_v18  ;;  %v15126_v4 = vadd.f32 %v15024_v27, %v5948_v49  ;;  %v7063_v27 = vld [vmem:[%s14923_s21 + $0x260] sm:$0xff]  ;;  %v11470_v49 = vpack.c.bf16 %v7078_v48, %v7076_v21 }
 0xbf6   :  { %v15128_v40 = vadd.f32 %v6627_v15, %v6283_v10  ;;  %v6629_v12 = vpop.f32.mrb[53].mxu0  ;;  %v11460_v46 = vpack.c.bf16 %v7065_v45, %v7063_v27  ;;  %v11468_v10 = vpack.c.bf16 %v7073_v44, %v7071_v11  ;;  %v7075_v18 = vld [vmem:[%s14923_s21 + $0x2c0] sm:$0xff]  ;;  %v6323_v15 = vrot.slane %v15137_v43, %v14947_v26  ;;  %v7086_v27 = vld [vmem:[%s14923_s21 + $0x318] sm:$0xff]  ;;  %v7093_v11 = vld [vmem:[%s14923_s21 + $0x350] sm:$0xff] }
 0xbf7   :  { %v15132_v32 = vadd.f32 %v6629_v12, %v6287_v22  ;;  %11453 = vmatpush1.bf16.msra.mxu0 %v11452_v63  ;;  %v7077_v22 = vld [vmem:[%s14923_s21 + $0x2d0] sm:$0xff]  ;;  %v7096_v44 = vld [vmem:[%s14923_s21 + $0x368] sm:$0xff] }
 0xbf8   :  { %11455 = vmatprep.subr.bf16.mxu0 %v11454_v31  ;;  %v7080_v31 = vld [vmem:[%s14923_s21 + $0x2e8] sm:$0xff]  ;;  %v11472_v9 = vpack.c.bf16 %v7077_v22, %v7075_v18  ;;  %v7099_v22 = vld [vmem:[%s14923_s21 + $0x380] sm:$0xff] }
 0xbf9   :  { %v6698_v16 = vpop.f32.mrb[54].mxu0  ;;  %v11474_v12 = vpack.c.bf16 %v7082_v13, %v7080_v31  ;;  %v7106_v31 = vld [vmem:[%s14923_s21 + $0x3b8] sm:$0xff] }
 0xbfa   :  { %v15143_v5 = vadd.f32 %v6698_v16, %v6291_v36  ;;  %v6700_v17 = vpop.f32.mrb[55].mxu0  ;;  %v7079_v36 = vld [vmem:[%s14923_s21 + $0x2e0] sm:$0xff] }
 0xbfb   :  { %v15147_v1 = vadd.f32 %v6700_v17, %v6295_v56  ;;  %11457 = vmatpush1.bf16.msra.mxu0 %v11456_v20  ;;  %v7081_v56 = vld [vmem:[%s14923_s21 + $0x2f0] sm:$0xff]  ;;  %v7088_v17 = vld [vmem:[%s14923_s21 + $0x328] sm:$0xff] }
 0xbfc   :  { %11459 = vmatprep.subr.bf16.mxu0 %v11458_v7  ;;  %v7084_v7 = vld [vmem:[%s14923_s21 + $0x308] sm:$0xff]  ;;  %v11476_v50 = vpack.c.bf16 %v7081_v56, %v7079_v36 }
 0xbfd   :  { %v6769_v42 = vpop.f32.mrb[56].mxu0  ;;  %v11478_v43 = vpack.c.bf16 %v7086_v27, %v7084_v7  ;;  %v7109_v7 = vld [vmem:[%s14923_s21 + $0x3d0] sm:$0xff]  ;;  %v7112_v27 = vld [vmem:[%s14923_s21 + $0x3e8] sm:$0xff] }
 0xbfe   :  { %v15155_v6 = vadd.f32 %v6769_v42, %v6299_v33  ;;  %v6771_v47 = vpop.f32.mrb[57].mxu0  ;;  %v7090_v33 = vld [vmem:[%s14923_s21 + $0x338] sm:$0xff]  ;;  %v7089_v42 = vld [vmem:[%s14923_s21 + $0x330] sm:$0xff] }
 0xbff   :  { %v15159_v59 = vadd.f32 %v6771_v47, %v6303_v30  ;;  %11461 = vmatpush1.bf16.msra.mxu0 %v11460_v46  ;;  %v11480_v46 = vpack.c.bf16 %v7085_v57, %v7083_v28  ;;  %v11482_v53 = vpack.c.bf16 %v7090_v33, %v7088_v17  ;;  %v7094_v47 = vld [vmem:[%s14923_s21 + $0x358] sm:$0xff]  ;;  %v7111_v28 = vld [vmem:[%s14923_s21 + $0x3e0] sm:$0xff]  ;;  %v7113_v57 = vld [vmem:[%s14923_s21 + $0x3f0] sm:$0xff] }
 0xc00   :  { %11463 = vmatprep.subr.bf16.mxu0 %v11462_v23  ;;  %v7116_v17 = vld [vmem:[%s14923_s21 + $0x408] sm:$0xff]  ;;  %v7118_v33 = vld [vmem:[%s14923_s21 + $0x418] sm:$0xff] }
 0xc01   :  { %v6840_v35 = vpop.f32.mrb[58].mxu0 }
 0xc02   :  { %v15167_v34 = vadd.f32 %v6840_v35, %v6307_v39  ;;  %v6842_v14 = vpop.f32.mrb[59].mxu0  ;;  %v7098_v35 = vld [vmem:[%s14923_s21 + $0x378] sm:$0xff] }
 0xc03   :  { %v15171_v61 = vadd.f32 %v6842_v14, %v6311_v51  ;;  %11465 = vmatpush1.bf16.msra.mxu0 %v11464_v24  ;;  %v11484_v51 = vpack.c.bf16 %v7089_v42, %v7087_v29  ;;  %v11486_v24 = vpack.c.bf16 %v7094_v47, %v7092_v41  ;;  %v7095_v14 = vld [vmem:[%s14923_s21 + $0x360] sm:$0xff]  ;;  %v7120_v29 = vld [vmem:[%s14923_s21 + $0x428] sm:$0xff]  ;;  %v7122_v42 = vld [vmem:[%s14923_s21 + $0x438] sm:$0xff] }
 0xc04   :  { %11467 = vmatprep.subr.bf16.mxu0 %v11466_v37  ;;  %v7091_v37 = vld [vmem:[%s14923_s21 + $0x340] sm:$0xff]  ;;  %v11514_v41 = vpack.c.bf16 %v7122_v42, %v7120_v29  ;;  %v7152_v29 = vld [vmem:[%s14923_s21 + $0x528] sm:$0xff]  ;;  %v7154_v42 = vld [vmem:[%s14923_s21 + $0x538] sm:$0xff] }
 0xc05   :  { %v6911_v63 = vpop.f32.mrb[60].mxu0  ;;  %v11488_v48 = vpack.c.bf16 %v7093_v11, %v7091_v37  ;;  %v7119_v47 = vld [vmem:[%s14923_s21 + $0x420] sm:$0xff] }
 0xc06   :  { %v15179_v62 = vadd.f32 %v6911_v63, %v6315_v52  ;;  %v6913_v2 = vpop.f32.mrb[61].mxu0  ;;  %v7097_v52 = vld [vmem:[%s14923_s21 + $0x370] sm:$0xff]  ;;  %v7104_v63 = vld [vmem:[%s14923_s21 + $0x3a8] sm:$0xff] }
 0xc07   :  { %v15183_v25 = vadd.f32 %v6913_v2, %v6319_v60  ;;  %11469 = vmatpush1.bf16.msra.mxu0 %v11468_v10  ;;  %v7100_v60 = vld [vmem:[%s14923_s21 + $0x388] sm:$0xff]  ;;  %v7102_v10 = vld [vmem:[%s14923_s21 + $0x398] sm:$0xff]  ;;  %v11498_v2 = vpack.c.bf16 %v7106_v31, %v7104_v63 }
 0xc08   :  { %11471 = vmatprep.subr.bf16.mxu0 %v11470_v49  ;;  %v11492_v49 = vpack.c.bf16 %v7097_v52, %v7095_v14  ;;  %v11494_v18 = vpack.c.bf16 %v7102_v10, %v7100_v60  ;;  %v7127_v52 = vld [vmem:[%s14923_s21 + $0x460] sm:$0xff]  ;;  %v7129_v60 = vld [vmem:[%s14923_s21 + $0x470] sm:$0xff]  ;;  %v7134_v10 = vld [vmem:[%s14923_s21 + $0x498] sm:$0xff] }
 0xc09   :  { %v6982_v20 = vpop.f32.mrb[62].mxu0  ;;  %v7136_v63 = vld [vmem:[%s14923_s21 + $0x4a8] sm:$0xff]  ;;  %v7138_v31 = vld [vmem:[%s14923_s21 + $0x4b8] sm:$0xff] }
 0xc0a   :  { %v15191_v45 = vadd.f32 %v6982_v20, %v6323_v15  ;;  %v6984_v26 = vpop.f32.mrb[63].mxu0  ;;  %v7103_v15 = vld [vmem:[%s14923_s21 + $0x3a0] sm:$0xff] }
 0xc0b   :  { %v15193_v16 = vadd.f32 %v6984_v26, %v6327_v55  ;;  %11473 = vmatpush1.bf16.msra.mxu0 %v11472_v9  ;;  %v7105_v55 = vld [vmem:[%s14923_s21 + $0x3b0] sm:$0xff]  ;;  %v7108_v9 = vld [vmem:[%s14923_s21 + $0x3c8] sm:$0xff]  ;;  %v7107_v20 = vld [vmem:[%s14923_s21 + $0x3c0] sm:$0xff] }
 0xc0c   :  { %11475 = vmatprep.subr.bf16.mxu0 %v11474_v12  ;;  %v7110_v12 = vld [vmem:[%s14923_s21 + $0x3d8] sm:$0xff]  ;;  %v11500_v36 = vpack.c.bf16 %v7105_v55, %v7103_v15  ;;  %v7135_v15 = vld [vmem:[%s14923_s21 + $0x4a0] sm:$0xff]  ;;  %v7137_v55 = vld [vmem:[%s14923_s21 + $0x4b0] sm:$0xff] }
 0xc0d   :  { %v11502_v56 = vpack.c.bf16 %v7110_v12, %v7108_v9  ;;  %v7114_v26 = vld [vmem:[%s14923_s21 + $0x3f8] sm:$0xff]  ;;  %v7140_v9 = vld [vmem:[%s14923_s21 + $0x4c8] sm:$0xff] }
 0xc0e   :  { %v7142_v12 = vld [vmem:[%s14923_s21 + $0x4d8] sm:$0xff] }
 0xc0f   :  { %v9361_v30 = vpop.f32.mrb[28].mxu1  ;;  %11477 = vmatpush1.bf16.msra.mxu0 %v11476_v50  ;;  %v11504_v50 = vpack.c.bf16 %v7109_v7, %v7107_v20  ;;  %v7139_v20 = vld [vmem:[%s14923_s21 + $0x4c0] sm:$0xff]  ;;  %v7141_v7 = vld [vmem:[%s14923_s21 + $0x4d0] sm:$0xff] }
 0xc10   :  { %v9362_v23 = vpop.f32.mrb[29].mxu1  ;;  %11479 = vmatprep.subr.bf16.mxu0 %v11478_v43  ;;  %v11506_v43 = vpack.c.bf16 %v7114_v26, %v7112_v27  ;;  %v7144_v27 = vld [vmem:[%s14923_s21 + $0x4e8] sm:$0xff]  ;;  %v7146_v26 = vld [vmem:[%s14923_s21 + $0x4f8] sm:$0xff] }
 0xc11   :  { %v9363_v38 = vadd.f32 %v9362_v23, %v9361_v30  ;;  %v11508_v30 = vpack.c.bf16 %v7113_v57, %v7111_v28  ;;  %v7115_v23 = vld [vmem:[%s14923_s21 + $0x400] sm:$0xff]  ;;  %v7145_v57 = vld [vmem:[%s14923_s21 + $0x4f0] sm:$0xff] }
 0xc12   :  { %v7143_v28 = vld [vmem:[%s14923_s21 + $0x4e0] sm:$0xff] }
 0xc13   :  { %v6088_v39 = vadd.f32 %v9363_v38, %v15126_v4  ;;  %11481 = vmatpush1.bf16.msra.mxu0 %v11480_v46  ;;  %v11490_v4 = vpack.c.bf16 %v7098_v35, %v7096_v44  ;;  %v11510_v46 = vpack.c.bf16 %v7118_v33, %v7116_v17  ;;  %v7123_v44 = vld [vmem:[%s14923_s21 + $0x440] sm:$0xff]  ;;  %v7125_v35 = vld [vmem:[%s14923_s21 + $0x450] sm:$0xff]  ;;  %v7148_v17 = vld [vmem:[%s14923_s21 + $0x508] sm:$0xff] }
 0xc14   :  { %11483 = vmatprep.subr.bf16.mxu0 %v11482_v53  ;;  %v7117_v53 = vld [vmem:[%s14923_s21 + $0x410] sm:$0xff]  ;;  %v11520_v14 = vpack.c.bf16 %v7125_v35, %v7123_v44  ;;  %v7150_v33 = vld [vmem:[%s14923_s21 + $0x518] sm:$0xff]  ;;  %v7155_v44 = vld [vmem:[%s14923_s21 + $0x540] sm:$0xff] }
 0xc15   :  { %v15209_v21 = vadd.f32 %v15096_v19, %v6088_v39  ;;  %v7101_v19 = vld [vmem:[%s14923_s21 + $0x390] sm:$0xff]  ;;  %v11512_v38 = vpack.c.bf16 %v7117_v53, %v7115_v23  ;;  %v7147_v23 = vld [vmem:[%s14923_s21 + $0x500] sm:$0xff] }
 0xc16   :  { %v11496_v13 = vpack.c.bf16 %v7101_v19, %v7099_v22  ;;  %v7121_v39 = vld [vmem:[%s14923_s21 + $0x430] sm:$0xff]  ;;  %v7131_v22 = vld [vmem:[%s14923_s21 + $0x480] sm:$0xff] }
 0xc17   :  { %11485 = vmatpush1.bf16.msra.mxu0 %v11484_v51  ;;  %v7124_v51 = vld [vmem:[%s14923_s21 + $0x448] sm:$0xff]  ;;  %v11516_v37 = vpack.c.bf16 %v7121_v39, %v7119_v47  ;;  %v7133_v19 = vld [vmem:[%s14923_s21 + $0x490] sm:$0xff]  ;;  %v7151_v47 = vld [vmem:[%s14923_s21 + $0x520] sm:$0xff] }
 0xc18   :  { %11487 = vmatprep.subr.bf16.mxu0 %v11486_v24  ;;  %v7126_v24 = vld [vmem:[%s14923_s21 + $0x458] sm:$0xff]  ;;  %v7149_v53 = vld [vmem:[%s14923_s21 + $0x510] sm:$0xff] }
 0xc19   :  { %v11518_v11 = vpack.c.bf16 %v7126_v24, %v7124_v51  ;;  %v7153_v39 = vld [vmem:[%s14923_s21 + $0x530] sm:$0xff]  ;;  %v7156_v51 = vld [vmem:[%s14923_s21 + $0x548] sm:$0xff]  ;;  %v7158_v24 = vld [vmem:[%s14923_s21 + $0x558] sm:$0xff] }
 0xc1a   :  { %v7157_v35 = vld [vmem:[%s14923_s21 + $0x550] sm:$0xff] }
 0xc1b   :  { %11489 = vmatpush1.bf16.msra.mxu0 %v11488_v48  ;;  %v7128_v48 = vld [vmem:[%s14923_s21 + $0x468] sm:$0xff] }
 0xc1c   :  { %11491 = vmatprep.subr.bf16.mxu0 %v11490_v4  ;;  %v7130_v4 = vld [vmem:[%s14923_s21 + $0x478] sm:$0xff] }
 0xc1f   :  { %11493 = vmatpush1.bf16.msra.mxu0 %v11492_v49  ;;  %v11524_v49 = vpack.c.bf16 %v7129_v60, %v7127_v52  ;;  %v7159_v52 = vld [vmem:[%s14923_s21 + $0x560] sm:$0xff]  ;;  %v7161_v60 = vld [vmem:[%s14923_s21 + $0x570] sm:$0xff] }
 0xc20   :  { %11495 = vmatprep.subr.bf16.mxu0 %v11494_v18 }
 0xc23   :  { %11497 = vmatpush1.bf16.msra.mxu0 %v11496_v13  ;;  %v11528_v13 = vpack.c.bf16 %v7133_v19, %v7131_v22  ;;  %v7163_v22 = vld [vmem:[%s14923_s21 + $0x580] sm:$0xff]  ;;  %v7165_v19 = vld [vmem:[%s14923_s21 + $0x590] sm:$0xff] }
 0xc24   :  { %11499 = vmatprep.subr.bf16.mxu0 %v11498_v2  ;;  %v11530_v2 = vpack.c.bf16 %v7138_v31, %v7136_v63  ;;  %v7168_v63 = vld [vmem:[%s14923_s21 + $0x5a8] sm:$0xff]  ;;  %v7170_v31 = vld [vmem:[%s14923_s21 + $0x5b8] sm:$0xff] }
 0xc27   :  { %11501 = vmatpush1.bf16.msra.mxu0 %v11500_v36  ;;  %v11532_v36 = vpack.c.bf16 %v7137_v55, %v7135_v15  ;;  %v7167_v15 = vld [vmem:[%s14923_s21 + $0x5a0] sm:$0xff]  ;;  %v7169_v55 = vld [vmem:[%s14923_s21 + $0x5b0] sm:$0xff] }
 0xc28   :  { %11503 = vmatprep.subr.bf16.mxu0 %v11502_v56  ;;  %v11534_v56 = vpack.c.bf16 %v7142_v12, %v7140_v9  ;;  %v7172_v9 = vld [vmem:[%s14923_s21 + $0x5c8] sm:$0xff]  ;;  %v7174_v12 = vld [vmem:[%s14923_s21 + $0x5d8] sm:$0xff] }
 0xc2b   :  { %11505 = vmatpush1.bf16.msra.mxu0 %v11504_v50  ;;  %v11536_v50 = vpack.c.bf16 %v7141_v7, %v7139_v20  ;;  %v7171_v20 = vld [vmem:[%s14923_s21 + $0x5c0] sm:$0xff]  ;;  %v7173_v7 = vld [vmem:[%s14923_s21 + $0x5d0] sm:$0xff] }
 0xc2c   :  { %11507 = vmatprep.subr.bf16.mxu0 %v11506_v43  ;;  %v11538_v43 = vpack.c.bf16 %v7146_v26, %v7144_v27  ;;  %v7176_v27 = vld [vmem:[%s14923_s21 + $0x5e8] sm:$0xff]  ;;  %v7178_v26 = vld [vmem:[%s14923_s21 + $0x5f8] sm:$0xff] }
 0xc2f   :  { %11509 = vmatpush1.bf16.msra.mxu0 %v11508_v30  ;;  %v11540_v30 = vpack.c.bf16 %v7145_v57, %v7143_v28  ;;  %v7175_v28 = vld [vmem:[%s14923_s21 + $0x5e0] sm:$0xff]  ;;  %v7177_v57 = vld [vmem:[%s14923_s21 + $0x5f0] sm:$0xff] }
 0xc30   :  { %11511 = vmatprep.subr.bf16.mxu0 %v11510_v46  ;;  %v11542_v46 = vpack.c.bf16 %v7150_v33, %v7148_v17  ;;  %v7180_v17 = vld [vmem:[%s14923_s21 + $0x608] sm:$0xff]  ;;  %v7182_v33 = vld [vmem:[%s14923_s21 + $0x618] sm:$0xff] }
 0xc32   :  { %7647 = vmatmul.mubr.f32.vlgmr.msra.gmra.mrb[64].mxu0 %v15115_v54  ;;  %v11522_v54 = vpack.c.bf16 %v7130_v4, %v7128_v48  ;;  %v7160_v48 = vld [vmem:[%s14923_s21 + $0x568] sm:$0xff]  ;;  %v7162_v4 = vld [vmem:[%s14923_s21 + $0x578] sm:$0xff] }
 0xc33   :  { %11513 = vmatpush1.bf16.msra.mxu0 %v11512_v38  ;;  %7717 = vmatprep.mubr.f32.mxu0 %v15132_v32  ;;  %v7132_v32 = vld [vmem:[%s14923_s21 + $0x488] sm:$0xff]  ;;  %v11544_v38 = vpack.c.bf16 %v7149_v53, %v7147_v23  ;;  %v7179_v23 = vld [vmem:[%s14923_s21 + $0x600] sm:$0xff]  ;;  %v7181_v53 = vld [vmem:[%s14923_s21 + $0x610] sm:$0xff] }
 0xc34   :  { %11515 = vmatprep.subr.bf16.mxu0 %v11514_v41  ;;  %v11526_v18 = vpack.c.bf16 %v7134_v10, %v7132_v32  ;;  %v11546_v41 = vpack.c.bf16 %v7154_v42, %v7152_v29  ;;  %v7164_v32 = vld [vmem:[%s14923_s21 + $0x588] sm:$0xff]  ;;  %v7166_v10 = vld [vmem:[%s14923_s21 + $0x598] sm:$0xff] }
 0xc35   :  { %v7184_v29 = vld [vmem:[%s14923_s21 + $0x628] sm:$0xff]  ;;  %v7186_v42 = vld [vmem:[%s14923_s21 + $0x638] sm:$0xff] }
 0xc37   :  { %11517 = vmatpush1.bf16.msra.mxu0 %v11516_v37  ;;  %v11548_v37 = vpack.c.bf16 %v7153_v39, %v7151_v47  ;;  %v7183_v47 = vld [vmem:[%s14923_s21 + $0x620] sm:$0xff]  ;;  %v7185_v39 = vld [vmem:[%s14923_s21 + $0x630] sm:$0xff] }
 0xc38   :  { %11519 = vmatprep.subr.bf16.mxu0 %v11518_v11  ;;  %v11550_v11 = vpack.c.bf16 %v7158_v24, %v7156_v51  ;;  %v7188_v51 = vld [vmem:[%s14923_s21 + $0x648] sm:$0xff]  ;;  %v7190_v24 = vld [vmem:[%s14923_s21 + $0x658] sm:$0xff] }
 0xc3b   :  { %11521 = vmatpush1.bf16.msra.mxu0 %v11520_v14  ;;  %v11552_v14 = vpack.c.bf16 %v7157_v35, %v7155_v44  ;;  %v7187_v44 = vld [vmem:[%s14923_s21 + $0x640] sm:$0xff]  ;;  %v7189_v35 = vld [vmem:[%s14923_s21 + $0x650] sm:$0xff] }
 0xc3c   :  { %11523 = vmatprep.subr.bf16.mxu0 %v11522_v54  ;;  %v11554_v54 = vpack.c.bf16 %v7162_v4, %v7160_v48  ;;  %v7192_v48 = vld [vmem:[%s14923_s21 + $0x668] sm:$0xff]  ;;  %v7194_v4 = vld [vmem:[%s14923_s21 + $0x678] sm:$0xff] }
 0xc3f   :  { %11525 = vmatpush1.bf16.msra.mxu0 %v11524_v49  ;;  %v11556_v49 = vpack.c.bf16 %v7161_v60, %v7159_v52  ;;  %v7193_v52 = vld [vmem:[%s14923_s21 + $0x670] sm:$0xff]  ;;  %v7198_v60 = vld [vmem:[%s14923_s21 + $0x698] sm:$0xff] }
 0xc40   :  { %11527 = vmatprep.subr.bf16.mxu0 %v11526_v18  ;;  %v11558_v18 = vpack.c.bf16 %v7166_v10, %v7164_v32 }
 0xc43   :  { %11529 = vmatpush1.bf16.msra.mxu0 %v11528_v13  ;;  %v11560_v13 = vpack.c.bf16 %v7165_v19, %v7163_v22  ;;  %v7200_v22 = vld [vmem:[%s14923_s21 + $0x6a8] sm:$0xff]  ;;  %v7202_v19 = vld [vmem:[%s14923_s21 + $0x6b8] sm:$0xff] }
 0xc44   :  { %11531 = vmatprep.subr.bf16.mxu0 %v11530_v2  ;;  %v11562_v2 = vpack.c.bf16 %v7170_v31, %v7168_v63  ;;  %v11594_v31 = vpack.c.bf16 %v7202_v19, %v7200_v22 }
 0xc47   :  { %11533 = vmatpush1.bf16.msra.mxu0 %v11532_v36  ;;  %v11564_v36 = vpack.c.bf16 %v7169_v55, %v7167_v15  ;;  %v7204_v15 = vld [vmem:[%s14923_s21 + $0x6c8] sm:$0xff]  ;;  %v7206_v55 = vld [vmem:[%s14923_s21 + $0x6d8] sm:$0xff] }
 0xc48   :  { %11535 = vmatprep.subr.bf16.mxu0 %v11534_v56  ;;  %v11566_v56 = vpack.c.bf16 %v7174_v12, %v7172_v9  ;;  %v11598_v12 = vpack.c.bf16 %v7206_v55, %v7204_v15 }
 0xc4b   :  { %11537 = vmatpush1.bf16.msra.mxu0 %v11536_v50  ;;  %v11568_v50 = vpack.c.bf16 %v7173_v7, %v7171_v20  ;;  %v7208_v20 = vld [vmem:[%s14923_s21 + $0x6e8] sm:$0xff]  ;;  %v7210_v7 = vld [vmem:[%s14923_s21 + $0x6f8] sm:$0xff] }
 0xc4c   :  { %11539 = vmatprep.subr.bf16.mxu0 %v11538_v43  ;;  %v11570_v43 = vpack.c.bf16 %v7178_v26, %v7176_v27  ;;  %v11602_v26 = vpack.c.bf16 %v7210_v7, %v7208_v20 }
 0xc4f   :  { %11541 = vmatpush1.bf16.msra.mxu0 %v11540_v30  ;;  %v11572_v30 = vpack.c.bf16 %v7177_v57, %v7175_v28  ;;  %v7212_v28 = vld [vmem:[%s14923_s21 + $0x708] sm:$0xff]  ;;  %v7214_v57 = vld [vmem:[%s14923_s21 + $0x718] sm:$0xff] }
 0xc50   :  { %11543 = vmatprep.subr.bf16.mxu0 %v11542_v46  ;;  %v11574_v46 = vpack.c.bf16 %v7182_v33, %v7180_v17  ;;  %v11606_v33 = vpack.c.bf16 %v7214_v57, %v7212_v28  ;;  %v7246_v28 = vld [vmem:[%s14923_s21 + $0x818] sm:$0xff] }
 0xc53   :  { %11545 = vmatpush1.bf16.msra.mxu0 %v11544_v38  ;;  %v11576_v38 = vpack.c.bf16 %v7181_v53, %v7179_v23  ;;  %v7216_v23 = vld [vmem:[%s14923_s21 + $0x728] sm:$0xff]  ;;  %v7218_v53 = vld [vmem:[%s14923_s21 + $0x738] sm:$0xff] }
 0xc54   :  { %11547 = vmatprep.subr.bf16.mxu0 %v11546_v41  ;;  %v11578_v41 = vpack.c.bf16 %v7186_v42, %v7184_v29  ;;  %v11610_v42 = vpack.c.bf16 %v7218_v53, %v7216_v23  ;;  %v7245_v23 = vld [vmem:[%s14923_s21 + $0x810] sm:$0xff]  ;;  %v7248_v53 = vld [vmem:[%s14923_s21 + $0x828] sm:$0xff] }
 0xc57   :  { %11549 = vmatpush1.bf16.msra.mxu0 %v11548_v37  ;;  %v11580_v37 = vpack.c.bf16 %v7185_v39, %v7183_v47  ;;  %v7220_v47 = vld [vmem:[%s14923_s21 + $0x748] sm:$0xff]  ;;  %v7222_v39 = vld [vmem:[%s14923_s21 + $0x758] sm:$0xff] }
 0xc58   :  { %11551 = vmatprep.subr.bf16.mxu0 %v11550_v11  ;;  %v11582_v11 = vpack.c.bf16 %v7190_v24, %v7188_v51  ;;  %v11614_v24 = vpack.c.bf16 %v7222_v39, %v7220_v47  ;;  %v7252_v47 = vld [vmem:[%s14923_s21 + $0x848] sm:$0xff]  ;;  %v7254_v39 = vld [vmem:[%s14923_s21 + $0x858] sm:$0xff] }
 0xc5b   :  { %11553 = vmatpush1.bf16.msra.mxu0 %v11552_v14  ;;  %v11584_v14 = vpack.c.bf16 %v7189_v35, %v7187_v44  ;;  %v7224_v44 = vld [vmem:[%s14923_s21 + $0x768] sm:$0xff]  ;;  %v7226_v35 = vld [vmem:[%s14923_s21 + $0x778] sm:$0xff] }
 0xc5c   :  { %11555 = vmatprep.subr.bf16.mxu0 %v11554_v54  ;;  %v7191_v54 = vld [vmem:[%s14923_s21 + $0x660] sm:$0xff] }
 0xc5d   :  { %v11588_v32 = vpack.c.bf16 %v7193_v52, %v7191_v54  ;;  %v7228_v54 = vld [vmem:[%s14923_s21 + $0x788] sm:$0xff]  ;;  %v7230_v52 = vld [vmem:[%s14923_s21 + $0x798] sm:$0xff] }
 0xc5f   :  { %11557 = vmatpush1.bf16.msra.mxu0 %v11556_v49  ;;  %v7195_v49 = vld [vmem:[%s14923_s21 + $0x680] sm:$0xff] }
 0xc60   :  { %11559 = vmatprep.subr.bf16.mxu0 %v11558_v18  ;;  %v7197_v18 = vld [vmem:[%s14923_s21 + $0x690] sm:$0xff] }
 0xc61   :  { %v11592_v63 = vpack.c.bf16 %v7197_v18, %v7195_v49  ;;  %v7232_v49 = vld [vmem:[%s14923_s21 + $0x7a8] sm:$0xff]  ;;  %v7234_v18 = vld [vmem:[%s14923_s21 + $0x7b8] sm:$0xff] }
 0xc62   :  { %v11626_v19 = vpack.c.bf16 %v7234_v18, %v7232_v49 }
 0xc63   :  { %11561 = vmatpush1.bf16.msra.mxu0 %v11560_v13  ;;  %v7199_v13 = vld [vmem:[%s14923_s21 + $0x6a0] sm:$0xff] }
 0xc64   :  { %11563 = vmatprep.subr.bf16.mxu0 %v11562_v2  ;;  %v7201_v2 = vld [vmem:[%s14923_s21 + $0x6b0] sm:$0xff] }
 0xc65   :  { %v11596_v9 = vpack.c.bf16 %v7201_v2, %v7199_v13  ;;  %v7236_v13 = vld [vmem:[%s14923_s21 + $0x7c8] sm:$0xff]  ;;  %v7238_v2 = vld [vmem:[%s14923_s21 + $0x7d8] sm:$0xff] }
 0xc66   :  { %v11630_v55 = vpack.c.bf16 %v7238_v2, %v7236_v13 }
 0xc67   :  { %11565 = vmatpush1.bf16.msra.mxu0 %v11564_v36  ;;  %v7203_v36 = vld [vmem:[%s14923_s21 + $0x6c0] sm:$0xff] }
 0xc68   :  { %11567 = vmatprep.subr.bf16.mxu0 %v11566_v56  ;;  %v7205_v56 = vld [vmem:[%s14923_s21 + $0x6d0] sm:$0xff] }
 0xc69   :  { %v11600_v27 = vpack.c.bf16 %v7205_v56, %v7203_v36  ;;  %v7240_v36 = vld [vmem:[%s14923_s21 + $0x7e8] sm:$0xff]  ;;  %v7242_v56 = vld [vmem:[%s14923_s21 + $0x7f8] sm:$0xff] }
 0xc6a   :  { %v11634_v7 = vpack.c.bf16 %v7242_v56, %v7240_v36 }
 0xc6b   :  { %11569 = vmatpush1.bf16.msra.mxu0 %v11568_v50  ;;  %v7207_v50 = vld [vmem:[%s14923_s21 + $0x6e0] sm:$0xff] }
 0xc6c   :  { %11571 = vmatprep.subr.bf16.mxu0 %v11570_v43  ;;  %v7209_v43 = vld [vmem:[%s14923_s21 + $0x6f0] sm:$0xff] }
 0xc6d   :  { %v11604_v17 = vpack.c.bf16 %v7209_v43, %v7207_v50  ;;  %v7244_v43 = vld [vmem:[%s14923_s21 + $0x808] sm:$0xff] }
 0xc6f   :  { %11573 = vmatpush1.bf16.msra.mxu0 %v11572_v30  ;;  %v7211_v30 = vld [vmem:[%s14923_s21 + $0x700] sm:$0xff] }
 0xc70   :  { %11575 = vmatprep.subr.bf16.mxu0 %v11574_v46  ;;  %v7213_v46 = vld [vmem:[%s14923_s21 + $0x710] sm:$0xff] }
 0xc71   :  { %v11608_v29 = vpack.c.bf16 %v7213_v46, %v7211_v30  ;;  %v11638_v30 = vpack.c.bf16 %v7246_v28, %v7244_v43  ;;  %v7243_v46 = vld [vmem:[%s14923_s21 + $0x800] sm:$0xff] }
 0xc72   :  { %7718 = vmatmul.mubr.f32.vlgmr.msra.gmra.mrb[64].mxu0 %v15128_v40  ;;  %v11586_v40 = vpack.c.bf16 %v7194_v4, %v7192_v48  ;;  %v11618_v4 = vpack.c.bf16 %v7226_v35, %v7224_v44  ;;  %v7256_v44 = vld [vmem:[%s14923_s21 + $0x868] sm:$0xff]  ;;  %v7258_v35 = vld [vmem:[%s14923_s21 + $0x878] sm:$0xff]  ;;  %v7275_v28 = vld [vmem:[%s14923_s21 + $0x900] sm:$0xff] }
 0xc73   :  { %11577 = vmatpush1.bf16.msra.mxu0 %v11576_v38  ;;  %7788 = vmatprep.mubr.f32.mxu0 %v15147_v1  ;;  %v7196_v1 = vld [vmem:[%s14923_s21 + $0x688] sm:$0xff]  ;;  %v7215_v38 = vld [vmem:[%s14923_s21 + $0x720] sm:$0xff] }
 0xc74   :  { %11579 = vmatprep.subr.bf16.mxu0 %v11578_v41  ;;  %v11590_v10 = vpack.c.bf16 %v7198_v60, %v7196_v1  ;;  %v7217_v41 = vld [vmem:[%s14923_s21 + $0x730] sm:$0xff]  ;;  %v11622_v60 = vpack.c.bf16 %v7230_v52, %v7228_v54 }
 0xc75   :  { %v11612_v51 = vpack.c.bf16 %v7217_v41, %v7215_v38  ;;  %v7247_v38 = vld [vmem:[%s14923_s21 + $0x820] sm:$0xff]  ;;  %v7249_v41 = vld [vmem:[%s14923_s21 + $0x830] sm:$0xff] }
 0xc77   :  { %11581 = vmatpush1.bf16.msra.mxu0 %v11580_v37  ;;  %v7219_v37 = vld [vmem:[%s14923_s21 + $0x740] sm:$0xff] }
 0xc78   :  { %11583 = vmatprep.subr.bf16.mxu0 %v11582_v11  ;;  %v7221_v11 = vld [vmem:[%s14923_s21 + $0x750] sm:$0xff] }
 0xc79   :  { %v11616_v48 = vpack.c.bf16 %v7221_v11, %v7219_v37  ;;  %v7251_v37 = vld [vmem:[%s14923_s21 + $0x840] sm:$0xff]  ;;  %v7253_v11 = vld [vmem:[%s14923_s21 + $0x850] sm:$0xff] }
 0xc7b   :  { %11585 = vmatpush1.bf16.msra.mxu0 %v11584_v14  ;;  %v7223_v14 = vld [vmem:[%s14923_s21 + $0x760] sm:$0xff] }
 0xc7c   :  { %11587 = vmatprep.subr.bf16.mxu0 %v11586_v40  ;;  %v7225_v40 = vld [vmem:[%s14923_s21 + $0x770] sm:$0xff] }
 0xc7d   :  { %v11620_v1 = vpack.c.bf16 %v7225_v40, %v7223_v14  ;;  %v7257_v14 = vld [vmem:[%s14923_s21 + $0x870] sm:$0xff]  ;;  %v7262_v40 = vld [vmem:[%s14923_s21 + $0x898] sm:$0xff] }
 0xc7f   :  { %11589 = vmatpush1.bf16.msra.mxu0 %v11588_v32  ;;  %v7227_v32 = vld [vmem:[%s14923_s21 + $0x780] sm:$0xff] }
 0xc80   :  { %11591 = vmatprep.subr.bf16.mxu0 %v11590_v10  ;;  %v7229_v10 = vld [vmem:[%s14923_s21 + $0x790] sm:$0xff] }
 0xc81   :  { %v11624_v22 = vpack.c.bf16 %v7229_v10, %v7227_v32  ;;  %v7264_v32 = vld [vmem:[%s14923_s21 + $0x8a8] sm:$0xff]  ;;  %v7266_v10 = vld [vmem:[%s14923_s21 + $0x8b8] sm:$0xff] }
 0xc82   :  { %v11658_v18 = vpack.c.bf16 %v7266_v10, %v7264_v32  ;;  %v7295_v32 = vld [vmem:[%s14923_s21 + $0x9a0] sm:$0xff]  ;;  %v7297_v10 = vld [vmem:[%s14923_s21 + $0x9b0] sm:$0xff] }
 0xc83   :  { %11593 = vmatpush1.bf16.msra.mxu0 %v11592_v63  ;;  %v7231_v63 = vld [vmem:[%s14923_s21 + $0x7a0] sm:$0xff] }
 0xc84   :  { %11595 = vmatprep.subr.bf16.mxu0 %v11594_v31  ;;  %v7233_v31 = vld [vmem:[%s14923_s21 + $0x7b0] sm:$0xff] }
 0xc85   :  { %v11628_v15 = vpack.c.bf16 %v7233_v31, %v7231_v63  ;;  %v7268_v63 = vld [vmem:[%s14923_s21 + $0x8c8] sm:$0xff]  ;;  %v7270_v31 = vld [vmem:[%s14923_s21 + $0x8d8] sm:$0xff] }
 0xc86   :  { %v11662_v2 = vpack.c.bf16 %v7270_v31, %v7268_v63  ;;  %v7299_v63 = vld [vmem:[%s14923_s21 + $0x9c0] sm:$0xff]  ;;  %v7301_v31 = vld [vmem:[%s14923_s21 + $0x9d0] sm:$0xff] }
 0xc87   :  { %11597 = vmatpush1.bf16.msra.mxu0 %v11596_v9  ;;  %v7235_v9 = vld [vmem:[%s14923_s21 + $0x7c0] sm:$0xff] }
 0xc88   :  { %11599 = vmatprep.subr.bf16.mxu0 %v11598_v12  ;;  %v7237_v12 = vld [vmem:[%s14923_s21 + $0x7d0] sm:$0xff] }
 0xc89   :  { %v11632_v20 = vpack.c.bf16 %v7237_v12, %v7235_v9  ;;  %v7272_v9 = vld [vmem:[%s14923_s21 + $0x8e8] sm:$0xff]  ;;  %v7274_v12 = vld [vmem:[%s14923_s21 + $0x8f8] sm:$0xff] }
 0xc8a   :  { %v11666_v56 = vpack.c.bf16 %v7274_v12, %v7272_v9  ;;  %v7303_v9 = vld [vmem:[%s14923_s21 + $0x9e0] sm:$0xff]  ;;  %v7305_v12 = vld [vmem:[%s14923_s21 + $0x9f0] sm:$0xff] }
 0xc8b   :  { %11601 = vmatpush1.bf16.msra.mxu0 %v11600_v27  ;;  %v7239_v27 = vld [vmem:[%s14923_s21 + $0x7e0] sm:$0xff] }
 0xc8c   :  { %11603 = vmatprep.subr.bf16.mxu0 %v11602_v26  ;;  %v7241_v26 = vld [vmem:[%s14923_s21 + $0x7f0] sm:$0xff] }
 0xc8f   :  { %11605 = vmatpush1.bf16.msra.mxu0 %v11604_v17 }
 0xc90   :  { %11607 = vmatprep.subr.bf16.mxu0 %v11606_v33  ;;  %v11636_v33 = vpack.c.bf16 %v7241_v26, %v7239_v27  ;;  %v7276_v27 = vld [vmem:[%s14923_s21 + $0x908] sm:$0xff]  ;;  %v7278_v26 = vld [vmem:[%s14923_s21 + $0x918] sm:$0xff] }
 0xc91   :  { %v11670_v43 = vpack.c.bf16 %v7278_v26, %v7276_v27  ;;  %v7307_v27 = vld [vmem:[%s14923_s21 + $0xa00] sm:$0xff]  ;;  %v7309_v26 = vld [vmem:[%s14923_s21 + $0xa10] sm:$0xff] }
 0xc93   :  { %11609 = vmatpush1.bf16.msra.mxu0 %v11608_v29  ;;  %v7250_v29 = vld [vmem:[%s14923_s21 + $0x838] sm:$0xff] }
 0xc94   :  { %11611 = vmatprep.subr.bf16.mxu0 %v11610_v42  ;;  %v11640_v42 = vpack.c.bf16 %v7245_v23, %v7243_v46 }
 0xc97   :  { %11613 = vmatpush1.bf16.msra.mxu0 %v11612_v51  ;;  %v11644_v51 = vpack.c.bf16 %v7249_v41, %v7247_v38 }
 0xc98   :  { %11615 = vmatprep.subr.bf16.mxu0 %v11614_v24  ;;  %v11646_v24 = vpack.c.bf16 %v7254_v39, %v7252_v47  ;;  %v7283_v47 = vld [vmem:[%s14923_s21 + $0x940] sm:$0xff]  ;;  %v7285_v39 = vld [vmem:[%s14923_s21 + $0x950] sm:$0xff] }
 0xc9b   :  { %11617 = vmatpush1.bf16.msra.mxu0 %v11616_v48  ;;  %v11648_v48 = vpack.c.bf16 %v7253_v11, %v7251_v37  ;;  %v11680_v37 = vpack.c.bf16 %v7285_v39, %v7283_v47  ;;  %v7319_v39 = vld [vmem:[%s14923_s21 + $0xa60] sm:$0xff] }
 0xc9c   :  { %11619 = vmatprep.subr.bf16.mxu0 %v11618_v4  ;;  %v7255_v4 = vld [vmem:[%s14923_s21 + $0x860] sm:$0xff] }
 0xc9d   :  { %v11652_v54 = vpack.c.bf16 %v7257_v14, %v7255_v4 }
 0xc9f   :  { %11621 = vmatpush1.bf16.msra.mxu0 %v11620_v1  ;;  %v7259_v1 = vld [vmem:[%s14923_s21 + $0x880] sm:$0xff] }
 0xca0   :  { %11623 = vmatprep.subr.bf16.mxu0 %v11622_v60  ;;  %v7261_v60 = vld [vmem:[%s14923_s21 + $0x890] sm:$0xff] }
 0xca1   :  { %v11656_v49 = vpack.c.bf16 %v7261_v60, %v7259_v1 }
 0xca3   :  { %11625 = vmatpush1.bf16.msra.mxu0 %v11624_v22  ;;  %v7263_v22 = vld [vmem:[%s14923_s21 + $0x8a0] sm:$0xff] }
 0xca4   :  { %11627 = vmatprep.subr.bf16.mxu0 %v11626_v19  ;;  %v7265_v19 = vld [vmem:[%s14923_s21 + $0x8b0] sm:$0xff] }
 0xca5   :  { %v11660_v13 = vpack.c.bf16 %v7265_v19, %v7263_v22  ;;  %v11692_v22 = vpack.c.bf16 %v7297_v10, %v7295_v32  ;;  %v7331_v32 = vld [vmem:[%s14923_s21 + $0xac0] sm:$0xff]  ;;  %v7333_v10 = vld [vmem:[%s14923_s21 + $0xad0] sm:$0xff] }
 0xca7   :  { %11629 = vmatpush1.bf16.msra.mxu0 %v11628_v15  ;;  %v7267_v15 = vld [vmem:[%s14923_s21 + $0x8c0] sm:$0xff] }
 0xca8   :  { %11631 = vmatprep.subr.bf16.mxu0 %v11630_v55  ;;  %v7269_v55 = vld [vmem:[%s14923_s21 + $0x8d0] sm:$0xff] }
 0xca9   :  { %v6227_v50 = vpop.f32.mrb[30].mxu1  ;;  %v11664_v36 = vpack.c.bf16 %v7269_v55, %v7267_v15  ;;  %v11696_v15 = vpack.c.bf16 %v7301_v31, %v7299_v63  ;;  %v7335_v63 = vld [vmem:[%s14923_s21 + $0xae0] sm:$0xff]  ;;  %v7337_v31 = vld [vmem:[%s14923_s21 + $0xaf0] sm:$0xff] }
 0xcaa   :  { %v15364_v57 = vadd.f32 %v6227_v50, %v15209_v21  ;;  %v6229_v17 = vpop.f32.mrb[31].mxu1  ;;  %v11642_v21 = vpack.c.bf16 %v7250_v29, %v7248_v53  ;;  %v7279_v53 = vld [vmem:[%s14923_s21 + $0x920] sm:$0xff]  ;;  %v7281_v29 = vld [vmem:[%s14923_s21 + $0x930] sm:$0xff] }
 0xcab   :  { %11633 = vmatpush1.bf16.msra.mxu0 %v11632_v20  ;;  %v7271_v20 = vld [vmem:[%s14923_s21 + $0x8e0] sm:$0xff]  ;;  %v7277_v17 = vld [vmem:[%s14923_s21 + $0x910] sm:$0xff]  ;;  %v11676_v38 = vpack.c.bf16 %v7281_v29, %v7279_v53 }
 0xcac   :  { %11635 = vmatprep.subr.bf16.mxu0 %v11634_v7  ;;  %v7273_v7 = vld [vmem:[%s14923_s21 + $0x8f0] sm:$0xff]  ;;  %v11672_v46 = vpack.c.bf16 %v7277_v17, %v7275_v28  ;;  %v11704_v28 = vpack.c.bf16 %v7309_v26, %v7307_v27  ;;  %v7343_v27 = vld [vmem:[%s14923_s21 + $0xb20] sm:$0xff] }
 0xcad   :  { %v11668_v50 = vpack.c.bf16 %v7273_v7, %v7271_v20  ;;  %v11700_v20 = vpack.c.bf16 %v7305_v12, %v7303_v9  ;;  %v7339_v9 = vld [vmem:[%s14923_s21 + $0xb00] sm:$0xff]  ;;  %v7341_v12 = vld [vmem:[%s14923_s21 + $0xb10] sm:$0xff] }
 0xcae   :  { %v7345_v26 = vld [vmem:[%s14923_s21 + $0xb30] sm:$0xff] }
 0xcaf   :  { %11637 = vmatpush1.bf16.msra.mxu0 %v11636_v33  ;;  %v7280_v33 = vld [vmem:[%s14923_s21 + $0x928] sm:$0xff] }
 0xcb0   :  { %11639 = vmatprep.subr.bf16.mxu0 %v11638_v30  ;;  %v7282_v30 = vld [vmem:[%s14923_s21 + $0x938] sm:$0xff] }
 0xcb1   :  { %v11674_v23 = vpack.c.bf16 %v7282_v30, %v7280_v33  ;;  %v7311_v33 = vld [vmem:[%s14923_s21 + $0xa20] sm:$0xff]  ;;  %v7313_v30 = vld [vmem:[%s14923_s21 + $0xa30] sm:$0xff] }
 0xcb2   :  { %7789 = vmatmul.mubr.f32.vlgmr.msra.gmra.mrb[64].mxu0 %v15143_v5  ;;  %v11650_v5 = vpack.c.bf16 %v7258_v35, %v7256_v44  ;;  %v7287_v44 = vld [vmem:[%s14923_s21 + $0x960] sm:$0xff]  ;;  %v7289_v35 = vld [vmem:[%s14923_s21 + $0x970] sm:$0xff]  ;;  %v11708_v53 = vpack.c.bf16 %v7313_v30, %v7311_v33 }
 0xcb3   :  { %11641 = vmatpush1.bf16.msra.mxu0 %v11640_v42  ;;  %7859 = vmatprep.mubr.f32.mxu0 %v15159_v59  ;;  %v7260_v59 = vld [vmem:[%s14923_s21 + $0x888] sm:$0xff]  ;;  %v11684_v4 = vpack.c.bf16 %v7289_v35, %v7287_v44  ;;  %v7323_v44 = vld [vmem:[%s14923_s21 + $0xa80] sm:$0xff]  ;;  %v7325_v35 = vld [vmem:[%s14923_s21 + $0xa90] sm:$0xff] }
 0xcb4   :  { %11643 = vmatprep.subr.bf16.mxu0 %v11642_v21  ;;  %v11654_v52 = vpack.c.bf16 %v7262_v40, %v7260_v59  ;;  %v7284_v42 = vld [vmem:[%s14923_s21 + $0x948] sm:$0xff]  ;;  %v7286_v21 = vld [vmem:[%s14923_s21 + $0x958] sm:$0xff]  ;;  %v7291_v59 = vld [vmem:[%s14923_s21 + $0x980] sm:$0xff] }
 0xcb5   :  { %v11678_v41 = vpack.c.bf16 %v7286_v21, %v7284_v42  ;;  %v7293_v40 = vld [vmem:[%s14923_s21 + $0x990] sm:$0xff]  ;;  %v7315_v42 = vld [vmem:[%s14923_s21 + $0xa40] sm:$0xff] }
 0xcb6   :  { %v11688_v1 = vpack.c.bf16 %v7293_v40, %v7291_v59  ;;  %v7317_v21 = vld [vmem:[%s14923_s21 + $0xa50] sm:$0xff]  ;;  %v7327_v59 = vld [vmem:[%s14923_s21 + $0xaa0] sm:$0xff] }
 0xcb7   :  { %11645 = vmatpush1.bf16.msra.mxu0 %v11644_v51  ;;  %v7288_v51 = vld [vmem:[%s14923_s21 + $0x968] sm:$0xff]  ;;  %v11712_v47 = vpack.c.bf16 %v7317_v21, %v7315_v42  ;;  %v7329_v40 = vld [vmem:[%s14923_s21 + $0xab0] sm:$0xff]  ;;  %v7347_v33 = vld [vmem:[%s14923_s21 + $0xb40] sm:$0xff] }
 0xcb8   :  { %11647 = vmatprep.subr.bf16.mxu0 %v11646_v24  ;;  %v7290_v24 = vld [vmem:[%s14923_s21 + $0x978] sm:$0xff]  ;;  %v7349_v30 = vld [vmem:[%s14923_s21 + $0xb50] sm:$0xff]  ;;  %v7351_v42 = vld [vmem:[%s14923_s21 + $0xb60] sm:$0xff] }
 0xcb9   :  { %v11682_v11 = vpack.c.bf16 %v7290_v24, %v7288_v51  ;;  %v7321_v51 = vld [vmem:[%s14923_s21 + $0xa70] sm:$0xff]  ;;  %v7326_v24 = vld [vmem:[%s14923_s21 + $0xa98] sm:$0xff] }
 0xcba   :  { %v7353_v21 = vld [vmem:[%s14923_s21 + $0xb70] sm:$0xff] }
 0xcbb   :  { %11649 = vmatpush1.bf16.msra.mxu0 %v11648_v48  ;;  %v7292_v48 = vld [vmem:[%s14923_s21 + $0x988] sm:$0xff] }
 0xcbc   :  { %11651 = vmatprep.subr.bf16.mxu0 %v11650_v5  ;;  %v7294_v5 = vld [vmem:[%s14923_s21 + $0x998] sm:$0xff] }
 0xcbd   :  { %v11686_v14 = vpack.c.bf16 %v7294_v5, %v7292_v48  ;;  %v7328_v48 = vld [vmem:[%s14923_s21 + $0xaa8] sm:$0xff]  ;;  %v7330_v5 = vld [vmem:[%s14923_s21 + $0xab8] sm:$0xff] }
 0xcbf   :  { %11653 = vmatpush1.bf16.msra.mxu0 %v11652_v54  ;;  %v7296_v54 = vld [vmem:[%s14923_s21 + $0x9a8] sm:$0xff] }
 0xcc0   :  { %11655 = vmatprep.subr.bf16.mxu0 %v11654_v52  ;;  %v7298_v52 = vld [vmem:[%s14923_s21 + $0x9b8] sm:$0xff] }
 0xcc1   :  { %v11690_v60 = vpack.c.bf16 %v7298_v52, %v7296_v54  ;;  %v7332_v54 = vld [vmem:[%s14923_s21 + $0xac8] sm:$0xff]  ;;  %v7334_v52 = vld [vmem:[%s14923_s21 + $0xad8] sm:$0xff] }
 0xcc3   :  { %11657 = vmatpush1.bf16.msra.mxu0 %v11656_v49  ;;  %v7300_v49 = vld [vmem:[%s14923_s21 + $0x9c8] sm:$0xff] }
 0xcc4   :  { %11659 = vmatprep.subr.bf16.mxu0 %v11658_v18  ;;  %v7302_v18 = vld [vmem:[%s14923_s21 + $0x9d8] sm:$0xff] }
 0xcc5   :  { %v11694_v19 = vpack.c.bf16 %v7302_v18, %v7300_v49  ;;  %v7336_v49 = vld [vmem:[%s14923_s21 + $0xae8] sm:$0xff]  ;;  %v7338_v18 = vld [vmem:[%s14923_s21 + $0xaf8] sm:$0xff] }
 0xcc7   :  { %11661 = vmatpush1.bf16.msra.mxu0 %v11660_v13  ;;  %v7304_v13 = vld [vmem:[%s14923_s21 + $0x9e8] sm:$0xff] }
 0xcc8   :  { %11663 = vmatprep.subr.bf16.mxu0 %v11662_v2  ;;  %v7306_v2 = vld [vmem:[%s14923_s21 + $0x9f8] sm:$0xff] }
 0xcc9   :  { %v11698_v55 = vpack.c.bf16 %v7306_v2, %v7304_v13  ;;  %v7340_v13 = vld [vmem:[%s14923_s21 + $0xb08] sm:$0xff]  ;;  %v7342_v2 = vld [vmem:[%s14923_s21 + $0xb18] sm:$0xff] }
 0xccb   :  { %11665 = vmatpush1.bf16.msra.mxu0 %v11664_v36  ;;  %v7308_v36 = vld [vmem:[%s14923_s21 + $0xa08] sm:$0xff] }
 0xccc   :  { %11667 = vmatprep.subr.bf16.mxu0 %v11666_v56  ;;  %v7310_v56 = vld [vmem:[%s14923_s21 + $0xa18] sm:$0xff] }
 0xccd   :  { %v11702_v7 = vpack.c.bf16 %v7310_v56, %v7308_v36  ;;  %v7344_v36 = vld [vmem:[%s14923_s21 + $0xb28] sm:$0xff]  ;;  %v7346_v56 = vld [vmem:[%s14923_s21 + $0xb38] sm:$0xff] }
 0xccf   :  { %11669 = vmatpush1.bf16.msra.mxu0 %v11668_v50  ;;  %v7312_v50 = vld [vmem:[%s14923_s21 + $0xa28] sm:$0xff] }
 0xcd0   :  { %11671 = vmatprep.subr.bf16.mxu0 %v11670_v43  ;;  %v7314_v43 = vld [vmem:[%s14923_s21 + $0xa38] sm:$0xff] }
 0xcd1   :  { %v11706_v17 = vpack.c.bf16 %v7314_v43, %v7312_v50  ;;  %v7348_v50 = vld [vmem:[%s14923_s21 + $0xb48] sm:$0xff]  ;;  %v7350_v43 = vld [vmem:[%s14923_s21 + $0xb58] sm:$0xff] }
 0xcd3   :  { %11673 = vmatpush1.bf16.msra.mxu0 %v11672_v46  ;;  %v7316_v46 = vld [vmem:[%s14923_s21 + $0xa48] sm:$0xff] }
 0xcd4   :  { %11675 = vmatprep.subr.bf16.mxu0 %v11674_v23  ;;  %v7318_v23 = vld [vmem:[%s14923_s21 + $0xa58] sm:$0xff] }
 0xcd5   :  { %v11710_v29 = vpack.c.bf16 %v7318_v23, %v7316_v46  ;;  %v7352_v46 = vld [vmem:[%s14923_s21 + $0xb68] sm:$0xff]  ;;  %v7354_v23 = vld [vmem:[%s14923_s21 + $0xb78] sm:$0xff] }
 0xcd7   :  { %11677 = vmatpush1.bf16.msra.mxu0 %v11676_v38  ;;  %v7320_v38 = vld [vmem:[%s14923_s21 + $0xa68] sm:$0xff] }
 0xcd8   :  { %11679 = vmatprep.subr.bf16.mxu0 %v11678_v41  ;;  %v7322_v41 = vld [vmem:[%s14923_s21 + $0xa78] sm:$0xff] }
 0xcdb   :  { %11681 = vmatpush1.bf16.msra.mxu0 %v11680_v37  ;;  %v11716_v37 = vpack.c.bf16 %v7321_v51, %v7319_v39  ;;  %v7355_v39 = vld [vmem:[%s14923_s21 + $0xb80] sm:$0xff]  ;;  %v7357_v51 = vld [vmem:[%s14923_s21 + $0xb90] sm:$0xff] }
 0xcdc   :  { %11683 = vmatprep.subr.bf16.mxu0 %v11682_v11 }
 0xcdf   :  { %11685 = vmatpush1.bf16.msra.mxu0 %v11684_v4  ;;  %v11720_v4 = vpack.c.bf16 %v7325_v35, %v7323_v44  ;;  %v7359_v44 = vld [vmem:[%s14923_s21 + $0xba0] sm:$0xff]  ;;  %v7361_v35 = vld [vmem:[%s14923_s21 + $0xbb0] sm:$0xff] }
 0xce0   :  { %11687 = vmatprep.subr.bf16.mxu0 %v11686_v14  ;;  %v11722_v14 = vpack.c.bf16 %v7330_v5, %v7328_v48  ;;  %v7364_v48 = vld [vmem:[%s14923_s21 + $0xbc8] sm:$0xff]  ;;  %v7366_v5 = vld [vmem:[%s14923_s21 + $0xbd8] sm:$0xff] }
 0xce3   :  { %11689 = vmatpush1.bf16.msra.mxu0 %v11688_v1  ;;  %v11724_v1 = vpack.c.bf16 %v7329_v40, %v7327_v59  ;;  %v7363_v59 = vld [vmem:[%s14923_s21 + $0xbc0] sm:$0xff]  ;;  %v7365_v40 = vld [vmem:[%s14923_s21 + $0xbd0] sm:$0xff] }
 0xce4   :  { %11691 = vmatprep.subr.bf16.mxu0 %v11690_v60  ;;  %v11726_v60 = vpack.c.bf16 %v7334_v52, %v7332_v54  ;;  %v7368_v54 = vld [vmem:[%s14923_s21 + $0xbe8] sm:$0xff]  ;;  %v7370_v52 = vld [vmem:[%s14923_s21 + $0xbf8] sm:$0xff] }
 0xce7   :  { %11693 = vmatpush1.bf16.msra.mxu0 %v11692_v22  ;;  %v11728_v22 = vpack.c.bf16 %v7333_v10, %v7331_v32  ;;  %v7367_v32 = vld [vmem:[%s14923_s21 + $0xbe0] sm:$0xff]  ;;  %v7369_v10 = vld [vmem:[%s14923_s21 + $0xbf0] sm:$0xff] }
 0xce8   :  { %11695 = vmatprep.subr.bf16.mxu0 %v11694_v19  ;;  %v11730_v19 = vpack.c.bf16 %v7338_v18, %v7336_v49  ;;  %v7372_v49 = vld [vmem:[%s14923_s21 + $0xc08] sm:$0xff]  ;;  %v7374_v18 = vld [vmem:[%s14923_s21 + $0xc18] sm:$0xff] }
 0xceb   :  { %11697 = vmatpush1.bf16.msra.mxu0 %v11696_v15  ;;  %v11732_v15 = vpack.c.bf16 %v7337_v31, %v7335_v63  ;;  %v7371_v63 = vld [vmem:[%s14923_s21 + $0xc00] sm:$0xff]  ;;  %v7373_v31 = vld [vmem:[%s14923_s21 + $0xc10] sm:$0xff] }
 0xcec   :  { %11699 = vmatprep.subr.bf16.mxu0 %v11698_v55  ;;  %v11734_v55 = vpack.c.bf16 %v7342_v2, %v7340_v13  ;;  %v7376_v13 = vld [vmem:[%s14923_s21 + $0xc28] sm:$0xff]  ;;  %v7378_v2 = vld [vmem:[%s14923_s21 + $0xc38] sm:$0xff] }
 0xcef   :  { %11701 = vmatpush1.bf16.msra.mxu0 %v11700_v20  ;;  %v11736_v20 = vpack.c.bf16 %v7341_v12, %v7339_v9  ;;  %v7375_v9 = vld [vmem:[%s14923_s21 + $0xc20] sm:$0xff]  ;;  %v7377_v12 = vld [vmem:[%s14923_s21 + $0xc30] sm:$0xff] }
 0xcf0   :  { %11703 = vmatprep.subr.bf16.mxu0 %v11702_v7  ;;  %v11738_v7 = vpack.c.bf16 %v7346_v56, %v7344_v36  ;;  %v7380_v36 = vld [vmem:[%s14923_s21 + $0xc48] sm:$0xff]  ;;  %v7382_v56 = vld [vmem:[%s14923_s21 + $0xc58] sm:$0xff] }
 0xcf2   :  { %7860 = vmatmul.mubr.f32.vlgmr.msra.gmra.mrb[64].mxu0 %v15155_v6  ;;  %v11714_v6 = vpack.c.bf16 %v7322_v41, %v7320_v38  ;;  %v7356_v38 = vld [vmem:[%s14923_s21 + $0xb88] sm:$0xff]  ;;  %v7358_v41 = vld [vmem:[%s14923_s21 + $0xb98] sm:$0xff] }
 0xcf3   :  { %11705 = vmatpush1.bf16.msra.mxu0 %v11704_v28  ;;  %7930 = vmatprep.mubr.f32.mxu0 %v15171_v61  ;;  %v7324_v61 = vld [vmem:[%s14923_s21 + $0xa88] sm:$0xff]  ;;  %v11740_v28 = vpack.c.bf16 %v7345_v26, %v7343_v27  ;;  %v7379_v27 = vld [vmem:[%s14923_s21 + $0xc40] sm:$0xff] }
 0xcf4   :  { %11707 = vmatprep.subr.bf16.mxu0 %v11706_v17  ;;  %v11718_v11 = vpack.c.bf16 %v7326_v24, %v7324_v61  ;;  %v11742_v17 = vpack.c.bf16 %v7350_v43, %v7348_v50  ;;  %v7360_v61 = vld [vmem:[%s14923_s21 + $0xba8] sm:$0xff]  ;;  %v7362_v24 = vld [vmem:[%s14923_s21 + $0xbb8] sm:$0xff]  ;;  %v7383_v43 = vld [vmem:[%s14923_s21 + $0xc60] sm:$0xff] }
 0xcf5   :  { %v7384_v26 = vld [vmem:[%s14923_s21 + $0xc68] sm:$0xff] }
 0xcf7   :  { %11709 = vmatpush1.bf16.msra.mxu0 %v11708_v53  ;;  %v11744_v53 = vpack.c.bf16 %v7349_v30, %v7347_v33  ;;  %v7388_v33 = vld [vmem:[%s14923_s21 + $0xc88] sm:$0xff]  ;;  %v7390_v30 = vld [vmem:[%s14923_s21 + $0xc98] sm:$0xff] }
 0xcf8   :  { %11711 = vmatprep.subr.bf16.mxu0 %v11710_v29  ;;  %v11746_v29 = vpack.c.bf16 %v7354_v23, %v7352_v46  ;;  %v8097_v46 = vld [vmem:[%s15511_s5 + $0x80] sm:$0xff]  ;;  %v8098_v23 = vld [vmem:[%s15511_s5 + $0x88] sm:$0xff] }
 0xcfb   :  { %11713 = vmatpush1.bf16.msra.mxu0 %v11712_v47  ;;  %v11748_v47 = vpack.c.bf16 %v7353_v21, %v7351_v42  ;;  %v8082_v42 = vld [vmem:[%s15511_s5 + $0x8] sm:$0xff]  ;;  %v8099_v21 = vld [vmem:[%s15511_s5 + $0x90] sm:$0xff] }
 0xcfc   :  { %11715 = vmatprep.subr.bf16.mxu0 %v11714_v6  ;;  %v11750_v6 = vpack.c.bf16 %v7358_v41, %v7356_v38  ;;  %v8100_v38 = vld [vmem:[%s15511_s5 + $0x98] sm:$0xff] }
 0xcff   :  { %11717 = vmatpush1.bf16.msra.mxu0 %v11716_v37  ;;  %v11752_v37 = vpack.c.bf16 %v7357_v51, %v7355_v39  ;;  %v8083_v39 = vld [vmem:[%s15511_s5 + $0x10] sm:$0xff]  ;;  %v8084_v51 = vld [vmem:[%s15511_s5 + $0x18] sm:$0xff] }
 0xd00   :  { %11719 = vmatprep.subr.bf16.mxu0 %v11718_v11  ;;  %v11754_v11 = vpack.c.bf16 %v7362_v24, %v7360_v61  ;;  %v8101_v61 = vld [vmem:[%s15511_s5 + $0xa0] sm:$0xff]  ;;  %v11782_v24 = vpack.c.bf16 %v7390_v30, %v7388_v33  ;;  %v7406_v33 = vld [vmem:[%s14923_s21 + $0xd18] sm:$0xff] }
 0xd03   :  { %11721 = vmatpush1.bf16.msra.mxu0 %v11720_v4  ;;  %v11756_v4 = vpack.c.bf16 %v7361_v35, %v7359_v44  ;;  %v8102_v44 = vld [vmem:[%s15511_s5 + $0xa8] sm:$0xff] }
 0xd04   :  { %11723 = vmatprep.subr.bf16.mxu0 %v11722_v14  ;;  %v11758_v14 = vpack.c.bf16 %v7366_v5, %v7364_v48  ;;  %v7392_v35 = vld [vmem:[%s14923_s21 + $0xca8] sm:$0xff]  ;;  %v7394_v48 = vld [vmem:[%s14923_s21 + $0xcb8] sm:$0xff]  ;;  %v11900_v5 = vpack.c.bf16 %v8084_v51, %v8083_v39 }
 0xd05   :  { %v7410_v39 = vld [vmem:[%s14923_s21 + $0xd38] sm:$0xff] }
 0xd07   :  { %11725 = vmatpush1.bf16.msra.mxu0 %v11724_v1  ;;  %v11760_v1 = vpack.c.bf16 %v7365_v40, %v7363_v59  ;;  %v8086_v59 = vld [vmem:[%s15511_s5 + $0x28] sm:$0xff] }
 0xd08   :  { %11727 = vmatprep.subr.bf16.mxu0 %v11726_v60  ;;  %v11762_v60 = vpack.c.bf16 %v7370_v52, %v7368_v54  ;;  %v8103_v54 = vld [vmem:[%s15511_s5 + $0xb0] sm:$0xff]  ;;  %v8104_v52 = vld [vmem:[%s15511_s5 + $0xb8] sm:$0xff] }
 0xd0b   :  { %11729 = vmatpush1.bf16.msra.mxu0 %v11728_v22  ;;  %v11764_v22 = vpack.c.bf16 %v7369_v10, %v7367_v32  ;;  %v7393_v32 = vld [vmem:[%s14923_s21 + $0xcb0] sm:$0xff]  ;;  %v7396_v10 = vld [vmem:[%s14923_s21 + $0xcc8] sm:$0xff] }
 0xd0c   :  { %11731 = vmatprep.subr.bf16.mxu0 %v11730_v19  ;;  %v11766_v19 = vpack.c.bf16 %v7374_v18, %v7372_v49  ;;  %v7398_v49 = vld [vmem:[%s14923_s21 + $0xcd8] sm:$0xff] }
 0xd0f   :  { %11733 = vmatpush1.bf16.msra.mxu0 %v11732_v15  ;;  %v11768_v15 = vpack.c.bf16 %v7373_v31, %v7371_v63  ;;  %v8088_v63 = vld [vmem:[%s15511_s5 + $0x38] sm:$0xff] }
 0xd10   :  { %11735 = vmatprep.subr.bf16.mxu0 %v11734_v55  ;;  %v11770_v55 = vpack.c.bf16 %v7378_v2, %v7376_v13  ;;  %v8105_v13 = vld [vmem:[%s15511_s5 + $0xc0] sm:$0xff]  ;;  %v8106_v2 = vld [vmem:[%s15511_s5 + $0xc8] sm:$0xff] }
 0xd13   :  { %11737 = vmatpush1.bf16.msra.mxu0 %v11736_v20  ;;  %v11772_v20 = vpack.c.bf16 %v7377_v12, %v7375_v9  ;;  %v7397_v9 = vld [vmem:[%s14923_s21 + $0xcd0] sm:$0xff]  ;;  %v7400_v12 = vld [vmem:[%s14923_s21 + $0xce8] sm:$0xff] }
 0xd14   :  { %11739 = vmatprep.subr.bf16.mxu0 %v11738_v7  ;;  %v11774_v7 = vpack.c.bf16 %v7382_v56, %v7380_v36  ;;  %v7402_v36 = vld [vmem:[%s14923_s21 + $0xcf8] sm:$0xff] }
 0xd17   :  { %11741 = vmatpush1.bf16.msra.mxu0 %v11740_v28 }
 0xd18   :  { %11743 = vmatprep.subr.bf16.mxu0 %v11742_v17  ;;  %v7385_v17 = vld [vmem:[%s14923_s21 + $0xc70] sm:$0xff] }
 0xd19   :  { %v11780_v41 = vpack.c.bf16 %v7385_v17, %v7383_v43  ;;  %v7399_v43 = vld [vmem:[%s14923_s21 + $0xce0] sm:$0xff]  ;;  %v7404_v17 = vld [vmem:[%s14923_s21 + $0xd08] sm:$0xff] }
 0xd1b   :  { %11745 = vmatpush1.bf16.msra.mxu0 %v11744_v53  ;;  %v8081_v53 = vld [vmem:[%s15511_s5] sm:$0xff] }
 0xd1c   :  { %11747 = vmatprep.subr.bf16.mxu0 %v11746_v29  ;;  %v11894_v29 = vpack.c.bf16 %v8098_v23, %v8097_v46  ;;  %v8091_v23 = vld [vmem:[%s15511_s5 + $0x50] sm:$0xff] }
 0xd1e   :  { %11895 = vmatprep.subr.bf16.mxu1 %v11894_v29 }
 0xd1f   :  { %11749 = vmatpush1.bf16.msra.mxu0 %v11748_v47  ;;  %v11896_v47 = vpack.c.bf16 %v8082_v42, %v8081_v53  ;;  %v8092_v53 = vld [vmem:[%s15511_s5 + $0x58] sm:$0xff]  ;;  %v8109_v42 = vld [vmem:[%s15511_s5 + $0xe0] sm:$0xff] }
 0xd20   :  { %11751 = vmatprep.subr.bf16.mxu0 %v11750_v6  ;;  %v11898_v6 = vpack.c.bf16 %v8100_v38, %v8099_v21  ;;  %v8110_v21 = vld [vmem:[%s15511_s5 + $0xe8] sm:$0xff]  ;;  %v11798_v38 = vpack.c.bf16 %v7406_v33, %v7404_v17  ;;  %v11916_v51 = vpack.c.bf16 %v8092_v53, %v8091_v23  ;;  %v7438_v33 = vld [vmem:[%s14923_s21 + $0xe18] sm:$0xff]  ;;  %v7435_v23 = vld [vmem:[%s14923_s21 + $0xe00] sm:$0xff] }
 0xd21   :  { %11897 = vmatpush3.bf16.msra.mxu1 %v11896_v47  ;;  %v7405_v47 = vld [vmem:[%s14923_s21 + $0xd10] sm:$0xff]  ;;  %v7436_v17 = vld [vmem:[%s14923_s21 + $0xe08] sm:$0xff] }
 0xd22   :  { %11899 = vmatprep.subr.bf16.mxu1 %v11898_v6  ;;  %v7408_v6 = vld [vmem:[%s14923_s21 + $0xd28] sm:$0xff]  ;;  %v7437_v53 = vld [vmem:[%s14923_s21 + $0xe10] sm:$0xff] }
 0xd23   :  { %11753 = vmatpush1.bf16.msra.mxu0 %v11752_v37  ;;  %v7387_v37 = vld [vmem:[%s14923_s21 + $0xc80] sm:$0xff] }
 0xd24   :  { %11755 = vmatprep.subr.bf16.mxu0 %v11754_v11  ;;  %v7389_v11 = vld [vmem:[%s14923_s21 + $0xc90] sm:$0xff] }
 0xd25   :  { %v11784_v40 = vpack.c.bf16 %v7389_v11, %v7387_v37  ;;  %11901 = vmatpush3.bf16.msra.mxu1 %v11900_v5  ;;  %v11802_v37 = vpack.c.bf16 %v7410_v39, %v7408_v6  ;;  %v7407_v11 = vld [vmem:[%s14923_s21 + $0xd20] sm:$0xff]  ;;  %v7444_v6 = vld [vmem:[%s14923_s21 + $0xe48] sm:$0xff]  ;;  %v7446_v39 = vld [vmem:[%s14923_s21 + $0xe58] sm:$0xff] }
 0xd27   :  { %11757 = vmatpush1.bf16.msra.mxu0 %v11756_v4  ;;  %v11902_v4 = vpack.c.bf16 %v8102_v44, %v8101_v61  ;;  %v11918_v61 = vpack.c.bf16 %v8110_v21, %v8109_v42  ;;  %v7409_v44 = vld [vmem:[%s14923_s21 + $0xd30] sm:$0xff]  ;;  %v7442_v42 = vld [vmem:[%s14923_s21 + $0xe38] sm:$0xff]  ;;  %v11832_v21 = vpack.c.bf16 %v7437_v53, %v7435_v23 }
 0xd28   :  { %11759 = vmatprep.subr.bf16.mxu0 %v11758_v14  ;;  %v8085_v14 = vld [vmem:[%s15511_s5 + $0x20] sm:$0xff]  ;;  %v11804_v5 = vpack.c.bf16 %v7409_v44, %v7407_v11  ;;  %v7448_v11 = vld [vmem:[%s14923_s21 + $0xe68] sm:$0xff]  ;;  %v7450_v44 = vld [vmem:[%s14923_s21 + $0xe78] sm:$0xff] }
 0xd29   :  { %v11904_v18 = vpack.c.bf16 %v8086_v59, %v8085_v14  ;;  %11903 = vmatprep.subr.bf16.mxu1 %v11902_v4  ;;  %v7411_v14 = vld [vmem:[%s14923_s21 + $0xd40] sm:$0xff]  ;;  %v7413_v59 = vld [vmem:[%s14923_s21 + $0xd50] sm:$0xff] }
 0xd2b   :  { %11761 = vmatpush1.bf16.msra.mxu0 %v11760_v1  ;;  %v11786_v1 = vpack.c.bf16 %v7394_v48, %v7392_v35  ;;  %11905 = vmatpush3.bf16.msra.mxu1 %v11904_v18  ;;  %v7412_v35 = vld [vmem:[%s14923_s21 + $0xd48] sm:$0xff]  ;;  %v7414_v48 = vld [vmem:[%s14923_s21 + $0xd58] sm:$0xff] }
 0xd2c   :  { %11763 = vmatprep.subr.bf16.mxu0 %v11762_v60  ;;  %v7391_v60 = vld [vmem:[%s14923_s21 + $0xca0] sm:$0xff]  ;;  %v11806_v4 = vpack.c.bf16 %v7414_v48, %v7412_v35 }
 0xd2d   :  { %v11788_v31 = vpack.c.bf16 %v7393_v32, %v7391_v60  ;;  %v7415_v60 = vld [vmem:[%s14923_s21 + $0xd60] sm:$0xff]  ;;  %v7417_v32 = vld [vmem:[%s14923_s21 + $0xd70] sm:$0xff] }
 0xd2e   :  { %v11812_v18 = vpack.c.bf16 %v7417_v32, %v7415_v60  ;;  %v7447_v48 = vld [vmem:[%s14923_s21 + $0xe60] sm:$0xff] }
 0xd2f   :  { %11765 = vmatpush1.bf16.msra.mxu0 %v11764_v22  ;;  %v11906_v22 = vpack.c.bf16 %v8104_v52, %v8103_v54  ;;  %v7418_v54 = vld [vmem:[%s14923_s21 + $0xd78] sm:$0xff]  ;;  %v11808_v52 = vpack.c.bf16 %v7413_v59, %v7411_v14 }
 0xd30   :  { %11767 = vmatprep.subr.bf16.mxu0 %v11766_v19  ;;  %v8087_v19 = vld [vmem:[%s15511_s5 + $0x30] sm:$0xff] }
 0xd31   :  { %v11908_v56 = vpack.c.bf16 %v8088_v63, %v8087_v19  ;;  %11907 = vmatprep.subr.bf16.mxu1 %v11906_v22  ;;  %v7419_v19 = vld [vmem:[%s14923_s21 + $0xd80] sm:$0xff]  ;;  %v7421_v63 = vld [vmem:[%s14923_s21 + $0xd90] sm:$0xff] }
 0xd32   :  { %7931 = vmatmul.mubr.f32.vlgmr.msra.gmra.mrb[64].mxu0 %v15167_v34  ;;  %v7381_v34 = vld [vmem:[%s14923_s21 + $0xc50] sm:$0xff] }
 0xd33   :  { %11769 = vmatpush1.bf16.msra.mxu0 %v11768_v15  ;;  %8001 = vmatprep.mubr.f32.mxu0 %v15183_v25  ;;  %v7386_v25 = vld [vmem:[%s14923_s21 + $0xc78] sm:$0xff]  ;;  %v11776_v50 = vpack.c.bf16 %v7381_v34, %v7379_v27  ;;  %v11790_v15 = vpack.c.bf16 %v7398_v49, %v7396_v10  ;;  %v8090_v27 = vld [vmem:[%s15511_s5 + $0x48] sm:$0xff] }
 0xd34   :  { %11771 = vmatprep.subr.bf16.mxu0 %v11770_v55  ;;  %v11778_v28 = vpack.c.bf16 %v7386_v25, %v7384_v26  ;;  %v7395_v55 = vld [vmem:[%s14923_s21 + $0xcc0] sm:$0xff]  ;;  %v8107_v26 = vld [vmem:[%s15511_s5 + $0xd0] sm:$0xff]  ;;  %v8108_v25 = vld [vmem:[%s15511_s5 + $0xd8] sm:$0xff]  ;;  %11909 = vmatpush3.bf16.msra.mxu1 %v11908_v56 }
 0xd35   :  { %v11792_v34 = vpack.c.bf16 %v7397_v9, %v7395_v55  ;;  %v11914_v46 = vpack.c.bf16 %v8108_v25, %v8107_v26  ;;  %v7420_v10 = vld [vmem:[%s14923_s21 + $0xd88] sm:$0xff]  ;;  %v7422_v49 = vld [vmem:[%s14923_s21 + $0xd98] sm:$0xff]  ;;  %v7423_v55 = vld [vmem:[%s14923_s21 + $0xda0] sm:$0xff] }
 0xd36   :  { %v11814_v22 = vpack.c.bf16 %v7422_v49, %v7420_v10  ;;  %v7425_v9 = vld [vmem:[%s14923_s21 + $0xdb0] sm:$0xff]  ;;  %v7434_v26 = vld [vmem:[%s14923_s21 + $0xdf8] sm:$0xff]  ;;  %v7455_v10 = vld [vmem:[%s14923_s21 + $0xea0] sm:$0xff] }
 0xd37   :  { %11773 = vmatpush1.bf16.msra.mxu0 %v11772_v20  ;;  %v11910_v20 = vpack.c.bf16 %v8106_v2, %v8105_v13  ;;  %v7426_v13 = vld [vmem:[%s14923_s21 + $0xdb8] sm:$0xff]  ;;  %v11816_v2 = vpack.c.bf16 %v7421_v63, %v7419_v19  ;;  %v11820_v56 = vpack.c.bf16 %v7425_v9, %v7423_v55  ;;  %v7457_v49 = vld [vmem:[%s14923_s21 + $0xeb0] sm:$0xff] }
 0xd38   :  { %11775 = vmatprep.subr.bf16.mxu0 %v11774_v7  ;;  %v8089_v7 = vld [vmem:[%s15511_s5 + $0x40] sm:$0xff]  ;;  %v11852_v19 = vpack.c.bf16 %v7457_v49, %v7455_v10 }
 0xd39   :  { %v11912_v30 = vpack.c.bf16 %v8090_v27, %v8089_v7  ;;  %11911 = vmatprep.subr.bf16.mxu1 %v11910_v20  ;;  %v7427_v7 = vld [vmem:[%s14923_s21 + $0xdc0] sm:$0xff]  ;;  %v7429_v27 = vld [vmem:[%s14923_s21 + $0xdd0] sm:$0xff] }
 0xd3a   :  { %v11824_v25 = vpack.c.bf16 %v7429_v27, %v7427_v7 }
 0xd3b   :  { %11777 = vmatpush1.bf16.msra.mxu0 %v11776_v50  ;;  %v11794_v50 = vpack.c.bf16 %v7402_v36, %v7400_v12  ;;  %11913 = vmatpush3.bf16.msra.mxu1 %v11912_v30  ;;  %v7428_v12 = vld [vmem:[%s14923_s21 + $0xdc8] sm:$0xff]  ;;  %v7430_v36 = vld [vmem:[%s14923_s21 + $0xdd8] sm:$0xff] }
 0xd3c   :  { %11779 = vmatprep.subr.bf16.mxu0 %v11778_v28  ;;  %v7401_v28 = vld [vmem:[%s14923_s21 + $0xcf0] sm:$0xff]  ;;  %11915 = vmatprep.subr.bf16.mxu1 %v11914_v46  ;;  %v11822_v20 = vpack.c.bf16 %v7430_v36, %v7428_v12  ;;  %v11830_v46 = vpack.c.bf16 %v7438_v33, %v7436_v17  ;;  %v7463_v12 = vld [vmem:[%s14923_s21 + $0xee0] sm:$0xff] }
 0xd3d   :  { %v11796_v29 = vpack.c.bf16 %v7401_v28, %v7399_v43  ;;  %v7431_v43 = vld [vmem:[%s14923_s21 + $0xde0] sm:$0xff]  ;;  %v7433_v28 = vld [vmem:[%s14923_s21 + $0xdf0] sm:$0xff] }
 0xd3e   :  { %v11828_v30 = vpack.c.bf16 %v7433_v28, %v7431_v43  ;;  %v7465_v36 = vld [vmem:[%s14923_s21 + $0xef0] sm:$0xff]  ;;  %v7471_v17 = vld [vmem:[%s14923_s21 + $0xf20] sm:$0xff] }
 0xd3f   :  { %11781 = vmatpush1.bf16.msra.mxu0 %v11780_v41  ;;  %v7403_v41 = vld [vmem:[%s14923_s21 + $0xd00] sm:$0xff]  ;;  %11917 = vmatpush3.bf16.msra.mxu1 %v11916_v51  ;;  %v11860_v7 = vpack.c.bf16 %v7465_v36, %v7463_v12  ;;  %v7473_v33 = vld [vmem:[%s14923_s21 + $0xf30] sm:$0xff]  ;;  %v8096_v12 = vld [vmem:[%s15511_s5 + $0x78] sm:$0xff] }
 0xd40   :  { %11783 = vmatprep.subr.bf16.mxu0 %v11782_v24  ;;  %v11800_v24 = vpack.c.bf16 %v7405_v47, %v7403_v41  ;;  %11919 = vmatprep.subr.bf16.mxu1 %v11918_v61  ;;  %v7439_v41 = vld [vmem:[%s14923_s21 + $0xe20] sm:$0xff]  ;;  %v7441_v47 = vld [vmem:[%s14923_s21 + $0xe30] sm:$0xff]  ;;  %v11838_v61 = vpack.c.bf16 %v7446_v39, %v7444_v6  ;;  %v11868_v23 = vpack.c.bf16 %v7473_v33, %v7471_v17  ;;  %v8199_v33 = vld [vmem:[%s15669_s9 + $0x28] sm:$0xff] }
 0xd41   :  { %v11836_v51 = vpack.c.bf16 %v7441_v47, %v7439_v41  ;;  %v7479_v6 = vld [vmem:[%s14923_s21 + $0xf60] sm:$0xff]  ;;  %v7481_v39 = vld [vmem:[%s14923_s21 + $0xf70] sm:$0xff] }
 0xd43   :  { %11785 = vmatpush1.bf16.msra.mxu0 %v11784_v40  ;;  %v7416_v40 = vld [vmem:[%s14923_s21 + $0xd68] sm:$0xff] }
 0xd44   :  { %11787 = vmatprep.subr.bf16.mxu0 %v11786_v1  ;;  %v11810_v1 = vpack.c.bf16 %v7418_v54, %v7416_v40  ;;  %v7451_v40 = vld [vmem:[%s14923_s21 + $0xe80] sm:$0xff]  ;;  %v7453_v54 = vld [vmem:[%s14923_s21 + $0xe90] sm:$0xff] }
 0xd45   :  { %v11848_v60 = vpack.c.bf16 %v7453_v54, %v7451_v40 }
 0xd47   :  { %11789 = vmatpush1.bf16.msra.mxu0 %v11788_v31  ;;  %v7424_v31 = vld [vmem:[%s14923_s21 + $0xda8] sm:$0xff] }
 0xd48   :  { %11791 = vmatprep.subr.bf16.mxu0 %v11790_v15  ;;  %v11818_v15 = vpack.c.bf16 %v7426_v13, %v7424_v31  ;;  %v7459_v31 = vld [vmem:[%s14923_s21 + $0xec0] sm:$0xff]  ;;  %v7461_v13 = vld [vmem:[%s14923_s21 + $0xed0] sm:$0xff] }
 0xd49   :  { %v11856_v55 = vpack.c.bf16 %v7461_v13, %v7459_v31  ;;  %v8094_v31 = vld [vmem:[%s15511_s5 + $0x68] sm:$0xff] }
 0xd4b   :  { %11793 = vmatpush1.bf16.msra.mxu0 %v11792_v34  ;;  %v7432_v34 = vld [vmem:[%s14923_s21 + $0xde8] sm:$0xff] }
 0xd4c   :  { %11795 = vmatprep.subr.bf16.mxu0 %v11794_v50  ;;  %v11826_v50 = vpack.c.bf16 %v7434_v26, %v7432_v34  ;;  %v7467_v34 = vld [vmem:[%s14923_s21 + $0xf00] sm:$0xff]  ;;  %v7469_v26 = vld [vmem:[%s14923_s21 + $0xf10] sm:$0xff] }
 0xd4d   :  { %v11864_v43 = vpack.c.bf16 %v7469_v26, %v7467_v34 }
 0xd4f   :  { %11797 = vmatpush1.bf16.msra.mxu0 %v11796_v29  ;;  %v7440_v29 = vld [vmem:[%s14923_s21 + $0xe28] sm:$0xff] }
 0xd50   :  { %11799 = vmatprep.subr.bf16.mxu0 %v11798_v38  ;;  %v11834_v38 = vpack.c.bf16 %v7442_v42, %v7440_v29  ;;  %v7475_v29 = vld [vmem:[%s14923_s21 + $0xf40] sm:$0xff]  ;;  %v7477_v42 = vld [vmem:[%s14923_s21 + $0xf50] sm:$0xff] }
 0xd51   :  { %v11872_v41 = vpack.c.bf16 %v7477_v42, %v7475_v29  ;;  %v8198_v42 = vld [vmem:[%s15669_s9 + $0x20] sm:$0xff] }
 0xd53   :  { %11801 = vmatpush1.bf16.msra.mxu0 %v11800_v24  ;;  %v7443_v24 = vld [vmem:[%s14923_s21 + $0xe40] sm:$0xff] }
 0xd54   :  { %11803 = vmatprep.subr.bf16.mxu0 %v11802_v37  ;;  %v7445_v37 = vld [vmem:[%s14923_s21 + $0xe50] sm:$0xff] }
 0xd55   :  { %v11840_v35 = vpack.c.bf16 %v7445_v37, %v7443_v24  ;;  %v11876_v24 = vpack.c.bf16 %v7481_v39, %v7479_v6  ;;  %v8202_v39 = vld [vmem:[%s15669_s9 + $0x40] sm:$0xff] }
 0xd57   :  { %11805 = vmatpush1.bf16.msra.mxu0 %v11804_v5  ;;  %v7449_v5 = vld [vmem:[%s14923_s21 + $0xe70] sm:$0xff] }
 0xd58   :  { %11807 = vmatprep.subr.bf16.mxu0 %v11806_v4  ;;  %v7454_v4 = vld [vmem:[%s14923_s21 + $0xe98] sm:$0xff]  ;;  %v11844_v14 = vpack.c.bf16 %v7449_v5, %v7447_v48 }
 0xd5b   :  { %11809 = vmatpush1.bf16.msra.mxu0 %v11808_v52  ;;  %v7456_v52 = vld [vmem:[%s14923_s21 + $0xea8] sm:$0xff] }
 0xd5c   :  { %11811 = vmatprep.subr.bf16.mxu0 %v11810_v1  ;;  %v7458_v1 = vld [vmem:[%s14923_s21 + $0xeb8] sm:$0xff] }
 0xd5d   :  { %v11850_v32 = vpack.c.bf16 %v7458_v1, %v7456_v52  ;;  %v7491_v52 = vld [vmem:[%s14923_s21 + $0xfc0] sm:$0xff]  ;;  %v7493_v1 = vld [vmem:[%s14923_s21 + $0xfd0] sm:$0xff] }
 0xd5e   :  { %v11888_v10 = vpack.c.bf16 %v7493_v1, %v7491_v52  ;;  %v8214_v1 = vld [vmem:[%s15669_s9 + $0xa0] sm:$0xff] }
 0xd5f   :  { %11813 = vmatpush1.bf16.msra.mxu0 %v11812_v18  ;;  %v7460_v18 = vld [vmem:[%s14923_s21 + $0xec8] sm:$0xff] }
 0xd60   :  { %11815 = vmatprep.subr.bf16.mxu0 %v11814_v22  ;;  %v7462_v22 = vld [vmem:[%s14923_s21 + $0xed8] sm:$0xff] }
 0xd61   :  { %v11854_v63 = vpack.c.bf16 %v7462_v22, %v7460_v18  ;;  %v7495_v18 = vld [vmem:[%s14923_s21 + $0xfe0] sm:$0xff]  ;;  %v7497_v22 = vld [vmem:[%s14923_s21 + $0xff0] sm:$0xff] }
 0xd63   :  { %11817 = vmatpush1.bf16.msra.mxu0 %v11816_v2  ;;  %v7464_v2 = vld [vmem:[%s14923_s21 + $0xee8] sm:$0xff] }
 0xd64   :  { %11819 = vmatprep.subr.bf16.mxu0 %v11818_v15  ;;  %v7466_v15 = vld [vmem:[%s14923_s21 + $0xef8] sm:$0xff] }
 0xd65   :  { %v11858_v9 = vpack.c.bf16 %v7466_v15, %v7464_v2  ;;  %v8111_v2 = vld [vmem:[%s15511_s5 + $0xf0] sm:$0xff]  ;;  %v8112_v15 = vld [vmem:[%s15511_s5 + $0xf8] sm:$0xff] }
 0xd67   :  { %11821 = vmatpush1.bf16.msra.mxu0 %v11820_v56  ;;  %v7468_v56 = vld [vmem:[%s14923_s21 + $0xf08] sm:$0xff] }
 0xd68   :  { %11823 = vmatprep.subr.bf16.mxu0 %v11822_v20  ;;  %v7470_v20 = vld [vmem:[%s14923_s21 + $0xf18] sm:$0xff] }
 0xd69   :  { %v11862_v27 = vpack.c.bf16 %v7470_v20, %v7468_v56  ;;  %v8197_v56 = vld [vmem:[%s15669_s9 + $0x18] sm:$0xff] }
 0xd6b   :  { %11825 = vmatpush1.bf16.msra.mxu0 %v11824_v25  ;;  %v7472_v25 = vld [vmem:[%s14923_s21 + $0xf28] sm:$0xff] }
 0xd6c   :  { %11827 = vmatprep.subr.bf16.mxu0 %v11826_v50  ;;  %v7474_v50 = vld [vmem:[%s14923_s21 + $0xf38] sm:$0xff] }
 0xd6d   :  { %v11866_v28 = vpack.c.bf16 %v7474_v50, %v7472_v25 }
 0xd6f   :  { %11829 = vmatpush1.bf16.msra.mxu0 %v11828_v30  ;;  %v7476_v30 = vld [vmem:[%s14923_s21 + $0xf48] sm:$0xff] }
 0xd70   :  { %11831 = vmatprep.subr.bf16.mxu0 %v11830_v46  ;;  %v7478_v46 = vld [vmem:[%s14923_s21 + $0xf58] sm:$0xff] }
 0xd71   :  { %v11870_v53 = vpack.c.bf16 %v7478_v46, %v7476_v30  ;;  %v8201_v30 = vld [vmem:[%s15669_s9 + $0x38] sm:$0xff] }
 0xd72   :  { %8002 = vmatmul.mubr.f32.vlgmr.msra.gmra.mrb[64].mxu0 %v15179_v62  ;;  %v11842_v62 = vpack.c.bf16 %v7450_v44, %v7448_v11  ;;  %v7483_v11 = vld [vmem:[%s14923_s21 + $0xf80] sm:$0xff]  ;;  %v7485_v44 = vld [vmem:[%s14923_s21 + $0xf90] sm:$0xff]  ;;  %v11930_v29 = vpack.c.bf16 %v8201_v30, %v8199_v33 }
 0xd73   :  { %11833 = vmatpush1.bf16.msra.mxu0 %v11832_v21  ;;  %8072 = vmatprep.mubr.f32.mxu0 %v15193_v16  ;;  %v7452_v16 = vld [vmem:[%s14923_s21 + $0xe88] sm:$0xff]  ;;  %v11880_v48 = vpack.c.bf16 %v7485_v44, %v7483_v11  ;;  %v8206_v44 = vld [vmem:[%s15669_s9 + $0x60] sm:$0xff] }
 0xd74   :  { %11835 = vmatprep.subr.bf16.mxu0 %v11834_v38  ;;  %v11846_v59 = vpack.c.bf16 %v7454_v4, %v7452_v16  ;;  %v7480_v21 = vld [vmem:[%s14923_s21 + $0xf68] sm:$0xff]  ;;  %v7482_v38 = vld [vmem:[%s14923_s21 + $0xf78] sm:$0xff]  ;;  %v7487_v16 = vld [vmem:[%s14923_s21 + $0xfa0] sm:$0xff] }
 0xd75   :  { %v11874_v47 = vpack.c.bf16 %v7482_v38, %v7480_v21  ;;  %v7489_v4 = vld [vmem:[%s14923_s21 + $0xfb0] sm:$0xff]  ;;  %v8203_v38 = vld [vmem:[%s15669_s9 + $0x48] sm:$0xff]  ;;  %v8234_v30 = vld [vmem:[%s15669_s9 + $0x140] sm:$0xff] }
 0xd76   :  { %v11884_v40 = vpack.c.bf16 %v7489_v4, %v7487_v16  ;;  %v8200_v21 = vld [vmem:[%s15669_s9 + $0x30] sm:$0xff]  ;;  %v8210_v4 = vld [vmem:[%s15669_s9 + $0x80] sm:$0xff] }
 0xd77   :  { %11837 = vmatpush1.bf16.msra.mxu0 %v11836_v51  ;;  %v7484_v51 = vld [vmem:[%s14923_s21 + $0xf88] sm:$0xff] }
 0xd78   :  { %11839 = vmatprep.subr.bf16.mxu0 %v11838_v61  ;;  %v7486_v61 = vld [vmem:[%s14923_s21 + $0xf98] sm:$0xff] }
 0xd79   :  { %v11878_v37 = vpack.c.bf16 %v7486_v61, %v7484_v51  ;;  %v8204_v51 = vld [vmem:[%s15669_s9 + $0x50] sm:$0xff]  ;;  %v8207_v61 = vld [vmem:[%s15669_s9 + $0x68] sm:$0xff] }
 0xd7b   :  { %11841 = vmatpush1.bf16.msra.mxu0 %v11840_v35  ;;  %v7488_v35 = vld [vmem:[%s14923_s21 + $0xfa8] sm:$0xff] }
 0xd7c   :  { %11843 = vmatprep.subr.bf16.mxu0 %v11842_v62  ;;  %v7490_v62 = vld [vmem:[%s14923_s21 + $0xfb8] sm:$0xff] }
 0xd7d   :  { %v11882_v5 = vpack.c.bf16 %v7490_v62, %v7488_v35  ;;  %v8208_v35 = vld [vmem:[%s15669_s9 + $0x70] sm:$0xff]  ;;  %v8211_v62 = vld [vmem:[%s15669_s9 + $0x88] sm:$0xff] }
 0xd7f   :  { %11845 = vmatpush1.bf16.msra.mxu0 %v11844_v14  ;;  %v7492_v14 = vld [vmem:[%s14923_s21 + $0xfc8] sm:$0xff] }
 0xd80   :  { %11847 = vmatprep.subr.bf16.mxu0 %v11846_v59  ;;  %v7494_v59 = vld [vmem:[%s14923_s21 + $0xfd8] sm:$0xff] }
 0xd81   :  { %v11886_v54 = vpack.c.bf16 %v7494_v59, %v7492_v14  ;;  %v8212_v14 = vld [vmem:[%s15669_s9 + $0x90] sm:$0xff]  ;;  %v8215_v59 = vld [vmem:[%s15669_s9 + $0xa8] sm:$0xff] }
 0xd83   :  { %11849 = vmatpush1.bf16.msra.mxu0 %v11848_v60  ;;  %v7496_v60 = vld [vmem:[%s14923_s21 + $0xfe8] sm:$0xff] }
 0xd84   :  { %11851 = vmatprep.subr.bf16.mxu0 %v11850_v32  ;;  %v7498_v32 = vld [vmem:[%s14923_s21 + $0xff8] sm:$0xff]  ;;  %s15781_s21 = sld [smem:[%s15933_s0 + %s12528_s14]]   ;;  %s12534_s14 = smov 27  }
 0xd85   :  { %v11890_v49 = vpack.c.bf16 %v7498_v32, %v7496_v60  ;;  %v8216_v60 = vld [vmem:[%s15669_s9 + $0xb0] sm:$0xff]  ;;  %v8219_v32 = vld [vmem:[%s15669_s9 + $0xc8] sm:$0xff] }
 0xd87   :  { %11853 = vmatpush1.bf16.msra.mxu0 %v11852_v19  ;;  %v11892_v19 = vpack.c.bf16 %v7497_v22, %v7495_v18  ;;  %v8218_v22 = vld [vmem:[%s15669_s9 + $0xc0] sm:$0xff] }
 0xd88   :  { %11855 = vmatprep.subr.bf16.mxu0 %v11854_v63  ;;  %v8093_v63 = vld [vmem:[%s15511_s5 + $0x60] sm:$0xff] }
 0xd89   :  { %v11920_v13 = vpack.c.bf16 %v8094_v31, %v8093_v63  ;;  %v8223_v63 = vld [vmem:[%s15669_s9 + $0xe8] sm:$0xff]  ;;  %v8225_v31 = vld [vmem:[%s15669_s9 + $0xf8] sm:$0xff] }
 0xd8b   :  { %11857 = vmatpush1.bf16.msra.mxu0 %v11856_v55  ;;  %11921 = vmatpush3.bf16.msra.mxu1 %v11920_v13  ;;  %v11922_v55 = vpack.c.bf16 %v8112_v15, %v8111_v2  ;;  %v11954_v2 = vpack.c.bf16 %v8225_v31, %v8223_v63  ;;  %v8222_v15 = vld [vmem:[%s15669_s9 + $0xe0] sm:$0xff] }
 0xd8c   :  { %11859 = vmatprep.subr.bf16.mxu0 %v11858_v9  ;;  %v8095_v9 = vld [vmem:[%s15511_s5 + $0x70] sm:$0xff]  ;;  %v9049_v63 = vld [vmem:[%s8959_s19] ss:$0 sm:$0xff]  ;;  %s8969_s19 = sld [smem:[%s15933_s0 + %s12533_s22]]  }
 0xd8d   :  { %v11924_v36 = vpack.c.bf16 %v8096_v12, %v8095_v9  ;;  %11923 = vmatprep.subr.bf16.mxu1 %v11922_v55  ;;  %v8224_v55 = vld [vmem:[%s15669_s9 + $0xf0] sm:$0xff]  ;;  %v8227_v9 = vld [vmem:[%s15669_s9 + $0x108] sm:$0xff]  ;;  %v8229_v12 = vld [vmem:[%s15669_s9 + $0x118] sm:$0xff] }
 0xd8f   :  { %11861 = vmatpush1.bf16.msra.mxu0 %v11860_v7  ;;  %11925 = vmatpush3.bf16.msra.mxu1 %v11924_v36  ;;  %v7499_v7 = vld [vmem:[%s8957_s13] sm:$0x3]  ;;  %v11956_v36 = vpack.c.bf16 %v8224_v55, %v8222_v15  ;;  %v8260_v55 = vld [vmem:[%s15669_s9 + $0x210] sm:$0xff] }
 0xd90   :  { %11863 = vmatprep.subr.bf16.mxu0 %v11862_v27  ;;  %v7504_v27 = vrot.slane %v7499_v7, %v13266_v58  ;;  %v7508_v34 = vrot.slane %v7499_v7, %v13273_v3  ;;  %v8231_v7 = vld [vmem:[%s15669_s9 + $0x128] sm:$0xff]  ;;  %v8258_v15 = vld [vmem:[%s15669_s9 + $0x200] sm:$0xff] }
 0xd93   :  { %11865 = vmatpush1.bf16.msra.mxu0 %v11864_v43  ;;  %v8194_v43 = vld [vmem:[%s15669_s9] sm:$0xff] }
 0xd94   :  { %11867 = vmatprep.subr.bf16.mxu0 %v11866_v28  ;;  %v8196_v28 = vld [vmem:[%s15669_s9 + $0x10] sm:$0xff] }
 0xd97   :  { %11869 = vmatpush1.bf16.msra.mxu0 %v11868_v23  ;;  %v11928_v23 = vpack.c.bf16 %v8196_v28, %v8194_v43  ;;  %v8235_v43 = vld [vmem:[%s15669_s9 + $0x148] sm:$0xff]  ;;  %v8237_v28 = vld [vmem:[%s15669_s9 + $0x158] sm:$0xff] }
 0xd98   :  { %11871 = vmatprep.subr.bf16.mxu0 %v11870_v53  ;;  %v11966_v33 = vpack.c.bf16 %v8237_v28, %v8235_v43  ;;  %v8266_v43 = vld [vmem:[%s15669_s9 + $0x240] sm:$0xff]  ;;  %v8268_v28 = vld [vmem:[%s15669_s9 + $0x250] sm:$0xff] }
 0xd9b   :  { %11873 = vmatpush1.bf16.msra.mxu0 %v11872_v41  ;;  %v8205_v41 = vld [vmem:[%s15669_s9 + $0x58] sm:$0xff] }
 0xd9c   :  { %11875 = vmatprep.subr.bf16.mxu0 %v11874_v47  ;;  %v11932_v47 = vpack.c.bf16 %v8200_v21, %v8198_v42  ;;  %v11934_v6 = vpack.c.bf16 %v8205_v41, %v8203_v38  ;;  %v8238_v21 = vld [vmem:[%s15669_s9 + $0x160] sm:$0xff]  ;;  %v8240_v38 = vld [vmem:[%s15669_s9 + $0x170] sm:$0xff]  ;;  %v8243_v41 = vld [vmem:[%s15669_s9 + $0x188] sm:$0xff] }
 0xd9f   :  { %11877 = vmatpush1.bf16.msra.mxu0 %v11876_v24  ;;  %v8209_v24 = vld [vmem:[%s15669_s9 + $0x78] sm:$0xff] }
 0xda0   :  { %11879 = vmatprep.subr.bf16.mxu0 %v11878_v37  ;;  %v11936_v37 = vpack.c.bf16 %v8204_v51, %v8202_v39  ;;  %v11938_v11 = vpack.c.bf16 %v8209_v24, %v8207_v61  ;;  %v8242_v51 = vld [vmem:[%s15669_s9 + $0x180] sm:$0xff]  ;;  %v8244_v61 = vld [vmem:[%s15669_s9 + $0x190] sm:$0xff]  ;;  %v8247_v24 = vld [vmem:[%s15669_s9 + $0x1a8] sm:$0xff] }
 0xda3   :  { %11881 = vmatpush1.bf16.msra.mxu0 %v11880_v48  ;;  %v8213_v48 = vld [vmem:[%s15669_s9 + $0x98] sm:$0xff] }
 0xda4   :  { %11883 = vmatprep.subr.bf16.mxu0 %v11882_v5  ;;  %v11940_v5 = vpack.c.bf16 %v8208_v35, %v8206_v44  ;;  %v11942_v16 = vpack.c.bf16 %v8213_v48, %v8211_v62  ;;  %v8246_v35 = vld [vmem:[%s15669_s9 + $0x1a0] sm:$0xff]  ;;  %v8248_v62 = vld [vmem:[%s15669_s9 + $0x1b0] sm:$0xff] }
 0xda5   :  { %v11980_v48 = vpack.c.bf16 %v8248_v62, %v8246_v35 }
 0xda7   :  { %11885 = vmatpush1.bf16.msra.mxu0 %v11884_v40  ;;  %v8217_v40 = vld [vmem:[%s15669_s9 + $0xb8] sm:$0xff] }
 0xda8   :  { %11887 = vmatprep.subr.bf16.mxu0 %v11886_v54  ;;  %v11944_v54 = vpack.c.bf16 %v8212_v14, %v8210_v4  ;;  %v11946_v52 = vpack.c.bf16 %v8217_v40, %v8215_v59  ;;  %v8250_v14 = vld [vmem:[%s15669_s9 + $0x1c0] sm:$0xff]  ;;  %v8252_v59 = vld [vmem:[%s15669_s9 + $0x1d0] sm:$0xff] }
 0xda9   :  { %v11984_v40 = vpack.c.bf16 %v8252_v59, %v8250_v14 }
 0xdab   :  { %11889 = vmatpush1.bf16.msra.mxu0 %v11888_v10  ;;  %v8221_v10 = vld [vmem:[%s15669_s9 + $0xd8] sm:$0xff] }
 0xdac   :  { %11891 = vmatprep.subr.bf16.mxu0 %v11890_v49  ;;  %v11948_v49 = vpack.c.bf16 %v8216_v60, %v8214_v1  ;;  %v11950_v18 = vpack.c.bf16 %v8221_v10, %v8219_v32  ;;  %v8254_v60 = vld [vmem:[%s15669_s9 + $0x1e0] sm:$0xff]  ;;  %v8256_v32 = vld [vmem:[%s15669_s9 + $0x1f0] sm:$0xff] }
 0xdad   :  { %v11988_v10 = vpack.c.bf16 %v8256_v32, %v8254_v60  ;;  %v8447_v60 = vld [vmem:[%s15781_s21 + $0x8] sm:$0xff] }
 0xdaf   :  { %11893 = vmatpush1.bf16.msra.mxu0 %v11892_v19  ;;  %v8220_v19 = vld [vmem:[%s15669_s9 + $0xd0] sm:$0xff] }
 0xdb0   :  { %v11952_v13 = vpack.c.bf16 %v8220_v19, %v8218_v22 }
 0xdb2   :  { %8073 = vmatmul.mubr.f32.vlgmr.msra.gmra.mrb[64].mxu0 %v15191_v45  ;;  %v8195_v45 = vld [vmem:[%s15669_s9 + $0x8] sm:$0xff] }
 0xdb3   :  { %v11926_v20 = vpack.c.bf16 %v8197_v56, %v8195_v45  ;;  %v11958_v45 = vpack.c.bf16 %v8229_v12, %v8227_v9  ;;  %v8226_v56 = vld [vmem:[%s15669_s9 + $0x100] sm:$0xff]  ;;  %v8263_v12 = vld [vmem:[%s15669_s9 + $0x228] sm:$0xff] }
 0xdb5   :  { %11927 = vmatprep.subr.bf16.mxu1 %v11926_v20  ;;  %v8228_v20 = vld [vmem:[%s15669_s9 + $0x110] sm:$0xff] }
 0xe85   :  { %v8074_v26 = vpop.f32.mrb[64].mxu0 }
 0xe86   :  { %v12157_v25 = vadd.f32 %v8074_v26, %v7504_v27  ;;  %v8076_v50 = vpop.f32.mrb[65].mxu0  ;;  %v8233_v27 = vld [vmem:[%s15669_s9 + $0x138] sm:$0xff] }
 0xe87   :  { %v12158_v17 = vadd.f32 %v8076_v50, %v7508_v34  ;;  %v11960_v34 = vpack.c.bf16 %v8228_v20, %v8226_v56  ;;  %v11962_v26 = vpack.c.bf16 %v8233_v27, %v8231_v7  ;;  %v8232_v50 = vld [vmem:[%s15669_s9 + $0x130] sm:$0xff]  ;;  %v11992_v56 = vpack.c.bf16 %v8260_v55, %v8258_v15  ;;  %v8262_v7 = vld [vmem:[%s15669_s9 + $0x220] sm:$0xff]  ;;  %v8455_v55 = vld [vmem:[%s15781_s21 + $0x48] sm:$0xff] }
 0xe88   :  { %v8079_v53 = vmax.f32 %v12157_v25, 0.0  ;;  %v8230_v25 = vld [vmem:[%s15669_s9 + $0x120] sm:$0xff]  ;;  %v8264_v27 = vld [vmem:[%s15669_s9 + $0x230] sm:$0xff] }
 0xe89   :  { %v8080_v46 = vmax.f32 %v12158_v17, 0.0  ;;  %v11964_v17 = vpack.c.bf16 %v8232_v50, %v8230_v25  ;;  %v11996_v25 = vpack.c.bf16 %v8264_v27, %v8262_v7  ;;  %v8454_v15 = vld [vmem:[%s15781_s21 + $0x40] sm:$0xff]  ;;  %v8459_v27 = vld [vmem:[%s15781_s21 + $0x68] sm:$0xff] }
 0xe8a   :  { %v8458_v7 = vld [vmem:[%s15781_s21 + $0x60] sm:$0xff] }
 0xe8b   :  { %8184 = vmatprep.mubr.f32.mxu1 %v8080_v46  ;;  %v8236_v46 = vld [vmem:[%s15669_s9 + $0x150] sm:$0xff] }
 0xe8c   :  { %8185 = vmatmul.mubr.f32.vlgmr.msra.gmra.mrb[32].mxu1 %v8079_v53  ;;  %v8241_v53 = vld [vmem:[%s15669_s9 + $0x178] sm:$0xff] }
 0xe8d   :  { %11929 = vmatpush1.bf16.msra.mxu1 %v11928_v23  ;;  %v8239_v23 = vld [vmem:[%s15669_s9 + $0x168] sm:$0xff] }
 0xe8e   :  { %11931 = vmatprep.subr.bf16.mxu1 %v11930_v29  ;;  %v11968_v29 = vpack.c.bf16 %v8236_v46, %v8234_v30  ;;  %v11970_v42 = vpack.c.bf16 %v8241_v53, %v8239_v23  ;;  %v12000_v30 = vpack.c.bf16 %v8268_v28, %v8266_v43  ;;  %v8270_v23 = vld [vmem:[%s15669_s9 + $0x260] sm:$0xff]  ;;  %v8272_v53 = vld [vmem:[%s15669_s9 + $0x270] sm:$0xff]  ;;  %v8463_v28 = vld [vmem:[%s15781_s21 + $0x88] sm:$0xff] }
 0xe8f   :  { %v8462_v43 = vld [vmem:[%s15781_s21 + $0x80] sm:$0xff] }
 0xe91   :  { %11933 = vmatpush1.bf16.msra.mxu1 %v11932_v47  ;;  %v8245_v47 = vld [vmem:[%s15669_s9 + $0x198] sm:$0xff] }
 0xe92   :  { %11935 = vmatprep.subr.bf16.mxu1 %v11934_v6  ;;  %v11972_v6 = vpack.c.bf16 %v8240_v38, %v8238_v21  ;;  %v11974_v39 = vpack.c.bf16 %v8245_v47, %v8243_v41  ;;  %v12004_v21 = vpack.c.bf16 %v8272_v53, %v8270_v23  ;;  %v8274_v41 = vld [vmem:[%s15669_s9 + $0x280] sm:$0xff]  ;;  %v8276_v47 = vld [vmem:[%s15669_s9 + $0x290] sm:$0xff]  ;;  %v8467_v53 = vld [vmem:[%s15781_s21 + $0xa8] sm:$0xff] }
 0xe93   :  { %v8466_v23 = vld [vmem:[%s15781_s21 + $0xa0] sm:$0xff] }
 0xe95   :  { %11937 = vmatpush1.bf16.msra.mxu1 %v11936_v37  ;;  %v8249_v37 = vld [vmem:[%s15669_s9 + $0x1b8] sm:$0xff] }
 0xe96   :  { %11939 = vmatprep.subr.bf16.mxu1 %v11938_v11  ;;  %v11976_v11 = vpack.c.bf16 %v8244_v61, %v8242_v51  ;;  %v11978_v44 = vpack.c.bf16 %v8249_v37, %v8247_v24  ;;  %v12008_v51 = vpack.c.bf16 %v8276_v47, %v8274_v41  ;;  %v8278_v24 = vld [vmem:[%s15669_s9 + $0x2a0] sm:$0xff]  ;;  %v8280_v37 = vld [vmem:[%s15669_s9 + $0x2b0] sm:$0xff]  ;;  %v8568_v47 = vld [vmem:[%s15826_s25 + $0x88] sm:$0xff] }
 0xe97   :  { %v12012_v35 = vpack.c.bf16 %v8280_v37, %v8278_v24  ;;  %v8567_v41 = vld [vmem:[%s15826_s25 + $0x80] sm:$0xff] }
 0xe99   :  { %11941 = vmatpush1.bf16.msra.mxu1 %v11940_v5  ;;  %v8251_v5 = vld [vmem:[%s15669_s9 + $0x1c8] sm:$0xff] }
 0xe9a   :  { %11943 = vmatprep.subr.bf16.mxu1 %v11942_v16  ;;  %v8253_v16 = vld [vmem:[%s15669_s9 + $0x1d8] sm:$0xff] }
 0xe9b   :  { %v11982_v4 = vpack.c.bf16 %v8253_v16, %v8251_v5  ;;  %v8284_v5 = vld [vmem:[%s15669_s9 + $0x2d0] sm:$0xff]  ;;  %v8287_v16 = vld [vmem:[%s15669_s9 + $0x2e8] sm:$0xff] }
 0xe9d   :  { %11945 = vmatpush1.bf16.msra.mxu1 %v11944_v54  ;;  %v8255_v54 = vld [vmem:[%s15669_s9 + $0x1e8] sm:$0xff] }
 0xe9e   :  { %11947 = vmatprep.subr.bf16.mxu1 %v11946_v52  ;;  %v8257_v52 = vld [vmem:[%s15669_s9 + $0x1f8] sm:$0xff] }
 0xe9f   :  { %v11986_v1 = vpack.c.bf16 %v8257_v52, %v8255_v54  ;;  %v8288_v54 = vld [vmem:[%s15669_s9 + $0x2f0] sm:$0xff] }
 0xea1   :  { %11949 = vmatpush1.bf16.msra.mxu1 %v11948_v49  ;;  %v8259_v49 = vld [vmem:[%s15669_s9 + $0x208] sm:$0xff] }
 0xea2   :  { %11951 = vmatprep.subr.bf16.mxu1 %v11950_v18  ;;  %v8261_v18 = vld [vmem:[%s15669_s9 + $0x218] sm:$0xff] }
 0xea3   :  { %v11990_v22 = vpack.c.bf16 %v8261_v18, %v8259_v49  ;;  %v8449_v49 = vld [vmem:[%s15781_s21 + $0x18] sm:$0xff] }
 0xea5   :  { %11953 = vmatpush1.bf16.msra.mxu1 %v11952_v13 }
 0xea6   :  { %11955 = vmatprep.subr.bf16.mxu1 %v11954_v2 }
 0xea9   :  { %11957 = vmatpush1.bf16.msra.mxu1 %v11956_v36  ;;  %v8265_v36 = vld [vmem:[%s15669_s9 + $0x238] sm:$0xff] }
 0xeaa   :  { %11959 = vmatprep.subr.bf16.mxu1 %v11958_v45  ;;  %v11994_v20 = vpack.c.bf16 %v8265_v36, %v8263_v12  ;;  %v12035_v12 = vpack.c.bf16 %v8455_v55, %v8454_v15  ;;  %v8456_v36 = vld [vmem:[%s15781_s21 + $0x50] sm:$0xff]  ;;  %v8559_v15 = vld [vmem:[%s15826_s25 + $0x40] sm:$0xff]  ;;  %v8560_v55 = vld [vmem:[%s15826_s25 + $0x48] sm:$0xff] }
 0xead   :  { %11961 = vmatpush1.bf16.msra.mxu1 %v11960_v34  ;;  %v8267_v34 = vld [vmem:[%s15669_s9 + $0x248] sm:$0xff] }
 0xeae   :  { %11963 = vmatprep.subr.bf16.mxu1 %v11962_v26  ;;  %v8269_v26 = vld [vmem:[%s15669_s9 + $0x258] sm:$0xff] }
 0xeaf   :  { %v11998_v50 = vpack.c.bf16 %v8269_v26, %v8267_v34  ;;  %v12041_v34 = vpack.c.bf16 %v8459_v27, %v8458_v7  ;;  %v8460_v26 = vld [vmem:[%s15781_s21 + $0x70] sm:$0xff]  ;;  %v8562_v27 = vld [vmem:[%s15826_s25 + $0x58] sm:$0xff] }
 0xeb0   :  { %v8561_v7 = vld [vmem:[%s15826_s25 + $0x50] sm:$0xff] }
 0xeb1   :  { %11965 = vmatpush1.bf16.msra.mxu1 %v11964_v17  ;;  %v8271_v17 = vld [vmem:[%s15669_s9 + $0x268] sm:$0xff] }
 0xeb2   :  { %11967 = vmatprep.subr.bf16.mxu1 %v11966_v33  ;;  %v8273_v33 = vld [vmem:[%s15669_s9 + $0x278] sm:$0xff] }
 0xeb3   :  { %v12002_v46 = vpack.c.bf16 %v8273_v33, %v8271_v17  ;;  %v12047_v17 = vpack.c.bf16 %v8463_v28, %v8462_v43  ;;  %v8464_v33 = vld [vmem:[%s15781_s21 + $0x90] sm:$0xff]  ;;  %v8563_v43 = vld [vmem:[%s15826_s25 + $0x60] sm:$0xff]  ;;  %v8564_v28 = vld [vmem:[%s15826_s25 + $0x68] sm:$0xff] }
 0xeb5   :  { %11969 = vmatpush1.bf16.msra.mxu1 %v11968_v29  ;;  %v8275_v29 = vld [vmem:[%s15669_s9 + $0x288] sm:$0xff] }
 0xeb6   :  { %11971 = vmatprep.subr.bf16.mxu1 %v11970_v42  ;;  %v8277_v42 = vld [vmem:[%s15669_s9 + $0x298] sm:$0xff] }
 0xeb7   :  { %v12006_v38 = vpack.c.bf16 %v8277_v42, %v8275_v29  ;;  %v12053_v29 = vpack.c.bf16 %v8467_v53, %v8466_v23  ;;  %v8468_v42 = vld [vmem:[%s15781_s21 + $0xb0] sm:$0xff]  ;;  %v8566_v53 = vld [vmem:[%s15826_s25 + $0x78] sm:$0xff] }
 0xeb8   :  { %v8565_v23 = vld [vmem:[%s15826_s25 + $0x70] sm:$0xff] }
 0xeb9   :  { %11973 = vmatpush1.bf16.msra.mxu1 %v11972_v6  ;;  %v8279_v6 = vld [vmem:[%s15669_s9 + $0x2a8] sm:$0xff] }
 0xeba   :  { %11975 = vmatprep.subr.bf16.mxu1 %v11974_v39  ;;  %v8281_v39 = vld [vmem:[%s15669_s9 + $0x2b8] sm:$0xff] }
 0xebb   :  { %v12010_v61 = vpack.c.bf16 %v8281_v39, %v8279_v6  ;;  %v12058_v6 = vpack.c.bf16 %v8568_v47, %v8567_v41  ;;  %v8290_v39 = vld [vmem:[%s8961_s4] sm:$0x3]  ;;  %v8585_v41 = vld [vmem:[%s15826_s25 + $0x110] sm:$0xff]  ;;  %v8586_v47 = vld [vmem:[%s15826_s25 + $0x118] sm:$0xff] }
 0xebd   :  { %11977 = vmatpush1.bf16.msra.mxu1 %v11976_v11  ;;  %v8283_v11 = vld [vmem:[%s15669_s9 + $0x2c8] sm:$0xff] }
 0xebe   :  { %11979 = vmatprep.subr.bf16.mxu1 %v11978_v44  ;;  %v8285_v44 = vld [vmem:[%s15669_s9 + $0x2d8] sm:$0xff] }
 0xebf   :  { %v12014_v62 = vpack.c.bf16 %v8285_v44, %v8283_v11  ;;  %v8551_v44 = vld [vmem:[%s15826_s25] sm:$0xff] }
 0xec1   :  { %11981 = vmatpush1.bf16.msra.mxu1 %v11980_v48  ;;  %v8282_v48 = vld [vmem:[%s15669_s9 + $0x2c0] sm:$0xff] }
 0xec2   :  { %11983 = vmatprep.subr.bf16.mxu1 %v11982_v4  ;;  %v8289_v4 = vld [vmem:[%s15669_s9 + $0x2f8] sm:$0xff]  ;;  %v12016_v14 = vpack.c.bf16 %v8284_v5, %v8282_v48  ;;  %v8569_v48 = vld [vmem:[%s15826_s25 + $0x90] sm:$0xff] }
 0xec3   :  { %v12018_v59 = vpack.c.bf16 %v8289_v4, %v8287_v16  ;;  %v8570_v5 = vld [vmem:[%s15826_s25 + $0x98] sm:$0xff] }
 0xec5   :  { %11985 = vmatpush1.bf16.msra.mxu1 %v11984_v40  ;;  %v8286_v40 = vld [vmem:[%s15669_s9 + $0x2e0] sm:$0xff] }
 0xec6   :  { %11987 = vmatprep.subr.bf16.mxu1 %v11986_v1  ;;  %v12020_v52 = vpack.c.bf16 %v8288_v54, %v8286_v40  ;;  %v8446_v1 = vld [vmem:[%s15781_s21] sm:$0xff]  ;;  %v8572_v54 = vld [vmem:[%s15826_s25 + $0xa8] sm:$0xff] }
 0xec7   :  { %v12023_v32 = vpack.c.bf16 %v8447_v60, %v8446_v1  ;;  %v8571_v40 = vld [vmem:[%s15826_s25 + $0xa0] sm:$0xff] }
 0xec8   :  { %v12066_v1 = vpack.c.bf16 %v8572_v54, %v8571_v40  ;;  %v8555_v60 = vld [vmem:[%s15826_s25 + $0x20] sm:$0xff]  ;;  %v8750_v54 = vld [vmem:[%s8966_s2 + $0x8] sm:$0xff] }
 0xec9   :  { %11989 = vmatpush1.bf16.msra.mxu1 %v11988_v10  ;;  %v8448_v10 = vld [vmem:[%s15781_s21 + $0x10] sm:$0xff]  ;;  %v8749_v40 = vld [vmem:[%s8966_s2] sm:$0xff] }
 0xeca   :  { %11991 = vmatprep.subr.bf16.mxu1 %v11990_v22  ;;  %v12026_v18 = vpack.c.bf16 %v8449_v49, %v8448_v10  ;;  %v8450_v22 = vld [vmem:[%s15781_s21 + $0x20] sm:$0xff]  ;;  %v8573_v10 = vld [vmem:[%s15826_s25 + $0xb0] sm:$0xff]  ;;  %v8574_v49 = vld [vmem:[%s15826_s25 + $0xb8] sm:$0xff] }
 0xf5f   :  { %v9431_v19 = vpop.f32.mrb[32].mxu1 }
 0xf60   :  { %v9432_v31 = vpop.f32.mrb[33].mxu1 }
 0xf61   :  { %v9433_v13 = vadd.f32 %v9432_v31, %v9431_v19  ;;  %v8451_v19 = vld [vmem:[%s15781_s21 + $0x28] sm:$0xff]  ;;  %v8452_v31 = vld [vmem:[%s15781_s21 + $0x30] sm:$0xff] }
 0xf63   :  { %v8187_v2 = vadd.f32 %v9433_v13, %v9049_v63  ;;  %v12029_v63 = vpack.c.bf16 %v8451_v19, %v8450_v22  ;;  %v8453_v13 = vld [vmem:[%s15781_s21 + $0x38] sm:$0xff]  ;;  %v12070_v22 = vpack.c.bf16 %v8574_v49, %v8573_v10  ;;  %v8557_v19 = vld [vmem:[%s15826_s25 + $0x30] sm:$0xff]  ;;  %v8753_v10 = vld [vmem:[%s8966_s2 + $0x20] sm:$0xff] }
 0xf64   :  { %v8754_v49 = vld [vmem:[%s8966_s2 + $0x28] sm:$0xff] }
 0xf65   :  { %v15747_v9 = vmax.f32 %v8187_v2, 0.0  ;;  %v12032_v2 = vpack.c.bf16 %v8453_v13, %v8452_v31  ;;  %v8576_v31 = vld [vmem:[%s15826_s25 + $0xc8] sm:$0xff] }
 0xf67   :  { %v8192_v45 = vrot.slane %v15747_v9, 2 }
 0xf69   :  { %8366 = vmatprep.mubr.f32.mxu1 %v8192_v45 }
 0xf6a   :  { %8367 = vmatmul.mubr.f32.vlgmr.msra.gmra.mrb[34].mxu1 %v15747_v9 }
 0xf6b   :  { %11993 = vmatpush1.bf16.msra.mxu1 %v11992_v56  ;;  %8437 = vmatprep.mubr.f32.mxu1 %v12468_v0  ;;  %v8457_v56 = vld [vmem:[%s15781_s21 + $0x58] sm:$0xff] }
 0xf6c   :  { %11995 = vmatprep.subr.bf16.mxu1 %v11994_v20  ;;  %v12038_v20 = vpack.c.bf16 %v8457_v56, %v8456_v36  ;;  %v8578_v36 = vld [vmem:[%s15826_s25 + $0xd8] sm:$0xff]  ;;  %v12076_v56 = vpack.c.bf16 %v8560_v55, %v8559_v15 }
 0xf6f   :  { %11997 = vmatpush1.bf16.msra.mxu1 %v11996_v25  ;;  %v8461_v25 = vld [vmem:[%s15781_s21 + $0x78] sm:$0xff] }
 0xf70   :  { %11999 = vmatprep.subr.bf16.mxu1 %v11998_v50  ;;  %v12044_v50 = vpack.c.bf16 %v8461_v25, %v8460_v26  ;;  %v8580_v26 = vld [vmem:[%s15826_s25 + $0xe8] sm:$0xff]  ;;  %v12080_v25 = vpack.c.bf16 %v8562_v27, %v8561_v7  ;;  %v9050_v7 = vld [vmem:[%s8963_s7] ss:$0 sm:$0xff] }
 0xf73   :  { %12001 = vmatpush1.bf16.msra.mxu1 %v12000_v30  ;;  %v8465_v30 = vld [vmem:[%s15781_s21 + $0x98] sm:$0xff] }
 0xf74   :  { %12003 = vmatprep.subr.bf16.mxu1 %v12002_v46  ;;  %v12050_v46 = vpack.c.bf16 %v8465_v30, %v8464_v33  ;;  %v8582_v33 = vld [vmem:[%s15826_s25 + $0xf8] sm:$0xff]  ;;  %v12084_v30 = vpack.c.bf16 %v8564_v28, %v8563_v43  ;;  %v8843_v28 = vld [vmem:[%s8968_s15] sm:$0xff] }
 0xf77   :  { %12005 = vmatpush1.bf16.msra.mxu1 %v12004_v21  ;;  %v8469_v21 = vld [vmem:[%s15781_s21 + $0xb8] sm:$0xff]  ;;  %s8967_s21 = sld [smem:[%s15933_s0 + %s12534_s14]]  }
 0xf78   :  { %12007 = vmatprep.subr.bf16.mxu1 %v12006_v38  ;;  %v12056_v38 = vpack.c.bf16 %v8469_v21, %v8468_v42  ;;  %v8583_v42 = vld [vmem:[%s15826_s25 + $0x100] sm:$0xff]  ;;  %v8584_v21 = vld [vmem:[%s15826_s25 + $0x108] sm:$0xff] }
 0xf7b   :  { %12009 = vmatpush1.bf16.msra.mxu1 %v12008_v51  ;;  %v8295_v51 = vrot.slane %v8290_v39, %v13266_v58 }
 0xf7c   :  { %12011 = vmatprep.subr.bf16.mxu1 %v12010_v61  ;;  %v8299_v61 = vrot.slane %v8290_v39, %v13273_v3  ;;  %v8553_v3 = vld [vmem:[%s15826_s25 + $0x10] sm:$0xff]  ;;  %v8587_v39 = vld [vmem:[%s15826_s25 + $0x120] sm:$0xff] }
 0xf7f   :  { %12013 = vmatpush1.bf16.msra.mxu1 %v12012_v35  ;;  %v8552_v35 = vld [vmem:[%s15826_s25 + $0x8] sm:$0xff] }
 0xf80   :  { %12015 = vmatprep.subr.bf16.mxu1 %v12014_v62  ;;  %v12060_v4 = vpack.c.bf16 %v8552_v35, %v8551_v44  ;;  %v8592_v44 = vld [vmem:[%s15826_s25 + $0x148] sm:$0xff] }
 0xf83   :  { %12017 = vmatpush1.bf16.msra.mxu1 %v12016_v14  ;;  %v12062_v14 = vpack.c.bf16 %v8570_v5, %v8569_v48  ;;  %v8594_v48 = vld [vmem:[%s15826_s25 + $0x158] sm:$0xff] }
 0xf84   :  { %12019 = vmatprep.subr.bf16.mxu1 %v12018_v59  ;;  %v8554_v59 = vld [vmem:[%s15826_s25 + $0x18] sm:$0xff] }
 0xf87   :  { %12021 = vmatpush1.bf16.msra.mxu1 %v12020_v52  ;;  %v12064_v52 = vpack.c.bf16 %v8554_v59, %v8553_v3  ;;  %v8598_v3 = vld [vmem:[%s15826_s25 + $0x178] sm:$0xff] }
 0xf88   :  { %12022 = vmatprep.subr.bf16.mxu1 %v12515_v8 }
 0xf8a   :  { %8438 = vmatmul.mubr.f32.vlgmr.msra.gmra.mrb[34].mxu1 %v15364_v57 }
 0xf8b   :  { %12024 = vmatpush1.bf16.msra.mxu1 %v12023_v32  ;;  %v8556_v32 = vld [vmem:[%s15826_s25 + $0x28] sm:$0xff] }
 0xf8c   :  { %12025 = vmatprep.subr.bf16.mxu1 %v12515_v8 }
 0xf8f   :  { %12027 = vmatpush1.bf16.msra.mxu1 %v12026_v18  ;;  %v12068_v18 = vpack.c.bf16 %v8556_v32, %v8555_v60  ;;  %v8752_v60 = vld [vmem:[%s8966_s2 + $0x18] sm:$0xff] }
 0xf90   :  { %12028 = vmatprep.subr.bf16.mxu1 %v12515_v8 }
 0xf93   :  { %12030 = vmatpush1.bf16.msra.mxu1 %v12029_v63  ;;  %v8558_v63 = vld [vmem:[%s15826_s25 + $0x38] sm:$0xff] }
 0xf94   :  { %12031 = vmatprep.subr.bf16.mxu1 %v12515_v8  ;;  %v12072_v13 = vpack.c.bf16 %v8558_v63, %v8557_v19  ;;  %v8757_v63 = vld [vmem:[%s8966_s2 + $0x40] sm:$0xff] }
 0xf97   :  { %12033 = vmatpush1.bf16.msra.mxu1 %v12032_v2 }
 0xf98   :  { %12034 = vmatprep.subr.bf16.mxu1 %v12515_v8 }
 0xf9b   :  { %12036 = vmatpush1.bf16.msra.mxu1 %v12035_v12  ;;  %v8577_v12 = vld [vmem:[%s15826_s25 + $0xd0] sm:$0xff] }
 0xf9c   :  { %12037 = vmatprep.subr.bf16.mxu1 %v12515_v8 }
 0xf9f   :  { %12039 = vmatpush1.bf16.msra.mxu1 %v12038_v20  ;;  %v12078_v20 = vpack.c.bf16 %v8578_v36, %v8577_v12 }
 0xfa0   :  { %12040 = vmatprep.subr.bf16.mxu1 %v12515_v8 }
 0xfa3   :  { %12042 = vmatpush1.bf16.msra.mxu1 %v12041_v34  ;;  %v8579_v34 = vld [vmem:[%s15826_s25 + $0xe0] sm:$0xff] }
 0xfa4   :  { %12043 = vmatprep.subr.bf16.mxu1 %v12515_v8 }
 0xfa7   :  { %12045 = vmatpush1.bf16.msra.mxu1 %v12044_v50  ;;  %v12082_v50 = vpack.c.bf16 %v8580_v26, %v8579_v34 }
 0xfa8   :  { %12046 = vmatprep.subr.bf16.mxu1 %v12515_v8 }
 0xfab   :  { %12048 = vmatpush1.bf16.msra.mxu1 %v12047_v17  ;;  %v8581_v17 = vld [vmem:[%s15826_s25 + $0xf0] sm:$0xff] }
 0xfac   :  { %12049 = vmatprep.subr.bf16.mxu1 %v12515_v8 }
 0xfaf   :  { %12051 = vmatpush1.bf16.msra.mxu1 %v12050_v46  ;;  %v12086_v46 = vpack.c.bf16 %v8582_v33, %v8581_v17  ;;  %v8844_v17 = vld [vmem:[%s8968_s15 + $0x8] sm:$0xff] }
 0xfb0   :  { %12052 = vmatprep.subr.bf16.mxu1 %v12515_v8 }
 0xfb3   :  { %12054 = vmatpush1.bf16.msra.mxu1 %v12053_v29  ;;  %v12088_v29 = vpack.c.bf16 %v8566_v53, %v8565_v23  ;;  %v8845_v23 = vld [vmem:[%s8968_s15 + $0x10] sm:$0xff]  ;;  %v8846_v53 = vld [vmem:[%s8968_s15 + $0x18] sm:$0xff] }
 0xfb4   :  { %12055 = vmatprep.subr.bf16.mxu1 %v12515_v8 }
 0xfb7   :  { %12057 = vmatpush1.bf16.msra.mxu1 %v12056_v38  ;;  %v12091_v38 = vpack.c.bf16 %v8584_v21, %v8583_v42  ;;  %v8847_v42 = vld [vmem:[%s8968_s15 + $0x20] sm:$0xff]  ;;  %v8848_v21 = vld [vmem:[%s8968_s15 + $0x28] sm:$0xff] }
 0xfb8   :  { %12059 = vmatprep.subr.bf16.mxu1 %v12058_v6  ;;  %v12094_v6 = vpack.c.bf16 %v8586_v47, %v8585_v41  ;;  %v66_v41 = vstv %s8969_s19 }
 0xfb9   :  { %67 = vst [vmem:[#allocation2] sm:$0x1] %v66_v41 }
0x105d   :  { %v8439_v24 = vpop.f32.mrb[34].mxu1 }
0x105e   :  { %v12159_v37 = vadd.f32 %v8439_v24, %v8295_v51  ;;  %v8441_v11 = vpop.f32.mrb[35].mxu1  ;;  %v8588_v51 = vld [vmem:[%s15826_s25 + $0x128] sm:$0xff]  ;;  %v8589_v24 = vld [vmem:[%s15826_s25 + $0x130] sm:$0xff] }
0x105f   :  { %v12160_v62 = vadd.f32 %v8441_v11, %v8299_v61  ;;  %v12097_v61 = vpack.c.bf16 %v8588_v51, %v8587_v39  ;;  %v8591_v11 = vld [vmem:[%s15826_s25 + $0x140] sm:$0xff] }
0x1060   :  { %v8444_v58 = vmax.f32 %v12159_v37, 0.0  ;;  %v12103_v35 = vpack.c.bf16 %v8592_v44, %v8591_v11  ;;  %v9055_v51 = vld [vmem:[#allocation2] ss:$0 sm:$0xff] }
0x1061   :  { %v8445_v16 = vmax.f32 %v12160_v62, 0.0  ;;  %v8593_v62 = vld [vmem:[%s15826_s25 + $0x150] sm:$0xff] }
0x1062   :  { %v12106_v5 = vpack.c.bf16 %v8594_v48, %v8593_v62 }
0x1063   :  { %9051 = vmatprep.mubr.msk.f32.mxu1 %vm8477_vm4, %v8445_v16  ;;  %v8595_v16 = vld [vmem:[%s15826_s25 + $0x160] sm:$0xff] }
0x1064   :  { %8546 = vmatmul.mubr.f32.vlgmr.msra.gmra.mrb[36].mxu1 %v8444_v58 }
0x1065   :  { %12061 = vmatpush3.bf16.msra.mxu1 %v12060_v4  ;;  %8663 = vmatprep.mubr.f32.mxu1 %v8192_v45  ;;  %v8575_v45 = vld [vmem:[%s15826_s25 + $0xc0] sm:$0xff]  ;;  %v8596_v4 = vld [vmem:[%s15826_s25 + $0x168] sm:$0xff] }
0x1066   :  { %12063 = vmatprep.subr.bf16.mxu1 %v12062_v14  ;;  %v12074_v2 = vpack.c.bf16 %v8576_v31, %v8575_v45  ;;  %v12109_v58 = vpack.c.bf16 %v8596_v4, %v8595_v16  ;;  %v8597_v14 = vld [vmem:[%s15826_s25 + $0x170] sm:$0xff]  ;;  %v8758_v45 = vld [vmem:[%s8966_s2 + $0x48] sm:$0xff] }
0x1067   :  { %v12112_v59 = vpack.c.bf16 %v8598_v3, %v8597_v14  ;;  %v12127_v31 = vpack.c.bf16 %v8758_v45, %v8757_v63 }
0x1069   :  { %12065 = vmatpush3.bf16.msra.mxu1 %v12064_v52  ;;  %v8751_v52 = vld [vmem:[%s8966_s2 + $0x10] sm:$0xff] }
0x106a   :  { %12067 = vmatprep.subr.bf16.mxu1 %v12066_v1  ;;  %v12115_v1 = vpack.c.bf16 %v8750_v54, %v8749_v40  ;;  %v12118_v32 = vpack.c.bf16 %v8752_v60, %v8751_v52 }
0x106d   :  { %12069 = vmatpush3.bf16.msra.mxu1 %v12068_v18  ;;  %v8755_v18 = vld [vmem:[%s8966_s2 + $0x30] sm:$0xff] }
0x106e   :  { %12071 = vmatprep.subr.bf16.mxu1 %v12070_v22  ;;  %v8756_v22 = vld [vmem:[%s8966_s2 + $0x38] sm:$0xff] }
0x106f   :  { %v12124_v19 = vpack.c.bf16 %v8756_v22, %v8755_v18 }
0x1071   :  { %12073 = vmatpush3.bf16.msra.mxu1 %v12072_v13  ;;  %v8759_v13 = vld [vmem:[%s8966_s2 + $0x50] sm:$0xff] }
0x1072   :  { %12075 = vmatprep.subr.bf16.mxu1 %v12074_v2  ;;  %v8760_v2 = vld [vmem:[%s8966_s2 + $0x58] sm:$0xff] }
0x1073   :  { %v12130_v15 = vpack.c.bf16 %v8760_v2, %v8759_v13 }
0x1075   :  { %12077 = vmatpush3.bf16.msra.mxu1 %v12076_v56 }
0x1076   :  { %12079 = vmatprep.subr.bf16.mxu1 %v12078_v20 }
0x1079   :  { %12081 = vmatpush3.bf16.msra.mxu1 %v12080_v25 }
0x107a   :  { %12083 = vmatprep.subr.bf16.mxu1 %v12082_v50  ;;  %v9052_v50 = vld [vmem:[%s8965_s11] ss:$0 sm:$0xff] }
0x107d   :  { %12085 = vmatpush3.bf16.msra.mxu1 %v12084_v30  ;;  %v12133_v30 = vpack.c.bf16 %v8844_v17, %v8843_v28 }
0x107e   :  { %12087 = vmatprep.subr.bf16.mxu1 %v12086_v46 }
0x1081   :  { %12089 = vmatpush3.bf16.msra.mxu1 %v12088_v29  ;;  %v12136_v29 = vpack.c.bf16 %v8846_v53, %v8845_v23 }
0x1082   :  { %12090 = vmatprep.subr.bf16.mxu1 %v12515_v8 }
0x1084   :  { %8664 = vmatmul.mubr.f32.vlgmr.msra.gmra.mrb[38].mxu1 %v15747_v9  ;;  %v8590_v9 = vld [vmem:[%s15826_s25 + $0x138] sm:$0xff] }
0x1085   :  { %12092 = vmatpush3.bf16.msra.mxu1 %v12091_v38  ;;  %9705 = vmatprep.mubr.msk.f32.mxu1 %vm12516_vm12, %v12468_v0  ;;  %v12100_v37 = vpack.c.bf16 %v8590_v9, %v8589_v24  ;;  %v12139_v38 = vpack.c.bf16 %v8848_v21, %v8847_v42 }
0x1086   :  { %12093 = vmatprep.subr.bf16.mxu1 %v12515_v8 }
0x1089   :  { %12095 = vmatpush3.bf16.msra.mxu1 %v12094_v6 }
0x108a   :  { %12096 = vmatprep.subr.bf16.mxu1 %v12515_v8 }
0x108d   :  { %12098 = vmatpush3.bf16.msra.mxu1 %v12097_v61 }
0x108e   :  { %12099 = vmatprep.subr.bf16.mxu1 %v12515_v8 }
0x1091   :  { %12101 = vmatpush3.bf16.msra.mxu1 %v12100_v37 }
0x1092   :  { %12102 = vmatprep.subr.bf16.mxu1 %v12515_v8 }
0x1095   :  { %12104 = vmatpush3.bf16.msra.mxu1 %v12103_v35 }
0x1096   :  { %12105 = vmatprep.subr.bf16.mxu1 %v12515_v8 }
0x1099   :  { %12107 = vmatpush3.bf16.msra.mxu1 %v12106_v5 }
0x109a   :  { %12108 = vmatprep.subr.bf16.mxu1 %v12515_v8 }
0x109d   :  { %12110 = vmatpush3.bf16.msra.mxu1 %v12109_v58 }
0x109e   :  { %12111 = vmatprep.subr.bf16.mxu1 %v12515_v8 }
0x10a1   :  { %12113 = vmatpush3.bf16.msra.mxu1 %v12112_v59 }
0x10a2   :  { %12114 = vmatprep.subr.bf16.mxu1 %v12515_v8 }
0x10a4   :  { %9706 = vmatmul.mubr.f32.vlgmr.msra.gmra.mrb[40].mxu1 %v15364_v57  ;;  %v12121_v57 = vpack.c.bf16 %v8754_v49, %v8753_v10 }
0x10a5   :  { %9732 = vmatprep.mubr.msk.f32.mxu1 %vm12516_vm12, %v12468_v0  ;;  %12116 = vmatpush3.bf16.msra.mxu1 %v12115_v1 }
0x10a6   :  { %12117 = vmatprep.subr.bf16.mxu1 %v12515_v8 }
0x10a9   :  { %12119 = vmatpush3.bf16.msra.mxu1 %v12118_v32 }
0x10aa   :  { %12120 = vmatprep.subr.bf16.mxu1 %v12515_v8 }
0x10ad   :  { %12122 = vmatpush3.bf16.msra.mxu1 %v12121_v57 }
0x10ae   :  { %12123 = vmatprep.subr.bf16.mxu1 %v12515_v8 }
0x10b1   :  { %12125 = vmatpush3.bf16.msra.mxu1 %v12124_v19 }
0x10b2   :  { %12126 = vmatprep.subr.bf16.mxu1 %v12515_v8 }
0x10b5   :  { %12128 = vmatpush3.bf16.msra.mxu1 %v12127_v31 }
0x10b6   :  { %12129 = vmatprep.subr.bf16.mxu1 %v12515_v8 }
0x10b9   :  { %12131 = vmatpush3.bf16.msra.mxu1 %v12130_v15 }
0x10ba   :  { %12132 = vmatprep.subr.bf16.mxu1 %v12515_v8 }
0x1137   :  { %v8547_v55 = vpop.f32.mrb[36].mxu1 }
0x1138   :  { %v8549_v12 = vpop.f32.mrb[37].mxu1  ;;  %v8548_v34 = vadd.f32 %v9050_v7, %v8547_v55 }
0x1157   :  { %v9466_v36 = vpop.f32.mrb[38].mxu1 }
0x1158   :  { %v9467_v56 = vpop.f32.mrb[39].mxu1 }
0x1159   :  { %v9468_v20 = vadd.f32 %v9467_v56, %v9466_v36 }
0x1177   :  { %v8735_v27 = vpop.f32.mrb[40].mxu1 }
0x1178   :  { %v8736_v26 = vadd.f32 %v9468_v20, %v8735_v27  ;;  %v9707_v25 = vpop.f32.mrb[41].mxu1 }
0x117a   :  { %v8739_v43 = vadd.f32 %v8736_v26, %v8548_v34 }
0x117c   :  { %v8747_v33 = vadd.f32 %v9052_v50, %v8739_v43 }
0x117e   :  { %v8748_v46 = vmax.f32 %v8747_v33, 0.0 }
0x1180   :  { %9733 = vmatmul.mubr.msk.f32.vlgmr.msra.gmra.mrb[42].mxu1 %vm8768_vm3, %v8748_v46 }
0x1181   :  { %12134 = vmatpush3.bf16.msra.mxu1 %v12133_v30  ;;  %9747 = vmatprep.mubr.msk.f32.mxu1 %vm12516_vm12, %v12468_v0  ;;  %v9053_v0 = vld [vmem:[%s8967_s21] ss:$0 sm:$0xff] }
0x1182   :  { %12135 = vmatprep.subr.bf16.mxu1 %v12515_v8 }
0x1185   :  { %12137 = vmatpush3.bf16.msra.mxu1 %v12136_v29 }
0x1186   :  { %12138 = vmatprep.subr.bf16.mxu1 %v12515_v8 }
0x1189   :  { %12140 = vmatpush3.bf16.msra.mxu1 %v12139_v38 }
0x1253   :  { %v8838_v47 = vpop.f32.mrb[42].mxu1 }
0x1254   :  { %v8839_v6 = vadd.f32 %v9053_v0, %v8838_v47  ;;  %v9734_v8 = vpop.f32.mrb[43].mxu1 }
0x1256   :  { %v8842_v39 = vmax.f32 %v8839_v6, 0.0 }
0x1258   :  { %9748 = vmatmul.mubr.msk.f32.vlgmr.msra.gmra.mrb[44].mxu1 %vm2159_vm0, %v8842_v39 }
0x132b   :  { %v8925_v61 = vpop.f32.mrb[44].mxu1 }
0x132c   :  { %v8926_v24 = vadd.f32 %v9055_v51, %v8925_v61  ;;  %v9749_v9 = vpop.f32.mrb[45].mxu1 }
0x132e   :  { %v9057_v37 = vmul.f32 -1.442695, %v8926_v24 }
0x1330   :  { %12461 = vpow2.f32 %v9057_v37 }
0x133a   :  { %v12462_v11 = vpop.eup %12461 }
0x133b   :  { %v8932_v44 = vadd.f32 1.0, %v12462_v11 }
0x133d   :  { %12463 = vrcp.f32 %v8932_v44 }
0x1347   :  { %v12464_v35 = vpop.eup %12463 }
0x1348   :  { %8936 = vst.msk [vmem:[%s8970_s26] sm:$0x3] %vm8935_vm6, %v12464_v35 }

</bundles_post_ra>
